<compile_context>
chip_gen: v7x
topology: tpu7x:2x2x1
jax: 0.10.0
libtpu: 0.0.40
codegen_flags: <defaults>
</compile_context>

<pallas_src>
import functools
import math

import jax
import jax.numpy as jnp
from jax.experimental import pallas as pl
from jax.experimental.pallas import tpu as pltpu


def _round_up(x, m):
    return ((x + m - 1) // m) * m


def _pad2(a, rows, cols):
    return jnp.pad(a, ((0, rows - a.shape[0]), (0, cols - a.shape[1])))


# --------------------------------------------------------------------------
# Per-generation configuration
# --------------------------------------------------------------------------
def _tpu_config():
    """VMEM capacity, TensorCores/chip and MXU-shape driven choices."""
    kind = ""
    try:
        kind = jax.devices()[0].device_kind.lower()
    except Exception:
        pass
    if "v7" in kind:
        # 64 MiB VMEM/TC, 2 TCs/chip, 256-deep MXU -> fuse gate matmuls.
        return dict(vmem=64 << 20, num_tc=2, fuse_gates=True)
    if "v6" in kind:
        # 128 MiB VMEM, 1 TC, 256-deep MXU.
        return dict(vmem=128 << 20, num_tc=1, fuse_gates=True)
    if "v5e" in kind or "v5 lite" in kind or "v5lite" in kind:
        # 128-deep MXU: K=128 already fills it, skip the +20%-FLOP fusion.
        return dict(vmem=128 << 20, num_tc=1, fuse_gates=False)
    # Unknown (v4/v5p/interpret/...): conservative defaults.
    return dict(vmem=64 << 20, num_tc=1, fuse_gates=True)


def _choose_bt(B, n_p, itemsize, vmem_phys, num_tc):
    """Largest graphs-per-grid-step s.t. blocks fit comfortably in VMEM while
    keeping grid >= num_tc so every TensorCore gets work (v7x megacore)."""
    if vmem_phys >= (96 << 20):          # v5e / v6e: 128 MiB VMEM
        max_rows, max_adj_bytes = 2048, 24 << 20
    else:                                # v7x: 64 MiB VMEM
        max_rows, max_adj_bytes = 1024, 8 << 20
    bt_cap = max(1, min(max_rows // n_p,
                        max_adj_bytes // (n_p * n_p * itemsize)))
    return max(1, min(bt_cap, -(-B // num_tc)))


# --------------------------------------------------------------------------
# Kernel
# --------------------------------------------------------------------------
def _gnn_kernel(*refs, steps: int, fuse_gates: bool, adj_on_vpu: bool):
    if fuse_gates:
        (inp_ref, adj_ref, mask_ref,
         we_ref, wg_ref, wh1_ref, bz_ref, br_ref, bh_ref,
         wro_ref, bro_ref, wmlp_ref, bmlp_ref, out_ref) = refs
        wa_ref = wx_ref = None
    else:
        (inp_ref, adj_ref, mask_ref,
         we_ref, wa_ref, wx_ref, wh1_ref, bz_ref, br_ref, bh_ref,
         wro_ref, bro_ref, wmlp_ref, bmlp_ref, out_ref) = refs
        wg_ref = None

    Bt, Np, Din = inp_ref.shape
    H = we_ref.shape[1]               # padded hidden dim (multiple of 128)
    M = Bt * Np                       # tall M for all weight matmuls
    f32 = jnp.float32
    mmt = we_ref.dtype                # matmul operand dtype (bf16 by default)

    inp = inp_ref[...].reshape(M, Din)
    adj = adj_ref[...]                                  # (Bt, Np, Np)
    mask = mask_ref[...].astype(f32)                    # (Bt, Np, 1)
    mask2 = mask.reshape(M, 1)
    mask_full = jnp.broadcast_to(mask2, (M, H))         # hoisted broadcast

    # Bias reads + broadcasts hoisted out of the GRU loop (no CSE of
    # broadcast_in_dim across iterations).
    bz = jnp.broadcast_to(bz_ref[...], (M, H))
    br = jnp.broadcast_to(br_ref[...], (M, H))
    bh = jnp.broadcast_to(bh_ref[...], (M, H))

    # ---- encoder: x = mask * relu(inputs @ We) ----------------------------
    x = jnp.dot(inp, we_ref[...], preferred_element_type=f32)
    x = mask_full * jnp.maximum(x, 0.0)

    # ---- GGNN / GRU propagation -------------------------------------------
    def gru_step(_, x):
        xm = x.astype(mmt)                       # single bf16 cast per step
        xm3 = xm.reshape(Bt, Np, H)

        if adj_on_vpu:
            # Small node dim: Bt tiny (Np x Np)@(Np x H) matmuls badly
            # under-fill the MXU -> accumulate on the VPU instead.
            a3 = jnp.zeros((Bt, Np, H), f32)
            for m in range(Np):                  # static, small (Np <= 32)
                a3 = a3 + (adj[:, :, m:m + 1].astype(f32)
                           * xm3[:, m:m + 1, :].astype(f32))
        else:
            a3 = jnp.einsum("bnm,bmd->bnd", adj, xm3,
                            preferred_element_type=f32)
        a = a3.reshape(M, H)

        if fuse_gates:
            # LHS=[a|x] (M,2H) @ [[wz0|wr0|wh0],[wz1|wr1|0]] (2H,3H):
            # fills the 256-deep MXU and halves matmul issues (v6e/v7x).
            ax = jnp.concatenate([a.astype(mmt), xm], axis=1)
            g = jnp.dot(ax, wg_ref[...], preferred_element_type=f32)
            gz = g[:, 0:H]
            gr = g[:, H:2 * H]
            gh = g[:, 2 * H:3 * H]
        else:
            ga = jnp.dot(a.astype(mmt), wa_ref[...], preferred_element_type=f32)
            gx = jnp.dot(xm, wx_ref[...], preferred_element_type=f32)
            gz = ga[:, 0:H] + gx[:, 0:H]
            gr = ga[:, H:2 * H] + gx[:, H:2 * H]
            gh = ga[:, 2 * H:3 * H]

        z = jax.nn.sigmoid(gz + bz)
        r = jax.nn.sigmoid(gr + br)
        hh = jnp.dot((x * r).astype(mmt), wh1_ref[...],
                     preferred_element_type=f32)
        h = jnp.maximum(mask_full * (gh + hh + bh), 0.0)
        return x + z * (h - x)        # == h*z + x*(1-z), one fewer mul

    x = jax.lax.fori_loop(0, steps, gru_step, x, unroll=(steps <= 4))

    # ---- readout (att fused into emb matmul: watt replicated across lanes) -
    xm = x.astype(mmt)
    ro = jnp.dot(xm, wro_ref[...], preferred_element_type=f32) + bro_ref[...]
    emb = jnp.maximum(ro[:, :H], 0.0)            # (M, H)
    att = jax.nn.sigmoid(ro[:, H:])              # (M, H), identical lanes
    g3 = (mask_full * att * emb).reshape(Bt, Np, H)
    n = jnp.maximum(jnp.sum(mask, axis=1), 1.0)  # (Bt, 1); guards padded graphs
    mneg = (mask - 1.0) * 1e9                    # (Bt, Np, 1)
    pooled = jnp.sum(g3, axis=1) / n + jnp.max(g3 + mneg, axis=1)   # (Bt, H)
    out = jnp.dot(pooled.astype(mmt), wmlp_ref[...],
                  preferred_element_type=f32) + bmlp_ref[...]       # (Bt, O)
    out_ref[...] = out.reshape(out_ref.shape).astype(out_ref.dtype)


# --------------------------------------------------------------------------
# Parameter packing
# --------------------------------------------------------------------------
def _pack_params(p, din_p, h_p, o_p, mm_dtype, fuse_gates):
    f32 = jnp.float32

    def padw(w, r, c):
        return _pad2(w, r, c).astype(mm_dtype)

    def padb(b, c):
        return _pad2(b, 1, c).astype(f32)

    wa = jnp.concatenate([_pad2(p["wz0"], h_p, h_p),
                          _pad2(p["wr0"], h_p, h_p),
                          _pad2(p["wh0"], h_p, h_p)], axis=1)        # (H, 3H)
    wx = jnp.concatenate([_pad2(p["wz1"], h_p, h_p),
                          _pad2(p["wr1"], h_p, h_p)], axis=1)        # (H, 2H)

    packed = dict(
        we=padw(p["we"], din_p, h_p),
        wh1=padw(p["wh1"], h_p, h_p),
        bz=padb(p["bz0"] + p["bz1"], h_p),
        br=padb(p["br0"] + p["br1"], h_p),
        bh=padb(p["bh0"] + p["bh1"], h_p),
        # readout: [wemb | watt replicated across h_p lanes]  -> lane-dense
        wro=jnp.concatenate(
            [_pad2(p["wemb"], h_p, h_p),
             jnp.tile(_pad2(p["watt"], h_p, 1), (1, h_p))],
            axis=1).astype(mm_dtype),                                # (H, 2H)
        bro=jnp.concatenate(
            [_pad2(p["bemb"], 1, h_p),
             jnp.broadcast_to(p["batt"].reshape(1, 1), (1, h_p))],
            axis=1).astype(f32),                                     # (1, 2H)
        wmlp=padw(p["wmlp"], h_p, o_p),
        bmlp=padb(p["bmlp"], o_p),
    )
    if fuse_gates:
        wx_pad = jnp.concatenate([wx, jnp.zeros((h_p, h_p), wx.dtype)], axis=1)
        packed["wg"] = jnp.concatenate([wa, wx_pad], axis=0).astype(mm_dtype)
    else:
        packed["wa"] = wa.astype(mm_dtype)
        packed["wx"] = wx.astype(mm_dtype)
    return packed


# --------------------------------------------------------------------------
# Wrapper
# --------------------------------------------------------------------------
def gnn_forward(inputs, adj_matrix, mask, params, *, steps=2,
                mm_dtype=jnp.bfloat16, block_b=None):
    """inputs (B,N,Din), adj (B,N,N), mask (B,N,1) -> (B, output_dim)."""
    B, N, Din = inputs.shape
    H = params["wz0"].shape[0]
    O = params["wmlp"].shape[1]

    cfg = _tpu_config()
    n_p = _round_up(N, 16)          # bf16-friendly sublane padding
    din_p = _round_up(Din, 128)     # lane-dense feature dims
    h_p = _round_up(H, 128)
    o_p = _round_up(O, 128)
    elem = jnp.dtype(mm_dtype).itemsize

    fuse_gates = bool(cfg["fuse_gates"])
    adj_on_vpu = n_p <= 32

    Bt = int(block_b) if block_b is not None else _choose_bt(
        B, n_p, elem, cfg["vmem"], cfg["num_tc"])
    grid = -(-B // Bt)
    B_pad = grid * Bt               # pad batch with mask=0 graphs if needed

    inp_p = jnp.pad(inputs, ((0, B_pad - B), (0, n_p - N),
                             (0, din_p - Din))).astype(mm_dtype)
    adj_p = jnp.pad(adj_matrix, ((0, B_pad - B), (0, n_p - N),
                                 (0, n_p - N))).astype(mm_dtype)
    mask_p = jnp.pad(mask, ((0, B_pad - B), (0, n_p - N),
                            (0, 0))).astype(jnp.float32)

    packed = _pack_params(params, din_p, h_p, o_p, mm_dtype, fuse_gates)
    if fuse_gates:
        order = ["we", "wg", "wh1", "bz", "br", "bh",
                 "wro", "bro", "wmlp", "bmlp"]
    else:
        order = ["we", "wa", "wx", "wh1", "bz", "br", "bh",
                 "wro", "bro", "wmlp", "bmlp"]
    param_args = [packed[k] for k in order]
    param_bytes = sum(int(v.size) * jnp.dtype(v.dtype).itemsize
                      for v in param_args)

    data_map = lambda b: (b, 0, 0)

    # VMEM budget: double-buffered data blocks + params + f32 temporaries,
    # capped per generation (v7x: leave headroom below 64 MiB; v5e/v6e: use
    # the larger 128 MiB VMEM).
    block_bytes = (Bt * n_p * din_p * elem + Bt * n_p * n_p * elem
                   + Bt * n_p * 4 + Bt * o_p * 4)
    work_bytes = Bt * n_p * h_p * 4 * 24 + Bt * n_p * 3 * h_p * 4
    cap = (52 << 20) if cfg["vmem"] <= (64 << 20) else (100 << 20)
    vmem_limit = int(min(max(2 * block_bytes + 2 * param_bytes + work_bytes
                             + (4 << 20), 32 << 20), cap))

    adj_fl = 2 * n_p * n_p * h_p
    if fuse_gates:
        gate_fl = 2 * n_p * (2 * h_p) * (3 * h_p)
    else:
        gate_fl = 2 * n_p * h_p * (3 * h_p) + 2 * n_p * h_p * (2 * h_p)
    per_graph_flops = (2 * n_p * din_p * h_p
                       + steps * (adj_fl + gate_fl + 2 * n_p * h_p * h_p)
                       + 2 * n_p * h_p * (2 * h_p) + 2 * h_p * o_p)
    cost = pl.CostEstimate(
        flops=int(B_pad * per_graph_flops),
        transcendentals=int(B_pad * (steps * 2 + 1) * n_p * h_p),
        bytes_accessed=int(B_pad * (n_p * din_p * elem + n_p * n_p * elem
                                    + n_p * 4 + o_p * 4) + param_bytes))

    kernel = functools.partial(_gnn_kernel, steps=steps,
                               fuse_gates=fuse_gates, adj_on_vpu=adj_on_vpu)

    # TODO(synk): for very large N on v7x (64 MiB VMEM), stream adj row-tiles
    # via memory_space=pl.ANY + manual double-buffered async copies instead of
    # one (Bt, N, N) block; the block chooser currently just keeps adj <= 8 MiB.

    def _run(use_buffered):
        def pspec(shape):
            zmap = lambda b, _s=shape: (0,) * len(_s)
            if use_buffered:
                # Constant index_map -> fetched once; single buffer halves
                # the parameter VMEM footprint.
                return pl.BlockSpec(shape, zmap, pipeline_mode=pl.Buffered(1))
            return pl.BlockSpec(shape, zmap)

        in_specs = [pl.BlockSpec((Bt, n_p, din_p), data_map),
                    pl.BlockSpec((Bt, n_p, n_p), data_map),
                    pl.BlockSpec((Bt, n_p, 1), data_map)]
        in_specs += [pspec(p.shape) for p in param_args]
        out_specs = pl.BlockSpec((1, Bt, o_p), data_map)

        return pl.pallas_call(
            kernel,
            out_shape=jax.ShapeDtypeStruct((grid, Bt, o_p), jnp.float32),
            grid=(grid,),
            in_specs=in_specs,
            out_specs=out_specs,
            compiler_params=pltpu.CompilerParams(
                dimension_semantics=("parallel",),
                vmem_limit_bytes=vmem_limit),
            cost_estimate=cost,
        )(inp_p, adj_p, mask_p, *param_args)

    use_buffered = hasattr(pl, "Buffered")
    try:
        out = _run(use_buffered)
    except Exception:
        if not use_buffered:
            raise
        out = _run(False)     # fall back to default double-buffered params

    return out.reshape(B_pad, o_p)[:B, :O]


# --------------------------------------------------------------------------
# Parameter init (PyTorch-equivalent) and pure-JAX reference
# --------------------------------------------------------------------------
def _xavier_uniform(key, fan_out, fan_in, dtype=jnp.float32):
    bound = math.sqrt(6.0 / (fan_in + fan_out))
    return jax.random.uniform(key, (fan_out, fan_in), dtype, -bound, bound)


def init_params(key, input_dim, hidden_dim, output_dim, dtype=jnp.float32):
    keys = jax.random.split(key, 20)

    def linear(kw, kb, fan_in, fan_out):
        w = _xavier_uniform(kw, fan_out, fan_in, dtype).T       # (in, out)
        bb = 1.0 / math.sqrt(fan_in)
        b = jax.random.uniform(kb, (1, fan_out), dtype, -bb, bb)
        return w, b

    we = _xavier_uniform(keys[0], hidden_dim, input_dim, dtype).T
    wz0, bz0 = linear(keys[1], keys[2], hidden_dim, hidden_dim)
    wz1, bz1 = linear(keys[3], keys[4], hidden_dim, hidden_dim)
    wr0, br0 = linear(keys[5], keys[6], hidden_dim, hidden_dim)
    wr1, br1 = linear(keys[7], keys[8], hidden_dim, hidden_dim)
    wh0, bh0 = linear(keys[9], keys[10], hidden_dim, hidden_dim)
    wh1, bh1 = linear(keys[11], keys[12], hidden_dim, hidden_dim)
    watt, batt = linear(keys[13], keys[14], hidden_dim, 1)
    wemb, bemb = linear(keys[15], keys[16], hidden_dim, hidden_dim)
    wmlp, bmlp = linear(keys[17], keys[18], hidden_dim, output_dim)
    return dict(we=we,
                wz0=wz0, bz0=bz0, wz1=wz1, bz1=bz1,
                wr0=wr0, br0=br0, wr1=wr1, br1=br1,
                wh0=wh0, bh0=bh0, wh1=wh1, bh1=bh1,
                watt=watt, batt=batt, wemb=wemb, bemb=bemb,
                wmlp=wmlp, bmlp=bmlp)


def gnn_ref(inputs, adj, mask, p, *, steps=2, mm_dtype=jnp.float32):
    """Pure-JAX reference mirroring the PyTorch GNN forward."""
    f32 = jnp.float32

    def mm(a, b):
        return jnp.dot(a.astype(mm_dtype), b.astype(mm_dtype),
                       preferred_element_type=f32)

    def bmm(a, b):
        return jnp.einsum("bnm,bmd->bnd", a.astype(mm_dtype),
                          b.astype(mm_dtype), preferred_element_type=f32)

    x = mask * jax.nn.relu(mm(inputs, p["we"]))
    for _ in range(steps):
        a = bmm(adj, x)
        z = jax.nn.sigmoid(mm(a, p["wz0"]) + p["bz0"]
                           + mm(x, p["wz1"]) + p["bz1"])
        r = jax.nn.sigmoid(mm(a, p["wr0"]) + p["br0"]
                           + mm(x, p["wr1"]) + p["br1"])
        h = jax.nn.relu(mask * (mm(a, p["wh0"]) + p["bh0"]
                                + mm(x * r, p["wh1"]) + p["bh1"]))
        x = h * z + x * (1.0 - z)
    att = jax.nn.sigmoid(mm(x, p["watt"]) + p["batt"])
    emb = jax.nn.relu(mm(x, p["wemb"]) + p["bemb"])
    n = jnp.sum(mask, axis=1)                 # (B, 1)
    m = (mask - 1.0) * 1e9                    # (B, N, 1)
    g = mask * att * emb                      # (B, N, H)
    g = jnp.sum(g, axis=1) / n + jnp.max(g + m, axis=1)   # (B, H)
    return mm(g, p["wmlp"]) + p["bmlp"]       # (B, O)


# --------------------------------------------------------------------------
if __name__ == "__main__":
    key = jax.random.PRNGKey(0)
    B, N, DIN, HID, OUT, STEPS = 2, 8, 16, 32, 8, 2

    k_in, k_adj, k_mask, k_par = jax.random.split(key, 4)
    inputs = jax.random.normal(k_in, (B, N, DIN), jnp.float32)
    adj = jax.random.uniform(k_adj, (B, N, N), jnp.float32)
    mask = (jax.random.uniform(k_mask, (B, N, 1)) > 0.2).astype(jnp.float32)
    params = init_params(k_par, DIN, HID, OUT)

    out = gnn_forward(inputs, adj, mask, params, steps=STEPS,
                      mm_dtype=jnp.bfloat16)
    out = jax.block_until_ready(out)
    assert out.shape == (B, OUT)

    # Reference with matching matmul precision (bf16 operands, f32 accumulate).
    ref = gnn_ref(inputs, adj, mask, params, steps=STEPS,
                  mm_dtype=jnp.bfloat16)
    assert jnp.allclose(out, ref, atol=2e-3, rtol=2e-3), "mismatch vs reference"

    print("KERNEL_OK")
</pallas_src>

<mosaic_0001>
module attributes {stable_mosaic.version = 11 : i64} {
  func.func @_gnn_kernel(%arg0: i32, %arg1: memref<2x16x128xbf16, #tpu.memory_space<vmem>>, %arg2: memref<2x16x16xbf16, #tpu.memory_space<vmem>>, %arg3: memref<2x16x1xf32, #tpu.memory_space<vmem>>, %arg4: memref<128x128xbf16, #tpu.memory_space<vmem>>, %arg5: memref<256x384xbf16, #tpu.memory_space<vmem>>, %arg6: memref<128x128xbf16, #tpu.memory_space<vmem>>, %arg7: memref<1x128xf32, #tpu.memory_space<vmem>>, %arg8: memref<1x128xf32, #tpu.memory_space<vmem>>, %arg9: memref<1x128xf32, #tpu.memory_space<vmem>>, %arg10: memref<128x256xbf16, #tpu.memory_space<vmem>>, %arg11: memref<1x256xf32, #tpu.memory_space<vmem>>, %arg12: memref<128x128xbf16, #tpu.memory_space<vmem>>, %arg13: memref<1x128xf32, #tpu.memory_space<vmem>>, %arg14: memref<1x2x128xf32, #tpu.memory_space<vmem>>) attributes {dimension_semantics = [#tpu.dimension_semantics<parallel>], iteration_bounds = array<i64: 1>, scalar_prefetch = 0 : i64, scratch_operands = 0 : i64, tpu.core_type = #tpu.core_type<tc>, window_params = [{transform_indices = @transform_0, window_bounds = array<i64: 2, 16, 128>}, {transform_indices = @transform_1, window_bounds = array<i64: 2, 16, 16>}, {transform_indices = @transform_2, window_bounds = array<i64: 2, 16, 1>}, {pipeline_mode = #tpu.pipeline_mode<synchronous>, transform_indices = @transform_3, window_bounds = array<i64: 128, 128>}, {pipeline_mode = #tpu.pipeline_mode<synchronous>, transform_indices = @transform_4, window_bounds = array<i64: 256, 384>}, {pipeline_mode = #tpu.pipeline_mode<synchronous>, transform_indices = @transform_5, window_bounds = array<i64: 128, 128>}, {pipeline_mode = #tpu.pipeline_mode<synchronous>, transform_indices = @transform_6, window_bounds = array<i64: 1, 128>}, {pipeline_mode = #tpu.pipeline_mode<synchronous>, transform_indices = @transform_7, window_bounds = array<i64: 1, 128>}, {pipeline_mode = #tpu.pipeline_mode<synchronous>, transform_indices = @transform_8, window_bounds = array<i64: 1, 128>}, {pipeline_mode = #tpu.pipeline_mode<synchronous>, transform_indices = @transform_9, window_bounds = array<i64: 128, 256>}, {pipeline_mode = #tpu.pipeline_mode<synchronous>, transform_indices = @transform_10, window_bounds = array<i64: 1, 256>}, {pipeline_mode = #tpu.pipeline_mode<synchronous>, transform_indices = @transform_11, window_bounds = array<i64: 128, 128>}, {pipeline_mode = #tpu.pipeline_mode<synchronous>, transform_indices = @transform_12, window_bounds = array<i64: 1, 128>}, {transform_indices = @transform_13, window_bounds = array<i64: 1, 2, 128>}]} {
    %c0 = arith.constant 0 : index
    %c0_0 = arith.constant 0 : index
    %c0_1 = arith.constant 0 : index
    %0 = vector.load %arg1[%c0, %c0_0, %c0_1] : memref<2x16x128xbf16, #tpu.memory_space<vmem>>, vector<2x16x128xbf16>
    %1 = vector.shape_cast %0 : vector<2x16x128xbf16> to vector<32x128xbf16>
    %c0_2 = arith.constant 0 : index
    %c0_3 = arith.constant 0 : index
    %c0_4 = arith.constant 0 : index
    %2 = vector.load %arg2[%c0_2, %c0_3, %c0_4] : memref<2x16x16xbf16, #tpu.memory_space<vmem>>, vector<2x16x16xbf16>
    %c0_5 = arith.constant 0 : index
    %c0_6 = arith.constant 0 : index
    %c0_7 = arith.constant 0 : index
    %3 = vector.load %arg3[%c0_5, %c0_6, %c0_7] : memref<2x16x1xf32, #tpu.memory_space<vmem>>, vector<2x16x1xf32>
    %4 = vector.shape_cast %3 : vector<2x16x1xf32> to vector<32x1xf32>
    %5 = vector.shape_cast %4 : vector<32x1xf32> to vector<32x1xf32>
    %6 = vector.broadcast %5 : vector<32x1xf32> to vector<32x128xf32>
    %c0_8 = arith.constant 0 : index
    %c0_9 = arith.constant 0 : index
    %7 = vector.load %arg7[%c0_8, %c0_9] : memref<1x128xf32, #tpu.memory_space<vmem>>, vector<1x128xf32>
    %8 = vector.shape_cast %7 : vector<1x128xf32> to vector<1x128xf32>
    %9 = vector.broadcast %8 : vector<1x128xf32> to vector<32x128xf32>
    %c0_10 = arith.constant 0 : index
    %c0_11 = arith.constant 0 : index
    %10 = vector.load %arg8[%c0_10, %c0_11] : memref<1x128xf32, #tpu.memory_space<vmem>>, vector<1x128xf32>
    %11 = vector.shape_cast %10 : vector<1x128xf32> to vector<1x128xf32>
    %12 = vector.broadcast %11 : vector<1x128xf32> to vector<32x128xf32>
    %c0_12 = arith.constant 0 : index
    %c0_13 = arith.constant 0 : index
    %13 = vector.load %arg9[%c0_12, %c0_13] : memref<1x128xf32, #tpu.memory_space<vmem>>, vector<1x128xf32>
    %14 = vector.shape_cast %13 : vector<1x128xf32> to vector<1x128xf32>
    %15 = vector.broadcast %14 : vector<1x128xf32> to vector<32x128xf32>
    %c0_14 = arith.constant 0 : index
    %c0_15 = arith.constant 0 : index
    %16 = vector.load %arg4[%c0_14, %c0_15] : memref<128x128xbf16, #tpu.memory_space<vmem>>, vector<128x128xbf16>
    %cst = arith.constant dense<0.000000e+00> : vector<32x128xf32>
    %17 = tpu.matmul %1, %16, %cst {dimension_numbers = #tpu.dot_dimension_numbers<[1], [0], [0], [1], [0, 0, 1, 1], [], []>} : vector<32x128xbf16>, vector<128x128xbf16>, vector<32x128xf32> -> vector<32x128xf32>
    %cst_16 = arith.constant 0.000000e+00 : f32
    %18 = vector.broadcast %cst_16 : f32 to vector<32x128xf32>
    %19 = arith.maximumf %17, %18 : vector<32x128xf32>
    %20 = arith.mulf %6, %19 : vector<32x128xf32>
    %c0_i32 = arith.constant 0 : i32
    %21 = arith.truncf %20 : vector<32x128xf32> to vector<32x128xbf16>
    %22 = vector.shape_cast %21 : vector<32x128xbf16> to vector<2x16x128xbf16>
    %cst_17 = arith.constant 0.000000e+00 : f32
    %23 = vector.broadcast %cst_17 : f32 to vector<2x16x128xf32>
    %24 = vector.extract_strided_slice %2 {offsets = [0, 0, 0], sizes = [2, 16, 1], strides = [1, 1, 1]} : vector<2x16x16xbf16> to vector<2x16x1xbf16>
    %25 = arith.extf %24 : vector<2x16x1xbf16> to vector<2x16x1xf32>
    %26 = vector.extract_strided_slice %22 {offsets = [0, 0, 0], sizes = [2, 1, 128], strides = [1, 1, 1]} : vector<2x16x128xbf16> to vector<2x1x128xbf16>
    %27 = arith.extf %26 : vector<2x1x128xbf16> to vector<2x1x128xf32>
    %28 = vector.broadcast %25 : vector<2x16x1xf32> to vector<2x16x128xf32>
    %29 = vector.broadcast %27 : vector<2x1x128xf32> to vector<2x16x128xf32>
    %30 = arith.mulf %28, %29 : vector<2x16x128xf32>
    %31 = arith.addf %23, %30 : vector<2x16x128xf32>
    %32 = vector.extract_strided_slice %2 {offsets = [0, 0, 1], sizes = [2, 16, 1], strides = [1, 1, 1]} : vector<2x16x16xbf16> to vector<2x16x1xbf16>
    %33 = arith.extf %32 : vector<2x16x1xbf16> to vector<2x16x1xf32>
    %34 = vector.extract_strided_slice %22 {offsets = [0, 1, 0], sizes = [2, 1, 128], strides = [1, 1, 1]} : vector<2x16x128xbf16> to vector<2x1x128xbf16>
    %35 = arith.extf %34 : vector<2x1x128xbf16> to vector<2x1x128xf32>
    %36 = vector.broadcast %33 : vector<2x16x1xf32> to vector<2x16x128xf32>
    %37 = vector.broadcast %35 : vector<2x1x128xf32> to vector<2x16x128xf32>
    %38 = arith.mulf %36, %37 : vector<2x16x128xf32>
    %39 = arith.addf %31, %38 : vector<2x16x128xf32>
    %40 = vector.extract_strided_slice %2 {offsets = [0, 0, 2], sizes = [2, 16, 1], strides = [1, 1, 1]} : vector<2x16x16xbf16> to vector<2x16x1xbf16>
    %41 = arith.extf %40 : vector<2x16x1xbf16> to vector<2x16x1xf32>
    %42 = vector.extract_strided_slice %22 {offsets = [0, 2, 0], sizes = [2, 1, 128], strides = [1, 1, 1]} : vector<2x16x128xbf16> to vector<2x1x128xbf16>
    %43 = arith.extf %42 : vector<2x1x128xbf16> to vector<2x1x128xf32>
    %44 = vector.broadcast %41 : vector<2x16x1xf32> to vector<2x16x128xf32>
    %45 = vector.broadcast %43 : vector<2x1x128xf32> to vector<2x16x128xf32>
    %46 = arith.mulf %44, %45 : vector<2x16x128xf32>
    %47 = arith.addf %39, %46 : vector<2x16x128xf32>
    %48 = vector.extract_strided_slice %2 {offsets = [0, 0, 3], sizes = [2, 16, 1], strides = [1, 1, 1]} : vector<2x16x16xbf16> to vector<2x16x1xbf16>
    %49 = arith.extf %48 : vector<2x16x1xbf16> to vector<2x16x1xf32>
    %50 = vector.extract_strided_slice %22 {offsets = [0, 3, 0], sizes = [2, 1, 128], strides = [1, 1, 1]} : vector<2x16x128xbf16> to vector<2x1x128xbf16>
    %51 = arith.extf %50 : vector<2x1x128xbf16> to vector<2x1x128xf32>
    %52 = vector.broadcast %49 : vector<2x16x1xf32> to vector<2x16x128xf32>
    %53 = vector.broadcast %51 : vector<2x1x128xf32> to vector<2x16x128xf32>
    %54 = arith.mulf %52, %53 : vector<2x16x128xf32>
    %55 = arith.addf %47, %54 : vector<2x16x128xf32>
    %56 = vector.extract_strided_slice %2 {offsets = [0, 0, 4], sizes = [2, 16, 1], strides = [1, 1, 1]} : vector<2x16x16xbf16> to vector<2x16x1xbf16>
    %57 = arith.extf %56 : vector<2x16x1xbf16> to vector<2x16x1xf32>
    %58 = vector.extract_strided_slice %22 {offsets = [0, 4, 0], sizes = [2, 1, 128], strides = [1, 1, 1]} : vector<2x16x128xbf16> to vector<2x1x128xbf16>
    %59 = arith.extf %58 : vector<2x1x128xbf16> to vector<2x1x128xf32>
    %60 = vector.broadcast %57 : vector<2x16x1xf32> to vector<2x16x128xf32>
    %61 = vector.broadcast %59 : vector<2x1x128xf32> to vector<2x16x128xf32>
    %62 = arith.mulf %60, %61 : vector<2x16x128xf32>
    %63 = arith.addf %55, %62 : vector<2x16x128xf32>
    %64 = vector.extract_strided_slice %2 {offsets = [0, 0, 5], sizes = [2, 16, 1], strides = [1, 1, 1]} : vector<2x16x16xbf16> to vector<2x16x1xbf16>
    %65 = arith.extf %64 : vector<2x16x1xbf16> to vector<2x16x1xf32>
    %66 = vector.extract_strided_slice %22 {offsets = [0, 5, 0], sizes = [2, 1, 128], strides = [1, 1, 1]} : vector<2x16x128xbf16> to vector<2x1x128xbf16>
    %67 = arith.extf %66 : vector<2x1x128xbf16> to vector<2x1x128xf32>
    %68 = vector.broadcast %65 : vector<2x16x1xf32> to vector<2x16x128xf32>
    %69 = vector.broadcast %67 : vector<2x1x128xf32> to vector<2x16x128xf32>
    %70 = arith.mulf %68, %69 : vector<2x16x128xf32>
    %71 = arith.addf %63, %70 : vector<2x16x128xf32>
    %72 = vector.extract_strided_slice %2 {offsets = [0, 0, 6], sizes = [2, 16, 1], strides = [1, 1, 1]} : vector<2x16x16xbf16> to vector<2x16x1xbf16>
    %73 = arith.extf %72 : vector<2x16x1xbf16> to vector<2x16x1xf32>
    %74 = vector.extract_strided_slice %22 {offsets = [0, 6, 0], sizes = [2, 1, 128], strides = [1, 1, 1]} : vector<2x16x128xbf16> to vector<2x1x128xbf16>
    %75 = arith.extf %74 : vector<2x1x128xbf16> to vector<2x1x128xf32>
    %76 = vector.broadcast %73 : vector<2x16x1xf32> to vector<2x16x128xf32>
    %77 = vector.broadcast %75 : vector<2x1x128xf32> to vector<2x16x128xf32>
    %78 = arith.mulf %76, %77 : vector<2x16x128xf32>
    %79 = arith.addf %71, %78 : vector<2x16x128xf32>
    %80 = vector.extract_strided_slice %2 {offsets = [0, 0, 7], sizes = [2, 16, 1], strides = [1, 1, 1]} : vector<2x16x16xbf16> to vector<2x16x1xbf16>
    %81 = arith.extf %80 : vector<2x16x1xbf16> to vector<2x16x1xf32>
    %82 = vector.extract_strided_slice %22 {offsets = [0, 7, 0], sizes = [2, 1, 128], strides = [1, 1, 1]} : vector<2x16x128xbf16> to vector<2x1x128xbf16>
    %83 = arith.extf %82 : vector<2x1x128xbf16> to vector<2x1x128xf32>
    %84 = vector.broadcast %81 : vector<2x16x1xf32> to vector<2x16x128xf32>
    %85 = vector.broadcast %83 : vector<2x1x128xf32> to vector<2x16x128xf32>
    %86 = arith.mulf %84, %85 : vector<2x16x128xf32>
    %87 = arith.addf %79, %86 : vector<2x16x128xf32>
    %88 = vector.extract_strided_slice %2 {offsets = [0, 0, 8], sizes = [2, 16, 1], strides = [1, 1, 1]} : vector<2x16x16xbf16> to vector<2x16x1xbf16>
    %89 = arith.extf %88 : vector<2x16x1xbf16> to vector<2x16x1xf32>
    %90 = vector.extract_strided_slice %22 {offsets = [0, 8, 0], sizes = [2, 1, 128], strides = [1, 1, 1]} : vector<2x16x128xbf16> to vector<2x1x128xbf16>
    %91 = arith.extf %90 : vector<2x1x128xbf16> to vector<2x1x128xf32>
    %92 = vector.broadcast %89 : vector<2x16x1xf32> to vector<2x16x128xf32>
    %93 = vector.broadcast %91 : vector<2x1x128xf32> to vector<2x16x128xf32>
    %94 = arith.mulf %92, %93 : vector<2x16x128xf32>
    %95 = arith.addf %87, %94 : vector<2x16x128xf32>
    %96 = vector.extract_strided_slice %2 {offsets = [0, 0, 9], sizes = [2, 16, 1], strides = [1, 1, 1]} : vector<2x16x16xbf16> to vector<2x16x1xbf16>
    %97 = arith.extf %96 : vector<2x16x1xbf16> to vector<2x16x1xf32>
    %98 = vector.extract_strided_slice %22 {offsets = [0, 9, 0], sizes = [2, 1, 128], strides = [1, 1, 1]} : vector<2x16x128xbf16> to vector<2x1x128xbf16>
    %99 = arith.extf %98 : vector<2x1x128xbf16> to vector<2x1x128xf32>
    %100 = vector.broadcast %97 : vector<2x16x1xf32> to vector<2x16x128xf32>
    %101 = vector.broadcast %99 : vector<2x1x128xf32> to vector<2x16x128xf32>
    %102 = arith.mulf %100, %101 : vector<2x16x128xf32>
    %103 = arith.addf %95, %102 : vector<2x16x128xf32>
    %104 = vector.extract_strided_slice %2 {offsets = [0, 0, 10], sizes = [2, 16, 1], strides = [1, 1, 1]} : vector<2x16x16xbf16> to vector<2x16x1xbf16>
    %105 = arith.extf %104 : vector<2x16x1xbf16> to vector<2x16x1xf32>
    %106 = vector.extract_strided_slice %22 {offsets = [0, 10, 0], sizes = [2, 1, 128], strides = [1, 1, 1]} : vector<2x16x128xbf16> to vector<2x1x128xbf16>
    %107 = arith.extf %106 : vector<2x1x128xbf16> to vector<2x1x128xf32>
    %108 = vector.broadcast %105 : vector<2x16x1xf32> to vector<2x16x128xf32>
    %109 = vector.broadcast %107 : vector<2x1x128xf32> to vector<2x16x128xf32>
    %110 = arith.mulf %108, %109 : vector<2x16x128xf32>
    %111 = arith.addf %103, %110 : vector<2x16x128xf32>
    %112 = vector.extract_strided_slice %2 {offsets = [0, 0, 11], sizes = [2, 16, 1], strides = [1, 1, 1]} : vector<2x16x16xbf16> to vector<2x16x1xbf16>
    %113 = arith.extf %112 : vector<2x16x1xbf16> to vector<2x16x1xf32>
    %114 = vector.extract_strided_slice %22 {offsets = [0, 11, 0], sizes = [2, 1, 128], strides = [1, 1, 1]} : vector<2x16x128xbf16> to vector<2x1x128xbf16>
    %115 = arith.extf %114 : vector<2x1x128xbf16> to vector<2x1x128xf32>
    %116 = vector.broadcast %113 : vector<2x16x1xf32> to vector<2x16x128xf32>
    %117 = vector.broadcast %115 : vector<2x1x128xf32> to vector<2x16x128xf32>
    %118 = arith.mulf %116, %117 : vector<2x16x128xf32>
    %119 = arith.addf %111, %118 : vector<2x16x128xf32>
    %120 = vector.extract_strided_slice %2 {offsets = [0, 0, 12], sizes = [2, 16, 1], strides = [1, 1, 1]} : vector<2x16x16xbf16> to vector<2x16x1xbf16>
    %121 = arith.extf %120 : vector<2x16x1xbf16> to vector<2x16x1xf32>
    %122 = vector.extract_strided_slice %22 {offsets = [0, 12, 0], sizes = [2, 1, 128], strides = [1, 1, 1]} : vector<2x16x128xbf16> to vector<2x1x128xbf16>
    %123 = arith.extf %122 : vector<2x1x128xbf16> to vector<2x1x128xf32>
    %124 = vector.broadcast %121 : vector<2x16x1xf32> to vector<2x16x128xf32>
    %125 = vector.broadcast %123 : vector<2x1x128xf32> to vector<2x16x128xf32>
    %126 = arith.mulf %124, %125 : vector<2x16x128xf32>
    %127 = arith.addf %119, %126 : vector<2x16x128xf32>
    %128 = vector.extract_strided_slice %2 {offsets = [0, 0, 13], sizes = [2, 16, 1], strides = [1, 1, 1]} : vector<2x16x16xbf16> to vector<2x16x1xbf16>
    %129 = arith.extf %128 : vector<2x16x1xbf16> to vector<2x16x1xf32>
    %130 = vector.extract_strided_slice %22 {offsets = [0, 13, 0], sizes = [2, 1, 128], strides = [1, 1, 1]} : vector<2x16x128xbf16> to vector<2x1x128xbf16>
    %131 = arith.extf %130 : vector<2x1x128xbf16> to vector<2x1x128xf32>
    %132 = vector.broadcast %129 : vector<2x16x1xf32> to vector<2x16x128xf32>
    %133 = vector.broadcast %131 : vector<2x1x128xf32> to vector<2x16x128xf32>
    %134 = arith.mulf %132, %133 : vector<2x16x128xf32>
    %135 = arith.addf %127, %134 : vector<2x16x128xf32>
    %136 = vector.extract_strided_slice %2 {offsets = [0, 0, 14], sizes = [2, 16, 1], strides = [1, 1, 1]} : vector<2x16x16xbf16> to vector<2x16x1xbf16>
    %137 = arith.extf %136 : vector<2x16x1xbf16> to vector<2x16x1xf32>
    %138 = vector.extract_strided_slice %22 {offsets = [0, 14, 0], sizes = [2, 1, 128], strides = [1, 1, 1]} : vector<2x16x128xbf16> to vector<2x1x128xbf16>
    %139 = arith.extf %138 : vector<2x1x128xbf16> to vector<2x1x128xf32>
    %140 = vector.broadcast %137 : vector<2x16x1xf32> to vector<2x16x128xf32>
    %141 = vector.broadcast %139 : vector<2x1x128xf32> to vector<2x16x128xf32>
    %142 = arith.mulf %140, %141 : vector<2x16x128xf32>
    %143 = arith.addf %135, %142 : vector<2x16x128xf32>
    %144 = vector.extract_strided_slice %2 {offsets = [0, 0, 15], sizes = [2, 16, 1], strides = [1, 1, 1]} : vector<2x16x16xbf16> to vector<2x16x1xbf16>
    %145 = arith.extf %144 : vector<2x16x1xbf16> to vector<2x16x1xf32>
    %146 = vector.extract_strided_slice %22 {offsets = [0, 15, 0], sizes = [2, 1, 128], strides = [1, 1, 1]} : vector<2x16x128xbf16> to vector<2x1x128xbf16>
    %147 = arith.extf %146 : vector<2x1x128xbf16> to vector<2x1x128xf32>
    %148 = vector.broadcast %145 : vector<2x16x1xf32> to vector<2x16x128xf32>
    %149 = vector.broadcast %147 : vector<2x1x128xf32> to vector<2x16x128xf32>
    %150 = arith.mulf %148, %149 : vector<2x16x128xf32>
    %151 = arith.addf %143, %150 : vector<2x16x128xf32>
    %152 = vector.shape_cast %151 : vector<2x16x128xf32> to vector<32x128xf32>
    %153 = arith.truncf %152 : vector<32x128xf32> to vector<32x128xbf16>
    %154 = tpu.concatenate %153, %21 in 1 : vector<32x128xbf16>, vector<32x128xbf16> -> vector<32x256xbf16>
    %c0_18 = arith.constant 0 : index
    %c0_19 = arith.constant 0 : index
    %155 = vector.load %arg5[%c0_18, %c0_19] : memref<256x384xbf16, #tpu.memory_space<vmem>>, vector<256x384xbf16>
    %cst_20 = arith.constant dense<0.000000e+00> : vector<32x384xf32>
    %156 = tpu.matmul %154, %155, %cst_20 {dimension_numbers = #tpu.dot_dimension_numbers<[1], [0], [0], [1], [0, 0, 1, 1], [], []>} : vector<32x256xbf16>, vector<256x384xbf16>, vector<32x384xf32> -> vector<32x384xf32>
    %157 = vector.extract_strided_slice %156 {offsets = [0, 0], sizes = [32, 128], strides = [1, 1]} : vector<32x384xf32> to vector<32x128xf32>
    %158 = vector.extract_strided_slice %156 {offsets = [0, 128], sizes = [32, 128], strides = [1, 1]} : vector<32x384xf32> to vector<32x128xf32>
    %159 = vector.extract_strided_slice %156 {offsets = [0, 256], sizes = [32, 128], strides = [1, 1]} : vector<32x384xf32> to vector<32x128xf32>
    %160 = arith.addf %157, %9 : vector<32x128xf32>
    %161 = arith.negf %160 : vector<32x128xf32>
    %162 = math.exp %161 : vector<32x128xf32>
    %cst_21 = arith.constant 1.000000e+00 : f32
    %163 = vector.broadcast %cst_21 : f32 to vector<32x128xf32>
    %164 = arith.addf %163, %162 : vector<32x128xf32>
    %165 = arith.divf %163, %164 : vector<32x128xf32>
    %166 = arith.addf %158, %12 : vector<32x128xf32>
    %167 = arith.negf %166 : vector<32x128xf32>
    %168 = math.exp %167 : vector<32x128xf32>
    %cst_22 = arith.constant 1.000000e+00 : f32
    %169 = vector.broadcast %cst_22 : f32 to vector<32x128xf32>
    %170 = arith.addf %169, %168 : vector<32x128xf32>
    %171 = arith.divf %169, %170 : vector<32x128xf32>
    %172 = arith.mulf %20, %171 : vector<32x128xf32>
    %173 = arith.truncf %172 : vector<32x128xf32> to vector<32x128xbf16>
    %c0_23 = arith.constant 0 : index
    %c0_24 = arith.constant 0 : index
    %174 = vector.load %arg6[%c0_23, %c0_24] : memref<128x128xbf16, #tpu.memory_space<vmem>>, vector<128x128xbf16>
    %cst_25 = arith.constant dense<0.000000e+00> : vector<32x128xf32>
    %175 = tpu.matmul %173, %174, %cst_25 {dimension_numbers = #tpu.dot_dimension_numbers<[1], [0], [0], [1], [0, 0, 1, 1], [], []>} : vector<32x128xbf16>, vector<128x128xbf16>, vector<32x128xf32> -> vector<32x128xf32>
    %176 = arith.addf %159, %175 : vector<32x128xf32>
    %177 = arith.addf %176, %15 : vector<32x128xf32>
    %178 = arith.mulf %6, %177 : vector<32x128xf32>
    %cst_26 = arith.constant 0.000000e+00 : f32
    %179 = vector.broadcast %cst_26 : f32 to vector<32x128xf32>
    %180 = arith.maximumf %178, %179 : vector<32x128xf32>
    %181 = arith.subf %180, %20 : vector<32x128xf32>
    %182 = arith.mulf %165, %181 : vector<32x128xf32>
    %183 = arith.addf %20, %182 : vector<32x128xf32>
    %c1_i32 = arith.constant 1 : i32
    %184 = arith.truncf %183 : vector<32x128xf32> to vector<32x128xbf16>
    %185 = vector.shape_cast %184 : vector<32x128xbf16> to vector<2x16x128xbf16>
    %cst_27 = arith.constant 0.000000e+00 : f32
    %186 = vector.broadcast %cst_27 : f32 to vector<2x16x128xf32>
    %187 = vector.extract_strided_slice %2 {offsets = [0, 0, 0], sizes = [2, 16, 1], strides = [1, 1, 1]} : vector<2x16x16xbf16> to vector<2x16x1xbf16>
    %188 = arith.extf %187 : vector<2x16x1xbf16> to vector<2x16x1xf32>
    %189 = vector.extract_strided_slice %185 {offsets = [0, 0, 0], sizes = [2, 1, 128], strides = [1, 1, 1]} : vector<2x16x128xbf16> to vector<2x1x128xbf16>
    %190 = arith.extf %189 : vector<2x1x128xbf16> to vector<2x1x128xf32>
    %191 = vector.broadcast %188 : vector<2x16x1xf32> to vector<2x16x128xf32>
    %192 = vector.broadcast %190 : vector<2x1x128xf32> to vector<2x16x128xf32>
    %193 = arith.mulf %191, %192 : vector<2x16x128xf32>
    %194 = arith.addf %186, %193 : vector<2x16x128xf32>
    %195 = vector.extract_strided_slice %2 {offsets = [0, 0, 1], sizes = [2, 16, 1], strides = [1, 1, 1]} : vector<2x16x16xbf16> to vector<2x16x1xbf16>
    %196 = arith.extf %195 : vector<2x16x1xbf16> to vector<2x16x1xf32>
    %197 = vector.extract_strided_slice %185 {offsets = [0, 1, 0], sizes = [2, 1, 128], strides = [1, 1, 1]} : vector<2x16x128xbf16> to vector<2x1x128xbf16>
    %198 = arith.extf %197 : vector<2x1x128xbf16> to vector<2x1x128xf32>
    %199 = vector.broadcast %196 : vector<2x16x1xf32> to vector<2x16x128xf32>
    %200 = vector.broadcast %198 : vector<2x1x128xf32> to vector<2x16x128xf32>
    %201 = arith.mulf %199, %200 : vector<2x16x128xf32>
    %202 = arith.addf %194, %201 : vector<2x16x128xf32>
    %203 = vector.extract_strided_slice %2 {offsets = [0, 0, 2], sizes = [2, 16, 1], strides = [1, 1, 1]} : vector<2x16x16xbf16> to vector<2x16x1xbf16>
    %204 = arith.extf %203 : vector<2x16x1xbf16> to vector<2x16x1xf32>
    %205 = vector.extract_strided_slice %185 {offsets = [0, 2, 0], sizes = [2, 1, 128], strides = [1, 1, 1]} : vector<2x16x128xbf16> to vector<2x1x128xbf16>
    %206 = arith.extf %205 : vector<2x1x128xbf16> to vector<2x1x128xf32>
    %207 = vector.broadcast %204 : vector<2x16x1xf32> to vector<2x16x128xf32>
    %208 = vector.broadcast %206 : vector<2x1x128xf32> to vector<2x16x128xf32>
    %209 = arith.mulf %207, %208 : vector<2x16x128xf32>
    %210 = arith.addf %202, %209 : vector<2x16x128xf32>
    %211 = vector.extract_strided_slice %2 {offsets = [0, 0, 3], sizes = [2, 16, 1], strides = [1, 1, 1]} : vector<2x16x16xbf16> to vector<2x16x1xbf16>
    %212 = arith.extf %211 : vector<2x16x1xbf16> to vector<2x16x1xf32>
    %213 = vector.extract_strided_slice %185 {offsets = [0, 3, 0], sizes = [2, 1, 128], strides = [1, 1, 1]} : vector<2x16x128xbf16> to vector<2x1x128xbf16>
    %214 = arith.extf %213 : vector<2x1x128xbf16> to vector<2x1x128xf32>
    %215 = vector.broadcast %212 : vector<2x16x1xf32> to vector<2x16x128xf32>
    %216 = vector.broadcast %214 : vector<2x1x128xf32> to vector<2x16x128xf32>
    %217 = arith.mulf %215, %216 : vector<2x16x128xf32>
    %218 = arith.addf %210, %217 : vector<2x16x128xf32>
    %219 = vector.extract_strided_slice %2 {offsets = [0, 0, 4], sizes = [2, 16, 1], strides = [1, 1, 1]} : vector<2x16x16xbf16> to vector<2x16x1xbf16>
    %220 = arith.extf %219 : vector<2x16x1xbf16> to vector<2x16x1xf32>
    %221 = vector.extract_strided_slice %185 {offsets = [0, 4, 0], sizes = [2, 1, 128], strides = [1, 1, 1]} : vector<2x16x128xbf16> to vector<2x1x128xbf16>
    %222 = arith.extf %221 : vector<2x1x128xbf16> to vector<2x1x128xf32>
    %223 = vector.broadcast %220 : vector<2x16x1xf32> to vector<2x16x128xf32>
    %224 = vector.broadcast %222 : vector<2x1x128xf32> to vector<2x16x128xf32>
    %225 = arith.mulf %223, %224 : vector<2x16x128xf32>
    %226 = arith.addf %218, %225 : vector<2x16x128xf32>
    %227 = vector.extract_strided_slice %2 {offsets = [0, 0, 5], sizes = [2, 16, 1], strides = [1, 1, 1]} : vector<2x16x16xbf16> to vector<2x16x1xbf16>
    %228 = arith.extf %227 : vector<2x16x1xbf16> to vector<2x16x1xf32>
    %229 = vector.extract_strided_slice %185 {offsets = [0, 5, 0], sizes = [2, 1, 128], strides = [1, 1, 1]} : vector<2x16x128xbf16> to vector<2x1x128xbf16>
    %230 = arith.extf %229 : vector<2x1x128xbf16> to vector<2x1x128xf32>
    %231 = vector.broadcast %228 : vector<2x16x1xf32> to vector<2x16x128xf32>
    %232 = vector.broadcast %230 : vector<2x1x128xf32> to vector<2x16x128xf32>
    %233 = arith.mulf %231, %232 : vector<2x16x128xf32>
    %234 = arith.addf %226, %233 : vector<2x16x128xf32>
    %235 = vector.extract_strided_slice %2 {offsets = [0, 0, 6], sizes = [2, 16, 1], strides = [1, 1, 1]} : vector<2x16x16xbf16> to vector<2x16x1xbf16>
    %236 = arith.extf %235 : vector<2x16x1xbf16> to vector<2x16x1xf32>
    %237 = vector.extract_strided_slice %185 {offsets = [0, 6, 0], sizes = [2, 1, 128], strides = [1, 1, 1]} : vector<2x16x128xbf16> to vector<2x1x128xbf16>
    %238 = arith.extf %237 : vector<2x1x128xbf16> to vector<2x1x128xf32>
    %239 = vector.broadcast %236 : vector<2x16x1xf32> to vector<2x16x128xf32>
    %240 = vector.broadcast %238 : vector<2x1x128xf32> to vector<2x16x128xf32>
    %241 = arith.mulf %239, %240 : vector<2x16x128xf32>
    %242 = arith.addf %234, %241 : vector<2x16x128xf32>
    %243 = vector.extract_strided_slice %2 {offsets = [0, 0, 7], sizes = [2, 16, 1], strides = [1, 1, 1]} : vector<2x16x16xbf16> to vector<2x16x1xbf16>
    %244 = arith.extf %243 : vector<2x16x1xbf16> to vector<2x16x1xf32>
    %245 = vector.extract_strided_slice %185 {offsets = [0, 7, 0], sizes = [2, 1, 128], strides = [1, 1, 1]} : vector<2x16x128xbf16> to vector<2x1x128xbf16>
    %246 = arith.extf %245 : vector<2x1x128xbf16> to vector<2x1x128xf32>
    %247 = vector.broadcast %244 : vector<2x16x1xf32> to vector<2x16x128xf32>
    %248 = vector.broadcast %246 : vector<2x1x128xf32> to vector<2x16x128xf32>
    %249 = arith.mulf %247, %248 : vector<2x16x128xf32>
    %250 = arith.addf %242, %249 : vector<2x16x128xf32>
    %251 = vector.extract_strided_slice %2 {offsets = [0, 0, 8], sizes = [2, 16, 1], strides = [1, 1, 1]} : vector<2x16x16xbf16> to vector<2x16x1xbf16>
    %252 = arith.extf %251 : vector<2x16x1xbf16> to vector<2x16x1xf32>
    %253 = vector.extract_strided_slice %185 {offsets = [0, 8, 0], sizes = [2, 1, 128], strides = [1, 1, 1]} : vector<2x16x128xbf16> to vector<2x1x128xbf16>
    %254 = arith.extf %253 : vector<2x1x128xbf16> to vector<2x1x128xf32>
    %255 = vector.broadcast %252 : vector<2x16x1xf32> to vector<2x16x128xf32>
    %256 = vector.broadcast %254 : vector<2x1x128xf32> to vector<2x16x128xf32>
    %257 = arith.mulf %255, %256 : vector<2x16x128xf32>
    %258 = arith.addf %250, %257 : vector<2x16x128xf32>
    %259 = vector.extract_strided_slice %2 {offsets = [0, 0, 9], sizes = [2, 16, 1], strides = [1, 1, 1]} : vector<2x16x16xbf16> to vector<2x16x1xbf16>
    %260 = arith.extf %259 : vector<2x16x1xbf16> to vector<2x16x1xf32>
    %261 = vector.extract_strided_slice %185 {offsets = [0, 9, 0], sizes = [2, 1, 128], strides = [1, 1, 1]} : vector<2x16x128xbf16> to vector<2x1x128xbf16>
    %262 = arith.extf %261 : vector<2x1x128xbf16> to vector<2x1x128xf32>
    %263 = vector.broadcast %260 : vector<2x16x1xf32> to vector<2x16x128xf32>
    %264 = vector.broadcast %262 : vector<2x1x128xf32> to vector<2x16x128xf32>
    %265 = arith.mulf %263, %264 : vector<2x16x128xf32>
    %266 = arith.addf %258, %265 : vector<2x16x128xf32>
    %267 = vector.extract_strided_slice %2 {offsets = [0, 0, 10], sizes = [2, 16, 1], strides = [1, 1, 1]} : vector<2x16x16xbf16> to vector<2x16x1xbf16>
    %268 = arith.extf %267 : vector<2x16x1xbf16> to vector<2x16x1xf32>
    %269 = vector.extract_strided_slice %185 {offsets = [0, 10, 0], sizes = [2, 1, 128], strides = [1, 1, 1]} : vector<2x16x128xbf16> to vector<2x1x128xbf16>
    %270 = arith.extf %269 : vector<2x1x128xbf16> to vector<2x1x128xf32>
    %271 = vector.broadcast %268 : vector<2x16x1xf32> to vector<2x16x128xf32>
    %272 = vector.broadcast %270 : vector<2x1x128xf32> to vector<2x16x128xf32>
    %273 = arith.mulf %271, %272 : vector<2x16x128xf32>
    %274 = arith.addf %266, %273 : vector<2x16x128xf32>
    %275 = vector.extract_strided_slice %2 {offsets = [0, 0, 11], sizes = [2, 16, 1], strides = [1, 1, 1]} : vector<2x16x16xbf16> to vector<2x16x1xbf16>
    %276 = arith.extf %275 : vector<2x16x1xbf16> to vector<2x16x1xf32>
    %277 = vector.extract_strided_slice %185 {offsets = [0, 11, 0], sizes = [2, 1, 128], strides = [1, 1, 1]} : vector<2x16x128xbf16> to vector<2x1x128xbf16>
    %278 = arith.extf %277 : vector<2x1x128xbf16> to vector<2x1x128xf32>
    %279 = vector.broadcast %276 : vector<2x16x1xf32> to vector<2x16x128xf32>
    %280 = vector.broadcast %278 : vector<2x1x128xf32> to vector<2x16x128xf32>
    %281 = arith.mulf %279, %280 : vector<2x16x128xf32>
    %282 = arith.addf %274, %281 : vector<2x16x128xf32>
    %283 = vector.extract_strided_slice %2 {offsets = [0, 0, 12], sizes = [2, 16, 1], strides = [1, 1, 1]} : vector<2x16x16xbf16> to vector<2x16x1xbf16>
    %284 = arith.extf %283 : vector<2x16x1xbf16> to vector<2x16x1xf32>
    %285 = vector.extract_strided_slice %185 {offsets = [0, 12, 0], sizes = [2, 1, 128], strides = [1, 1, 1]} : vector<2x16x128xbf16> to vector<2x1x128xbf16>
    %286 = arith.extf %285 : vector<2x1x128xbf16> to vector<2x1x128xf32>
    %287 = vector.broadcast %284 : vector<2x16x1xf32> to vector<2x16x128xf32>
    %288 = vector.broadcast %286 : vector<2x1x128xf32> to vector<2x16x128xf32>
    %289 = arith.mulf %287, %288 : vector<2x16x128xf32>
    %290 = arith.addf %282, %289 : vector<2x16x128xf32>
    %291 = vector.extract_strided_slice %2 {offsets = [0, 0, 13], sizes = [2, 16, 1], strides = [1, 1, 1]} : vector<2x16x16xbf16> to vector<2x16x1xbf16>
    %292 = arith.extf %291 : vector<2x16x1xbf16> to vector<2x16x1xf32>
    %293 = vector.extract_strided_slice %185 {offsets = [0, 13, 0], sizes = [2, 1, 128], strides = [1, 1, 1]} : vector<2x16x128xbf16> to vector<2x1x128xbf16>
    %294 = arith.extf %293 : vector<2x1x128xbf16> to vector<2x1x128xf32>
    %295 = vector.broadcast %292 : vector<2x16x1xf32> to vector<2x16x128xf32>
    %296 = vector.broadcast %294 : vector<2x1x128xf32> to vector<2x16x128xf32>
    %297 = arith.mulf %295, %296 : vector<2x16x128xf32>
    %298 = arith.addf %290, %297 : vector<2x16x128xf32>
    %299 = vector.extract_strided_slice %2 {offsets = [0, 0, 14], sizes = [2, 16, 1], strides = [1, 1, 1]} : vector<2x16x16xbf16> to vector<2x16x1xbf16>
    %300 = arith.extf %299 : vector<2x16x1xbf16> to vector<2x16x1xf32>
    %301 = vector.extract_strided_slice %185 {offsets = [0, 14, 0], sizes = [2, 1, 128], strides = [1, 1, 1]} : vector<2x16x128xbf16> to vector<2x1x128xbf16>
    %302 = arith.extf %301 : vector<2x1x128xbf16> to vector<2x1x128xf32>
    %303 = vector.broadcast %300 : vector<2x16x1xf32> to vector<2x16x128xf32>
    %304 = vector.broadcast %302 : vector<2x1x128xf32> to vector<2x16x128xf32>
    %305 = arith.mulf %303, %304 : vector<2x16x128xf32>
    %306 = arith.addf %298, %305 : vector<2x16x128xf32>
    %307 = vector.extract_strided_slice %2 {offsets = [0, 0, 15], sizes = [2, 16, 1], strides = [1, 1, 1]} : vector<2x16x16xbf16> to vector<2x16x1xbf16>
    %308 = arith.extf %307 : vector<2x16x1xbf16> to vector<2x16x1xf32>
    %309 = vector.extract_strided_slice %185 {offsets = [0, 15, 0], sizes = [2, 1, 128], strides = [1, 1, 1]} : vector<2x16x128xbf16> to vector<2x1x128xbf16>
    %310 = arith.extf %309 : vector<2x1x128xbf16> to vector<2x1x128xf32>
    %311 = vector.broadcast %308 : vector<2x16x1xf32> to vector<2x16x128xf32>
    %312 = vector.broadcast %310 : vector<2x1x128xf32> to vector<2x16x128xf32>
    %313 = arith.mulf %311, %312 : vector<2x16x128xf32>
    %314 = arith.addf %306, %313 : vector<2x16x128xf32>
    %315 = vector.shape_cast %314 : vector<2x16x128xf32> to vector<32x128xf32>
    %316 = arith.truncf %315 : vector<32x128xf32> to vector<32x128xbf16>
    %317 = tpu.concatenate %316, %184 in 1 : vector<32x128xbf16>, vector<32x128xbf16> -> vector<32x256xbf16>
    %c0_28 = arith.constant 0 : index
    %c0_29 = arith.constant 0 : index
    %318 = vector.load %arg5[%c0_28, %c0_29] : memref<256x384xbf16, #tpu.memory_space<vmem>>, vector<256x384xbf16>
    %cst_30 = arith.constant dense<0.000000e+00> : vector<32x384xf32>
    %319 = tpu.matmul %317, %318, %cst_30 {dimension_numbers = #tpu.dot_dimension_numbers<[1], [0], [0], [1], [0, 0, 1, 1], [], []>} : vector<32x256xbf16>, vector<256x384xbf16>, vector<32x384xf32> -> vector<32x384xf32>
    %320 = vector.extract_strided_slice %319 {offsets = [0, 0], sizes = [32, 128], strides = [1, 1]} : vector<32x384xf32> to vector<32x128xf32>
    %321 = vector.extract_strided_slice %319 {offsets = [0, 128], sizes = [32, 128], strides = [1, 1]} : vector<32x384xf32> to vector<32x128xf32>
    %322 = vector.extract_strided_slice %319 {offsets = [0, 256], sizes = [32, 128], strides = [1, 1]} : vector<32x384xf32> to vector<32x128xf32>
    %323 = arith.addf %320, %9 : vector<32x128xf32>
    %324 = arith.negf %323 : vector<32x128xf32>
    %325 = math.exp %324 : vector<32x128xf32>
    %cst_31 = arith.constant 1.000000e+00 : f32
    %326 = vector.broadcast %cst_31 : f32 to vector<32x128xf32>
    %327 = arith.addf %326, %325 : vector<32x128xf32>
    %328 = arith.divf %326, %327 : vector<32x128xf32>
    %329 = arith.addf %321, %12 : vector<32x128xf32>
    %330 = arith.negf %329 : vector<32x128xf32>
    %331 = math.exp %330 : vector<32x128xf32>
    %cst_32 = arith.constant 1.000000e+00 : f32
    %332 = vector.broadcast %cst_32 : f32 to vector<32x128xf32>
    %333 = arith.addf %332, %331 : vector<32x128xf32>
    %334 = arith.divf %332, %333 : vector<32x128xf32>
    %335 = arith.mulf %183, %334 : vector<32x128xf32>
    %336 = arith.truncf %335 : vector<32x128xf32> to vector<32x128xbf16>
    %c0_33 = arith.constant 0 : index
    %c0_34 = arith.constant 0 : index
    %337 = vector.load %arg6[%c0_33, %c0_34] : memref<128x128xbf16, #tpu.memory_space<vmem>>, vector<128x128xbf16>
    %cst_35 = arith.constant dense<0.000000e+00> : vector<32x128xf32>
    %338 = tpu.matmul %336, %337, %cst_35 {dimension_numbers = #tpu.dot_dimension_numbers<[1], [0], [0], [1], [0, 0, 1, 1], [], []>} : vector<32x128xbf16>, vector<128x128xbf16>, vector<32x128xf32> -> vector<32x128xf32>
    %339 = arith.addf %322, %338 : vector<32x128xf32>
    %340 = arith.addf %339, %15 : vector<32x128xf32>
    %341 = arith.mulf %6, %340 : vector<32x128xf32>
    %cst_36 = arith.constant 0.000000e+00 : f32
    %342 = vector.broadcast %cst_36 : f32 to vector<32x128xf32>
    %343 = arith.maximumf %341, %342 : vector<32x128xf32>
    %344 = arith.subf %343, %183 : vector<32x128xf32>
    %345 = arith.mulf %328, %344 : vector<32x128xf32>
    %346 = arith.addf %183, %345 : vector<32x128xf32>
    %347 = arith.truncf %346 : vector<32x128xf32> to vector<32x128xbf16>
    %c0_37 = arith.constant 0 : index
    %c0_38 = arith.constant 0 : index
    %348 = vector.load %arg10[%c0_37, %c0_38] : memref<128x256xbf16, #tpu.memory_space<vmem>>, vector<128x256xbf16>
    %cst_39 = arith.constant dense<0.000000e+00> : vector<32x256xf32>
    %349 = tpu.matmul %347, %348, %cst_39 {dimension_numbers = #tpu.dot_dimension_numbers<[1], [0], [0], [1], [0, 0, 1, 1], [], []>} : vector<32x128xbf16>, vector<128x256xbf16>, vector<32x256xf32> -> vector<32x256xf32>
    %c0_40 = arith.constant 0 : index
    %c0_41 = arith.constant 0 : index
    %350 = vector.load %arg11[%c0_40, %c0_41] : memref<1x256xf32, #tpu.memory_space<vmem>>, vector<1x256xf32>
    %351 = vector.broadcast %350 : vector<1x256xf32> to vector<32x256xf32>
    %352 = arith.addf %349, %351 : vector<32x256xf32>
    %353 = vector.extract_strided_slice %352 {offsets = [0, 0], sizes = [32, 128], strides = [1, 1]} : vector<32x256xf32> to vector<32x128xf32>
    %cst_42 = arith.constant 0.000000e+00 : f32
    %354 = vector.broadcast %cst_42 : f32 to vector<32x128xf32>
    %355 = arith.maximumf %353, %354 : vector<32x128xf32>
    %356 = vector.extract_strided_slice %352 {offsets = [0, 128], sizes = [32, 128], strides = [1, 1]} : vector<32x256xf32> to vector<32x128xf32>
    %357 = arith.negf %356 : vector<32x128xf32>
    %358 = math.exp %357 : vector<32x128xf32>
    %cst_43 = arith.constant 1.000000e+00 : f32
    %359 = vector.broadcast %cst_43 : f32 to vector<32x128xf32>
    %360 = arith.addf %359, %358 : vector<32x128xf32>
    %361 = arith.divf %359, %360 : vector<32x128xf32>
    %362 = arith.mulf %6, %361 : vector<32x128xf32>
    %363 = arith.mulf %362, %355 : vector<32x128xf32>
    %364 = vector.shape_cast %363 : vector<32x128xf32> to vector<2x16x128xf32>
    %cst_44 = arith.constant dense<0.000000e+00> : vector<2x1xf32>
    %365 = vector.multi_reduction <add>, %3, %cst_44 [1] : vector<2x16x1xf32> to vector<2x1xf32>
    %cst_45 = arith.constant 1.000000e+00 : f32
    %366 = vector.broadcast %cst_45 : f32 to vector<2x1xf32>
    %367 = arith.maximumf %365, %366 : vector<2x1xf32>
    %cst_46 = arith.constant 1.000000e+00 : f32
    %368 = vector.broadcast %cst_46 : f32 to vector<2x16x1xf32>
    %369 = arith.subf %3, %368 : vector<2x16x1xf32>
    %cst_47 = arith.constant 1.000000e+09 : f32
    %370 = vector.broadcast %cst_47 : f32 to vector<2x16x1xf32>
    %371 = arith.mulf %369, %370 : vector<2x16x1xf32>
    %cst_48 = arith.constant dense<0.000000e+00> : vector<2x128xf32>
    %372 = vector.multi_reduction <add>, %364, %cst_48 [1] : vector<2x16x128xf32> to vector<2x128xf32>
    %373 = vector.broadcast %367 : vector<2x1xf32> to vector<2x128xf32>
    %374 = arith.divf %372, %373 : vector<2x128xf32>
    %375 = vector.broadcast %371 : vector<2x16x1xf32> to vector<2x16x128xf32>
    %376 = arith.addf %364, %375 : vector<2x16x128xf32>
    %cst_49 = arith.constant dense<0xFF800000> : vector<2x128xf32>
    %377 = vector.multi_reduction <maximumf>, %376, %cst_49 [1] : vector<2x16x128xf32> to vector<2x128xf32>
    %378 = arith.addf %374, %377 : vector<2x128xf32>
    %379 = arith.truncf %378 : vector<2x128xf32> to vector<2x128xbf16>
    %c0_50 = arith.constant 0 : index
    %c0_51 = arith.constant 0 : index
    %380 = vector.load %arg12[%c0_50, %c0_51] : memref<128x128xbf16, #tpu.memory_space<vmem>>, vector<128x128xbf16>
    %cst_52 = arith.constant dense<0.000000e+00> : vector<2x128xf32>
    %381 = tpu.matmul %379, %380, %cst_52 {dimension_numbers = #tpu.dot_dimension_numbers<[1], [0], [0], [1], [0, 0, 1, 1], [], []>} : vector<2x128xbf16>, vector<128x128xbf16>, vector<2x128xf32> -> vector<2x128xf32>
    %c0_53 = arith.constant 0 : index
    %c0_54 = arith.constant 0 : index
    %382 = vector.load %arg13[%c0_53, %c0_54] : memref<1x128xf32, #tpu.memory_space<vmem>>, vector<1x128xf32>
    %383 = vector.broadcast %382 : vector<1x128xf32> to vector<2x128xf32>
    %384 = arith.addf %381, %383 : vector<2x128xf32>
    %385 = vector.shape_cast %384 : vector<2x128xf32> to vector<1x2x128xf32>
    %c0_55 = arith.constant 0 : index
    %c0_56 = arith.constant 0 : index
    %c0_57 = arith.constant 0 : index
    %386 = vector.load %arg14[%c0_55, %c0_56, %c0_57] : memref<1x2x128xf32, #tpu.memory_space<vmem>>, vector<1x2x128xf32>
    tpu.vector_store %arg14[%c0_55, %c0_56, %c0_57], %385 {strides = array<i32>} : memref<1x2x128xf32, #tpu.memory_space<vmem>>, vector<1x2x128xf32>,
    return
  }
  func.func @transform_0(%arg0: i32) -> (i32, i32, i32) {
    %c0_i32 = arith.constant 0 : i32
    %c0_i32_0 = arith.constant 0 : i32
    %c0_i32_1 = arith.constant 0 : i32
    return %arg0, %c0_i32, %c0_i32_0 : i32, i32, i32
  }
  func.func @transform_1(%arg0: i32) -> (i32, i32, i32) {
    %c0_i32 = arith.constant 0 : i32
    %c0_i32_0 = arith.constant 0 : i32
    %c0_i32_1 = arith.constant 0 : i32
    return %arg0, %c0_i32, %c0_i32_0 : i32, i32, i32
  }
  func.func @transform_2(%arg0: i32) -> (i32, i32, i32) {
    %c0_i32 = arith.constant 0 : i32
    %c0_i32_0 = arith.constant 0 : i32
    %c0_i32_1 = arith.constant 0 : i32
    return %arg0, %c0_i32, %c0_i32_0 : i32, i32, i32
  }
  func.func @transform_3(%arg0: i32) -> (i32, i32) {
    %c0_i32 = arith.constant 0 : i32
    %c0_i32_0 = arith.constant 0 : i32
    %c0_i32_1 = arith.constant 0 : i32
    return %c0_i32, %c0_i32_0 : i32, i32
  }
  func.func @transform_4(%arg0: i32) -> (i32, i32) {
    %c0_i32 = arith.constant 0 : i32
    %c0_i32_0 = arith.constant 0 : i32
    %c0_i32_1 = arith.constant 0 : i32
    return %c0_i32, %c0_i32_0 : i32, i32
  }
  func.func @transform_5(%arg0: i32) -> (i32, i32) {
    %c0_i32 = arith.constant 0 : i32
    %c0_i32_0 = arith.constant 0 : i32
    %c0_i32_1 = arith.constant 0 : i32
    return %c0_i32, %c0_i32_0 : i32, i32
  }
  func.func @transform_6(%arg0: i32) -> (i32, i32) {
    %c0_i32 = arith.constant 0 : i32
    %c0_i32_0 = arith.constant 0 : i32
    %c0_i32_1 = arith.constant 0 : i32
    return %c0_i32, %c0_i32_0 : i32, i32
  }
  func.func @transform_7(%arg0: i32) -> (i32, i32) {
    %c0_i32 = arith.constant 0 : i32
    %c0_i32_0 = arith.constant 0 : i32
    %c0_i32_1 = arith.constant 0 : i32
    return %c0_i32, %c0_i32_0 : i32, i32
  }
  func.func @transform_8(%arg0: i32) -> (i32, i32) {
    %c0_i32 = arith.constant 0 : i32
    %c0_i32_0 = arith.constant 0 : i32
    %c0_i32_1 = arith.constant 0 : i32
    return %c0_i32, %c0_i32_0 : i32, i32
  }
  func.func @transform_9(%arg0: i32) -> (i32, i32) {
    %c0_i32 = arith.constant 0 : i32
    %c0_i32_0 = arith.constant 0 : i32
    %c0_i32_1 = arith.constant 0 : i32
    return %c0_i32, %c0_i32_0 : i32, i32
  }
  func.func @transform_10(%arg0: i32) -> (i32, i32) {
    %c0_i32 = arith.constant 0 : i32
    %c0_i32_0 = arith.constant 0 : i32
    %c0_i32_1 = arith.constant 0 : i32
    return %c0_i32, %c0_i32_0 : i32, i32
  }
  func.func @transform_11(%arg0: i32) -> (i32, i32) {
    %c0_i32 = arith.constant 0 : i32
    %c0_i32_0 = arith.constant 0 : i32
    %c0_i32_1 = arith.constant 0 : i32
    return %c0_i32, %c0_i32_0 : i32, i32
  }
  func.func @transform_12(%arg0: i32) -> (i32, i32) {
    %c0_i32 = arith.constant 0 : i32
    %c0_i32_0 = arith.constant 0 : i32
    %c0_i32_1 = arith.constant 0 : i32
    return %c0_i32, %c0_i32_0 : i32, i32
  }
  func.func @transform_13(%arg0: i32) -> (i32, i32, i32) {
    %c0_i32 = arith.constant 0 : i32
    %c0_i32_0 = arith.constant 0 : i32
    %c0_i32_1 = arith.constant 0 : i32
    return %arg0, %c0_i32, %c0_i32_0 : i32, i32, i32
  }
}

module attributes {stable_mosaic.version = 11 : i64} {
  func.func @_gnn_kernel(%arg0: i32, %arg1: memref<2x16x128xbf16, #tpu.memory_space<vmem>>, %arg2: memref<2x16x16xbf16, #tpu.memory_space<vmem>>, %arg3: memref<2x16x1xf32, #tpu.memory_space<vmem>>, %arg4: memref<128x128xbf16, #tpu.memory_space<vmem>>, %arg5: memref<256x384xbf16, #tpu.memory_space<vmem>>, %arg6: memref<128x128xbf16, #tpu.memory_space<vmem>>, %arg7: memref<1x128xf32, #tpu.memory_space<vmem>>, %arg8: memref<1x128xf32, #tpu.memory_space<vmem>>, %arg9: memref<1x128xf32, #tpu.memory_space<vmem>>, %arg10: memref<128x256xbf16, #tpu.memory_space<vmem>>, %arg11: memref<1x256xf32, #tpu.memory_space<vmem>>, %arg12: memref<128x128xbf16, #tpu.memory_space<vmem>>, %arg13: memref<1x128xf32, #tpu.memory_space<vmem>>, %arg14: memref<1x2x128xf32, #tpu.memory_space<vmem>>) attributes {dimension_semantics = [#tpu.dimension_semantics<parallel>], iteration_bounds = array<i64: 1>, scalar_prefetch = 0 : i64, scratch_operands = 0 : i64, tpu.core_type = #tpu.core_type<tc>, window_params = [{transform_indices = @transform_0, window_bounds = array<i64: 2, 16, 128>}, {transform_indices = @transform_1, window_bounds = array<i64: 2, 16, 16>}, {transform_indices = @transform_2, window_bounds = array<i64: 2, 16, 1>}, {pipeline_mode = #tpu.pipeline_mode<synchronous>, transform_indices = @transform_3, window_bounds = array<i64: 128, 128>}, {pipeline_mode = #tpu.pipeline_mode<synchronous>, transform_indices = @transform_4, window_bounds = array<i64: 256, 384>}, {pipeline_mode = #tpu.pipeline_mode<synchronous>, transform_indices = @transform_5, window_bounds = array<i64: 128, 128>}, {pipeline_mode = #tpu.pipeline_mode<synchronous>, transform_indices = @transform_6, window_bounds = array<i64: 1, 128>}, {pipeline_mode = #tpu.pipeline_mode<synchronous>, transform_indices = @transform_7, window_bounds = array<i64: 1, 128>}, {pipeline_mode = #tpu.pipeline_mode<synchronous>, transform_indices = @transform_8, window_bounds = array<i64: 1, 128>}, {pipeline_mode = #tpu.pipeline_mode<synchronous>, transform_indices = @transform_9, window_bounds = array<i64: 128, 256>}, {pipeline_mode = #tpu.pipeline_mode<synchronous>, transform_indices = @transform_10, window_bounds = array<i64: 1, 256>}, {pipeline_mode = #tpu.pipeline_mode<synchronous>, transform_indices = @transform_11, window_bounds = array<i64: 128, 128>}, {pipeline_mode = #tpu.pipeline_mode<synchronous>, transform_indices = @transform_12, window_bounds = array<i64: 1, 128>}, {transform_indices = @transform_13, window_bounds = array<i64: 1, 2, 128>}]} {
    %c0 = arith.constant 0 : index
    %c0_0 = arith.constant 0 : index
    %c0_1 = arith.constant 0 : index
    %0 = vector.load %arg1[%c0, %c0_0, %c0_1] : memref<2x16x128xbf16, #tpu.memory_space<vmem>>, vector<2x16x128xbf16>
    %1 = vector.shape_cast %0 : vector<2x16x128xbf16> to vector<32x128xbf16>
    %c0_2 = arith.constant 0 : index
    %c0_3 = arith.constant 0 : index
    %c0_4 = arith.constant 0 : index
    %2 = vector.load %arg2[%c0_2, %c0_3, %c0_4] : memref<2x16x16xbf16, #tpu.memory_space<vmem>>, vector<2x16x16xbf16>
    %c0_5 = arith.constant 0 : index
    %c0_6 = arith.constant 0 : index
    %c0_7 = arith.constant 0 : index
    %3 = vector.load %arg3[%c0_5, %c0_6, %c0_7] : memref<2x16x1xf32, #tpu.memory_space<vmem>>, vector<2x16x1xf32>
    %4 = vector.shape_cast %3 : vector<2x16x1xf32> to vector<32x1xf32>
    %5 = vector.shape_cast %4 : vector<32x1xf32> to vector<32x1xf32>
    %6 = vector.broadcast %5 : vector<32x1xf32> to vector<32x128xf32>
    %c0_8 = arith.constant 0 : index
    %c0_9 = arith.constant 0 : index
    %7 = vector.load %arg7[%c0_8, %c0_9] : memref<1x128xf32, #tpu.memory_space<vmem>>, vector<1x128xf32>
    %8 = vector.shape_cast %7 : vector<1x128xf32> to vector<1x128xf32>
    %9 = vector.broadcast %8 : vector<1x128xf32> to vector<32x128xf32>
    %c0_10 = arith.constant 0 : index
    %c0_11 = arith.constant 0 : index
    %10 = vector.load %arg8[%c0_10, %c0_11] : memref<1x128xf32, #tpu.memory_space<vmem>>, vector<1x128xf32>
    %11 = vector.shape_cast %10 : vector<1x128xf32> to vector<1x128xf32>
    %12 = vector.broadcast %11 : vector<1x128xf32> to vector<32x128xf32>
    %c0_12 = arith.constant 0 : index
    %c0_13 = arith.constant 0 : index
    %13 = vector.load %arg9[%c0_12, %c0_13] : memref<1x128xf32, #tpu.memory_space<vmem>>, vector<1x128xf32>
    %14 = vector.shape_cast %13 : vector<1x128xf32> to vector<1x128xf32>
    %15 = vector.broadcast %14 : vector<1x128xf32> to vector<32x128xf32>
    %c0_14 = arith.constant 0 : index
    %c0_15 = arith.constant 0 : index
    %16 = vector.load %arg4[%c0_14, %c0_15] : memref<128x128xbf16, #tpu.memory_space<vmem>>, vector<128x128xbf16>
    %cst = arith.constant dense<0.000000e+00> : vector<32x128xf32>
    %17 = tpu.matmul %1, %16, %cst {dimension_numbers = #tpu.dot_dimension_numbers<[1], [0], [0], [1], [0, 0, 1, 1], [], []>} : vector<32x128xbf16>, vector<128x128xbf16>, vector<32x128xf32> -> vector<32x128xf32>
    %cst_16 = arith.constant 0.000000e+00 : f32
    %18 = vector.broadcast %cst_16 : f32 to vector<32x128xf32>
    %19 = arith.maximumf %17, %18 : vector<32x128xf32>
    %20 = arith.mulf %6, %19 : vector<32x128xf32>
    %c0_i32 = arith.constant 0 : i32
    %21 = arith.truncf %20 : vector<32x128xf32> to vector<32x128xbf16>
    %22 = vector.shape_cast %21 : vector<32x128xbf16> to vector<2x16x128xbf16>
    %cst_17 = arith.constant 0.000000e+00 : f32
    %23 = vector.broadcast %cst_17 : f32 to vector<2x16x128xf32>
    %24 = vector.extract_strided_slice %2 {offsets = [0, 0, 0], sizes = [2, 16, 1], strides = [1, 1, 1]} : vector<2x16x16xbf16> to vector<2x16x1xbf16>
    %25 = arith.extf %24 : vector<2x16x1xbf16> to vector<2x16x1xf32>
    %26 = vector.extract_strided_slice %22 {offsets = [0, 0, 0], sizes = [2, 1, 128], strides = [1, 1, 1]} : vector<2x16x128xbf16> to vector<2x1x128xbf16>
    %27 = arith.extf %26 : vector<2x1x128xbf16> to vector<2x1x128xf32>
    %28 = vector.broadcast %25 : vector<2x16x1xf32> to vector<2x16x128xf32>
    %29 = vector.broadcast %27 : vector<2x1x128xf32> to vector<2x16x128xf32>
    %30 = arith.mulf %28, %29 : vector<2x16x128xf32>
    %31 = arith.addf %23, %30 : vector<2x16x128xf32>
    %32 = vector.extract_strided_slice %2 {offsets = [0, 0, 1], sizes = [2, 16, 1], strides = [1, 1, 1]} : vector<2x16x16xbf16> to vector<2x16x1xbf16>
    %33 = arith.extf %32 : vector<2x16x1xbf16> to vector<2x16x1xf32>
    %34 = vector.extract_strided_slice %22 {offsets = [0, 1, 0], sizes = [2, 1, 128], strides = [1, 1, 1]} : vector<2x16x128xbf16> to vector<2x1x128xbf16>
    %35 = arith.extf %34 : vector<2x1x128xbf16> to vector<2x1x128xf32>
    %36 = vector.broadcast %33 : vector<2x16x1xf32> to vector<2x16x128xf32>
    %37 = vector.broadcast %35 : vector<2x1x128xf32> to vector<2x16x128xf32>
    %38 = arith.mulf %36, %37 : vector<2x16x128xf32>
    %39 = arith.addf %31, %38 : vector<2x16x128xf32>
    %40 = vector.extract_strided_slice %2 {offsets = [0, 0, 2], sizes = [2, 16, 1], strides = [1, 1, 1]} : vector<2x16x16xbf16> to vector<2x16x1xbf16>
    %41 = arith.extf %40 : vector<2x16x1xbf16> to vector<2x16x1xf32>
    %42 = vector.extract_strided_slice %22 {offsets = [0, 2, 0], sizes = [2, 1, 128], strides = [1, 1, 1]} : vector<2x16x128xbf16> to vector<2x1x128xbf16>
    %43 = arith.extf %42 : vector<2x1x128xbf16> to vector<2x1x128xf32>
    %44 = vector.broadcast %41 : vector<2x16x1xf32> to vector<2x16x128xf32>
    %45 = vector.broadcast %43 : vector<2x1x128xf32> to vector<2x16x128xf32>
    %46 = arith.mulf %44, %45 : vector<2x16x128xf32>
    %47 = arith.addf %39, %46 : vector<2x16x128xf32>
    %48 = vector.extract_strided_slice %2 {offsets = [0, 0, 3], sizes = [2, 16, 1], strides = [1, 1, 1]} : vector<2x16x16xbf16> to vector<2x16x1xbf16>
    %49 = arith.extf %48 : vector<2x16x1xbf16> to vector<2x16x1xf32>
    %50 = vector.extract_strided_slice %22 {offsets = [0, 3, 0], sizes = [2, 1, 128], strides = [1, 1, 1]} : vector<2x16x128xbf16> to vector<2x1x128xbf16>
    %51 = arith.extf %50 : vector<2x1x128xbf16> to vector<2x1x128xf32>
    %52 = vector.broadcast %49 : vector<2x16x1xf32> to vector<2x16x128xf32>
    %53 = vector.broadcast %51 : vector<2x1x128xf32> to vector<2x16x128xf32>
    %54 = arith.mulf %52, %53 : vector<2x16x128xf32>
    %55 = arith.addf %47, %54 : vector<2x16x128xf32>
    %56 = vector.extract_strided_slice %2 {offsets = [0, 0, 4], sizes = [2, 16, 1], strides = [1, 1, 1]} : vector<2x16x16xbf16> to vector<2x16x1xbf16>
    %57 = arith.extf %56 : vector<2x16x1xbf16> to vector<2x16x1xf32>
    %58 = vector.extract_strided_slice %22 {offsets = [0, 4, 0], sizes = [2, 1, 128], strides = [1, 1, 1]} : vector<2x16x128xbf16> to vector<2x1x128xbf16>
    %59 = arith.extf %58 : vector<2x1x128xbf16> to vector<2x1x128xf32>
    %60 = vector.broadcast %57 : vector<2x16x1xf32> to vector<2x16x128xf32>
    %61 = vector.broadcast %59 : vector<2x1x128xf32> to vector<2x16x128xf32>
    %62 = arith.mulf %60, %61 : vector<2x16x128xf32>
    %63 = arith.addf %55, %62 : vector<2x16x128xf32>
    %64 = vector.extract_strided_slice %2 {offsets = [0, 0, 5], sizes = [2, 16, 1], strides = [1, 1, 1]} : vector<2x16x16xbf16> to vector<2x16x1xbf16>
    %65 = arith.extf %64 : vector<2x16x1xbf16> to vector<2x16x1xf32>
    %66 = vector.extract_strided_slice %22 {offsets = [0, 5, 0], sizes = [2, 1, 128], strides = [1, 1, 1]} : vector<2x16x128xbf16> to vector<2x1x128xbf16>
    %67 = arith.extf %66 : vector<2x1x128xbf16> to vector<2x1x128xf32>
    %68 = vector.broadcast %65 : vector<2x16x1xf32> to vector<2x16x128xf32>
    %69 = vector.broadcast %67 : vector<2x1x128xf32> to vector<2x16x128xf32>
    %70 = arith.mulf %68, %69 : vector<2x16x128xf32>
    %71 = arith.addf %63, %70 : vector<2x16x128xf32>
    %72 = vector.extract_strided_slice %2 {offsets = [0, 0, 6], sizes = [2, 16, 1], strides = [1, 1, 1]} : vector<2x16x16xbf16> to vector<2x16x1xbf16>
    %73 = arith.extf %72 : vector<2x16x1xbf16> to vector<2x16x1xf32>
    %74 = vector.extract_strided_slice %22 {offsets = [0, 6, 0], sizes = [2, 1, 128], strides = [1, 1, 1]} : vector<2x16x128xbf16> to vector<2x1x128xbf16>
    %75 = arith.extf %74 : vector<2x1x128xbf16> to vector<2x1x128xf32>
    %76 = vector.broadcast %73 : vector<2x16x1xf32> to vector<2x16x128xf32>
    %77 = vector.broadcast %75 : vector<2x1x128xf32> to vector<2x16x128xf32>
    %78 = arith.mulf %76, %77 : vector<2x16x128xf32>
    %79 = arith.addf %71, %78 : vector<2x16x128xf32>
    %80 = vector.extract_strided_slice %2 {offsets = [0, 0, 7], sizes = [2, 16, 1], strides = [1, 1, 1]} : vector<2x16x16xbf16> to vector<2x16x1xbf16>
    %81 = arith.extf %80 : vector<2x16x1xbf16> to vector<2x16x1xf32>
    %82 = vector.extract_strided_slice %22 {offsets = [0, 7, 0], sizes = [2, 1, 128], strides = [1, 1, 1]} : vector<2x16x128xbf16> to vector<2x1x128xbf16>
    %83 = arith.extf %82 : vector<2x1x128xbf16> to vector<2x1x128xf32>
    %84 = vector.broadcast %81 : vector<2x16x1xf32> to vector<2x16x128xf32>
    %85 = vector.broadcast %83 : vector<2x1x128xf32> to vector<2x16x128xf32>
    %86 = arith.mulf %84, %85 : vector<2x16x128xf32>
    %87 = arith.addf %79, %86 : vector<2x16x128xf32>
    %88 = vector.extract_strided_slice %2 {offsets = [0, 0, 8], sizes = [2, 16, 1], strides = [1, 1, 1]} : vector<2x16x16xbf16> to vector<2x16x1xbf16>
    %89 = arith.extf %88 : vector<2x16x1xbf16> to vector<2x16x1xf32>
    %90 = vector.extract_strided_slice %22 {offsets = [0, 8, 0], sizes = [2, 1, 128], strides = [1, 1, 1]} : vector<2x16x128xbf16> to vector<2x1x128xbf16>
    %91 = arith.extf %90 : vector<2x1x128xbf16> to vector<2x1x128xf32>
    %92 = vector.broadcast %89 : vector<2x16x1xf32> to vector<2x16x128xf32>
    %93 = vector.broadcast %91 : vector<2x1x128xf32> to vector<2x16x128xf32>
    %94 = arith.mulf %92, %93 : vector<2x16x128xf32>
    %95 = arith.addf %87, %94 : vector<2x16x128xf32>
    %96 = vector.extract_strided_slice %2 {offsets = [0, 0, 9], sizes = [2, 16, 1], strides = [1, 1, 1]} : vector<2x16x16xbf16> to vector<2x16x1xbf16>
    %97 = arith.extf %96 : vector<2x16x1xbf16> to vector<2x16x1xf32>
    %98 = vector.extract_strided_slice %22 {offsets = [0, 9, 0], sizes = [2, 1, 128], strides = [1, 1, 1]} : vector<2x16x128xbf16> to vector<2x1x128xbf16>
    %99 = arith.extf %98 : vector<2x1x128xbf16> to vector<2x1x128xf32>
    %100 = vector.broadcast %97 : vector<2x16x1xf32> to vector<2x16x128xf32>
    %101 = vector.broadcast %99 : vector<2x1x128xf32> to vector<2x16x128xf32>
    %102 = arith.mulf %100, %101 : vector<2x16x128xf32>
    %103 = arith.addf %95, %102 : vector<2x16x128xf32>
    %104 = vector.extract_strided_slice %2 {offsets = [0, 0, 10], sizes = [2, 16, 1], strides = [1, 1, 1]} : vector<2x16x16xbf16> to vector<2x16x1xbf16>
    %105 = arith.extf %104 : vector<2x16x1xbf16> to vector<2x16x1xf32>
    %106 = vector.extract_strided_slice %22 {offsets = [0, 10, 0], sizes = [2, 1, 128], strides = [1, 1, 1]} : vector<2x16x128xbf16> to vector<2x1x128xbf16>
    %107 = arith.extf %106 : vector<2x1x128xbf16> to vector<2x1x128xf32>
    %108 = vector.broadcast %105 : vector<2x16x1xf32> to vector<2x16x128xf32>
    %109 = vector.broadcast %107 : vector<2x1x128xf32> to vector<2x16x128xf32>
    %110 = arith.mulf %108, %109 : vector<2x16x128xf32>
    %111 = arith.addf %103, %110 : vector<2x16x128xf32>
    %112 = vector.extract_strided_slice %2 {offsets = [0, 0, 11], sizes = [2, 16, 1], strides = [1, 1, 1]} : vector<2x16x16xbf16> to vector<2x16x1xbf16>
    %113 = arith.extf %112 : vector<2x16x1xbf16> to vector<2x16x1xf32>
    %114 = vector.extract_strided_slice %22 {offsets = [0, 11, 0], sizes = [2, 1, 128], strides = [1, 1, 1]} : vector<2x16x128xbf16> to vector<2x1x128xbf16>
    %115 = arith.extf %114 : vector<2x1x128xbf16> to vector<2x1x128xf32>
    %116 = vector.broadcast %113 : vector<2x16x1xf32> to vector<2x16x128xf32>
    %117 = vector.broadcast %115 : vector<2x1x128xf32> to vector<2x16x128xf32>
    %118 = arith.mulf %116, %117 : vector<2x16x128xf32>
    %119 = arith.addf %111, %118 : vector<2x16x128xf32>
    %120 = vector.extract_strided_slice %2 {offsets = [0, 0, 12], sizes = [2, 16, 1], strides = [1, 1, 1]} : vector<2x16x16xbf16> to vector<2x16x1xbf16>
    %121 = arith.extf %120 : vector<2x16x1xbf16> to vector<2x16x1xf32>
    %122 = vector.extract_strided_slice %22 {offsets = [0, 12, 0], sizes = [2, 1, 128], strides = [1, 1, 1]} : vector<2x16x128xbf16> to vector<2x1x128xbf16>
    %123 = arith.extf %122 : vector<2x1x128xbf16> to vector<2x1x128xf32>
    %124 = vector.broadcast %121 : vector<2x16x1xf32> to vector<2x16x128xf32>
    %125 = vector.broadcast %123 : vector<2x1x128xf32> to vector<2x16x128xf32>
    %126 = arith.mulf %124, %125 : vector<2x16x128xf32>
    %127 = arith.addf %119, %126 : vector<2x16x128xf32>
    %128 = vector.extract_strided_slice %2 {offsets = [0, 0, 13], sizes = [2, 16, 1], strides = [1, 1, 1]} : vector<2x16x16xbf16> to vector<2x16x1xbf16>
    %129 = arith.extf %128 : vector<2x16x1xbf16> to vector<2x16x1xf32>
    %130 = vector.extract_strided_slice %22 {offsets = [0, 13, 0], sizes = [2, 1, 128], strides = [1, 1, 1]} : vector<2x16x128xbf16> to vector<2x1x128xbf16>
    %131 = arith.extf %130 : vector<2x1x128xbf16> to vector<2x1x128xf32>
    %132 = vector.broadcast %129 : vector<2x16x1xf32> to vector<2x16x128xf32>
    %133 = vector.broadcast %131 : vector<2x1x128xf32> to vector<2x16x128xf32>
    %134 = arith.mulf %132, %133 : vector<2x16x128xf32>
    %135 = arith.addf %127, %134 : vector<2x16x128xf32>
    %136 = vector.extract_strided_slice %2 {offsets = [0, 0, 14], sizes = [2, 16, 1], strides = [1, 1, 1]} : vector<2x16x16xbf16> to vector<2x16x1xbf16>
    %137 = arith.extf %136 : vector<2x16x1xbf16> to vector<2x16x1xf32>
    %138 = vector.extract_strided_slice %22 {offsets = [0, 14, 0], sizes = [2, 1, 128], strides = [1, 1, 1]} : vector<2x16x128xbf16> to vector<2x1x128xbf16>
    %139 = arith.extf %138 : vector<2x1x128xbf16> to vector<2x1x128xf32>
    %140 = vector.broadcast %137 : vector<2x16x1xf32> to vector<2x16x128xf32>
    %141 = vector.broadcast %139 : vector<2x1x128xf32> to vector<2x16x128xf32>
    %142 = arith.mulf %140, %141 : vector<2x16x128xf32>
    %143 = arith.addf %135, %142 : vector<2x16x128xf32>
    %144 = vector.extract_strided_slice %2 {offsets = [0, 0, 15], sizes = [2, 16, 1], strides = [1, 1, 1]} : vector<2x16x16xbf16> to vector<2x16x1xbf16>
    %145 = arith.extf %144 : vector<2x16x1xbf16> to vector<2x16x1xf32>
    %146 = vector.extract_strided_slice %22 {offsets = [0, 15, 0], sizes = [2, 1, 128], strides = [1, 1, 1]} : vector<2x16x128xbf16> to vector<2x1x128xbf16>
    %147 = arith.extf %146 : vector<2x1x128xbf16> to vector<2x1x128xf32>
    %148 = vector.broadcast %145 : vector<2x16x1xf32> to vector<2x16x128xf32>
    %149 = vector.broadcast %147 : vector<2x1x128xf32> to vector<2x16x128xf32>
    %150 = arith.mulf %148, %149 : vector<2x16x128xf32>
    %151 = arith.addf %143, %150 : vector<2x16x128xf32>
    %152 = vector.shape_cast %151 : vector<2x16x128xf32> to vector<32x128xf32>
    %153 = arith.truncf %152 : vector<32x128xf32> to vector<32x128xbf16>
    %154 = tpu.concatenate %153, %21 in 1 : vector<32x128xbf16>, vector<32x128xbf16> -> vector<32x256xbf16>
    %c0_18 = arith.constant 0 : index
    %c0_19 = arith.constant 0 : index
    %155 = vector.load %arg5[%c0_18, %c0_19] : memref<256x384xbf16, #tpu.memory_space<vmem>>, vector<256x384xbf16>
    %cst_20 = arith.constant dense<0.000000e+00> : vector<32x384xf32>
    %156 = tpu.matmul %154, %155, %cst_20 {dimension_numbers = #tpu.dot_dimension_numbers<[1], [0], [0], [1], [0, 0, 1, 1], [], []>} : vector<32x256xbf16>, vector<256x384xbf16>, vector<32x384xf32> -> vector<32x384xf32>
    %157 = vector.extract_strided_slice %156 {offsets = [0, 0], sizes = [32, 128], strides = [1, 1]} : vector<32x384xf32> to vector<32x128xf32>
    %158 = vector.extract_strided_slice %156 {offsets = [0, 128], sizes = [32, 128], strides = [1, 1]} : vector<32x384xf32> to vector<32x128xf32>
    %159 = vector.extract_strided_slice %156 {offsets = [0, 256], sizes = [32, 128], strides = [1, 1]} : vector<32x384xf32> to vector<32x128xf32>
    %160 = arith.addf %157, %9 : vector<32x128xf32>
    %161 = arith.negf %160 : vector<32x128xf32>
    %162 = math.exp %161 : vector<32x128xf32>
    %cst_21 = arith.constant 1.000000e+00 : f32
    %163 = vector.broadcast %cst_21 : f32 to vector<32x128xf32>
    %164 = arith.addf %163, %162 : vector<32x128xf32>
    %165 = arith.divf %163, %164 : vector<32x128xf32>
    %166 = arith.addf %158, %12 : vector<32x128xf32>
    %167 = arith.negf %166 : vector<32x128xf32>
    %168 = math.exp %167 : vector<32x128xf32>
    %cst_22 = arith.constant 1.000000e+00 : f32
    %169 = vector.broadcast %cst_22 : f32 to vector<32x128xf32>
    %170 = arith.addf %169, %168 : vector<32x128xf32>
    %171 = arith.divf %169, %170 : vector<32x128xf32>
    %172 = arith.mulf %20, %171 : vector<32x128xf32>
    %173 = arith.truncf %172 : vector<32x128xf32> to vector<32x128xbf16>
    %c0_23 = arith.constant 0 : index
    %c0_24 = arith.constant 0 : index
    %174 = vector.load %arg6[%c0_23, %c0_24] : memref<128x128xbf16, #tpu.memory_space<vmem>>, vector<128x128xbf16>
    %cst_25 = arith.constant dense<0.000000e+00> : vector<32x128xf32>
    %175 = tpu.matmul %173, %174, %cst_25 {dimension_numbers = #tpu.dot_dimension_numbers<[1], [0], [0], [1], [0, 0, 1, 1], [], []>} : vector<32x128xbf16>, vector<128x128xbf16>, vector<32x128xf32> -> vector<32x128xf32>
    %176 = arith.addf %159, %175 : vector<32x128xf32>
    %177 = arith.addf %176, %15 : vector<32x128xf32>
    %178 = arith.mulf %6, %177 : vector<32x128xf32>
    %cst_26 = arith.constant 0.000000e+00 : f32
    %179 = vector.broadcast %cst_26 : f32 to vector<32x128xf32>
    %180 = arith.maximumf %178, %179 : vector<32x128xf32>
    %181 = arith.subf %180, %20 : vector<32x128xf32>
    %182 = arith.mulf %165, %181 : vector<32x128xf32>
    %183 = arith.addf %20, %182 : vector<32x128xf32>
    %c1_i32 = arith.constant 1 : i32
    %184 = arith.truncf %183 : vector<32x128xf32> to vector<32x128xbf16>
    %185 = vector.shape_cast %184 : vector<32x128xbf16> to vector<2x16x128xbf16>
    %cst_27 = arith.constant 0.000000e+00 : f32
    %186 = vector.broadcast %cst_27 : f32 to vector<2x16x128xf32>
    %187 = vector.extract_strided_slice %2 {offsets = [0, 0, 0], sizes = [2, 16, 1], strides = [1, 1, 1]} : vector<2x16x16xbf16> to vector<2x16x1xbf16>
    %188 = arith.extf %187 : vector<2x16x1xbf16> to vector<2x16x1xf32>
    %189 = vector.extract_strided_slice %185 {offsets = [0, 0, 0], sizes = [2, 1, 128], strides = [1, 1, 1]} : vector<2x16x128xbf16> to vector<2x1x128xbf16>
    %190 = arith.extf %189 : vector<2x1x128xbf16> to vector<2x1x128xf32>
    %191 = vector.broadcast %188 : vector<2x16x1xf32> to vector<2x16x128xf32>
    %192 = vector.broadcast %190 : vector<2x1x128xf32> to vector<2x16x128xf32>
    %193 = arith.mulf %191, %192 : vector<2x16x128xf32>
    %194 = arith.addf %186, %193 : vector<2x16x128xf32>
    %195 = vector.extract_strided_slice %2 {offsets = [0, 0, 1], sizes = [2, 16, 1], strides = [1, 1, 1]} : vector<2x16x16xbf16> to vector<2x16x1xbf16>
    %196 = arith.extf %195 : vector<2x16x1xbf16> to vector<2x16x1xf32>
    %197 = vector.extract_strided_slice %185 {offsets = [0, 1, 0], sizes = [2, 1, 128], strides = [1, 1, 1]} : vector<2x16x128xbf16> to vector<2x1x128xbf16>
    %198 = arith.extf %197 : vector<2x1x128xbf16> to vector<2x1x128xf32>
    %199 = vector.broadcast %196 : vector<2x16x1xf32> to vector<2x16x128xf32>
    %200 = vector.broadcast %198 : vector<2x1x128xf32> to vector<2x16x128xf32>
    %201 = arith.mulf %199, %200 : vector<2x16x128xf32>
    %202 = arith.addf %194, %201 : vector<2x16x128xf32>
    %203 = vector.extract_strided_slice %2 {offsets = [0, 0, 2], sizes = [2, 16, 1], strides = [1, 1, 1]} : vector<2x16x16xbf16> to vector<2x16x1xbf16>
    %204 = arith.extf %203 : vector<2x16x1xbf16> to vector<2x16x1xf32>
    %205 = vector.extract_strided_slice %185 {offsets = [0, 2, 0], sizes = [2, 1, 128], strides = [1, 1, 1]} : vector<2x16x128xbf16> to vector<2x1x128xbf16>
    %206 = arith.extf %205 : vector<2x1x128xbf16> to vector<2x1x128xf32>
    %207 = vector.broadcast %204 : vector<2x16x1xf32> to vector<2x16x128xf32>
    %208 = vector.broadcast %206 : vector<2x1x128xf32> to vector<2x16x128xf32>
    %209 = arith.mulf %207, %208 : vector<2x16x128xf32>
    %210 = arith.addf %202, %209 : vector<2x16x128xf32>
    %211 = vector.extract_strided_slice %2 {offsets = [0, 0, 3], sizes = [2, 16, 1], strides = [1, 1, 1]} : vector<2x16x16xbf16> to vector<2x16x1xbf16>
    %212 = arith.extf %211 : vector<2x16x1xbf16> to vector<2x16x1xf32>
    %213 = vector.extract_strided_slice %185 {offsets = [0, 3, 0], sizes = [2, 1, 128], strides = [1, 1, 1]} : vector<2x16x128xbf16> to vector<2x1x128xbf16>
    %214 = arith.extf %213 : vector<2x1x128xbf16> to vector<2x1x128xf32>
    %215 = vector.broadcast %212 : vector<2x16x1xf32> to vector<2x16x128xf32>
    %216 = vector.broadcast %214 : vector<2x1x128xf32> to vector<2x16x128xf32>
    %217 = arith.mulf %215, %216 : vector<2x16x128xf32>
    %218 = arith.addf %210, %217 : vector<2x16x128xf32>
    %219 = vector.extract_strided_slice %2 {offsets = [0, 0, 4], sizes = [2, 16, 1], strides = [1, 1, 1]} : vector<2x16x16xbf16> to vector<2x16x1xbf16>
    %220 = arith.extf %219 : vector<2x16x1xbf16> to vector<2x16x1xf32>
    %221 = vector.extract_strided_slice %185 {offsets = [0, 4, 0], sizes = [2, 1, 128], strides = [1, 1, 1]} : vector<2x16x128xbf16> to vector<2x1x128xbf16>
    %222 = arith.extf %221 : vector<2x1x128xbf16> to vector<2x1x128xf32>
    %223 = vector.broadcast %220 : vector<2x16x1xf32> to vector<2x16x128xf32>
    %224 = vector.broadcast %222 : vector<2x1x128xf32> to vector<2x16x128xf32>
    %225 = arith.mulf %223, %224 : vector<2x16x128xf32>
    %226 = arith.addf %218, %225 : vector<2x16x128xf32>
    %227 = vector.extract_strided_slice %2 {offsets = [0, 0, 5], sizes = [2, 16, 1], strides = [1, 1, 1]} : vector<2x16x16xbf16> to vector<2x16x1xbf16>
    %228 = arith.extf %227 : vector<2x16x1xbf16> to vector<2x16x1xf32>
    %229 = vector.extract_strided_slice %185 {offsets = [0, 5, 0], sizes = [2, 1, 128], strides = [1, 1, 1]} : vector<2x16x128xbf16> to vector<2x1x128xbf16>
    %230 = arith.extf %229 : vector<2x1x128xbf16> to vector<2x1x128xf32>
    %231 = vector.broadcast %228 : vector<2x16x1xf32> to vector<2x16x128xf32>
    %232 = vector.broadcast %230 : vector<2x1x128xf32> to vector<2x16x128xf32>
    %233 = arith.mulf %231, %232 : vector<2x16x128xf32>
    %234 = arith.addf %226, %233 : vector<2x16x128xf32>
    %235 = vector.extract_strided_slice %2 {offsets = [0, 0, 6], sizes = [2, 16, 1], strides = [1, 1, 1]} : vector<2x16x16xbf16> to vector<2x16x1xbf16>
    %236 = arith.extf %235 : vector<2x16x1xbf16> to vector<2x16x1xf32>
    %237 = vector.extract_strided_slice %185 {offsets = [0, 6, 0], sizes = [2, 1, 128], strides = [1, 1, 1]} : vector<2x16x128xbf16> to vector<2x1x128xbf16>
    %238 = arith.extf %237 : vector<2x1x128xbf16> to vector<2x1x128xf32>
    %239 = vector.broadcast %236 : vector<2x16x1xf32> to vector<2x16x128xf32>
    %240 = vector.broadcast %238 : vector<2x1x128xf32> to vector<2x16x128xf32>
    %241 = arith.mulf %239, %240 : vector<2x16x128xf32>
    %242 = arith.addf %234, %241 : vector<2x16x128xf32>
    %243 = vector.extract_strided_slice %2 {offsets = [0, 0, 7], sizes = [2, 16, 1], strides = [1, 1, 1]} : vector<2x16x16xbf16> to vector<2x16x1xbf16>
    %244 = arith.extf %243 : vector<2x16x1xbf16> to vector<2x16x1xf32>
    %245 = vector.extract_strided_slice %185 {offsets = [0, 7, 0], sizes = [2, 1, 128], strides = [1, 1, 1]} : vector<2x16x128xbf16> to vector<2x1x128xbf16>
    %246 = arith.extf %245 : vector<2x1x128xbf16> to vector<2x1x128xf32>
    %247 = vector.broadcast %244 : vector<2x16x1xf32> to vector<2x16x128xf32>
    %248 = vector.broadcast %246 : vector<2x1x128xf32> to vector<2x16x128xf32>
    %249 = arith.mulf %247, %248 : vector<2x16x128xf32>
    %250 = arith.addf %242, %249 : vector<2x16x128xf32>
    %251 = vector.extract_strided_slice %2 {offsets = [0, 0, 8], sizes = [2, 16, 1], strides = [1, 1, 1]} : vector<2x16x16xbf16> to vector<2x16x1xbf16>
    %252 = arith.extf %251 : vector<2x16x1xbf16> to vector<2x16x1xf32>
    %253 = vector.extract_strided_slice %185 {offsets = [0, 8, 0], sizes = [2, 1, 128], strides = [1, 1, 1]} : vector<2x16x128xbf16> to vector<2x1x128xbf16>
    %254 = arith.extf %253 : vector<2x1x128xbf16> to vector<2x1x128xf32>
    %255 = vector.broadcast %252 : vector<2x16x1xf32> to vector<2x16x128xf32>
    %256 = vector.broadcast %254 : vector<2x1x128xf32> to vector<2x16x128xf32>
    %257 = arith.mulf %255, %256 : vector<2x16x128xf32>
    %258 = arith.addf %250, %257 : vector<2x16x128xf32>
    %259 = vector.extract_strided_slice %2 {offsets = [0, 0, 9], sizes = [2, 16, 1], strides = [1, 1, 1]} : vector<2x16x16xbf16> to vector<2x16x1xbf16>
    %260 = arith.extf %259 : vector<2x16x1xbf16> to vector<2x16x1xf32>
    %261 = vector.extract_strided_slice %185 {offsets = [0, 9, 0], sizes = [2, 1, 128], strides = [1, 1, 1]} : vector<2x16x128xbf16> to vector<2x1x128xbf16>
    %262 = arith.extf %261 : vector<2x1x128xbf16> to vector<2x1x128xf32>
    %263 = vector.broadcast %260 : vector<2x16x1xf32> to vector<2x16x128xf32>
    %264 = vector.broadcast %262 : vector<2x1x128xf32> to vector<2x16x128xf32>
    %265 = arith.mulf %263, %264 : vector<2x16x128xf32>
    %266 = arith.addf %258, %265 : vector<2x16x128xf32>
    %267 = vector.extract_strided_slice %2 {offsets = [0, 0, 10], sizes = [2, 16, 1], strides = [1, 1, 1]} : vector<2x16x16xbf16> to vector<2x16x1xbf16>
    %268 = arith.extf %267 : vector<2x16x1xbf16> to vector<2x16x1xf32>
    %269 = vector.extract_strided_slice %185 {offsets = [0, 10, 0], sizes = [2, 1, 128], strides = [1, 1, 1]} : vector<2x16x128xbf16> to vector<2x1x128xbf16>
    %270 = arith.extf %269 : vector<2x1x128xbf16> to vector<2x1x128xf32>
    %271 = vector.broadcast %268 : vector<2x16x1xf32> to vector<2x16x128xf32>
    %272 = vector.broadcast %270 : vector<2x1x128xf32> to vector<2x16x128xf32>
    %273 = arith.mulf %271, %272 : vector<2x16x128xf32>
    %274 = arith.addf %266, %273 : vector<2x16x128xf32>
    %275 = vector.extract_strided_slice %2 {offsets = [0, 0, 11], sizes = [2, 16, 1], strides = [1, 1, 1]} : vector<2x16x16xbf16> to vector<2x16x1xbf16>
    %276 = arith.extf %275 : vector<2x16x1xbf16> to vector<2x16x1xf32>
    %277 = vector.extract_strided_slice %185 {offsets = [0, 11, 0], sizes = [2, 1, 128], strides = [1, 1, 1]} : vector<2x16x128xbf16> to vector<2x1x128xbf16>
    %278 = arith.extf %277 : vector<2x1x128xbf16> to vector<2x1x128xf32>
    %279 = vector.broadcast %276 : vector<2x16x1xf32> to vector<2x16x128xf32>
    %280 = vector.broadcast %278 : vector<2x1x128xf32> to vector<2x16x128xf32>
    %281 = arith.mulf %279, %280 : vector<2x16x128xf32>
    %282 = arith.addf %274, %281 : vector<2x16x128xf32>
    %283 = vector.extract_strided_slice %2 {offsets = [0, 0, 12], sizes = [2, 16, 1], strides = [1, 1, 1]} : vector<2x16x16xbf16> to vector<2x16x1xbf16>
    %284 = arith.extf %283 : vector<2x16x1xbf16> to vector<2x16x1xf32>
    %285 = vector.extract_strided_slice %185 {offsets = [0, 12, 0], sizes = [2, 1, 128], strides = [1, 1, 1]} : vector<2x16x128xbf16> to vector<2x1x128xbf16>
    %286 = arith.extf %285 : vector<2x1x128xbf16> to vector<2x1x128xf32>
    %287 = vector.broadcast %284 : vector<2x16x1xf32> to vector<2x16x128xf32>
    %288 = vector.broadcast %286 : vector<2x1x128xf32> to vector<2x16x128xf32>
    %289 = arith.mulf %287, %288 : vector<2x16x128xf32>
    %290 = arith.addf %282, %289 : vector<2x16x128xf32>
    %291 = vector.extract_strided_slice %2 {offsets = [0, 0, 13], sizes = [2, 16, 1], strides = [1, 1, 1]} : vector<2x16x16xbf16> to vector<2x16x1xbf16>
    %292 = arith.extf %291 : vector<2x16x1xbf16> to vector<2x16x1xf32>
    %293 = vector.extract_strided_slice %185 {offsets = [0, 13, 0], sizes = [2, 1, 128], strides = [1, 1, 1]} : vector<2x16x128xbf16> to vector<2x1x128xbf16>
    %294 = arith.extf %293 : vector<2x1x128xbf16> to vector<2x1x128xf32>
    %295 = vector.broadcast %292 : vector<2x16x1xf32> to vector<2x16x128xf32>
    %296 = vector.broadcast %294 : vector<2x1x128xf32> to vector<2x16x128xf32>
    %297 = arith.mulf %295, %296 : vector<2x16x128xf32>
    %298 = arith.addf %290, %297 : vector<2x16x128xf32>
    %299 = vector.extract_strided_slice %2 {offsets = [0, 0, 14], sizes = [2, 16, 1], strides = [1, 1, 1]} : vector<2x16x16xbf16> to vector<2x16x1xbf16>
    %300 = arith.extf %299 : vector<2x16x1xbf16> to vector<2x16x1xf32>
    %301 = vector.extract_strided_slice %185 {offsets = [0, 14, 0], sizes = [2, 1, 128], strides = [1, 1, 1]} : vector<2x16x128xbf16> to vector<2x1x128xbf16>
    %302 = arith.extf %301 : vector<2x1x128xbf16> to vector<2x1x128xf32>
    %303 = vector.broadcast %300 : vector<2x16x1xf32> to vector<2x16x128xf32>
    %304 = vector.broadcast %302 : vector<2x1x128xf32> to vector<2x16x128xf32>
    %305 = arith.mulf %303, %304 : vector<2x16x128xf32>
    %306 = arith.addf %298, %305 : vector<2x16x128xf32>
    %307 = vector.extract_strided_slice %2 {offsets = [0, 0, 15], sizes = [2, 16, 1], strides = [1, 1, 1]} : vector<2x16x16xbf16> to vector<2x16x1xbf16>
    %308 = arith.extf %307 : vector<2x16x1xbf16> to vector<2x16x1xf32>
    %309 = vector.extract_strided_slice %185 {offsets = [0, 15, 0], sizes = [2, 1, 128], strides = [1, 1, 1]} : vector<2x16x128xbf16> to vector<2x1x128xbf16>
    %310 = arith.extf %309 : vector<2x1x128xbf16> to vector<2x1x128xf32>
    %311 = vector.broadcast %308 : vector<2x16x1xf32> to vector<2x16x128xf32>
    %312 = vector.broadcast %310 : vector<2x1x128xf32> to vector<2x16x128xf32>
    %313 = arith.mulf %311, %312 : vector<2x16x128xf32>
    %314 = arith.addf %306, %313 : vector<2x16x128xf32>
    %315 = vector.shape_cast %314 : vector<2x16x128xf32> to vector<32x128xf32>
    %316 = arith.truncf %315 : vector<32x128xf32> to vector<32x128xbf16>
    %317 = tpu.concatenate %316, %184 in 1 : vector<32x128xbf16>, vector<32x128xbf16> -> vector<32x256xbf16>
    %c0_28 = arith.constant 0 : index
    %c0_29 = arith.constant 0 : index
    %318 = vector.load %arg5[%c0_28, %c0_29] : memref<256x384xbf16, #tpu.memory_space<vmem>>, vector<256x384xbf16>
    %cst_30 = arith.constant dense<0.000000e+00> : vector<32x384xf32>
    %319 = tpu.matmul %317, %318, %cst_30 {dimension_numbers = #tpu.dot_dimension_numbers<[1], [0], [0], [1], [0, 0, 1, 1], [], []>} : vector<32x256xbf16>, vector<256x384xbf16>, vector<32x384xf32> -> vector<32x384xf32>
    %320 = vector.extract_strided_slice %319 {offsets = [0, 0], sizes = [32, 128], strides = [1, 1]} : vector<32x384xf32> to vector<32x128xf32>
    %321 = vector.extract_strided_slice %319 {offsets = [0, 128], sizes = [32, 128], strides = [1, 1]} : vector<32x384xf32> to vector<32x128xf32>
    %322 = vector.extract_strided_slice %319 {offsets = [0, 256], sizes = [32, 128], strides = [1, 1]} : vector<32x384xf32> to vector<32x128xf32>
    %323 = arith.addf %320, %9 : vector<32x128xf32>
    %324 = arith.negf %323 : vector<32x128xf32>
    %325 = math.exp %324 : vector<32x128xf32>
    %cst_31 = arith.constant 1.000000e+00 : f32
    %326 = vector.broadcast %cst_31 : f32 to vector<32x128xf32>
    %327 = arith.addf %326, %325 : vector<32x128xf32>
    %328 = arith.divf %326, %327 : vector<32x128xf32>
    %329 = arith.addf %321, %12 : vector<32x128xf32>
    %330 = arith.negf %329 : vector<32x128xf32>
    %331 = math.exp %330 : vector<32x128xf32>
    %cst_32 = arith.constant 1.000000e+00 : f32
    %332 = vector.broadcast %cst_32 : f32 to vector<32x128xf32>
    %333 = arith.addf %332, %331 : vector<32x128xf32>
    %334 = arith.divf %332, %333 : vector<32x128xf32>
    %335 = arith.mulf %183, %334 : vector<32x128xf32>
    %336 = arith.truncf %335 : vector<32x128xf32> to vector<32x128xbf16>
    %c0_33 = arith.constant 0 : index
    %c0_34 = arith.constant 0 : index
    %337 = vector.load %arg6[%c0_33, %c0_34] : memref<128x128xbf16, #tpu.memory_space<vmem>>, vector<128x128xbf16>
    %cst_35 = arith.constant dense<0.000000e+00> : vector<32x128xf32>
    %338 = tpu.matmul %336, %337, %cst_35 {dimension_numbers = #tpu.dot_dimension_numbers<[1], [0], [0], [1], [0, 0, 1, 1], [], []>} : vector<32x128xbf16>, vector<128x128xbf16>, vector<32x128xf32> -> vector<32x128xf32>
    %339 = arith.addf %322, %338 : vector<32x128xf32>
    %340 = arith.addf %339, %15 : vector<32x128xf32>
    %341 = arith.mulf %6, %340 : vector<32x128xf32>
    %cst_36 = arith.constant 0.000000e+00 : f32
    %342 = vector.broadcast %cst_36 : f32 to vector<32x128xf32>
    %343 = arith.maximumf %341, %342 : vector<32x128xf32>
    %344 = arith.subf %343, %183 : vector<32x128xf32>
    %345 = arith.mulf %328, %344 : vector<32x128xf32>
    %346 = arith.addf %183, %345 : vector<32x128xf32>
    %347 = arith.truncf %346 : vector<32x128xf32> to vector<32x128xbf16>
    %c0_37 = arith.constant 0 : index
    %c0_38 = arith.constant 0 : index
    %348 = vector.load %arg10[%c0_37, %c0_38] : memref<128x256xbf16, #tpu.memory_space<vmem>>, vector<128x256xbf16>
    %cst_39 = arith.constant dense<0.000000e+00> : vector<32x256xf32>
    %349 = tpu.matmul %347, %348, %cst_39 {dimension_numbers = #tpu.dot_dimension_numbers<[1], [0], [0], [1], [0, 0, 1, 1], [], []>} : vector<32x128xbf16>, vector<128x256xbf16>, vector<32x256xf32> -> vector<32x256xf32>
    %c0_40 = arith.constant 0 : index
    %c0_41 = arith.constant 0 : index
    %350 = vector.load %arg11[%c0_40, %c0_41] : memref<1x256xf32, #tpu.memory_space<vmem>>, vector<1x256xf32>
    %351 = vector.broadcast %350 : vector<1x256xf32> to vector<32x256xf32>
    %352 = arith.addf %349, %351 : vector<32x256xf32>
    %353 = vector.extract_strided_slice %352 {offsets = [0, 0], sizes = [32, 128], strides = [1, 1]} : vector<32x256xf32> to vector<32x128xf32>
    %cst_42 = arith.constant 0.000000e+00 : f32
    %354 = vector.broadcast %cst_42 : f32 to vector<32x128xf32>
    %355 = arith.maximumf %353, %354 : vector<32x128xf32>
    %356 = vector.extract_strided_slice %352 {offsets = [0, 128], sizes = [32, 128], strides = [1, 1]} : vector<32x256xf32> to vector<32x128xf32>
    %357 = arith.negf %356 : vector<32x128xf32>
    %358 = math.exp %357 : vector<32x128xf32>
    %cst_43 = arith.constant 1.000000e+00 : f32
    %359 = vector.broadcast %cst_43 : f32 to vector<32x128xf32>
    %360 = arith.addf %359, %358 : vector<32x128xf32>
    %361 = arith.divf %359, %360 : vector<32x128xf32>
    %362 = arith.mulf %6, %361 : vector<32x128xf32>
    %363 = arith.mulf %362, %355 : vector<32x128xf32>
    %364 = vector.shape_cast %363 : vector<32x128xf32> to vector<2x16x128xf32>
    %cst_44 = arith.constant dense<0.000000e+00> : vector<2x1xf32>
    %365 = vector.multi_reduction <add>, %3, %cst_44 [1] : vector<2x16x1xf32> to vector<2x1xf32>
    %cst_45 = arith.constant 1.000000e+00 : f32
    %366 = vector.broadcast %cst_45 : f32 to vector<2x1xf32>
    %367 = arith.maximumf %365, %366 : vector<2x1xf32>
    %cst_46 = arith.constant 1.000000e+00 : f32
    %368 = vector.broadcast %cst_46 : f32 to vector<2x16x1xf32>
    %369 = arith.subf %3, %368 : vector<2x16x1xf32>
    %cst_47 = arith.constant 1.000000e+09 : f32
    %370 = vector.broadcast %cst_47 : f32 to vector<2x16x1xf32>
    %371 = arith.mulf %369, %370 : vector<2x16x1xf32>
    %cst_48 = arith.constant dense<0.000000e+00> : vector<2x128xf32>
    %372 = vector.multi_reduction <add>, %364, %cst_48 [1] : vector<2x16x128xf32> to vector<2x128xf32>
    %373 = vector.broadcast %367 : vector<2x1xf32> to vector<2x128xf32>
    %374 = arith.divf %372, %373 : vector<2x128xf32>
    %375 = vector.broadcast %371 : vector<2x16x1xf32> to vector<2x16x128xf32>
    %376 = arith.addf %364, %375 : vector<2x16x128xf32>
    %cst_49 = arith.constant dense<0xFF800000> : vector<2x128xf32>
    %377 = vector.multi_reduction <maximumf>, %376, %cst_49 [1] : vector<2x16x128xf32> to vector<2x128xf32>
    %378 = arith.addf %374, %377 : vector<2x128xf32>
    %379 = arith.truncf %378 : vector<2x128xf32> to vector<2x128xbf16>
    %c0_50 = arith.constant 0 : index
    %c0_51 = arith.constant 0 : index
    %380 = vector.load %arg12[%c0_50, %c0_51] : memref<128x128xbf16, #tpu.memory_space<vmem>>, vector<128x128xbf16>
    %cst_52 = arith.constant dense<0.000000e+00> : vector<2x128xf32>
    %381 = tpu.matmul %379, %380, %cst_52 {dimension_numbers = #tpu.dot_dimension_numbers<[1], [0], [0], [1], [0, 0, 1, 1], [], []>} : vector<2x128xbf16>, vector<128x128xbf16>, vector<2x128xf32> -> vector<2x128xf32>
    %c0_53 = arith.constant 0 : index
    %c0_54 = arith.constant 0 : index
    %382 = vector.load %arg13[%c0_53, %c0_54] : memref<1x128xf32, #tpu.memory_space<vmem>>, vector<1x128xf32>
    %383 = vector.broadcast %382 : vector<1x128xf32> to vector<2x128xf32>
    %384 = arith.addf %381, %383 : vector<2x128xf32>
    %385 = vector.shape_cast %384 : vector<2x128xf32> to vector<1x2x128xf32>
    %c0_55 = arith.constant 0 : index
    %c0_56 = arith.constant 0 : index
    %c0_57 = arith.constant 0 : index
    %386 = vector.load %arg14[%c0_55, %c0_56, %c0_57] : memref<1x2x128xf32, #tpu.memory_space<vmem>>, vector<1x2x128xf32>
    tpu.vector_store %arg14[%c0_55, %c0_56, %c0_57], %385 {strides = array<i32>} : memref<1x2x128xf32, #tpu.memory_space<vmem>>, vector<1x2x128xf32>,
    return
  }
  func.func @transform_0(%arg0: i32) -> (i32, i32, i32) {
    %c0_i32 = arith.constant 0 : i32
    %c0_i32_0 = arith.constant 0 : i32
    %c0_i32_1 = arith.constant 0 : i32
    return %arg0, %c0_i32, %c0_i32_0 : i32, i32, i32
  }
  func.func @transform_1(%arg0: i32) -> (i32, i32, i32) {
    %c0_i32 = arith.constant 0 : i32
    %c0_i32_0 = arith.constant 0 : i32
    %c0_i32_1 = arith.constant 0 : i32
    return %arg0, %c0_i32, %c0_i32_0 : i32, i32, i32
  }
  func.func @transform_2(%arg0: i32) -> (i32, i32, i32) {
    %c0_i32 = arith.constant 0 : i32
    %c0_i32_0 = arith.constant 0 : i32
    %c0_i32_1 = arith.constant 0 : i32
    return %arg0, %c0_i32, %c0_i32_0 : i32, i32, i32
  }
  func.func @transform_3(%arg0: i32) -> (i32, i32) {
    %c0_i32 = arith.constant 0 : i32
    %c0_i32_0 = arith.constant 0 : i32
    %c0_i32_1 = arith.constant 0 : i32
    return %c0_i32, %c0_i32_0 : i32, i32
  }
  func.func @transform_4(%arg0: i32) -> (i32, i32) {
    %c0_i32 = arith.constant 0 : i32
    %c0_i32_0 = arith.constant 0 : i32
    %c0_i32_1 = arith.constant 0 : i32
    return %c0_i32, %c0_i32_0 : i32, i32
  }
  func.func @transform_5(%arg0: i32) -> (i32, i32) {
    %c0_i32 = arith.constant 0 : i32
    %c0_i32_0 = arith.constant 0 : i32
    %c0_i32_1 = arith.constant 0 : i32
    return %c0_i32, %c0_i32_0 : i32, i32
  }
  func.func @transform_6(%arg0: i32) -> (i32, i32) {
    %c0_i32 = arith.constant 0 : i32
    %c0_i32_0 = arith.constant 0 : i32
    %c0_i32_1 = arith.constant 0 : i32
    return %c0_i32, %c0_i32_0 : i32, i32
  }
  func.func @transform_7(%arg0: i32) -> (i32, i32) {
    %c0_i32 = arith.constant 0 : i32
    %c0_i32_0 = arith.constant 0 : i32
    %c0_i32_1 = arith.constant 0 : i32
    return %c0_i32, %c0_i32_0 : i32, i32
  }
  func.func @transform_8(%arg0: i32) -> (i32, i32) {
    %c0_i32 = arith.constant 0 : i32
    %c0_i32_0 = arith.constant 0 : i32
    %c0_i32_1 = arith.constant 0 : i32
    return %c0_i32, %c0_i32_0 : i32, i32
  }
  func.func @transform_9(%arg0: i32) -> (i32, i32) {
    %c0_i32 = arith.constant 0 : i32
    %c0_i32_0 = arith.constant 0 : i32
    %c0_i32_1 = arith.constant 0 : i32
    return %c0_i32, %c0_i32_0 : i32, i32
  }
  func.func @transform_10(%arg0: i32) -> (i32, i32) {
    %c0_i32 = arith.constant 0 : i32
    %c0_i32_0 = arith.constant 0 : i32
    %c0_i32_1 = arith.constant 0 : i32
    return %c0_i32, %c0_i32_0 : i32, i32
  }
  func.func @transform_11(%arg0: i32) -> (i32, i32) {
    %c0_i32 = arith.constant 0 : i32
    %c0_i32_0 = arith.constant 0 : i32
    %c0_i32_1 = arith.constant 0 : i32
    return %c0_i32, %c0_i32_0 : i32, i32
  }
  func.func @transform_12(%arg0: i32) -> (i32, i32) {
    %c0_i32 = arith.constant 0 : i32
    %c0_i32_0 = arith.constant 0 : i32
    %c0_i32_1 = arith.constant 0 : i32
    return %c0_i32, %c0_i32_0 : i32, i32
  }
  func.func @transform_13(%arg0: i32) -> (i32, i32, i32) {
    %c0_i32 = arith.constant 0 : i32
    %c0_i32_0 = arith.constant 0 : i32
    %c0_i32_1 = arith.constant 0 : i32
    return %arg0, %c0_i32, %c0_i32_0 : i32, i32, i32
  }
}

</mosaic_0001>

<bundles_post_ra>
// kernel: tpu_custom_call.1
= control target key start
LH: loop header
LB: loop body
LE: loop exit
PB: predicated region body
PF: predicated region fallthrough
CT: control target
= control target key end

     0   :  { %18 = vsyncpa [#allocation3], 0  ;;  %s4559_s0 = inlined_call_operand.hbm [shape: bf16[2,16,128], index: 0, kind: input, shape index: {}]   ;;  %s4560_s1 = inlined_call_operand.hbm [shape: bf16[2,16,16], index: 1, kind: input, shape index: {}]   ;;  %s4561_s2 = inlined_call_operand.vmem [shape: f32[2,16,1], index: 2, kind: input, shape index: {}]   ;;  %s4562_s3 = inlined_call_operand.hbm [shape: bf16[128,128], index: 3, kind: input, shape index: {}]   ;;  %s4563_s4 = inlined_call_operand.hbm [shape: bf16[256,384], index: 4, kind: input, shape index: {}]   ;;  %s4564_s5 = inlined_call_operand.hbm [shape: bf16[128,128], index: 5, kind: input, shape index: {}]   ;;  %s4565_s6 = inlined_call_operand.vmem [shape: f32[1,128], index: 6, kind: input, shape index: {}]   ;;  %s4566_s7 = inlined_call_operand.vmem [shape: f32[1,128], index: 7, kind: input, shape index: {}]   ;;  %s4567_s8 = inlined_call_operand.vmem [shape: f32[1,128], index: 8, kind: input, shape index: {}]   ;;  %s4568_s9 = inlined_call_operand.hbm [shape: bf16[128,256], index: 9, kind: input, shape index: {}]   ;;  %s4569_s10 = inlined_call_operand.vmem [shape: f32[1,256], index: 10, kind: input, shape index: {}]   ;;  %s4570_s11 = inlined_call_operand.vmem [shape: bf16[128,128], index: 11, kind: input, shape index: {}]   ;;  %s4571_s12 = inlined_call_operand.vmem [shape: f32[1,128], index: 12, kind: input, shape index: {}]   ;;  %s4572_s13 = inlined_call_operand.hbm [shape: f32[1,2,128], index: 13, kind: output, shape index: {}]  }
   0x1   :  { %19 = vsyncpa [#allocation6], 0 }
   0x2   :  { %20 = vsyncpa [#allocation9], 0 }
   0x3   :  { %21 = vsyncpa [#allocation12], 0 }
   0x4   :  { %22 = vsyncpa [#allocation4], 0  ;;  %s3312_s25 = smov [#allocation5]   ;;  %s3313_s27 = smov [#allocation8]  }
   0x5   :  { %s40_s26 = sshll.u32 %s3312_s25, 4  ;;  %s66_s28 = sshll.u32 %s3313_s27, 4  ;;  %s41_s26 = int_to_ptr.vmem [resolvable:$true] %s40_s26  ;;  %s3413_s28 = int_to_ptr.vmem [resolvable:$true] %s66_s28 }
   0x6   :  { %s3148_s14 = scalar_lea.hbm %s4560_s1, 256 }
   0x7   :  { %p3149_p0 = scmp.ne.s32.totalorder %s4560_s1, %s3148_s14  ;;  %p3152_p1 = scmp.lt.u32.totalorder %s3148_s14, %s4560_s1 }
   0x9   :  { %p3154_p2 = pnand %p3152_p1, %p3149_p0 }
   0xb   :  { %3157 = shalt.err (!%p3154_p2)
}
   0xc   :  { %s3158_s19 = scalar_lea.vmem %s41_s26, 256  ;;  %p3163_p4 = scmp.lt.s32.totalorder %s41_s26, %s41_s26 }
   0xd   :  { %p3159_p3 = scmp.ne.s32.totalorder %s41_s26, %s3158_s19  ;;  %p3164_p5 = scmp.lt.s32.totalorder %s3158_s19, %s3158_s19 }
   0xf   :  { %p3165_p6 = por %p3164_p5, %p3163_p4 }
  0x11   :  { %p3166_p7 = pnand %p3165_p6, %p3159_p3 }
  0x13   :  { %3169 = shalt.err (!%p3166_p7)
}
  0x14   :  { %s3314_s20 = smov 64   ;;  %s3315_s21 = smov 4  }
  0x15   :  { %46 = dma.hbm_to_vmem [thread:$0]  %s4560_s1, 256, %s41_s26, [#allocation6], %s3314_s20, %s3314_s20, %s3315_s21  }
  0x16   :  { %s3170_s27 = scalar_lea.hbm %s4563_s4, 6144 }
  0x17   :  { %p3171_p8 = scmp.ne.s32.totalorder %s4563_s4, %s3170_s27  ;;  %p3174_p9 = scmp.lt.u32.totalorder %s3170_s27, %s4563_s4 }
  0x19   :  { %p3176_p10 = pnand %p3174_p9, %p3171_p8 }
  0x1b   :  { %3179 = shalt.err (!%p3176_p10)
}
  0x1c   :  { %s3180_s16 = scalar_lea.vmem %s3413_s28, 6144  ;;  %p3185_p12 = scmp.lt.s32.totalorder %s3413_s28, %s3413_s28 }
  0x1d   :  { %p3181_p11 = scmp.ne.s32.totalorder %s3413_s28, %s3180_s16  ;;  %p3186_p13 = scmp.lt.s32.totalorder %s3180_s16, %s3180_s16 }
  0x1f   :  { %p3187_p0 = por %p3186_p13, %p3185_p12 }
  0x21   :  { %p3188_p1 = pnand %p3187_p0, %p3181_p11 }
  0x23   :  { %3191 = shalt.err (!%p3188_p1)
}
  0x24   :  { %s3316_s1 = smov 192   ;;  %s3317_s26 = smov 12  }
  0x25   :  { %72 = dma.hbm_to_vmem [thread:$0]  %s4563_s4, 6144, %s3413_s28, [#allocation9], %s3316_s1, %s3316_s1, %s3317_s26  }
  0x26   :  { %s3318_s19 = smov [#allocation2]   ;;  %s3319_s23 = smov [#allocation7]  }
  0x27   :  { %s28_s22 = sshll.u32 %s3318_s19, 4  ;;  %s54_s24 = sshll.u32 %s3319_s23, 4  ;;  %s29_s22 = int_to_ptr.vmem [resolvable:$true] %s28_s22  ;;  %s3447_s24 = int_to_ptr.vmem [resolvable:$true] %s54_s24 }
  0x28   :  { %s3192_s29 = scalar_lea.hbm %s4559_s0, 256 }
  0x29   :  { %p3193_p2 = scmp.ne.s32.totalorder %s4559_s0, %s3192_s29  ;;  %p3196_p3 = scmp.lt.u32.totalorder %s3192_s29, %s4559_s0 }
  0x2b   :  { %p3198_p4 = pnand %p3196_p3, %p3193_p2 }
  0x2d   :  { %3201 = shalt.err (!%p3198_p4)
}
  0x2e   :  { %s3202_s4 = scalar_lea.vmem %s29_s22, 256  ;;  %p3207_p6 = scmp.lt.s32.totalorder %s29_s22, %s29_s22 }
  0x2f   :  { %p3203_p5 = scmp.ne.s32.totalorder %s29_s22, %s3202_s4  ;;  %p3208_p7 = scmp.lt.s32.totalorder %s3202_s4, %s3202_s4 }
  0x31   :  { %p3209_p8 = por %p3208_p7, %p3207_p6 }
  0x33   :  { %p3210_p9 = pnand %p3209_p8, %p3203_p5 }
  0x35   :  { %3213 = shalt.err (!%p3210_p9)
}
  0x36   :  { %34 = dma.hbm_to_vmem [thread:$0]  %s4559_s0, 256, %s29_s22, [#allocation3], %s3314_s20, %s3314_s20, %s3315_s21  }
  0x37   :  { %s3214_s18 = scalar_lea.hbm %s4562_s3, 1024 }
  0x38   :  { %p3215_p10 = scmp.ne.s32.totalorder %s4562_s3, %s3214_s18  ;;  %p3218_p11 = scmp.lt.u32.totalorder %s3214_s18, %s4562_s3 }
  0x3a   :  { %p3220_p12 = pnand %p3218_p11, %p3215_p10 }
  0x3c   :  { %3223 = shalt.err (!%p3220_p12)
}
  0x3d   :  { %s3224_s29 = scalar_lea.vmem %s3447_s24, 1024  ;;  %p3229_p0 = scmp.lt.s32.totalorder %s3447_s24, %s3447_s24 }
  0x3e   :  { %p3225_p13 = scmp.ne.s32.totalorder %s3447_s24, %s3224_s29  ;;  %p3230_p1 = scmp.lt.s32.totalorder %s3224_s29, %s3224_s29 }
  0x40   :  { %p3231_p2 = por %p3230_p1, %p3229_p0 }
  0x42   :  { %p3232_p3 = pnand %p3231_p2, %p3225_p13 }
  0x44   :  { %3235 = shalt.err (!%p3232_p3)
}
  0x45   :  { %60 = dma.hbm_to_vmem [thread:$0]  %s4562_s3, 1024, %s3447_s24, [#allocation6], %s3314_s20, %s3314_s20, %s3315_s21  }
  0x46   :  { %s3320_s30 = smov [#allocation10]   ;;  %s3321_s15 = smov [#allocation11]  }
  0x47   :  { %s78_s14 = sshll.u32 %s3320_s30, 4  ;;  %s96_s16 = sshll.u32 %s3321_s15, 4  ;;  %s79_s14 = int_to_ptr.vmem [resolvable:$true] %s78_s14  ;;  %s3484_s16 = int_to_ptr.vmem [resolvable:$true] %s96_s16 }
  0x48   :  { %s3236_s1 = scalar_lea.hbm %s4564_s5, 1024 }
  0x49   :  { %p3237_p4 = scmp.ne.s32.totalorder %s4564_s5, %s3236_s1  ;;  %p3240_p5 = scmp.lt.u32.totalorder %s3236_s1, %s4564_s5 }
  0x4b   :  { %p3242_p6 = pnand %p3240_p5, %p3237_p4 }
  0x4d   :  { %3245 = shalt.err (!%p3242_p6)
}
  0x4e   :  { %s3246_s3 = scalar_lea.vmem %s79_s14, 1024  ;;  %p3251_p8 = scmp.lt.s32.totalorder %s79_s14, %s79_s14 }
  0x4f   :  { %p3247_p7 = scmp.ne.s32.totalorder %s79_s14, %s3246_s3  ;;  %p3252_p9 = scmp.lt.s32.totalorder %s3246_s3, %s3246_s3 }
  0x51   :  { %p3253_p10 = por %p3252_p9, %p3251_p8 }
  0x53   :  { %p3254_p11 = pnand %p3253_p10, %p3247_p7 }
  0x55   :  { %3257 = shalt.err (!%p3254_p11)
}
  0x56   :  { %84 = dma.hbm_to_vmem [thread:$0]  %s4564_s5, 1024, %s79_s14, [#allocation9], %s3314_s20, %s3314_s20, %s3315_s21  }
  0x57   :  { %s3258_s29 = scalar_lea.hbm %s4568_s9, 2048 }
  0x58   :  { %p3259_p12 = scmp.ne.s32.totalorder %s4568_s9, %s3258_s29  ;;  %p3262_p13 = scmp.lt.u32.totalorder %s3258_s29, %s4568_s9 }
  0x5a   :  { %p3264_p0 = pnand %p3262_p13, %p3259_p12 }
  0x5c   :  { %3267 = shalt.err (!%p3264_p0)
}
  0x5d   :  { %s3268_s4 = scalar_lea.vmem %s3484_s16, 2048  ;;  %p3273_p2 = scmp.lt.s32.totalorder %s3484_s16, %s3484_s16 }
  0x5e   :  { %p3269_p1 = scmp.ne.s32.totalorder %s3484_s16, %s3268_s4  ;;  %p3274_p3 = scmp.lt.s32.totalorder %s3268_s4, %s3268_s4 }
  0x60   :  { %p3275_p4 = por %p3274_p3, %p3273_p2 }
  0x62   :  { %p3276_p5 = pnand %p3275_p4, %p3269_p1 }
  0x64   :  { %3279 = shalt.err (!%p3276_p5)
}
  0x65   :  { %s3322_s5 = smov 128   ;;  %s3323_s20 = smov 8  }
  0x66   :  { %102 = dma.hbm_to_vmem [thread:$0]  %s4568_s9, 2048, %s3484_s16, [#allocation12], %s3322_s5, %s3322_s5, %s3323_s20  }
  0x67   :  { %3302 = dma.done.wait [#allocation3], 256  }
  0x68   :  { %3303 = vsyncadd [#allocation3], 4294967040 }
  0x69   :  { %3304 = dma.done.wait [#allocation6], 1280  }
  0x6a   :  { %3305 = vsyncadd [#allocation6], 4294966016 }
  0x6b   :  { %3306 = dma.done.wait [#allocation9], 7168  }
  0x6c   :  { %3307 = vsyncadd [#allocation9], 4294960128 }
  0x6d   :  { %3308 = dma.done.wait [#allocation12], 2048  }
  0x6e   :  { %3309 = vsyncadd [#allocation12], 4294965248  ;;  %v4573_v0 = vmov 0   ;;  %v2946_v1 = vld [vmem:[#allocation7] sm:$0xff]   ;;  %v2947_v2 = vld [vmem:[#allocation7 + $0x8] sm:$0xff]   ;;  %vm2183_vm0 = vcmask 7168  }
  0x6f   :  { %2754 = vset.pattern.permute.xlu1 %v4573_v0  ;;  %2753 = vset.pattern.permute.xlu0 %v4573_v0  ;;  %v2948_v3 = vld [vmem:[#allocation7 + $0x10] sm:$0xff]   ;;  %v139_v6 = vld [vmem:[%s4561_s2 + $0x18] sm:$0xff]  ;;  %v2954_v13 = vld [vmem:[#allocation2] sm:$0xff]   ;;  %v3325_v21 = vmov 1   ;;  %v3326_v28 = vmov 3   ;;  %v3327_v30 = vmov 4  }
  0x70   :  { %2642 = vmatprep.subr.bf16.mxu0 %v2946_v1  ;;  %v138_v4 = vld [vmem:[%s4561_s2 + $0x10] sm:$0xff]  ;;  %v2949_v7 = vld [vmem:[#allocation7 + $0x18] sm:$0xff]   ;;  %v2194_v8 = vsel %vm2183_vm0, %v139_v6, 0.0  ;;  %v2950_v14 = vld [vmem:[#allocation7 + $0x20] sm:$0xff]   ;;  %2658 = vmatprep.mubr.bf16.mxu0 %v2954_v13  ;;  %v3328_v32 = vmov 2   ;;  %v3329_v33 = vmov 5  }
  0x71   :  { %2643 = vmatpush3.bf16.msra.mxu0 %v2946_v1  ;;  %152 = vperm.xlu1 %2754, %v138_v4   ;;  %v2193_v5 = vsel %vm2183_vm0, %v138_v4, 0.0  ;;  %v2539_v10 = vld [vmem:[#allocation5] sm:$0xff]   ;;  %v2546_v16 = vld [vmem:[#allocation5 + $0x8] sm:$0xff]   ;;  %v136_v17 = vld [vmem:[%s4561_s2] sm:$0xff]  ;;  %v3330_v34 = vmov 6   ;;  %v3331_v35 = vmov 7  }
  0x72   :  { %2644 = vmatprep.subr.bf16.mxu0 %v2947_v2  ;;  %v3528_v9 = vadd.f32 %v2194_v8, %v2193_v5  ;;  %v2540_v11 = vunpack.c.l.bf16 %v2539_v10  ;;  %v2541_v12 = vunpack.c.h.bf16 %v2539_v10  ;;  %v137_v18 = vld [vmem:[%s4561_s2 + $0x8] sm:$0xff]  ;;  %142 = vperm.xlu0 %2753, %v136_v17   ;;  %v2184_v19 = vsel %vm2183_vm0, %v136_v17, 0.0  ;;  %v2952_v26 = vld [vmem:[#allocation7 + $0x30] sm:$0xff]   ;;  %v2953_v29 = vld [vmem:[#allocation7 + $0x38] sm:$0xff]   ;;  %s3342_s25 = smov [#allocation13]  }
  0x73   :  { %v2951_v20 = vld [vmem:[#allocation7 + $0x28] sm:$0xff]   ;;  %v2185_v22 = vsel %vm2183_vm0, %v137_v18, 0.0  ;;  %v2544_v23 = vunpack.c.l.bf16 %v2546_v16  ;;  %v2545_v24 = vunpack.c.h.bf16 %v2546_v16  ;;  %v3332_v36 = vmov 10   ;;  %v3569_v41 = vld [vmem:[#allocation8 + $0x4] ss:$12 sps:$4 sm:$0xff]  }
  0x74   :  { %4702 = vst [vmem:[#allocation19_spill] sm:$0xff] %v3528_v9  ;;  %v3530_v15 = vpack.i.bf16 %v2541_v12, %v2540_v11  ;;  %v3541_v25 = vadd.f32 %v2185_v22, %v2184_v19  ;;  %v2955_v31 = vld [vmem:[#allocation2 + $0x8] sm:$0xff]   ;;  %v3333_v37 = vmov 8   ;;  %v3334_v38 = vmov 9   ;;  %1168 = vmatprep.subr.bf16.mxu1 %v3569_v41  ;;  %v3580_v45 = vld [vmem:[#allocation8 + $0x18] ss:$12 sps:$4 sm:$0xff]  }
  0x75   :  { %2645 = vmatpush3.bf16.msra.mxu0 %v2947_v2  ;;  %157 = vperm.xlu1 %2754, %v139_v6   ;;  %v3543_v27 = vpack.i.bf16 %v2545_v24, %v2544_v23  ;;  %v3335_v39 = vmov 13   ;;  %v3336_v40 = vmov 11   ;;  %v3337_v42 = vmov 12   ;;  %v3573_v43 = vld [vmem:[#allocation8] ss:$12 sps:$4 sm:$0xff]   ;;  %4705 = vst [vmem:[#allocation22_spill] sm:$0xff] %v3580_v45 }
  0x76   :  { %2646 = vmatprep.subr.bf16.mxu0 %v2948_v3  ;;  %147 = vperm.xlu0 %2753, %v137_v18   ;;  %4703 = vst [vmem:[#allocation20_spill] sm:$0xff] %v3541_v25  ;;  %v3575_v44 = vld [vmem:[#allocation8 + $0x1c] ss:$12 sps:$4 sm:$0xff]   ;;  %v3582_v46 = vld [vmem:[#allocation8 + $0x34] ss:$12 sps:$4 sm:$0xff]   ;;  %v3338_v49 = vmov 14  }
  0x77   :  { %4704 = vst [vmem:[#allocation21_spill] sm:$0xff] %v3575_v44  ;;  %1169 = vmatpush1.bf16.msra.mxu1 %v3573_v43  ;;  %4706 = vst [vmem:[#allocation23_spill] sm:$0xff] %v3582_v46  ;;  %v3587_v47 = vld [vmem:[#allocation8 + $0x30] ss:$12 sps:$4 sm:$0xff]   ;;  %v3589_v48 = vld [vmem:[#allocation8 + $0x4c] ss:$12 sps:$4 sm:$0xff]  }
  0x78   :  { %1170 = vmatprep.subr.bf16.mxu1 %v3575_v44  ;;  %4707 = vst [vmem:[#allocation24_spill] sm:$0xff] %v3587_v47  ;;  %4708 = vst [vmem:[#allocation25_spill] sm:$0xff] %v3589_v48  ;;  %v3594_v50 = vld [vmem:[#allocation8 + $0x48] ss:$12 sps:$4 sm:$0xff]   ;;  %v3596_v51 = vld [vmem:[#allocation8 + $0x64] ss:$12 sps:$4 sm:$0xff]  }
  0x79   :  { %2647 = vmatpush3.bf16.msra.mxu0 %v2948_v3  ;;  %2760 = vset.pattern.permute.xlu1 %v3325_v21  ;;  %4709 = vst [vmem:[#allocation26_spill] sm:$0xff] %v3594_v50  ;;  %4710 = vst [vmem:[#allocation27_spill] sm:$0xff] %v3596_v51  ;;  %v3339_v52 = vmov 15   ;;  %v3604_v53 = vld [vmem:[#allocation8 + $0x60] ss:$12 sps:$4 sm:$0xff]   ;;  %vm3341_vm1 = vmmov 0  }
  0x7a   :  { %2648 = vmatprep.subr.bf16.mxu0 %v2949_v7  ;;  %2762 = vperm.xlu1 %2760, %v3530_v15   ;;  %4711 = vst [vmem:[#allocation28_spill] sm:$0xff] %v3604_v53  ;;  %v3607_v54 = vld [vmem:[#allocation8 + $0x7c] ss:$12 sps:$4 sm:$0xff]   ;;  %v3611_v55 = vld [vmem:[#allocation8 + $0x78] ss:$12 sps:$4 sm:$0xff]   ;;  %vm2309_vm2 = vcmask 1041409  }
  0x7b   :  { %2756 = vperm.xlu0 %2753, %v3530_v15   ;;  %1171 = vmatpush1.bf16.msra.mxu1 %v3580_v45  ;;  %4712 = vst [vmem:[#allocation29_spill] sm:$0xff] %v3607_v54  ;;  %4713 = vst [vmem:[#allocation30_spill] sm:$0xff] %v3611_v55  ;;  %v3614_v56 = vld [vmem:[#allocation8 + $0x94] ss:$12 sps:$4 sm:$0xff]   ;;  %v3619_v58 = vld [vmem:[#allocation8 + $0x90] ss:$12 sps:$4 sm:$0xff]  }
  0x7c   :  { %1172 = vmatprep.subr.bf16.mxu1 %v3582_v46  ;;  %4714 = vst [vmem:[#allocation31_spill] sm:$0xff] %v3614_v56  ;;  %4716 = vst [vmem:[#allocation33_spill] sm:$0xff] %v3619_v58  ;;  %v3624_v60 = vld [vmem:[#allocation8 + $0xac] ss:$12 sps:$4 sm:$0xff]   ;;  %v3627_v61 = vld [vmem:[#allocation8 + $0xa8] ss:$12 sps:$4 sm:$0xff]  }
  0x7d   :  { %2649 = vmatpush3.bf16.msra.mxu0 %v2949_v7  ;;  %4718 = vst [vmem:[#allocation35_spill] sm:$0xff] %v3624_v60  ;;  %4719 = vst [vmem:[#allocation36_spill] sm:$0xff] %v3627_v61  ;;  %v3632_v63 = vld [vmem:[#allocation8 + $0xc4] ss:$12 sps:$4 sm:$0xff]   ;;  %v3634_v1 = vld [vmem:[#allocation8 + $0xc8] ss:$12 sps:$4 sm:$0xff]  }
  0x7e   :  { %2650 = vmatprep.subr.bf16.mxu0 %v2950_v14  ;;  %2766 = vset.pattern.permute.xlu1 %v3326_v28  ;;  %4721 = vst [vmem:[#allocation38_spill] sm:$0xff] %v3632_v63  ;;  %4722 = vst [vmem:[#allocation39_spill] sm:$0xff] %v3634_v1  ;;  %v3636_v2 = vld [vmem:[#allocation8 + $0xc0] ss:$12 sps:$4 sm:$0xff]   ;;  %v3638_v3 = vld [vmem:[#allocation8 + $0x8] ss:$12 sps:$4 sm:$0xff]  }
  0x7f   :  { %2768 = vperm.xlu1 %2766, %v3530_v15   ;;  %2779 = vperm.xlu0 %2753, %v3543_v27   ;;  %4723 = vst [vmem:[#allocation40_spill] sm:$0xff] %v3636_v2  ;;  %4724 = vst [vmem:[#allocation41_spill] sm:$0xff] %v3638_v3  ;;  %v3644_v4 = vld [vmem:[#allocation8 + $0xdc] ss:$12 sps:$4 sm:$0xff]   ;;  %v3646_v5 = vld [vmem:[#allocation8 + $0xe0] ss:$12 sps:$4 sm:$0xff]  }
  0x80   :  { %1173 = vmatpush1.bf16.msra.mxu1 %v3587_v47  ;;  %4725 = vst [vmem:[#allocation42_spill] sm:$0xff] %v3644_v4  ;;  %4726 = vst [vmem:[#allocation43_spill] sm:$0xff] %v3646_v5  ;;  %v3648_v6 = vld [vmem:[#allocation8 + $0xd8] ss:$12 sps:$4 sm:$0xff]   ;;  %v3650_v7 = vld [vmem:[#allocation8 + $0x20] ss:$12 sps:$4 sm:$0xff]  }
  0x81   :  { %2651 = vmatpush3.bf16.msra.mxu0 %v2950_v14  ;;  %1174 = vmatprep.subr.bf16.mxu1 %v3589_v48  ;;  %4727 = vst [vmem:[#allocation44_spill] sm:$0xff] %v3648_v6  ;;  %4728 = vst [vmem:[#allocation45_spill] sm:$0xff] %v3650_v7  ;;  %v3658_v10 = vld [vmem:[#allocation8 + $0xf4] ss:$12 sps:$4 sm:$0xff]   ;;  %v3660_v11 = vld [vmem:[#allocation8 + $0xf8] ss:$12 sps:$4 sm:$0xff]  }
  0x82   :  { %2652 = vmatprep.subr.bf16.mxu0 %v2951_v20  ;;  %4730 = vst [vmem:[#allocation47_spill] sm:$0xff] %v3658_v10  ;;  %4731 = vst [vmem:[#allocation48_spill] sm:$0xff] %v3660_v11  ;;  %v3662_v12 = vld [vmem:[#allocation8 + $0xf0] ss:$12 sps:$4 sm:$0xff]   ;;  %v3664_v13 = vld [vmem:[#allocation8 + $0x38] ss:$12 sps:$4 sm:$0xff]  }
  0x83   :  { %2772 = vset.pattern.permute.xlu1 %v3327_v30  ;;  %2783 = vset.pattern.permute.xlu0 %v3328_v32  ;;  %4732 = vst [vmem:[#allocation49_spill] sm:$0xff] %v3662_v12  ;;  %4733 = vst [vmem:[#allocation50_spill] sm:$0xff] %v3664_v13  ;;  %v3674_v16 = vld [vmem:[#allocation8 + $0x110] ss:$12 sps:$4 sm:$0xff]   ;;  %v3676_v17 = vld [vmem:[#allocation8 + $0x108] ss:$12 sps:$4 sm:$0xff]  }
  0x84   :  { %2774 = vperm.xlu1 %2772, %v3530_v15   ;;  %2785 = vperm.xlu0 %2783, %v3530_v15   ;;  %4736 = vst [vmem:[#allocation53_spill] sm:$0xff] %v3674_v16  ;;  %4737 = vst [vmem:[#allocation54_spill] sm:$0xff] %v3676_v17  ;;  %v3678_v18 = vld [vmem:[#allocation8 + $0x50] ss:$12 sps:$4 sm:$0xff]   ;;  %v3690_v22 = vld [vmem:[#allocation8 + $0x68] ss:$12 sps:$4 sm:$0xff]  }
  0x85   :  { %2653 = vmatpush3.bf16.msra.mxu0 %v2951_v20  ;;  %1175 = vmatpush1.bf16.msra.mxu1 %v3594_v50  ;;  %4738 = vst [vmem:[#allocation55_spill] sm:$0xff] %v3678_v18  ;;  %v3680_v19 = vld [vmem:[#allocation8 + $0x124] ss:$12 sps:$4 sm:$0xff]   ;;  %v3684_v20 = vld [vmem:[#allocation8 + $0x128] ss:$12 sps:$4 sm:$0xff]   ;;  %4742 = vst [vmem:[#allocation59_spill] sm:$0xff] %v3690_v22 }
  0x86   :  { %2654 = vmatprep.subr.bf16.mxu0 %v2952_v26  ;;  %1176 = vmatprep.subr.bf16.mxu1 %v3596_v51  ;;  %4739 = vst [vmem:[#allocation56_spill] sm:$0xff] %v3680_v19  ;;  %4740 = vst [vmem:[#allocation57_spill] sm:$0xff] %v3684_v20  ;;  %v3694_v23 = vld [vmem:[#allocation8 + $0x13c] ss:$12 sps:$4 sm:$0xff]   ;;  %v3696_v24 = vld [vmem:[#allocation8 + $0x140] ss:$12 sps:$4 sm:$0xff]  }
  0x87   :  { %4743 = vst [vmem:[#allocation60_spill] sm:$0xff] %v3694_v23  ;;  %4744 = vst [vmem:[#allocation61_spill] sm:$0xff] %v3696_v24  ;;  %v3716_v32 = vld [vmem:[#allocation8 + $0x150] ss:$12 sps:$4 sm:$0xff]  }
  0x88   :  { %2789 = vset.pattern.permute.xlu1 %v3325_v21  ;;  %2802 = vperm.xlu0 %2783, %v3543_v27   ;;  %v3688_v21 = vld [vmem:[#allocation8 + $0x120] ss:$12 sps:$4 sm:$0xff]   ;;  %4750 = vst [vmem:[#allocation67_spill] sm:$0xff] %v3716_v32 }
  0x89   :  { %2655 = vmatpush3.bf16.msra.mxu0 %v2952_v26  ;;  %2791 = vperm.xlu1 %2789, %v3543_v27   ;;  %4741 = vst [vmem:[#allocation58_spill] sm:$0xff] %v3688_v21 }
  0x8a   :  { %2656 = vmatprep.subr.bf16.mxu0 %v2953_v29  ;;  %1177 = vmatpush1.bf16.msra.mxu1 %v3604_v53 }
  0x8b   :  { %1178 = vmatprep.subr.bf16.mxu1 %v3607_v54 }
  0x8c   :  { %2818 = vset.pattern.permute.xlu0 %v3331_v35 }
  0x8d   :  { %2657 = vmatpush3.bf16.msra.mxu0 %v2953_v29  ;;  %2795 = vset.pattern.permute.xlu1 %v3329_v33  ;;  %v3706_v29 = vld [vmem:[#allocation8 + $0x80] ss:$12 sps:$4 sm:$0xff]  }
  0x8e   :  { %2797 = vperm.xlu1 %2795, %v3530_v15   ;;  %2820 = vperm.xlu0 %2818, %v3530_v15   ;;  %4747 = vst [vmem:[#allocation64_spill] sm:$0xff] %v3706_v29 }
  0x8f   :  { %1179 = vmatpush1.bf16.msra.mxu1 %v3611_v55  ;;  %2557 = vmatprep.subr.bf16.mxu0 %v3634_v1 }
  0x90   :  { %2659 = vmatmul.mubr.bf16.vlgmr.msra.gmra.mrb[0].mxu0 %v2955_v31  ;;  %1180 = vmatprep.subr.bf16.mxu1 %v3614_v56  ;;  %v3712_v31 = vld [vmem:[#allocation8 + $0x158] ss:$12 sps:$4 sm:$0xff]  }
  0x91   :  { %2558 = vmatpush3.bf16.msra.mxu0 %v3638_v3  ;;  %4749 = vst [vmem:[#allocation66_spill] sm:$0xff] %v3712_v31 }
  0x92   :  { %2806 = vset.pattern.permute.xlu1 %v3330_v34  ;;  %2836 = vset.pattern.permute.xlu0 %v3329_v33  ;;  %v3718_v33 = vld [vmem:[#allocation8 + $0x98] ss:$12 sps:$4 sm:$0xff]  }
  0x93   :  { %2808 = vperm.xlu1 %2806, %v3530_v15   ;;  %2838 = vperm.xlu0 %2836, %v3543_v27   ;;  %4751 = vst [vmem:[#allocation68_spill] sm:$0xff] %v3718_v33 }
  0x94   :  { %1181 = vmatpush1.bf16.msra.mxu1 %v3619_v58  ;;  %2559 = vmatprep.subr.bf16.mxu0 %v3646_v5 }
  0x95   :  { %1182 = vmatprep.subr.bf16.mxu1 %v3624_v60  ;;  %2560 = vmatpush3.bf16.msra.mxu0 %v3650_v7 }
  0x96   :  { %2561 = vmatprep.subr.bf16.mxu0 %v3660_v11 }
  0x97   :  { %2812 = vset.pattern.permute.xlu1 %v3326_v28  ;;  %2854 = vset.pattern.permute.xlu0 %v3332_v36  ;;  %v3704_v28 = vld [vmem:[#allocation8 + $0x138] ss:$12 sps:$4 sm:$0xff]  }
  0x98   :  { %2814 = vperm.xlu1 %2812, %v3543_v27   ;;  %2856 = vperm.xlu0 %2854, %v3530_v15   ;;  %4746 = vst [vmem:[#allocation63_spill] sm:$0xff] %v3704_v28 }
  0x99   :  { %1183 = vmatpush1.bf16.msra.mxu1 %v3627_v61  ;;  %2562 = vmatpush3.bf16.msra.mxu0 %v3664_v13 }
  0x9a   :  { %1184 = vmatprep.subr.bf16.mxu1 %v3632_v63  ;;  %2563 = vmatprep.subr.bf16.mxu0 %v3674_v16 }
  0x9c   :  { %2824 = vset.pattern.permute.xlu1 %v3327_v30  ;;  %2872 = vset.pattern.permute.xlu0 %v3333_v37  ;;  %v3710_v30 = vld [vmem:[#allocation8 + $0x154] ss:$12 sps:$4 sm:$0xff]  }
  0x9d   :  { %2826 = vperm.xlu1 %2824, %v3543_v27   ;;  %2874 = vperm.xlu0 %2872, %v3543_v27   ;;  %4748 = vst [vmem:[#allocation65_spill] sm:$0xff] %v3710_v30 }
  0x9e   :  { %1185 = vmatpush1.bf16.msra.mxu1 %v3636_v2  ;;  %2564 = vmatpush3.bf16.msra.mxu0 %v3678_v18 }
  0x9f   :  { %1186 = vmatprep.subr.bf16.mxu1 %v3644_v4  ;;  %2565 = vmatprep.subr.bf16.mxu0 %v3684_v20 }
  0xa1   :  { %2830 = vset.pattern.permute.xlu1 %v3333_v37  ;;  %2890 = vset.pattern.permute.xlu0 %v3335_v39 }
  0xa2   :  { %2832 = vperm.xlu1 %2830, %v3530_v15   ;;  %2892 = vperm.xlu0 %2890, %v3530_v15  }
  0xa3   :  { %1187 = vmatpush1.bf16.msra.mxu1 %v3648_v6  ;;  %2566 = vmatpush3.bf16.msra.mxu0 %v3690_v22  ;;  %v342_v22 = vlaneseq }
  0xa4   :  { %1188 = vmatprep.subr.bf16.mxu1 %v3658_v10  ;;  %2567 = vmatprep.subr.bf16.mxu0 %v3696_v24 }
  0xa5   :  { %v343_v16 = vshrl.u32 %v342_v22, 7 }
  0xa6   :  { %2842 = vset.pattern.permute.xlu1 %v3334_v38  ;;  %2908 = vset.pattern.permute.xlu0 %v3336_v40 }
  0xa7   :  { %2844 = vperm.xlu1 %2842, %v3530_v15   ;;  %2910 = vperm.xlu0 %2908, %v3543_v27   ;;  %v3775_v11 = vsub.s32 4, %v343_v16  ;;  %v3777_v7 = vsub.s32 0, %v343_v16  ;;  %v3779_v5 = vsub.s32 1, %v343_v16  ;;  %v3781_v3 = vsub.s32 2, %v343_v16 }
  0xa8   :  { %1189 = vmatpush1.bf16.msra.mxu1 %v3662_v12  ;;  %2568 = vmatpush3.bf16.msra.mxu0 %v3706_v29 }
  0xa9   :  { %2569 = vmatprep.subr.bf16.mxu0 %v3712_v31 }
  0xab   :  { %2848 = vset.pattern.permute.xlu1 %v3330_v34  ;;  %2926 = vset.pattern.permute.xlu0 %v3335_v39  ;;  %v3734_v39 = vld [vmem:[#allocation8 + $0xb0] ss:$12 sps:$4 sm:$0xff]  }
  0xac   :  { %2850 = vperm.xlu1 %2848, %v3543_v27   ;;  %2928 = vperm.xlu0 %2926, %v3543_v27   ;;  %4757 = vst [vmem:[#allocation74_spill] sm:$0xff] %v3734_v39 }
  0xad   :  { %2570 = vmatpush3.bf16.msra.mxu0 %v3718_v33 }
  0xb0   :  { %2860 = vset.pattern.permute.xlu1 %v3331_v35  ;;  %2944 = vset.pattern.permute.xlu0 %v4573_v0  ;;  %v3724_v35 = vld [vmem:[#allocation8 + $0x16c] ss:$12 sps:$4 sm:$0xff]  }
  0xb1   :  { %2862 = vperm.xlu1 %2860, %v3543_v27   ;;  %4753 = vst [vmem:[#allocation70_spill] sm:$0xff] %v3724_v35 }
  0xb5   :  { %2866 = vset.pattern.permute.xlu1 %v3336_v40 }
  0xb6   :  { %2868 = vperm.xlu1 %2866, %v3530_v15  }
  0xba   :  { %2878 = vset.pattern.permute.xlu1 %v3337_v42 }
  0xbb   :  { %2880 = vperm.xlu1 %2878, %v3530_v15  }
  0xbf   :  { %2884 = vset.pattern.permute.xlu1 %v3334_v38  ;;  %v3732_v38 = vld [vmem:[#allocation8 + $0x168] ss:$12 sps:$4 sm:$0xff]  }
  0xc0   :  { %2886 = vperm.xlu1 %2884, %v3543_v27   ;;  %4756 = vst [vmem:[#allocation73_spill] sm:$0xff] %v3732_v38 }
  0xc4   :  { %2896 = vset.pattern.permute.xlu1 %v3332_v36  ;;  %v3726_v36 = vld [vmem:[#allocation8 + $0x170] ss:$12 sps:$4 sm:$0xff]  }
  0xc5   :  { %2898 = vperm.xlu1 %2896, %v3543_v27   ;;  %4754 = vst [vmem:[#allocation71_spill] sm:$0xff] %v3726_v36  ;;  %2571 = vmatprep.subr.bf16.mxu0 %v3726_v36 }
  0xc6   :  { %2572 = vmatpush3.bf16.msra.mxu0 %v3734_v39 }
  0xc9   :  { %2902 = vset.pattern.permute.xlu1 %v3338_v49 }
  0xca   :  { %2904 = vperm.xlu1 %2902, %v3530_v15  }
  0xce   :  { %2914 = vset.pattern.permute.xlu1 %v3339_v52 }
  0xcf   :  { %2916 = vperm.xlu1 %2914, %v3530_v15   ;;  %v3672_v15 = vld [vmem:[#allocation8 + $0x10c] ss:$12 sps:$4 sm:$0xff]  }
  0xd0   :  { %4735 = vst [vmem:[#allocation52_spill] sm:$0xff] %v3672_v15  ;;  %1190 = vmatprep.subr.bf16.mxu1 %v3672_v15 }
  0xd1   :  { %1191 = vmatpush1.bf16.msra.mxu1 %v3676_v17 }
  0xd2   :  { %1192 = vmatprep.subr.bf16.mxu1 %v3680_v19 }
  0xd3   :  { %2920 = vset.pattern.permute.xlu1 %v3337_v42 }
  0xd4   :  { %2922 = vperm.xlu1 %2920, %v3543_v27  }
  0xd5   :  { %1193 = vmatpush1.bf16.msra.mxu1 %v3688_v21 }
  0xd6   :  { %1194 = vmatprep.subr.bf16.mxu1 %v3694_v23 }
  0xd8   :  { %2932 = vset.pattern.permute.xlu1 %v3338_v49 }
  0xd9   :  { %2934 = vperm.xlu1 %2932, %v3543_v27   ;;  %1195 = vmatpush1.bf16.msra.mxu1 %v3704_v28 }
  0xda   :  { %1196 = vmatprep.subr.bf16.mxu1 %v3710_v30  ;;  %v3791_v30 = vsub.s32 7, %v343_v16 }
  0xdd   :  { %2938 = vset.pattern.permute.xlu1 %v3339_v52  ;;  %1197 = vmatpush1.bf16.msra.mxu1 %v3716_v32  ;;  %v3789_v32 = vsub.s32 6, %v343_v16 }
  0xde   :  { %2940 = vperm.xlu1 %2938, %v3543_v27   ;;  %1198 = vmatprep.subr.bf16.mxu1 %v3724_v35  ;;  %v3787_v35 = vsub.s32 5, %v343_v16 }
  0xe1   :  { %1199 = vmatpush1.bf16.msra.mxu1 %v3732_v38  ;;  %v3785_v38 = vsub.s32 3, %v343_v16 }
  0xe2   :  { %2945 = vset.pattern.permute.xlu1 %v4573_v0  ;;  %1743 = vmatprep.subr.bf16.mxu1 %v3569_v41 }
  0xf0   :  { %v3617_v57 = vpop.permute.xlu1 %152 }
  0xf1   :  { %4715 = vst [vmem:[#allocation32_spill] sm:$0xff] %v3617_v57  ;;  %v3700_v27 = vpop.permute.xlu0 %142 }
  0xf2   :  { %4745 = vst [vmem:[#allocation62_spill] sm:$0xff] %v3700_v27 }
  0xf4   :  { %v3621_v59 = vpop.permute.xlu1 %157 }
  0xf5   :  { %4717 = vst [vmem:[#allocation34_spill] sm:$0xff] %v3621_v59  ;;  %v3728_v37 = vpop.permute.xlu0 %147 }
  0xf6   :  { %4755 = vst [vmem:[#allocation72_spill] sm:$0xff] %v3728_v37 }
  0xf9   :  { %v3630_v62 = vpop.permute.xlu1 %2762 }
  0xfa   :  { %4720 = vst [vmem:[#allocation37_spill] sm:$0xff] %v3630_v62  ;;  %v3740_v42 = vpop.permute.xlu0 %2756 }
  0xfb   :  { %4758 = vst [vmem:[#allocation75_spill] sm:$0xff] %v3740_v42 }
  0xfe   :  { %v3652_v8 = vpop.permute.xlu1 %2768  ;;  %v3747_v52 = vpop.permute.xlu0 %2779 }
  0xff   :  { %4729 = vst [vmem:[#allocation46_spill] sm:$0xff] %v3652_v8  ;;  %4759 = vst [vmem:[#allocation76_spill] sm:$0xff] %v3747_v52 }
 0x103   :  { %v3670_v14 = vpop.permute.xlu1 %2774  ;;  %v3751_v25 = vpop.permute.xlu0 %2785 }
 0x104   :  { %4734 = vst [vmem:[#allocation51_spill] sm:$0xff] %v3670_v14  ;;  %4760 = vst [vmem:[#allocation77_spill] sm:$0xff] %v3751_v25 }
 0x107   :  { %v3755_v36 = vpop.permute.xlu0 %2802 }
 0x108   :  { %v3698_v26 = vpop.permute.xlu1 %2791 }
 0x10d   :  { %v3720_v34 = vpop.permute.xlu1 %2797  ;;  %v3759_v31 = vpop.permute.xlu0 %2820 }
 0x10e   :  { %4752 = vst [vmem:[#allocation69_spill] sm:$0xff] %v3720_v34 }
 0x112   :  { %v3738_v40 = vpop.permute.xlu1 %2808  ;;  %v3763_v39 = vpop.permute.xlu0 %2838 }
 0x117   :  { %v3745_v49 = vpop.permute.xlu1 %2814  ;;  %v3767_v24 = vpop.permute.xlu0 %2856 }
 0x118   :  { %4762 = vst [vmem:[#allocation79_spill] sm:$0xff] %v3767_v24 }
 0x11c   :  { %v3749_v0 = vpop.permute.xlu1 %2826  ;;  %v3771_v18 = vpop.permute.xlu0 %2874 }
 0x121   :  { %v3753_v9 = vpop.permute.xlu1 %2832  ;;  %v3783_v1 = vpop.permute.xlu0 %2892 }
 0x122   :  { %4761 = vst [vmem:[#allocation78_spill] sm:$0xff] %v3753_v9  ;;  %v4786_v47 = vunpack.i.h.bf16 %v3753_v9 }
 0x126   :  { %v3757_v33 = vpop.permute.xlu1 %2844  ;;  %v3815_v4 = vpop.permute.xlu0 %2910 }
 0x127   :  { %v4787_v45 = vunpack.i.l.bf16 %v3757_v33 }
 0x12b   :  { %v3761_v29 = vpop.permute.xlu1 %2850  ;;  %v3845_v19 = vpop.permute.xlu0 %2928 }
 0x12c   :  { %4767 = vst [vmem:[#allocation84_spill] sm:$0xff] %v3845_v19 }
 0x130   :  { %v3765_v41 = vpop.permute.xlu1 %2862 }
 0x135   :  { %v3769_v20 = vpop.permute.xlu1 %2868 }
 0x136   :  { %4763 = vst [vmem:[#allocation80_spill] sm:$0xff] %v3769_v20 }
 0x13a   :  { %v3773_v13 = vpop.permute.xlu1 %2880 }
 0x13f   :  { %v3809_v6 = vpop.permute.xlu1 %2886 }
 0x144   :  { %v3829_v56 = vpop.permute.xlu1 %2898 }
 0x149   :  { %v3869_v21 = vpop.permute.xlu1 %2904 }
 0x163   :  { %v2660_v15 = vpop.f32.mrb[0].mxu0 }
 0x164   :  { %v291_v28 = vpop.f32.mrb[1].mxu0  ;;  %v308_v63 = vmax.f32 %v2660_v15, 0.0  ;;  %v4770_v15 = vunpack.i.h.bf16 %v3740_v42 }
 0x165   :  { %v306_v17 = vmax.f32 %v291_v28, 0.0  ;;  %v2661_v2 = vpop.f32.mrb[2].mxu0 }
 0x166   :  { %v309_v16 = vmax.f32 %v2661_v2, 0.0  ;;  %v294_v61 = vpop.f32.mrb[3].mxu0  ;;  %v3854_v60 = vmul.f32 %v308_v63, %v3617_v57 }
 0x167   :  { %v307_v58 = vmax.f32 %v294_v61, 0.0  ;;  %v3834_v10 = vmul.f32 %v306_v17, %v3700_v27  ;;  %v4769_v27 = vunpack.i.l.bf16 %v3740_v42 }
 0x168   :  { %v3842_v23 = vmul.f32 %v309_v16, %v3621_v59  ;;  %4768 = vst [vmem:[#allocation85_spill] sm:$0xff] %v3854_v60 }
 0x169   :  { %4764 = vst [vmem:[#allocation81_spill] sm:$0xff] %v3834_v10  ;;  %v3837_v22 = vmul.f32 %v307_v58, %v3728_v37  ;;  %v3900_v58 = vpop.permute.xlu1 %2916 }
 0x16a   :  { %4766 = vst [vmem:[#allocation83_spill] sm:$0xff] %v3842_v23  ;;  %v3866_v16 = vpack.c.bf16 %v3842_v23, %v3854_v60  ;;  %v4771_v60 = vunpack.i.l.bf16 %v3630_v62 }
 0x16b   :  { %4765 = vst [vmem:[#allocation82_spill] sm:$0xff] %v3837_v22  ;;  %v314_v17 = vpack.c.bf16 %v3837_v22, %v3834_v10  ;;  %v4772_v10 = vunpack.i.h.bf16 %v3630_v62 }
 0x16d   :  { %v320_v28 = vunpack.c.l.bf16 %v314_v17  ;;  %1200 = vmatprep.mubr.bf16.mxu1 %v314_v17  ;;  %1253 = vmatprep.mubr.bf16.mxu0 %v314_v17  ;;  %v584_v59 = vrot.slane %v314_v17, 4  ;;  %v585_v17 = vrot.slane %v3866_v16, 4 }
 0x16f   :  { %v345_v12 = vrot.slane %v320_v28, %v3777_v7  ;;  %v377_v37 = vrot.slane %v320_v28, %v3779_v5  ;;  %v409_v2 = vrot.slane %v320_v28, %v3781_v3  ;;  %v441_v63 = vrot.slane %v320_v28, %v3785_v38 }
 0x170   :  { %v473_v61 = vrot.slane %v320_v28, %v3775_v11  ;;  %v505_v54 = vrot.slane %v320_v28, %v3787_v35 }
 0x171   :  { %v350_v57 = vmul.f32 %v4769_v27, %v345_v12  ;;  %v351_v23 = vmul.f32 %v4770_v15, %v345_v12  ;;  %v382_v22 = vmul.f32 %v4771_v60, %v377_v37  ;;  %v383_v55 = vmul.f32 %v4772_v10, %v377_v37 }
 0x172   :  { %v4773_v27 = vunpack.i.l.bf16 %v3751_v25  ;;  %v4774_v12 = vunpack.i.h.bf16 %v3751_v25  ;;  %v3895_v10 = vunpack.c.l.bf16 %v3866_v16  ;;  %v3897_v37 = vunpack.c.l.bf16 %v584_v59 }
 0x173   :  { %v386_v53 = vadd.f32 %v382_v22, %v350_v57  ;;  %v387_v51 = vadd.f32 %v383_v55, %v351_v23  ;;  %v4775_v55 = vunpack.i.l.bf16 %v3652_v8  ;;  %v4776_v22 = vunpack.i.h.bf16 %v3652_v8 }
 0x174   :  { %v414_v42 = vmul.f32 %v4773_v27, %v409_v2  ;;  %v415_v15 = vmul.f32 %v4774_v12, %v409_v2  ;;  %v3907_v12 = vunpack.c.l.bf16 %v585_v17  ;;  %v4777_v60 = vunpack.i.l.bf16 %v3670_v14 }
 0x175   :  { %v446_v23 = vmul.f32 %v4775_v55, %v441_v63  ;;  %v447_v27 = vmul.f32 %v4776_v22, %v441_v63  ;;  %v537_v25 = vrot.slane %v320_v28, %v3789_v32  ;;  %v609_v63 = vrot.slane %v3897_v37, %v3777_v7 }
 0x176   :  { %v418_v62 = vadd.f32 %v414_v42, %v386_v53  ;;  %v419_v57 = vadd.f32 %v415_v15, %v387_v51  ;;  %v478_v59 = vmul.f32 %v4777_v60, %v473_v61  ;;  %v4778_v53 = vunpack.i.h.bf16 %v3670_v14 }
 0x177   :  { %v569_v42 = vrot.slane %v320_v28, %v3791_v30  ;;  %v4779_v15 = vunpack.i.l.bf16 %v3720_v34  ;;  %v641_v17 = vrot.slane %v3897_v37, %v3779_v5  ;;  %v349_v60 = vrot.slane %v3895_v10, %v3777_v7 }
 0x178   :  { %v450_v50 = vadd.f32 %v446_v23, %v418_v62  ;;  %v451_v48 = vadd.f32 %v447_v27, %v419_v57  ;;  %v479_v51 = vmul.f32 %v4778_v53, %v473_v61  ;;  %v4780_v57 = vunpack.i.h.bf16 %v3720_v34 }
 0x179   :  { %v510_v55 = vmul.f32 %v4779_v15, %v505_v54  ;;  %v673_v28 = vrot.slane %v3897_v37, %v3781_v3  ;;  %v4781_v61 = vunpack.i.l.bf16 %v3738_v40  ;;  %v705_v53 = vrot.slane %v3897_v37, %v3785_v38 }
 0x17a   :  { %v482_v22 = vadd.f32 %v478_v59, %v450_v50  ;;  %v483_v62 = vadd.f32 %v479_v51, %v451_v48  ;;  %v511_v23 = vmul.f32 %v4780_v57, %v505_v54  ;;  %v381_v15 = vrot.slane %v3895_v10, %v3779_v5 }
 0x17b   :  { %v542_v27 = vmul.f32 %v4781_v61, %v537_v25  ;;  %v413_v2 = vrot.slane %v3895_v10, %v3781_v3  ;;  %v4782_v59 = vunpack.i.h.bf16 %v3738_v40  ;;  %v4783_v51 = vunpack.i.l.bf16 %v3759_v31 }
 0x17c   :  { %v514_v50 = vadd.f32 %v510_v55, %v482_v22  ;;  %v515_v48 = vadd.f32 %v511_v23, %v483_v62  ;;  %v4784_v34 = vunpack.i.h.bf16 %v3759_v31  ;;  %v4785_v14 = vunpack.i.l.bf16 %v3753_v9 }
 0x17d   :  { %v543_v54 = vmul.f32 %v4782_v59, %v537_v25  ;;  %v574_v57 = vmul.f32 %v4783_v51, %v569_v42  ;;  %v615_v46 = vmul.f32 %v4786_v47, %v609_v63  ;;  %v646_v44 = vmul.f32 %v4787_v45, %v641_v17 }
 0x17e   :  { %v575_v61 = vmul.f32 %v4784_v34, %v569_v42  ;;  %v614_v8 = vmul.f32 %v4785_v14, %v609_v63  ;;  %v546_v55 = vadd.f32 %v542_v27, %v514_v50  ;;  %v4788_v62 = vunpack.i.h.bf16 %v3757_v33 }
 0x17f   :  { %v547_v22 = vadd.f32 %v543_v54, %v515_v48  ;;  %v4789_v23 = vunpack.i.l.bf16 %v3767_v24  ;;  %v4790_v51 = vunpack.i.h.bf16 %v3767_v24  ;;  %v4791_v42 = vunpack.i.l.bf16 %v3769_v20 }
 0x180   :  { %v647_v25 = vmul.f32 %v4788_v62, %v641_v17  ;;  %v4792_v9 = vunpack.i.l.bf16 %v3747_v52  ;;  %v4793_v63 = vunpack.i.h.bf16 %v3747_v52  ;;  %v578_v27 = vadd.f32 %v574_v57, %v546_v55 }
 0x181   :  { %v678_v59 = vmul.f32 %v4789_v23, %v673_v28  ;;  %v679_v34 = vmul.f32 %v4790_v51, %v673_v28  ;;  %v710_v14 = vmul.f32 %v4791_v42, %v705_v53  ;;  %v579_v50 = vadd.f32 %v575_v61, %v547_v22 }
 0x182   :  { %v352_v47 = vmul.f32 %v4792_v9, %v349_v60  ;;  %v353_v45 = vmul.f32 %v4793_v63, %v349_v60  ;;  %v4794_v48 = vunpack.i.h.bf16 %v3769_v20  ;;  %v737_v54 = vrot.slane %v3897_v37, %v3775_v11 }
 0x183   :  { %v769_v28 = vrot.slane %v3897_v37, %v3787_v35  ;;  %v801_v62 = vrot.slane %v3897_v37, %v3789_v32  ;;  %v4795_v23 = vunpack.i.l.bf16 %v3698_v26  ;;  %v4796_v51 = vunpack.i.h.bf16 %v3698_v26 }
 0x184   :  { %v711_v17 = vmul.f32 %v4794_v48, %v705_v53  ;;  %v618_v57 = vadd.f32 %v614_v8, %v578_v27  ;;  %v619_v61 = vadd.f32 %v615_v46, %v579_v50  ;;  %v4797_v55 = vunpack.i.l.bf16 %v3755_v36 }
 0x185   :  { %v384_v9 = vmul.f32 %v4795_v23, %v381_v15  ;;  %v385_v60 = vmul.f32 %v4796_v51, %v381_v15  ;;  %v445_v22 = vrot.slane %v3895_v10, %v3785_v38  ;;  %v4798_v48 = vunpack.i.h.bf16 %v3755_v36 }
 0x186   :  { %v416_v53 = vmul.f32 %v4797_v55, %v413_v2  ;;  %v477_v20 = vrot.slane %v3895_v10, %v3775_v11  ;;  %v650_v23 = vadd.f32 %v646_v44, %v618_v57  ;;  %v651_v24 = vadd.f32 %v647_v25, %v619_v61 }
 0x187   :  { %v388_v42 = vadd.f32 %v384_v9, %v352_v47  ;;  %v389_v63 = vadd.f32 %v385_v60, %v353_v45  ;;  %v417_v52 = vmul.f32 %v4798_v48, %v413_v2  ;;  %v4799_v15 = vunpack.i.l.bf16 %v3773_v13 }
 0x188   :  { %v509_v46 = vrot.slane %v3895_v10, %v3787_v35  ;;  %v4800_v51 = vunpack.i.l.bf16 %v3745_v49  ;;  %v4801_v45 = vunpack.i.h.bf16 %v3745_v49  ;;  %v682_v2 = vadd.f32 %v678_v59, %v650_v23 }
 0x189   :  { %v742_v8 = vmul.f32 %v4799_v15, %v737_v54  ;;  %v420_v27 = vadd.f32 %v416_v53, %v388_v42  ;;  %v421_v50 = vadd.f32 %v417_v52, %v389_v63  ;;  %v683_v60 = vadd.f32 %v679_v34, %v651_v24 }
 0x18a   :  { %v448_v47 = vmul.f32 %v4800_v51, %v445_v22  ;;  %v449_v9 = vmul.f32 %v4801_v45, %v445_v22  ;;  %v4802_v55 = vunpack.i.h.bf16 %v3773_v13  ;;  %v541_v25 = vrot.slane %v3895_v10, %v3789_v32 }
 0x18b   :  { %v4803_v48 = vunpack.i.l.bf16 %v3749_v0  ;;  %v4804_v52 = vunpack.i.h.bf16 %v3749_v0  ;;  %v714_v63 = vadd.f32 %v710_v14, %v682_v2  ;;  %v715_v15 = vadd.f32 %v711_v17, %v683_v60 }
 0x18c   :  { %v743_v44 = vmul.f32 %v4802_v55, %v737_v54  ;;  %v452_v57 = vadd.f32 %v448_v47, %v420_v27  ;;  %v453_v61 = vadd.f32 %v449_v9, %v421_v50  ;;  %v4805_v22 = vunpack.i.l.bf16 %v3783_v1  ;;  %v3999_v54 = vpop.permute.xlu1 %2922 }
 0x18d   :  { %v480_v53 = vmul.f32 %v4803_v48, %v477_v20  ;;  %v481_v42 = vmul.f32 %v4804_v52, %v477_v20  ;;  %v4806_v24 = vunpack.i.l.bf16 %v3763_v39  ;;  %v4807_v27 = vunpack.i.h.bf16 %v3763_v39 }
 0x18e   :  { %v774_v59 = vmul.f32 %v4805_v22, %v769_v28  ;;  %v573_v47 = vrot.slane %v3895_v10, %v3791_v30  ;;  %v746_v45 = vadd.f32 %v742_v8, %v714_v63  ;;  %v747_v20 = vadd.f32 %v743_v44, %v715_v15 }
 0x18f   :  { %v512_v34 = vmul.f32 %v4806_v24, %v509_v46  ;;  %v484_v23 = vadd.f32 %v480_v53, %v452_v57  ;;  %v485_v51 = vadd.f32 %v481_v42, %v453_v61  ;;  %v513_v50 = vmul.f32 %v4807_v27, %v509_v46 }
 0x190   :  { %v4808_v14 = vunpack.i.h.bf16 %v3783_v1  ;;  %v613_v9 = vrot.slane %v3907_v12, %v3777_v7  ;;  %v4809_v55 = vunpack.i.l.bf16 %v3761_v29  ;;  %v4810_v61 = vunpack.i.h.bf16 %v3761_v29  ;;  %v4028_v27 = vpop.permute.xlu1 %2934 }
 0x191   :  { %v516_v2 = vadd.f32 %v512_v34, %v484_v23  ;;  %v517_v60 = vadd.f32 %v513_v50, %v485_v51  ;;  %v4666_v46 = vunpack.i.l.bf16 %v3900_v58  ;;  %v778_v53 = vadd.f32 %v774_v59, %v746_v45  ;;  %4816 = vst [vmem:[#allocation86_spill] sm:$0xff] %v4028_v27 }
 0x192   :  { %v775_v17 = vmul.f32 %v4808_v14, %v769_v28  ;;  %v544_v57 = vmul.f32 %v4809_v55, %v541_v25  ;;  %v545_v48 = vmul.f32 %v4810_v61, %v541_v25  ;;  %v645_v8 = vrot.slane %v3907_v12, %v3779_v5 }
 0x193   :  { %v4811_v52 = vunpack.i.l.bf16 %v3765_v41  ;;  %v4812_v63 = vunpack.i.h.bf16 %v3765_v41  ;;  %v4813_v22 = vunpack.i.l.bf16 %v3869_v21  ;;  %v4814_v25 = vunpack.i.h.bf16 %v3869_v21 }
 0x194   :  { %v779_v10 = vadd.f32 %v775_v17, %v747_v20  ;;  %v548_v44 = vadd.f32 %v544_v57, %v516_v2  ;;  %v549_v28 = vadd.f32 %v545_v48, %v517_v60  ;;  %v4815_v59 = vunpack.i.l.bf16 %v3771_v18 }
 0x195   :  { %v576_v42 = vmul.f32 %v4811_v52, %v573_v47  ;;  %v577_v15 = vmul.f32 %v4812_v63, %v573_v47  ;;  %v806_v24 = vmul.f32 %v4813_v22, %v801_v62  ;;  %v807_v34 = vmul.f32 %v4814_v25, %v801_v62 }
 0x196   :  { %v616_v23 = vmul.f32 %v4815_v59, %v613_v9  ;;  %v677_v51 = vrot.slane %v3907_v12, %v3781_v3  ;;  %v4817_v20 = vunpack.i.h.bf16 %v3771_v18  ;;  %v833_v47 = vrot.slane %v3897_v37, %v3791_v30 }
 0x197   :  { %v580_v50 = vadd.f32 %v576_v42, %v548_v44  ;;  %v581_v45 = vadd.f32 %v577_v15, %v549_v28  ;;  %v4664_v17 = vunpack.i.h.bf16 %v3999_v54  ;;  %v810_v2 = vadd.f32 %v806_v24, %v778_v53 }
 0x198   :  { %v617_v14 = vmul.f32 %v4817_v20, %v613_v9  ;;  %v811_v62 = vadd.f32 %v807_v34, %v779_v10  ;;  %v4818_v60 = vunpack.i.l.bf16 %v3809_v6  ;;  %v4819_v48 = vunpack.i.h.bf16 %v3809_v6 }
 0x199   :  { %v620_v57 = vadd.f32 %v616_v23, %v580_v50  ;;  %v709_v44 = vrot.slane %v3907_v12, %v3785_v38  ;;  %v4665_v9 = vunpack.i.l.bf16 %v3999_v54  ;;  %v741_v37 = vrot.slane %v3907_v12, %v3775_v11 }
 0x19a   :  { %v648_v55 = vmul.f32 %v4818_v60, %v645_v8  ;;  %v621_v61 = vadd.f32 %v617_v14, %v581_v45  ;;  %v649_v52 = vmul.f32 %v4819_v48, %v645_v8  ;;  %v838_v53 = vmul.f32 %v4666_v46, %v833_v47 }
 0x19b   :  { %v4820_v10 = vunpack.i.h.bf16 %v3900_v58  ;;  %v4821_v15 = vunpack.i.l.bf16 %v3829_v56  ;;  %v4822_v8 = vunpack.i.h.bf16 %v3829_v56  ;;  %v4663_v25 = vunpack.i.l.bf16 %v3845_v19 }
 0x19c   :  { %v652_v42 = vadd.f32 %v648_v55, %v620_v57  ;;  %v653_v63 = vadd.f32 %v649_v52, %v621_v61  ;;  %v773_v34 = vrot.slane %v3907_v12, %v3787_v35  ;;  %v842_v59 = vadd.f32 %v838_v53, %v810_v2  ;;  %v4059_v55 = vpop.permute.xlu1 %2940 }
 0x19d   :  { %v839_v28 = vmul.f32 %v4820_v10, %v833_v47  ;;  %v680_v22 = vmul.f32 %v4821_v15, %v677_v51  ;;  %v681_v24 = vmul.f32 %v4822_v8, %v677_v51  ;;  %v4823_v20 = vunpack.i.l.bf16 %v3815_v4  ;;  %4825 = vst [vmem:[#allocation87_spill] sm:$0xff] %v4059_v55 }
 0x19e   :  { %v4824_v47 = vunpack.i.h.bf16 %v3815_v4  ;;  %v744_v51 = vmul.f32 %v4665_v9, %v741_v37  ;;  %v4661_v57 = vunpack.i.h.bf16 %v4028_v27  ;;  %v4662_v61 = vunpack.i.l.bf16 %v4028_v27  ;;  %v4867_v9 = vld [vmem:[#allocation81_spill] sm:$0xff] }
 0x19f   :  { %v843_v23 = vadd.f32 %v839_v28, %v811_v62  ;;  %v684_v50 = vadd.f32 %v680_v22, %v652_v42  ;;  %v685_v45 = vadd.f32 %v681_v24, %v653_v63  ;;  %v712_v14 = vmul.f32 %v4823_v20, %v709_v44  ;;  %v4828_v20 = vld [vmem:[#allocation22_spill] sm:$0xff] }
 0x1a0   :  { %v713_v60 = vmul.f32 %v4824_v47, %v709_v44  ;;  %v745_v2 = vmul.f32 %v4664_v17, %v741_v37  ;;  %v805_v62 = vrot.slane %v3907_v12, %v3789_v32  ;;  %v4659_v44 = vunpack.i.h.bf16 %v4059_v55  ;;  %v4829_v47 = vld [vmem:[#allocation23_spill] sm:$0xff] }
 0x1a1   :  { %v846_v48 = vpack.c.bf16 %v843_v23, %v842_v59  ;;  %v716_v52 = vadd.f32 %v712_v14, %v684_v50  ;;  %v837_v10 = vrot.slane %v3907_v12, %v3791_v30  ;;  %v776_v28 = vmul.f32 %v4663_v25, %v773_v34  ;;  %v4827_v23 = vld [vmem:[#allocation21_spill] sm:$0xff] }
 0x1a2   :  { %v717_v53 = vadd.f32 %v713_v60, %v685_v45  ;;  %v4660_v42 = vunpack.i.l.bf16 %v4059_v55  ;;  %v4826_v37 = vunpack.i.h.bf16 %v3845_v19  ;;  %v808_v12 = vmul.f32 %v4662_v61, %v805_v62  ;;  %v4911_v55 = vld [vmem:[#allocation69_spill] sm:$0xff] }
 0x1a3   :  { %1201 = vmatmul.mubr.bf16.vlgmr.msra.gmra.mrb[0].mxu1 %v846_v48  ;;  %1254 = vmatmul.mubr.bf16.vlgmr.msra.gmra.mrb[4].mxu0 %v846_v48  ;;  %v748_v63 = vadd.f32 %v744_v51, %v716_v52  ;;  %v809_v8 = vmul.f32 %v4661_v57, %v805_v62  ;;  %v4830_v51 = vld [vmem:[#allocation24_spill] sm:$0xff]  ;;  %v4831_v48 = vld [vmem:[#allocation25_spill] sm:$0xff]  ;;  %v4833_v62 = vld [vmem:[#allocation27_spill] sm:$0xff] }
 0x1a4   :  { %v749_v15 = vadd.f32 %v745_v2, %v717_v53  ;;  %v777_v22 = vmul.f32 %v4826_v37, %v773_v34  ;;  %1210 = vmatprep.mubr.bf16.mxu1 %v3866_v16  ;;  %1261 = vmatprep.mubr.bf16.mxu0 %v3866_v16  ;;  %v840_v50 = vmul.f32 %v4660_v42, %v837_v10  ;;  %v4832_v2 = vld [vmem:[#allocation26_spill] sm:$0xff]  ;;  %v4834_v52 = vld [vmem:[#allocation28_spill] sm:$0xff]  ;;  %v4835_v53 = vld [vmem:[#allocation29_spill] sm:$0xff] }
 0x1a5   :  { %1744 = vmatpush1.bf16.msra.mxu1 %v3573_v43  ;;  %v780_v24 = vadd.f32 %v776_v28, %v748_v63  ;;  %v841_v34 = vmul.f32 %v4659_v44, %v837_v10  ;;  %v4836_v10 = vld [vmem:[#allocation30_spill] sm:$0xff]  ;;  %v4837_v28 = vld [vmem:[#allocation31_spill] sm:$0xff]  ;;  %v4838_v63 = vld [vmem:[#allocation33_spill] sm:$0xff] }
 0x1a6   :  { %v781_v59 = vadd.f32 %v777_v22, %v749_v15  ;;  %1745 = vmatprep.subr.bf16.mxu1 %v4827_v23  ;;  %v4839_v15 = vld [vmem:[#allocation35_spill] sm:$0xff]  ;;  %v4840_v37 = vld [vmem:[#allocation36_spill] sm:$0xff]  ;;  %v4841_v22 = vld [vmem:[#allocation38_spill] sm:$0xff] }
 0x1a7   :  { %v812_v45 = vadd.f32 %v808_v12, %v780_v24  ;;  %v4842_v12 = vld [vmem:[#allocation40_spill] sm:$0xff]  ;;  %v4846_v23 = vld [vmem:[#allocation49_spill] sm:$0xff] }
 0x1a8   :  { %v813_v16 = vadd.f32 %v809_v8, %v781_v59  ;;  %v4843_v8 = vld [vmem:[#allocation42_spill] sm:$0xff]  ;;  %v4844_v24 = vld [vmem:[#allocation44_spill] sm:$0xff]  ;;  %v4845_v59 = vld [vmem:[#allocation47_spill] sm:$0xff] }
 0x1a9   :  { %1746 = vmatpush1.bf16.msra.mxu1 %v4828_v20  ;;  %v844_v43 = vadd.f32 %v840_v50, %v812_v45  ;;  %v4847_v50 = vld [vmem:[#allocation52_spill] sm:$0xff] }
 0x1aa   :  { %v845_v14 = vadd.f32 %v841_v34, %v813_v16  ;;  %1747 = vmatprep.subr.bf16.mxu1 %v4829_v47  ;;  %v4848_v34 = vld [vmem:[#allocation54_spill] sm:$0xff]  ;;  %v4849_v45 = vld [vmem:[#allocation56_spill] sm:$0xff]  ;;  %v4854_v47 = vld [vmem:[#allocation67_spill] sm:$0xff] }
 0x1ab   :  { %v4850_v16 = vld [vmem:[#allocation58_spill] sm:$0xff]  ;;  %v4851_v20 = vld [vmem:[#allocation60_spill] sm:$0xff] }
 0x1ac   :  { %v847_v60 = vpack.c.bf16 %v845_v14, %v844_v43  ;;  %v4852_v43 = vld [vmem:[#allocation63_spill] sm:$0xff]  ;;  %v4853_v14 = vld [vmem:[#allocation65_spill] sm:$0xff] }
 0x1ad   :  { %1748 = vmatpush1.bf16.msra.mxu1 %v4830_v51  ;;  %v4856_v51 = vld [vmem:[#allocation73_spill] sm:$0xff] }
 0x1ae   :  { %1211 = vmatmul.mubr.bf16.gmra.mrb[4].mxu1 %v847_v60  ;;  %1262 = vmatmul.mubr.bf16.gmra.mrb[8].mxu0 %v847_v60  ;;  %v4855_v60 = vld [vmem:[#allocation70_spill] sm:$0xff] }
 0x1af   :  { %1749 = vmatprep.subr.bf16.mxu1 %v4831_v48  ;;  %v4118_v48 = vld [vmem:[#allocation10] sm:$0xff]  }
 0x1b0   :  { %4857 = vst [vmem:[#allocation21_spill] sm:$0xff] %v4118_v48  ;;  %2662 = vmatprep.subr.bf16.mxu0 %v4118_v48 }
 0x1b1   :  { %1750 = vmatpush1.bf16.msra.mxu1 %v4832_v2  ;;  %v4120_v2 = vld [vmem:[#allocation10 + $0x8] sm:$0xff]   ;;  %2663 = vmatpush3.bf16.msra.mxu0 %v4118_v48 }
 0x1b2   :  { %1751 = vmatprep.subr.bf16.mxu1 %v4833_v62  ;;  %4858 = vst [vmem:[#allocation22_spill] sm:$0xff] %v4120_v2  ;;  %2664 = vmatprep.subr.bf16.mxu0 %v4120_v2  ;;  %v4125_v62 = vld [vmem:[#allocation10 + $0x10] sm:$0xff]  }
 0x1b3   :  { %4859 = vst [vmem:[#allocation23_spill] sm:$0xff] %v4125_v62 }
 0x1b5   :  { %1752 = vmatpush1.bf16.msra.mxu1 %v4834_v52  ;;  %2665 = vmatpush3.bf16.msra.mxu0 %v4120_v2  ;;  %v4129_v52 = vld [vmem:[#allocation10 + $0x18] sm:$0xff]  }
 0x1b6   :  { %1753 = vmatprep.subr.bf16.mxu1 %v4835_v53  ;;  %2666 = vmatprep.subr.bf16.mxu0 %v4125_v62  ;;  %4860 = vst [vmem:[#allocation24_spill] sm:$0xff] %v4129_v52  ;;  %v4133_v53 = vld [vmem:[#allocation10 + $0x20] sm:$0xff]  }
 0x1b7   :  { %4861 = vst [vmem:[#allocation25_spill] sm:$0xff] %v4133_v53 }
 0x1b9   :  { %1754 = vmatpush1.bf16.msra.mxu1 %v4836_v10  ;;  %2667 = vmatpush3.bf16.msra.mxu0 %v4125_v62  ;;  %v4137_v10 = vld [vmem:[#allocation10 + $0x28] sm:$0xff]  }
 0x1ba   :  { %1755 = vmatprep.subr.bf16.mxu1 %v4837_v28  ;;  %2668 = vmatprep.subr.bf16.mxu0 %v4129_v52  ;;  %4862 = vst [vmem:[#allocation26_spill] sm:$0xff] %v4137_v10  ;;  %v4141_v28 = vld [vmem:[#allocation10 + $0x30] sm:$0xff]  }
 0x1bb   :  { %4863 = vst [vmem:[#allocation27_spill] sm:$0xff] %v4141_v28 }
 0x1bd   :  { %1756 = vmatpush1.bf16.msra.mxu1 %v4838_v63  ;;  %2669 = vmatpush3.bf16.msra.mxu0 %v4129_v52  ;;  %v4145_v63 = vld [vmem:[#allocation10 + $0x38] sm:$0xff]  }
 0x1be   :  { %1757 = vmatprep.subr.bf16.mxu1 %v4839_v15  ;;  %2670 = vmatprep.subr.bf16.mxu0 %v4133_v53  ;;  %4864 = vst [vmem:[#allocation28_spill] sm:$0xff] %v4145_v63  ;;  %v4865_v15 = vld [vmem:[#allocation39_spill] sm:$0xff] }
 0x1c1   :  { %1758 = vmatpush1.bf16.msra.mxu1 %v4840_v37  ;;  %2671 = vmatpush3.bf16.msra.mxu0 %v4133_v53  ;;  %v4154_v37 = vld [vmem:[%s4566_s7] ss:$0 sm:$0xff] }
 0x1c2   :  { %1759 = vmatprep.subr.bf16.mxu1 %v4841_v22  ;;  %2672 = vmatprep.subr.bf16.mxu0 %v4137_v10  ;;  %4866 = vst [vmem:[#allocation29_spill] sm:$0xff] %v4154_v37 }
 0x1c5   :  { %1760 = vmatpush1.bf16.msra.mxu1 %v4842_v12  ;;  %2673 = vmatpush3.bf16.msra.mxu0 %v4137_v10 }
 0x1c6   :  { %1761 = vmatprep.subr.bf16.mxu1 %v4843_v8  ;;  %2674 = vmatprep.subr.bf16.mxu0 %v4141_v28 }
 0x1c9   :  { %1762 = vmatpush1.bf16.msra.mxu1 %v4844_v24  ;;  %2675 = vmatpush3.bf16.msra.mxu0 %v4141_v28 }
 0x1ca   :  { %1763 = vmatprep.subr.bf16.mxu1 %v4845_v59  ;;  %2676 = vmatprep.subr.bf16.mxu0 %v4145_v63 }
 0x1cd   :  { %1764 = vmatpush1.bf16.msra.mxu1 %v4846_v23  ;;  %2677 = vmatpush3.bf16.msra.mxu0 %v4145_v63 }
 0x1ce   :  { %1765 = vmatprep.subr.bf16.mxu1 %v4847_v50  ;;  %2595 = vmatprep.subr.bf16.mxu0 %v4865_v15 }
 0x1d1   :  { %1766 = vmatpush1.bf16.msra.mxu1 %v4848_v34 }
 0x1d2   :  { %1767 = vmatprep.subr.bf16.mxu1 %v4849_v45 }
 0x1d5   :  { %1768 = vmatpush1.bf16.msra.mxu1 %v4850_v16 }
 0x1d6   :  { %1769 = vmatprep.subr.bf16.mxu1 %v4851_v20 }
 0x1d9   :  { %1770 = vmatpush1.bf16.msra.mxu1 %v4852_v43 }
 0x1da   :  { %1771 = vmatprep.subr.bf16.mxu1 %v4853_v14 }
 0x1dd   :  { %1772 = vmatpush1.bf16.msra.mxu1 %v4854_v47 }
 0x1de   :  { %1773 = vmatprep.subr.bf16.mxu1 %v4855_v60 }
 0x1e1   :  { %1774 = vmatpush1.bf16.msra.mxu1 %v4856_v51 }
 0x276   :  { %v4156_v22 = vpop.f32.mrb[0].mxu1  ;;  %v2573_v12 = vpop.f32.mrb[4].mxu0 }
 0x277   :  { %v1204_v8 = vpop.f32.mrb[1].mxu1  ;;  %v2574_v24 = vpop.f32.mrb[5].mxu0 }
 0x278   :  { %v1298_v59 = vadd.f32 %v4154_v37, %v1204_v8  ;;  %v4159_v23 = vadd.f32 %v2574_v24, %v2573_v12  ;;  %v4161_v50 = vpop.f32.mrb[2].mxu1  ;;  %v2576_v34 = vpop.f32.mrb[6].mxu0 }
 0x279   :  { %v1208_v45 = vpop.f32.mrb[3].mxu1  ;;  %v2577_v16 = vpop.f32.mrb[7].mxu0 }
 0x27a   :  { %v2485_v20 = vmul.f32 -1.442695, %v1298_v59  ;;  %v1299_v43 = vadd.f32 %v4154_v37, %v1208_v45  ;;  %v4164_v14 = vadd.f32 %v2577_v16, %v2576_v34 }
 0x27c   :  { %3060 = vpow2.f32 %v2485_v20  ;;  %v2486_v47 = vmul.f32 -1.442695, %v1299_v43 }
 0x27e   :  { %3062 = vpow2.f32 %v2486_v47 }
 0x281   :  { %v1212_v60 = vpop.f32.mrb[4].mxu1  ;;  %v2579_v51 = vpop.f32.mrb[8].mxu0 }
 0x282   :  { %v1214_v15 = vpop.f32.mrb[5].mxu1  ;;  %v2580_v44 = vpop.f32.mrb[9].mxu0 }
 0x283   :  { %v1300_v12 = vadd.f32 %v4154_v37, %v1214_v15  ;;  %v4167_v8 = vadd.f32 %v2580_v44, %v2579_v51  ;;  %v1216_v24 = vpop.f32.mrb[6].mxu1  ;;  %v2582_v42 = vpop.f32.mrb[10].mxu0 }
 0x284   :  { %v1218_v57 = vpop.f32.mrb[7].mxu1  ;;  %v2583_v61 = vpop.f32.mrb[11].mxu0 }
 0x285   :  { %v2487_v59 = vmul.f32 -1.442695, %v1300_v12  ;;  %v1301_v45 = vadd.f32 %v4154_v37, %v1218_v57  ;;  %v4170_v34 = vadd.f32 %v2583_v61, %v2582_v42  ;;  %v4868_v12 = vld [vmem:[#allocation82_spill] sm:$0xff]  ;;  %v4872_v37 = vld [vmem:[#allocation43_spill] sm:$0xff] }
 0x286   :  { %v3061_v16 = vpop.eup %3060 }
 0x287   :  { %v1314_v20 = vadd.f32 1.0, %v3061_v16  ;;  %3064 = vpow2.f32 %v2487_v59  ;;  %v2488_v25 = vmul.f32 -1.442695, %v1301_v45 }
 0x288   :  { %v3063_v43 = vpop.eup %3062 }
 0x289   :  { %3066 = vrcp.f32 %v1314_v20  ;;  %v1315_v47 = vadd.f32 1.0, %v3063_v43  ;;  %v4869_v20 = vld [vmem:[#allocation85_spill] sm:$0xff]  ;;  %v4870_v43 = vld [vmem:[#allocation83_spill] sm:$0xff] }
 0x28b   :  { %3068 = vrcp.f32 %v1315_v47 }
 0x28c   :  { %3070 = vpow2.f32 %v2488_v25 }
 0x291   :  { %v3065_v44 = vpop.eup %3064 }
 0x292   :  { %v1316_v15 = vadd.f32 1.0, %v3065_v44  ;;  %v4871_v44 = vld [vmem:[#allocation41_spill] sm:$0xff] }
 0x293   :  { %v3067_v51 = vpop.eup %3066 }
 0x294   :  { %v1326_v46 = vmul.f32 %v3067_v51, %v4867_v9  ;;  %3072 = vrcp.f32 %v1316_v15  ;;  %v4873_v51 = vld [vmem:[#allocation45_spill] sm:$0xff]  ;;  %v4875_v15 = vld [vmem:[#allocation50_spill] sm:$0xff] }
 0x295   :  { %v3069_v17 = vpop.eup %3068 }
 0x296   :  { %v1327_v63 = vmul.f32 %v3069_v17, %v4868_v12  ;;  %v3071_v57 = vpop.eup %3070  ;;  %v4874_v17 = vld [vmem:[#allocation48_spill] sm:$0xff] }
 0x297   :  { %v1317_v61 = vadd.f32 1.0, %v3071_v57  ;;  %v4878_v57 = vld [vmem:[#allocation57_spill] sm:$0xff] }
 0x298   :  { %v1330_v42 = vpack.c.bf16 %v1327_v63, %v1326_v46  ;;  %v4876_v46 = vld [vmem:[#allocation53_spill] sm:$0xff]  ;;  %v4877_v63 = vld [vmem:[#allocation55_spill] sm:$0xff] }
 0x299   :  { %3074 = vrcp.f32 %v1317_v61  ;;  %v4879_v61 = vld [vmem:[#allocation59_spill] sm:$0xff] }
 0x29a   :  { %2678 = vmatprep.mubr.bf16.mxu0 %v1330_v42  ;;  %v4880_v42 = vld [vmem:[#allocation61_spill] sm:$0xff] }
 0x29e   :  { %v3073_v59 = vpop.eup %3072 }
 0x29f   :  { %v1328_v45 = vmul.f32 %v3073_v59, %v4869_v20  ;;  %v4881_v59 = vld [vmem:[#allocation64_spill] sm:$0xff] }
 0x2a3   :  { %v3075_v16 = vpop.eup %3074 }
 0x2a4   :  { %v1329_v25 = vmul.f32 %v3075_v16, %v4870_v43  ;;  %v4882_v16 = vld [vmem:[#allocation66_spill] sm:$0xff] }
 0x2a6   :  { %v1331_v47 = vpack.c.bf16 %v1329_v25, %v1328_v45  ;;  %v4884_v45 = vld [vmem:[#allocation71_spill] sm:$0xff]  ;;  %v4885_v25 = vld [vmem:[#allocation74_spill] sm:$0xff] }
 0x2a8   :  { %2679 = vmatmul.mubr.bf16.vlgmr.msra.gmra.mrb[12].mxu0 %v1331_v47  ;;  %v4195_v47 = vld [vmem:[%s4565_s6] ss:$0 sm:$0xff] }
 0x2a9   :  { %2596 = vmatpush3.bf16.msra.mxu0 %v4871_v44  ;;  %4886 = vst [vmem:[#allocation30_spill] sm:$0xff] %v4195_v47  ;;  %v1272_v44 = vadd.f32 %v4195_v47, %v1212_v60 }
 0x2aa   :  { %2597 = vmatprep.subr.bf16.mxu0 %v4872_v37  ;;  %v4883_v37 = vld [vmem:[#allocation68_spill] sm:$0xff] }
 0x2ad   :  { %2598 = vmatpush3.bf16.msra.mxu0 %v4873_v51  ;;  %v1270_v51 = vadd.f32 %v4195_v47, %v4156_v22 }
 0x2ae   :  { %2599 = vmatprep.subr.bf16.mxu0 %v4874_v17  ;;  %v1273_v17 = vadd.f32 %v4195_v47, %v1216_v24 }
 0x2b1   :  { %2600 = vmatpush3.bf16.msra.mxu0 %v4875_v15  ;;  %v1271_v15 = vadd.f32 %v4195_v47, %v4161_v50  ;;  %v4206_v50 = vld [vmem:[%s4567_s8] ss:$0 sm:$0xff]  ;;  %s2408_s8 = sshll.u32 %s3342_s25, 4  ;;  %s2409_s8 = int_to_ptr.vmem [resolvable:$true] %s2408_s8 }
 0x2b2   :  { %2601 = vmatprep.subr.bf16.mxu0 %v4876_v46  ;;  %v2483_v46 = vmul.f32 -1.442695, %v1272_v44  ;;  %4887 = vst [vmem:[#allocation31_spill] sm:$0xff] %v4206_v50  ;;  %s3280_s27 = scalar_lea.vmem %s2409_s8, 32  ;;  %p3285_p7 = scmp.lt.s32.totalorder %s2409_s8, %s2409_s8 }
 0x2b3   :  { %p3281_p6 = scmp.ne.s32.totalorder %s2409_s8, %s3280_s27  ;;  %p3286_p8 = scmp.lt.s32.totalorder %s3280_s27, %s3280_s27 }
 0x2b4   :  { %3076 = vpow2.f32 %v2483_v46 }
 0x2b5   :  { %2602 = vmatpush3.bf16.msra.mxu0 %v4877_v63  ;;  %v2481_v63 = vmul.f32 -1.442695, %v1270_v51  ;;  %p3287_p9 = por %p3286_p8, %p3285_p7 }
 0x2b6   :  { %2603 = vmatprep.subr.bf16.mxu0 %v4878_v57  ;;  %v2484_v57 = vmul.f32 -1.442695, %v1273_v17 }
 0x2b7   :  { %3078 = vpow2.f32 %v2481_v63  ;;  %p3288_p10 = pnand %p3287_p9, %p3281_p6 }
 0x2b8   :  { %3080 = vpow2.f32 %v2484_v57 }
 0x2b9   :  { %2604 = vmatpush3.bf16.msra.mxu0 %v4879_v61  ;;  %v2482_v61 = vmul.f32 -1.442695, %v1271_v15 }
 0x2ba   :  { %2605 = vmatprep.subr.bf16.mxu0 %v4880_v42 }
 0x2bb   :  { %3082 = vpow2.f32 %v2482_v61 }
 0x2bd   :  { %2606 = vmatpush3.bf16.msra.mxu0 %v4881_v59 }
 0x2be   :  { %2607 = vmatprep.subr.bf16.mxu0 %v4882_v16  ;;  %v3077_v42 = vpop.eup %3076 }
 0x2c1   :  { %2608 = vmatpush3.bf16.msra.mxu0 %v4883_v37  ;;  %v3079_v59 = vpop.eup %3078  ;;  %v1288_v37 = vadd.f32 1.0, %v3077_v42 }
 0x2c2   :  { %2609 = vmatprep.subr.bf16.mxu0 %v4884_v45  ;;  %v3081_v16 = vpop.eup %3080  ;;  %v1286_v45 = vadd.f32 1.0, %v3079_v59  ;;  %v4888_v59 = vld [vmem:[#allocation32_spill] sm:$0xff] }
 0x2c3   :  { %v1289_v22 = vadd.f32 1.0, %v3081_v16  ;;  %3084 = vrcp.f32 %v1288_v37 }
 0x2c4   :  { %3086 = vrcp.f32 %v1286_v45 }
 0x2c5   :  { %2610 = vmatpush3.bf16.msra.mxu0 %v4885_v25  ;;  %v3083_v60 = vpop.eup %3082  ;;  %3088 = vrcp.f32 %v1289_v22  ;;  %v4890_v22 = vld [vmem:[#allocation34_spill] sm:$0xff] }
 0x2c6   :  { %2682 = vmatprep.subr.bf16.mxu0 %v4118_v48  ;;  %v1287_v25 = vadd.f32 1.0, %v3083_v60  ;;  %v4928_v48 = vld [vmem:[#allocation76_spill] sm:$0xff] }
 0x2c8   :  { %3090 = vrcp.f32 %v1287_v25 }
 0x37b   :  { %v2680_v24 = vpop.f32.mrb[12].mxu0 }
 0x37c   :  { %v1447_v44 = vadd.f32 %v2680_v24, %v4167_v8  ;;  %v1430_v51 = vpop.f32.mrb[13].mxu0  ;;  %v4889_v8 = vld [vmem:[#allocation62_spill] sm:$0xff] }
 0x37d   :  { %v1445_v17 = vadd.f32 %v4159_v23, %v1430_v51  ;;  %v2681_v15 = vpop.f32.mrb[14].mxu0 }
 0x37e   :  { %v1451_v46 = vadd.f32 %v4206_v50, %v1447_v44  ;;  %v1448_v63 = vadd.f32 %v2681_v15, %v4170_v34  ;;  %v1433_v57 = vpop.f32.mrb[15].mxu0  ;;  %v4891_v44 = vld [vmem:[#allocation72_spill] sm:$0xff] }
 0x37f   :  { %v1449_v61 = vadd.f32 %v4206_v50, %v1445_v17  ;;  %v1446_v42 = vadd.f32 %v4164_v14, %v1433_v57  ;;  %v3085_v17 = vpop.eup %3084 }
 0x380   :  { %v1455_v16 = vmul.f32 %v1451_v46, %v4888_v59  ;;  %v1452_v60 = vadd.f32 %v4206_v50, %v1448_v63  ;;  %v3087_v46 = vpop.eup %3086 }
 0x381   :  { %v1453_v37 = vmul.f32 %v1449_v61, %v4889_v8  ;;  %v1450_v45 = vadd.f32 %v4206_v50, %v1446_v42  ;;  %v3089_v61 = vpop.eup %3088 }
 0x382   :  { %v1459_v23 = vmax.f32 %v1455_v16, 0.0  ;;  %v1456_v25 = vmul.f32 %v1452_v60, %v4890_v22  ;;  %v3091_v16 = vpop.eup %3090 }
 0x383   :  { %v1457_v24 = vmax.f32 %v1453_v37, 0.0  ;;  %v1454_v51 = vmul.f32 %v1450_v45, %v4891_v44 }
 0x384   :  { %v1463_v34 = vsub.f32 %v1459_v23, %v4869_v20  ;;  %v1460_v15 = vmax.f32 %v1456_v25, 0.0 }
 0x385   :  { %v1461_v14 = vsub.f32 %v1457_v24, %v4867_v9  ;;  %v1458_v57 = vmax.f32 %v1454_v51, 0.0 }
 0x386   :  { %v1467_v59 = vmul.f32 %v3085_v17, %v1463_v34  ;;  %v1464_v63 = vsub.f32 %v1460_v15, %v4870_v43 }
 0x387   :  { %v1465_v8 = vmul.f32 %v3087_v46, %v1461_v14  ;;  %v1462_v42 = vsub.f32 %v1458_v57, %v4868_v12  ;;  %v4896_v57 = vld [vmem:[#allocation75_spill] sm:$0xff] }
 0x388   :  { %v1468_v60 = vmul.f32 %v3089_v61, %v1464_v63  ;;  %v4225_v45 = vadd.f32 %v1467_v59, %v4869_v20  ;;  %v4897_v46 = vunpack.i.l.bf16 %v4896_v57  ;;  %v4898_v61 = vunpack.i.h.bf16 %v4896_v57 }
 0x389   :  { %v1466_v37 = vmul.f32 %v3091_v16, %v1462_v42  ;;  %v4231_v25 = vadd.f32 %v1465_v8, %v4867_v9  ;;  %v4899_v16 = vld [vmem:[#allocation37_spill] sm:$0xff] }
 0x38a   :  { %4892 = vst [vmem:[#allocation33_spill] sm:$0xff] %v4225_v45  ;;  %v4228_v23 = vadd.f32 %v1468_v60, %v4870_v43  ;;  %v4900_v60 = vunpack.i.l.bf16 %v4899_v16 }
 0x38b   :  { %4894 = vst [vmem:[#allocation36_spill] sm:$0xff] %v4231_v25  ;;  %v4234_v24 = vadd.f32 %v1466_v37, %v4868_v12 }
 0x38c   :  { %4893 = vst [vmem:[#allocation35_spill] sm:$0xff] %v4228_v23  ;;  %v4238_v51 = vpack.c.bf16 %v4228_v23, %v4225_v45 }
 0x38d   :  { %4895 = vst [vmem:[#allocation38_spill] sm:$0xff] %v4234_v24  ;;  %v1473_v34 = vpack.c.bf16 %v4234_v24, %v4231_v25 }
 0x38e   :  { %v1608_v15 = vrot.slane %v4238_v51, 4  ;;  %v4244_v59 = vunpack.c.l.bf16 %v4238_v51 }
 0x38f   :  { %v1475_v20 = vunpack.c.l.bf16 %v1473_v34  ;;  %1775 = vmatprep.mubr.bf16.mxu1 %v1473_v34  ;;  %1828 = vmatprep.mubr.bf16.mxu0 %v1473_v34  ;;  %v1607_v43 = vrot.slane %v1473_v34, 4  ;;  %v4901_v34 = vunpack.i.h.bf16 %v4899_v16 }
 0x390   :  { %v4250_v14 = vunpack.c.l.bf16 %v1608_v15  ;;  %v1484_v15 = vrot.slane %v4244_v59, %v3777_v7 }
 0x391   :  { %v1480_v9 = vrot.slane %v1475_v20, %v3777_v7  ;;  %v1496_v12 = vrot.slane %v1475_v20, %v3779_v5  ;;  %v1512_v8 = vrot.slane %v1475_v20, %v3781_v3  ;;  %v1528_v17 = vrot.slane %v1475_v20, %v3785_v38 }
 0x392   :  { %v1611_v22 = vunpack.c.l.bf16 %v1607_v43  ;;  %v1544_v50 = vrot.slane %v1475_v20, %v3775_v11  ;;  %v1560_v47 = vrot.slane %v1475_v20, %v3787_v35  ;;  %v1576_v43 = vrot.slane %v1475_v20, %v3789_v32 }
 0x393   :  { %v1485_v63 = vmul.f32 %v4897_v46, %v1480_v9  ;;  %v1486_v42 = vmul.f32 %v4898_v61, %v1480_v9  ;;  %v1501_v37 = vmul.f32 %v4900_v60, %v1496_v12  ;;  %v1502_v44 = vmul.f32 %v4901_v34, %v1496_v12  ;;  %v4902_v46 = vld [vmem:[#allocation77_spill] sm:$0xff]  ;;  %v4905_v60 = vld [vmem:[#allocation46_spill] sm:$0xff] }
 0x394   :  { %v4903_v24 = vunpack.i.l.bf16 %v4902_v46  ;;  %v4904_v9 = vunpack.i.h.bf16 %v4902_v46  ;;  %v4906_v25 = vunpack.i.l.bf16 %v4905_v60  ;;  %v1500_v12 = vrot.slane %v4244_v59, %v3779_v5 }
 0x395   :  { %v1505_v23 = vadd.f32 %v1501_v37, %v1485_v63  ;;  %v1506_v45 = vadd.f32 %v1502_v44, %v1486_v42  ;;  %v1516_v34 = vrot.slane %v4244_v59, %v3781_v3  ;;  %v4907_v44 = vunpack.i.h.bf16 %v4905_v60  ;;  %v4908_v37 = vld [vmem:[#allocation51_spill] sm:$0xff] }
 0x396   :  { %v1517_v57 = vmul.f32 %v4903_v24, %v1512_v8  ;;  %v1518_v61 = vmul.f32 %v4904_v9, %v1512_v8  ;;  %v1533_v16 = vmul.f32 %v4906_v25, %v1528_v17  ;;  %v1592_v24 = vrot.slane %v1475_v20, %v3791_v30 }
 0x397   :  { %v1534_v42 = vmul.f32 %v4907_v44, %v1528_v17  ;;  %v4909_v8 = vunpack.i.l.bf16 %v4908_v37  ;;  %v4910_v25 = vunpack.i.h.bf16 %v4908_v37  ;;  %v1616_v10 = vrot.slane %v1611_v22, %v3777_v7 }
 0x398   :  { %v1521_v28 = vadd.f32 %v1517_v57, %v1505_v23  ;;  %v1522_v63 = vadd.f32 %v1518_v61, %v1506_v45  ;;  %v1632_v53 = vrot.slane %v1611_v22, %v3779_v5  ;;  %v4912_v23 = vunpack.i.l.bf16 %v4911_v55 }
 0x399   :  { %v1549_v46 = vmul.f32 %v4909_v8, %v1544_v50  ;;  %v1550_v9 = vmul.f32 %v4910_v25, %v1544_v50  ;;  %v1648_v57 = vrot.slane %v1611_v22, %v3781_v3  ;;  %v4913_v17 = vunpack.i.h.bf16 %v4911_v55  ;;  %v4918_v55 = vld [vmem:[#allocation78_spill] sm:$0xff] }
 0x39a   :  { %v1537_v52 = vadd.f32 %v1533_v16, %v1521_v28  ;;  %v1538_v62 = vadd.f32 %v1534_v42, %v1522_v63  ;;  %v1565_v45 = vmul.f32 %v4912_v23, %v1560_v47  ;;  %v4914_v61 = vunpack.i.l.bf16 %v3738_v40 }
 0x39b   :  { %v1566_v20 = vmul.f32 %v4913_v17, %v1560_v47  ;;  %v4915_v44 = vunpack.i.h.bf16 %v3738_v40  ;;  %v1664_v37 = vrot.slane %v1611_v22, %v3785_v38  ;;  %v4916_v28 = vunpack.i.l.bf16 %v3759_v31 }
 0x39c   :  { %v1581_v60 = vmul.f32 %v4914_v61, %v1576_v43  ;;  %v1553_v8 = vadd.f32 %v1549_v46, %v1537_v52  ;;  %v1554_v25 = vadd.f32 %v1550_v9, %v1538_v62  ;;  %v1680_v63 = vrot.slane %v1611_v22, %v3775_v11  ;;  %v4923_v9 = vld [vmem:[#allocation79_spill] sm:$0xff] }
 0x39d   :  { %v1582_v50 = vmul.f32 %v4915_v44, %v1576_v43  ;;  %v1597_v16 = vmul.f32 %v4916_v28, %v1592_v24  ;;  %v4917_v42 = vunpack.i.h.bf16 %v3759_v31  ;;  %v4919_v47 = vunpack.i.l.bf16 %v4918_v55 }
 0x39e   :  { %v4920_v61 = vunpack.i.h.bf16 %v4918_v55  ;;  %v4921_v40 = vunpack.i.l.bf16 %v3757_v33  ;;  %v1569_v44 = vadd.f32 %v1565_v45, %v1553_v8  ;;  %v1570_v52 = vadd.f32 %v1566_v20, %v1554_v25 }
 0x39f   :  { %v1598_v23 = vmul.f32 %v4917_v42, %v1592_v24  ;;  %v1621_v17 = vmul.f32 %v4919_v47, %v1616_v10  ;;  %v4922_v62 = vunpack.i.h.bf16 %v3757_v33  ;;  %v4924_v28 = vunpack.i.l.bf16 %v4923_v9  ;;  %v4926_v42 = vld [vmem:[#allocation80_spill] sm:$0xff] }
 0x3a0   :  { %v1622_v27 = vmul.f32 %v4920_v61, %v1616_v10  ;;  %v1637_v43 = vmul.f32 %v4921_v40, %v1632_v53  ;;  %v4925_v31 = vunpack.i.h.bf16 %v4923_v9  ;;  %v4927_v19 = vunpack.i.l.bf16 %v4926_v42 }
 0x3a1   :  { %v1638_v46 = vmul.f32 %v4922_v62, %v1632_v53  ;;  %v1653_v2 = vmul.f32 %v4924_v28, %v1648_v57  ;;  %v4929_v55 = vunpack.i.l.bf16 %v4928_v48  ;;  %v4930_v61 = vunpack.i.l.bf16 %v3698_v26 }
 0x3a2   :  { %v1654_v24 = vmul.f32 %v4925_v31, %v1648_v57  ;;  %v1669_v47 = vmul.f32 %v4927_v19, %v1664_v37  ;;  %v1585_v45 = vadd.f32 %v1581_v60, %v1569_v44  ;;  %v1586_v20 = vadd.f32 %v1582_v50, %v1570_v52 }
 0x3a3   :  { %v1487_v10 = vmul.f32 %v4929_v55, %v1484_v15  ;;  %v1503_v40 = vmul.f32 %v4930_v61, %v1500_v12  ;;  %v4931_v33 = vunpack.i.h.bf16 %v4926_v42  ;;  %v4932_v8 = vunpack.i.h.bf16 %v4928_v48 }
 0x3a4   :  { %v4933_v62 = vunpack.i.l.bf16 %v3773_v13  ;;  %v4934_v9 = vunpack.i.h.bf16 %v3773_v13  ;;  %v1696_v28 = vrot.slane %v1611_v22, %v3787_v35  ;;  %v1712_v31 = vrot.slane %v1611_v22, %v3789_v32 }
 0x3a5   :  { %v1670_v53 = vmul.f32 %v4931_v33, %v1664_v37  ;;  %v1488_v25 = vmul.f32 %v4932_v8, %v1484_v15  ;;  %v1601_v55 = vadd.f32 %v1597_v16, %v1585_v45  ;;  %v1602_v61 = vadd.f32 %v1598_v23, %v1586_v20 }
 0x3a6   :  { %v1685_v57 = vmul.f32 %v4933_v62, %v1680_v63  ;;  %v1686_v19 = vmul.f32 %v4934_v9, %v1680_v63  ;;  %v4935_v60 = vunpack.i.h.bf16 %v3698_v26  ;;  %v1507_v44 = vadd.f32 %v1503_v40, %v1487_v10 }
 0x3a7   :  { %v1728_v37 = vrot.slane %v1611_v22, %v3791_v30  ;;  %v4936_v48 = vunpack.i.l.bf16 %v3755_v36  ;;  %v1532_v52 = vrot.slane %v4244_v59, %v3785_v38  ;;  %v1548_v13 = vrot.slane %v4244_v59, %v3775_v11 }
 0x3a8   :  { %v1504_v50 = vmul.f32 %v4935_v60, %v1500_v12  ;;  %v1625_v63 = vadd.f32 %v1621_v17, %v1601_v55  ;;  %v1626_v42 = vadd.f32 %v1622_v27, %v1602_v61  ;;  %v4937_v16 = vunpack.i.h.bf16 %v3755_v36 }
 0x3a9   :  { %v1519_v15 = vmul.f32 %v4936_v48, %v1516_v34  ;;  %v4938_v26 = vunpack.i.l.bf16 %v3783_v1  ;;  %v4939_v22 = vunpack.i.l.bf16 %v3745_v49  ;;  %v1564_v45 = vrot.slane %v4244_v59, %v3787_v35 }
 0x3aa   :  { %v1508_v33 = vadd.f32 %v1504_v50, %v1488_v25  ;;  %v1520_v23 = vmul.f32 %v4937_v16, %v1516_v34  ;;  %v1641_v20 = vadd.f32 %v1637_v43, %v1625_v63  ;;  %v1642_v8 = vadd.f32 %v1638_v46, %v1626_v42 }
 0x3ab   :  { %v1701_v12 = vmul.f32 %v4938_v26, %v1696_v28  ;;  %v1523_v10 = vadd.f32 %v1519_v15, %v1507_v44  ;;  %v1535_v40 = vmul.f32 %v4939_v22, %v1532_v52  ;;  %v4940_v17 = vunpack.i.h.bf16 %v3745_v49 }
 0x3ac   :  { %v1524_v62 = vadd.f32 %v1520_v23, %v1508_v33  ;;  %v4941_v25 = vunpack.i.h.bf16 %v3783_v1  ;;  %v4942_v9 = vunpack.i.l.bf16 %v3749_v0  ;;  %v1580_v61 = vrot.slane %v4244_v59, %v3789_v32 }
 0x3ad   :  { %v1536_v27 = vmul.f32 %v4940_v17, %v1532_v52  ;;  %v1539_v34 = vadd.f32 %v1535_v40, %v1523_v10  ;;  %v1657_v60 = vadd.f32 %v1653_v2, %v1641_v20  ;;  %v1658_v50 = vadd.f32 %v1654_v24, %v1642_v8 }
 0x3ae   :  { %v1702_v36 = vmul.f32 %v4941_v25, %v1696_v28  ;;  %v1551_v55 = vmul.f32 %v4942_v9, %v1548_v13  ;;  %v4943_v43 = vunpack.i.h.bf16 %v3749_v0  ;;  %v4944_v48 = vunpack.i.l.bf16 %v3869_v21 }
 0x3af   :  { %v1540_v44 = vadd.f32 %v1536_v27, %v1524_v62  ;;  %v4945_v1 = vunpack.i.l.bf16 %v3763_v39  ;;  %v1596_v52 = vrot.slane %v4244_v59, %v3791_v30  ;;  %v1673_v63 = vadd.f32 %v1669_v47, %v1657_v60 }
 0x3b0   :  { %v1552_v46 = vmul.f32 %v4943_v43, %v1548_v13  ;;  %v1717_v49 = vmul.f32 %v4944_v48, %v1712_v31  ;;  %v1555_v15 = vadd.f32 %v1551_v55, %v1539_v34  ;;  %v1674_v42 = vadd.f32 %v1670_v53, %v1658_v50 }
 0x3b1   :  { %v1567_v28 = vmul.f32 %v4945_v1, %v1564_v45  ;;  %v4946_v2 = vunpack.i.h.bf16 %v3763_v39  ;;  %v4947_v16 = vunpack.i.h.bf16 %v3869_v21  ;;  %v4948_v23 = vunpack.i.l.bf16 %v3761_v29 }
 0x3b2   :  { %v1556_v33 = vadd.f32 %v1552_v46, %v1540_v44  ;;  %v1620_v10 = vrot.slane %v4250_v14, %v3777_v7  ;;  %v1689_v22 = vadd.f32 %v1685_v57, %v1673_v63  ;;  %v1690_v40 = vadd.f32 %v1686_v19, %v1674_v42 }
 0x3b3   :  { %v1568_v24 = vmul.f32 %v4946_v2, %v1564_v45  ;;  %v1718_v0 = vmul.f32 %v4947_v16, %v1712_v31  ;;  %v1571_v13 = vadd.f32 %v1567_v28, %v1555_v15  ;;  %v1583_v26 = vmul.f32 %v4948_v23, %v1580_v61 }
 0x3b4   :  { %v4949_v59 = vunpack.i.h.bf16 %v3761_v29  ;;  %v4950_v53 = vunpack.i.l.bf16 %v3900_v58  ;;  %v4951_v21 = vunpack.i.l.bf16 %v3765_v41  ;;  %v1636_v8 = vrot.slane %v4250_v14, %v3779_v5 }
 0x3b5   :  { %v1572_v20 = vadd.f32 %v1568_v24, %v1556_v33  ;;  %v1587_v45 = vadd.f32 %v1583_v26, %v1571_v13  ;;  %v1705_v62 = vadd.f32 %v1701_v12, %v1689_v22  ;;  %v1706_v17 = vadd.f32 %v1702_v36, %v1690_v40 }
 0x3b6   :  { %v1584_v47 = vmul.f32 %v4949_v59, %v1580_v61  ;;  %v1733_v39 = vmul.f32 %v4950_v53, %v1728_v37  ;;  %v1599_v31 = vmul.f32 %v4951_v21, %v1596_v52  ;;  %v4952_v57 = vunpack.i.h.bf16 %v3765_v41 }
 0x3b7   :  { %v4953_v25 = vunpack.i.h.bf16 %v3900_v58  ;;  %v4954_v9 = vunpack.i.l.bf16 %v3771_v18  ;;  %v1652_v61 = vrot.slane %v4250_v14, %v3781_v3  ;;  %v1721_v60 = vadd.f32 %v1717_v49, %v1705_v62 }
 0x3b8   :  { %v1588_v27 = vadd.f32 %v1584_v47, %v1572_v20  ;;  %v1600_v19 = vmul.f32 %v4952_v57, %v1596_v52  ;;  %v1603_v34 = vadd.f32 %v1599_v31, %v1587_v45  ;;  %v1722_v50 = vadd.f32 %v1718_v0, %v1706_v17  ;;  %v4964_v20 = vld [vmem:[#allocation21_spill] sm:$0xff] }
 0x3b9   :  { %v1734_v29 = vmul.f32 %v4953_v25, %v1728_v37  ;;  %v1623_v55 = vmul.f32 %v4954_v9, %v1620_v10  ;;  %v4955_v12 = vunpack.i.h.bf16 %v3771_v18  ;;  %v4956_v41 = vunpack.i.l.bf16 %v3809_v6  ;;  %v4972_v25 = vld [vmem:[#allocation87_spill] sm:$0xff] }
 0x3ba   :  { %v1604_v44 = vadd.f32 %v1600_v19, %v1588_v27  ;;  %v1668_v58 = vrot.slane %v4250_v14, %v3785_v38  ;;  %v1737_v37 = vadd.f32 %v1733_v39, %v1721_v60  ;;  %v4957_v1 = vunpack.i.h.bf16 %v3809_v6  ;;  %v4967_v39 = vld [vmem:[#allocation22_spill] sm:$0xff] }
 0x3bb   :  { %v1624_v36 = vmul.f32 %v4955_v12, %v1620_v10  ;;  %v1627_v43 = vadd.f32 %v1623_v55, %v1603_v34  ;;  %v1639_v46 = vmul.f32 %v4956_v41, %v1636_v8  ;;  %v1738_v48 = vadd.f32 %v1734_v29, %v1722_v50  ;;  %v4976_v50 = vld [vmem:[#allocation24_spill] sm:$0xff]  ;;  %v4980_v41 = vld [vmem:[#allocation27_spill] sm:$0xff] }
 0x3bc   :  { %v1640_v28 = vmul.f32 %v4957_v1, %v1636_v8  ;;  %v4958_v49 = vunpack.i.l.bf16 %v3829_v56  ;;  %v1684_v18 = vrot.slane %v4250_v14, %v3775_v11  ;;  %v4959_v33 = vunpack.i.h.bf16 %v3829_v56  ;;  %v4969_v8 = vld [vmem:[#allocation86_spill] sm:$0xff]  ;;  %v3036_v1 = vld [vmem:[#allocation11 + $0x24] ss:$8 sps:$4 sm:$0xff]  }
 0x3bd   :  { %v1628_v15 = vadd.f32 %v1624_v36, %v1604_v44  ;;  %v1643_v3 = vadd.f32 %v1639_v46, %v1627_v43  ;;  %v1741_v63 = vpack.c.bf16 %v1738_v48, %v1737_v37  ;;  %v4960_v38 = vunpack.i.l.bf16 %v3815_v4  ;;  %v4978_v36 = vld [vmem:[#allocation25_spill] sm:$0xff]  ;;  %v4979_v43 = vld [vmem:[#allocation26_spill] sm:$0xff]  ;;  %v4981_v46 = vld [vmem:[#allocation28_spill] sm:$0xff] }
 0x3be   :  { %v1655_v52 = vmul.f32 %v4958_v49, %v1652_v61  ;;  %v1656_v2 = vmul.f32 %v4959_v33, %v1652_v61  ;;  %v1700_v6 = vrot.slane %v4250_v14, %v3787_v35  ;;  %v4961_v13 = vunpack.i.h.bf16 %v3815_v4  ;;  %v4965_v4 = vld [vmem:[#allocation84_spill] sm:$0xff]  ;;  %v3033_v48 = vld [vmem:[#allocation11 + $0x14] ss:$8 sps:$4 sm:$0xff]  }
 0x3bf   :  { %v1644_v42 = vadd.f32 %v1640_v28, %v1628_v15  ;;  %v1671_v16 = vmul.f32 %v4960_v38, %v1668_v58  ;;  %1776 = vmatmul.mubr.bf16.vlgmr.msra.gmra.mrb[8].mxu1 %v1741_v63  ;;  %1829 = vmatmul.mubr.bf16.vlgmr.msra.gmra.mrb[16].mxu0 %v1741_v63  ;;  %v4962_v56 = vunpack.i.l.bf16 %v3999_v54  ;;  %v1716_v10 = vrot.slane %v4250_v14, %v3789_v32  ;;  %v3030_v37 = vld [vmem:[#allocation11 + $0x4] ss:$8 sps:$4 sm:$0xff]   ;;  %v3031_v15 = vld [vmem:[#allocation11 + $0x10] ss:$8 sps:$4 sm:$0xff]   ;;  %v3034_v28 = vld [vmem:[#allocation11 + $0x20] ss:$8 sps:$4 sm:$0xff]  }
 0x3c0   :  { %v1659_v24 = vadd.f32 %v1655_v52, %v1643_v3  ;;  %v1672_v23 = vmul.f32 %v4961_v13, %v1668_v58  ;;  %1785 = vmatprep.mubr.bf16.mxu1 %v4238_v51  ;;  %1836 = vmatprep.mubr.bf16.mxu0 %v4238_v51  ;;  %v4963_v35 = vunpack.i.h.bf16 %v3999_v54  ;;  %v4966_v47 = vunpack.i.l.bf16 %v4965_v4  ;;  %v3028_v58 = vld [vmem:[#allocation11] ss:$8 sps:$4 sm:$0xff]   ;;  %v4982_v63 = vld [vmem:[#allocation29_spill] sm:$0xff] }
 0x3c1   :  { %v1660_v0 = vadd.f32 %v1656_v2, %v1644_v42  ;;  %v1687_v26 = vmul.f32 %v4962_v56, %v1684_v18  ;;  %2683 = vmatpush3.bf16.msra.mxu0 %v4964_v20  ;;  %v1732_v51 = vrot.slane %v4250_v14, %v3791_v30  ;;  %v4968_v21 = vunpack.i.h.bf16 %v4965_v4  ;;  %v4974_v14 = vld [vmem:[#allocation23_spill] sm:$0xff]  ;;  %2094 = vmatprep.subr.bf16.mxu1 %v3030_v37  ;;  %v3043_v37 = vld [vmem:[#allocation11 + $0x50] ss:$8 sps:$4 sm:$0xff]  }
 0x3c2   :  { %v1675_v11 = vadd.f32 %v1671_v16, %v1659_v24  ;;  %v1688_v40 = vmul.f32 %v4963_v35, %v1684_v18  ;;  %v1703_v53 = vmul.f32 %v4966_v47, %v1700_v6  ;;  %2684 = vmatprep.subr.bf16.mxu0 %v4967_v39  ;;  %v4970_v62 = vunpack.i.l.bf16 %v4969_v8  ;;  %2095 = vmatpush1.bf16.msra.mxu1 %v3028_v58  ;;  %v3045_v58 = vld [vmem:[#allocation11 + $0x54] ss:$8 sps:$4 sm:$0xff]  }
 0x3c3   :  { %v1676_v22 = vadd.f32 %v1672_v23, %v1660_v0  ;;  %v1704_v31 = vmul.f32 %v4968_v21, %v1700_v6  ;;  %v4971_v27 = vunpack.i.h.bf16 %v4969_v8  ;;  %v4973_v29 = vunpack.i.l.bf16 %v4972_v25  ;;  %2096 = vmatprep.subr.bf16.mxu1 %v3033_v48  ;;  %v3048_v48 = vld [vmem:[#allocation11 + $0x64] ss:$8 sps:$4 sm:$0xff]  }
 0x3c4   :  { %v1691_v59 = vadd.f32 %v1687_v26, %v1675_v11  ;;  %v1719_v54 = vmul.f32 %v4970_v62, %v1716_v10  ;;  %v4975_v9 = vunpack.i.h.bf16 %v4972_v25  ;;  %v4977_v12 = vmov 0  }
 0x3c5   :  { %v1692_v45 = vadd.f32 %v1688_v40, %v1676_v22  ;;  %v1720_v57 = vmul.f32 %v4971_v27, %v1716_v10  ;;  %2685 = vmatpush3.bf16.msra.mxu0 %v4967_v39  ;;  %v1735_v30 = vmul.f32 %v4973_v29, %v1732_v51  ;;  %v4984_v27 = vld [vmem:[#allocation38_spill] sm:$0xff] }
 0x3c6   :  { %v1707_v32 = vadd.f32 %v1703_v53, %v1691_v59  ;;  %2686 = vmatprep.subr.bf16.mxu0 %v4974_v14  ;;  %v1736_v55 = vmul.f32 %v4975_v9, %v1732_v51  ;;  %2097 = vmatpush1.bf16.msra.mxu1 %v3031_v15  ;;  %v4987_v15 = vld [vmem:[#allocation19_spill] sm:$0xff] }
 0x3c7   :  { %v1708_v17 = vadd.f32 %v1704_v31, %v1692_v45  ;;  %2098 = vmatprep.subr.bf16.mxu1 %v3036_v1  ;;  %v2196_v1 = vrot.slane %v4987_v15, 4 }
 0x3c8   :  { %v1723_v19 = vadd.f32 %v1719_v54, %v1707_v32  ;;  %v4983_v54 = vld [vmem:[#allocation36_spill] sm:$0xff] }
 0x3c9   :  { %v1724_v34 = vadd.f32 %v1720_v57, %v1708_v17  ;;  %2687 = vmatpush3.bf16.msra.mxu0 %v4974_v14 }
 0x3ca   :  { %v1739_v61 = vadd.f32 %v1735_v30, %v1723_v19  ;;  %2688 = vmatprep.subr.bf16.mxu0 %v4976_v50  ;;  %2099 = vmatpush1.bf16.msra.mxu1 %v3034_v28  ;;  %v4988_v28 = vld [vmem:[#allocation20_spill] sm:$0xff] }
 0x3cb   :  { %v1740_v60 = vadd.f32 %v1736_v55, %v1724_v34  ;;  %v4985_v55 = vld [vmem:[#allocation33_spill] sm:$0xff] }
 0x3cd   :  { %v1742_v44 = vpack.c.bf16 %v1740_v60, %v1739_v61  ;;  %2689 = vmatpush3.bf16.msra.mxu0 %v4976_v50  ;;  %v4986_v60 = vld [vmem:[#allocation35_spill] sm:$0xff] }
 0x3ce   :  { %2690 = vmatprep.subr.bf16.mxu0 %v4978_v36 }
 0x3cf   :  { %1786 = vmatmul.mubr.bf16.gmra.mrb[12].mxu1 %v1742_v44  ;;  %1837 = vmatmul.mubr.bf16.gmra.mrb[20].mxu0 %v1742_v44 }
 0x3d0   :  { %2126 = vmatprep.mubr.bf16.mxu1 %v4977_v12 }
 0x3d1   :  { %2691 = vmatpush3.bf16.msra.mxu0 %v4978_v36  ;;  %v3037_v36 = vld [vmem:[#allocation11 + $0x30] ss:$8 sps:$4 sm:$0xff]  }
 0x3d2   :  { %2692 = vmatprep.subr.bf16.mxu0 %v4979_v43 }
 0x3d5   :  { %2693 = vmatpush3.bf16.msra.mxu0 %v4979_v43  ;;  %v3039_v43 = vld [vmem:[#allocation11 + $0x34] ss:$8 sps:$4 sm:$0xff]  }
 0x3d6   :  { %2694 = vmatprep.subr.bf16.mxu0 %v4980_v41  ;;  %2100 = vmatprep.subr.bf16.mxu1 %v3039_v43 }
 0x3d7   :  { %2101 = vmatpush1.bf16.msra.mxu1 %v3037_v36 }
 0x3d9   :  { %2695 = vmatpush3.bf16.msra.mxu0 %v4980_v41  ;;  %v3040_v41 = vld [vmem:[#allocation11 + $0x40] ss:$8 sps:$4 sm:$0xff]  }
 0x3da   :  { %2696 = vmatprep.subr.bf16.mxu0 %v4981_v46 }
 0x3dd   :  { %2697 = vmatpush3.bf16.msra.mxu0 %v4981_v46  ;;  %v3042_v46 = vld [vmem:[#allocation11 + $0x44] ss:$8 sps:$4 sm:$0xff]  }
 0x3de   :  { %2102 = vmatprep.subr.bf16.mxu1 %v3042_v46 }
 0x3df   :  { %2103 = vmatpush1.bf16.msra.mxu1 %v3040_v41 }
 0x3e0   :  { %2104 = vmatprep.subr.bf16.mxu1 %v3045_v58 }
 0x3e3   :  { %2105 = vmatpush1.bf16.msra.mxu1 %v3043_v37 }
 0x3e4   :  { %2106 = vmatprep.subr.bf16.mxu1 %v3048_v48 }
 0x492   :  { %v4442_v3 = vpop.f32.mrb[8].mxu1  ;;  %v2611_v49 = vpop.f32.mrb[16].mxu0 }
 0x493   :  { %v1779_v52 = vpop.f32.mrb[9].mxu1  ;;  %v2612_v18 = vpop.f32.mrb[17].mxu0 }
 0x494   :  { %v1873_v42 = vadd.f32 %v4982_v63, %v1779_v52  ;;  %v4445_v33 = vadd.f32 %v2612_v18, %v2611_v49  ;;  %v4447_v2 = vpop.f32.mrb[10].mxu1  ;;  %v2614_v24 = vpop.f32.mrb[18].mxu0  ;;  %v2187_v49 = vrot.slane %v4988_v28, 4  ;;  %v3046_v52 = vld [vmem:[#allocation11 + $0x60] ss:$8 sps:$4 sm:$0xff]  }
 0x495   :  { %v1783_v38 = vpop.f32.mrb[11].mxu1  ;;  %v2615_v16 = vpop.f32.mrb[19].mxu0  ;;  %v3144_v18 = vld [vmem:[%s4561_s2] sm:$0xff]  ;;  %2107 = vmatpush1.bf16.msra.mxu1 %v3046_v52 }
 0x496   :  { %v2501_v6 = vmul.f32 -1.442695, %v1873_v42  ;;  %v1874_v0 = vadd.f32 %v4982_v63, %v1783_v38  ;;  %v4450_v13 = vadd.f32 %v2615_v16, %v2614_v24  ;;  %v3145_v42 = vld [vmem:[%s4561_s2 + $0x8] sm:$0xff]  ;;  %v3051_v38 = vld [vmem:[#allocation11 + $0x74] ss:$8 sps:$4 sm:$0xff]   ;;  %v2197_v16 = vadd.f32 %v2196_v1, %v4987_v15 }
 0x497   :  { %v2526_v24 = vadd.f32 -1.0, %v3145_v42  ;;  %2108 = vmatprep.subr.bf16.mxu1 %v3051_v38  ;;  %v4990_v15 = vld [vmem:[#allocation31_spill] sm:$0xff] }
 0x498   :  { %3092 = vpow2.f32 %v2501_v6  ;;  %v2502_v23 = vmul.f32 -1.442695, %v1874_v0  ;;  %v2188_v6 = vadd.f32 %v2187_v49, %v4988_v28  ;;  %v3146_v0 = vld [vmem:[%s4561_s2 + $0x10] sm:$0xff] }
 0x49a   :  { %3094 = vpow2.f32 %v2502_v23  ;;  %v2527_v23 = vadd.f32 -1.0, %v3146_v0 }
 0x4a2   :  { %v4452_v11 = vpop.f32.mrb[12].mxu1  ;;  %v2617_v56 = vpop.f32.mrb[20].mxu0 }
 0x4a3   :  { %v1789_v26 = vpop.f32.mrb[13].mxu1  ;;  %v2618_v10 = vpop.f32.mrb[21].mxu0 }
 0x4a4   :  { %v3093_v22 = vpop.eup %3092  ;;  %v1875_v35 = vadd.f32 %v4982_v63, %v1789_v26  ;;  %v4455_v40 = vadd.f32 %v2618_v10, %v2617_v56  ;;  %v4457_v20 = vpop.f32.mrb[14].mxu1  ;;  %v3147_v56 = vld [vmem:[%s4561_s2 + $0x18] sm:$0xff] }
 0x4a5   :  { %v2620_v59 = vpop.f32.mrb[22].mxu0  ;;  %v1889_v4 = vadd.f32 1.0, %v3093_v22  ;;  %v1793_v47 = vpop.f32.mrb[15].mxu1  ;;  %v2528_v26 = vadd.f32 -1.0, %v3147_v56  ;;  %v3049_v10 = vld [vmem:[#allocation11 + $0x70] ss:$8 sps:$4 sm:$0xff]  }
 0x4a6   :  { %v2621_v53 = vpop.f32.mrb[23].mxu0  ;;  %v3095_v51 = vpop.eup %3094  ;;  %v1876_v39 = vadd.f32 %v4982_v63, %v1793_v47  ;;  %v2503_v21 = vmul.f32 -1.442695, %v1875_v35  ;;  %v2525_v63 = vadd.f32 -1.0, %v3144_v18  ;;  %v2209_v22 = vmul.f32 1e+09, %v2526_v24  ;;  %2109 = vmatpush1.bf16.msra.mxu1 %v3049_v10 }
 0x4a7   :  { %3096 = vrcp.f32 %v1889_v4  ;;  %v1890_v45 = vadd.f32 1.0, %v3095_v51  ;;  %v4460_v31 = vadd.f32 %v2621_v53, %v2620_v59  ;;  %v2189_v59 = vrot.slane %v2188_v6, 2  ;;  %v4994_v56 = vld [vmem:[#allocation72_spill] sm:$0xff] }
 0x4a8   :  { %v2504_v32 = vmul.f32 -1.442695, %v1876_v39  ;;  %v2208_v35 = vmul.f32 1e+09, %v2525_v63  ;;  %v2198_v4 = vrot.slane %v2197_v16, 2  ;;  %2247 = vperm.xlu1 %2945, %v2209_v22   ;;  %v4991_v63 = vld [vmem:[#allocation32_spill] sm:$0xff] }
 0x4a9   :  { %3098 = vrcp.f32 %v1890_v45  ;;  %v2210_v47 = vmul.f32 1e+09, %v2527_v23  ;;  %v2211_v53 = vmul.f32 1e+09, %v2528_v26  ;;  %v2190_v51 = vadd.f32 %v2189_v59, %v2188_v6  ;;  %v4993_v6 = vld [vmem:[#allocation34_spill] sm:$0xff] }
 0x4aa   :  { %3100 = vpow2.f32 %v2503_v21  ;;  %2242 = vperm.xlu0 %2944, %v2208_v35   ;;  %v2199_v39 = vadd.f32 %v2198_v4, %v2197_v16 }
 0x4ab   :  { %3102 = vpow2.f32 %v2504_v32  ;;  %v2191_v45 = vrot.slane %v2190_v51, 1 }
 0x4ac   :  { %v2200_v21 = vrot.slane %v2199_v39, 1  ;;  %2252 = vperm.xlu1 %2945, %v2210_v47  }
 0x4ad   :  { %v2192_v32 = vadd.f32 %v2191_v45, %v2190_v51 }
 0x4ae   :  { %2257 = vperm.xlu0 %2944, %v2211_v53  }
 0x4b1   :  { %v3097_v8 = vpop.eup %3096 }
 0x4b2   :  { %v1901_v17 = vmul.f32 %v3097_v8, %v4983_v54  ;;  %v2201_v8 = vadd.f32 %v2200_v21, %v2199_v39 }
 0x4b3   :  { %v3099_v62 = vpop.eup %3098 }
 0x4b4   :  { %v1902_v57 = vmul.f32 %v3099_v62, %v4984_v27  ;;  %v3101_v19 = vpop.eup %3100  ;;  %v2202_v62 = vmax.f32 %v2192_v32, 1.0 }
 0x4b5   :  { %v1891_v25 = vadd.f32 1.0, %v3101_v19  ;;  %v3103_v30 = vpop.eup %3102 }
 0x4b6   :  { %v1905_v29 = vpack.c.bf16 %v1902_v57, %v1901_v17  ;;  %v1892_v14 = vadd.f32 1.0, %v3103_v30  ;;  %v2203_v17 = vmax.f32 %v2201_v8, 1.0  ;;  %2228 = vperm.xlu1 %2945, %v2202_v62   ;;  %v4989_v57 = vld [vmem:[#allocation30_spill] sm:$0xff] }
 0x4b7   :  { %3104 = vrcp.f32 %v1891_v25  ;;  %v1847_v19 = vadd.f32 %v4989_v57, %v4452_v11  ;;  %v1845_v25 = vadd.f32 %v4989_v57, %v4442_v3  ;;  %v1846_v30 = vadd.f32 %v4989_v57, %v4447_v2 }
 0x4b8   :  { %2698 = vmatprep.mubr.bf16.mxu0 %v1905_v29  ;;  %3106 = vrcp.f32 %v1892_v14  ;;  %2233 = vperm.xlu0 %2944, %v2203_v17   ;;  %v1848_v29 = vadd.f32 %v4989_v57, %v4457_v20 }
 0x4b9   :  { %v2499_v14 = vmul.f32 -1.442695, %v1847_v19 }
 0x4bb   :  { %3108 = vpow2.f32 %v2499_v14  ;;  %v3058_v14 = vld [vmem:[%s4570_s11 + $0x30] sm:$0xff]  }
 0x4c1   :  { %v3105_v34 = vpop.eup %3104 }
 0x4c2   :  { %v3107_v9 = vpop.eup %3106  ;;  %v1903_v61 = vmul.f32 %v3105_v34, %v4985_v55  ;;  %v2497_v34 = vmul.f32 -1.442695, %v1845_v25 }
 0x4c3   :  { %v1904_v50 = vmul.f32 %v3107_v9, %v4986_v60  ;;  %v2500_v9 = vmul.f32 -1.442695, %v1848_v29  ;;  %v3340_v29 = vmov 0.0  }
 0x4c4   :  { %3110 = vpow2.f32 %v2497_v34  ;;  %2702 = vmatprep.subr.bf16.mxu0 %v3340_v29  ;;  %v3059_v34 = vld [vmem:[%s4570_s11 + $0x38] sm:$0xff]  }
 0x4c5   :  { %v1906_v44 = vpack.c.bf16 %v1904_v50, %v1903_v61  ;;  %v2498_v61 = vmul.f32 -1.442695, %v1846_v30  ;;  %3112 = vpow2.f32 %v2500_v9  ;;  %v3109_v50 = vpop.eup %3108  ;;  %v3052_v30 = vld [vmem:[%s4570_s11] sm:$0xff]  }
 0x4c6   :  { %v1863_v43 = vadd.f32 1.0, %v3109_v50  ;;  %v2002_v9 = vld [vmem:[%s4569_s10] sm:$0x3] }
 0x4c7   :  { %2699 = vmatmul.mubr.bf16.vlgmr.msra.gmra.mrb[24].mxu0 %v1906_v44  ;;  %3114 = vpow2.f32 %v2498_v61  ;;  %v2011_v61 = vrot.slane %v2002_v9, %v3779_v5 }
 0x4c8   :  { %3116 = vrcp.f32 %v1863_v43  ;;  %2718 = vmatprep.mubr.msk.bf16.mxu0 %vm3341_vm1, %v3340_v29  ;;  %2703 = vmatpush3.bf16.msra.mxu0 %v3052_v30 }
 0x4c9   :  { %2704 = vmatprep.subr.bf16.mxu0 %v3340_v29 }
 0x4ce   :  { %v3111_v44 = vpop.eup %3110 }
 0x4cf   :  { %v3113_v11 = vpop.eup %3112  ;;  %v1861_v3 = vadd.f32 1.0, %v3111_v44 }
 0x4d0   :  { %v1864_v41 = vadd.f32 1.0, %v3113_v11 }
 0x4d1   :  { %v3115_v36 = vpop.eup %3114  ;;  %3118 = vrcp.f32 %v1861_v3 }
 0x4d2   :  { %v1862_v46 = vadd.f32 1.0, %v3115_v36  ;;  %3120 = vrcp.f32 %v1864_v41  ;;  %v3117_v22 = vpop.eup %3116 }
 0x4d4   :  { %3122 = vrcp.f32 %v1862_v46 }
 0x4db   :  { %v3119_v59 = vpop.eup %3118 }
 0x4dc   :  { %v3121_v53 = vpop.eup %3120 }
 0x4de   :  { %v3123_v45 = vpop.eup %3122 }
 0x59a   :  { %v2700_v20 = vpop.f32.mrb[24].mxu0 }
 0x59b   :  { %v1958_v2 = vadd.f32 %v2700_v20, %v4455_v40  ;;  %v1941_v58 = vpop.f32.mrb[25].mxu0  ;;  %v4992_v40 = vld [vmem:[#allocation62_spill] sm:$0xff] }
 0x59c   :  { %v1956_v37 = vadd.f32 %v4445_v33, %v1941_v58  ;;  %v2701_v48 = vpop.f32.mrb[26].mxu0 }
 0x59d   :  { %v1962_v1 = vadd.f32 %v4990_v15, %v1958_v2  ;;  %v1959_v28 = vadd.f32 %v2701_v48, %v4460_v31  ;;  %v1944_v49 = vpop.f32.mrb[27].mxu0 }
 0x59e   :  { %v1960_v52 = vadd.f32 %v4990_v15, %v1956_v37  ;;  %v1957_v18 = vadd.f32 %v4450_v13, %v1944_v49 }
 0x59f   :  { %v1966_v42 = vmul.f32 %v1962_v1, %v4991_v63  ;;  %v1963_v24 = vadd.f32 %v4990_v15, %v1959_v28 }
 0x5a0   :  { %v1964_v38 = vmul.f32 %v1960_v52, %v4992_v40  ;;  %v1961_v16 = vadd.f32 %v4990_v15, %v1957_v18 }
 0x5a1   :  { %v1970_v33 = vmax.f32 %v1966_v42, 0.0  ;;  %v1967_v0 = vmul.f32 %v1963_v24, %v4993_v6  ;;  %v2007_v42 = vrot.slane %v2002_v9, %v3777_v7  ;;  %v2248_v24 = vpop.permute.xlu1 %2247 }
 0x5a2   :  { %v1968_v23 = vmax.f32 %v1964_v38, 0.0  ;;  %v1965_v26 = vmul.f32 %v1961_v16, %v4994_v56 }
 0x5a3   :  { %v1974_v31 = vsub.f32 %v1970_v33, %v4985_v55  ;;  %v1971_v10 = vmax.f32 %v1967_v0, 0.0 }
 0x5a4   :  { %v1972_v13 = vsub.f32 %v1968_v23, %v4983_v54  ;;  %v1969_v35 = vmax.f32 %v1965_v26, 0.0 }
 0x5a5   :  { %v1975_v4 = vsub.f32 %v1971_v10, %v4986_v60  ;;  %v1978_v47 = vmul.f32 %v3117_v22, %v1974_v31  ;;  %v2253_v31 = vpop.permute.xlu1 %2252 }
 0x5a6   :  { %v1976_v51 = vmul.f32 %v3119_v59, %v1972_v13  ;;  %v1973_v39 = vsub.f32 %v1969_v35, %v4984_v27 }
 0x5a7   :  { %v1979_v21 = vmul.f32 %v3121_v53, %v1975_v4  ;;  %v1982_v8 = vadd.f32 %v1978_v47, %v4985_v55  ;;  %v3056_v55 = vld [vmem:[%s4570_s11 + $0x20] sm:$0xff]   ;;  %v2243_v47 = vpop.permute.xlu0 %2242 }
 0x5a8   :  { %v1977_v32 = vmul.f32 %v3123_v45, %v1973_v39  ;;  %v1980_v17 = vadd.f32 %v1976_v51, %v4983_v54  ;;  %v3053_v54 = vld [vmem:[%s4570_s11 + $0x8] sm:$0xff]  }
 0x5a9   :  { %v1983_v62 = vadd.f32 %v1979_v21, %v4986_v60  ;;  %2705 = vmatpush3.bf16.msra.mxu0 %v3053_v54  ;;  %v3057_v60 = vld [vmem:[%s4570_s11 + $0x28] sm:$0xff]   ;;  %v2229_v39 = vpop.permute.xlu1 %2228 }
 0x5aa   :  { %v1981_v57 = vadd.f32 %v1977_v32, %v4984_v27  ;;  %2706 = vmatprep.subr.bf16.mxu0 %v3340_v29  ;;  %v3055_v27 = vld [vmem:[%s4570_s11 + $0x18] sm:$0xff]  }
 0x5ab   :  { %v1985_v19 = vpack.c.bf16 %v1983_v62, %v1982_v8 }
 0x5ac   :  { %v1984_v25 = vpack.c.bf16 %v1981_v57, %v1980_v17 }
 0x5ae   :  { %2127 = vmatmul.mubr.bf16.vlgmr.msra.gmra.mrb[16].mxu1 %v1984_v25  ;;  %v2258_v25 = vpop.permute.xlu0 %2257 }
 0x5af   :  { %2136 = vmatprep.mubr.bf16.mxu1 %v4977_v12  ;;  %v3054_v12 = vld [vmem:[%s4570_s11 + $0x10] sm:$0xff]  }
 0x5b0   :  { %2707 = vmatpush3.bf16.msra.mxu0 %v3054_v12 }
 0x5b1   :  { %2708 = vmatprep.subr.bf16.mxu0 %v3340_v29 }
 0x5b4   :  { %2709 = vmatpush3.bf16.msra.mxu0 %v3055_v27 }
 0x5b5   :  { %2710 = vmatprep.subr.bf16.mxu0 %v3340_v29 }
 0x5b6   :  { %2137 = vmatmul.mubr.bf16.gmra.mrb[20].mxu1 %v1985_v19 }
 0x5b8   :  { %2711 = vmatpush3.bf16.msra.mxu0 %v3056_v55 }
 0x5b9   :  { %2712 = vmatprep.subr.bf16.mxu0 %v3340_v29 }
 0x5bc   :  { %2713 = vmatpush3.bf16.msra.mxu0 %v3057_v60 }
 0x5bd   :  { %2714 = vmatprep.subr.bf16.mxu0 %v3340_v29 }
 0x5c0   :  { %2715 = vmatpush3.bf16.msra.mxu0 %v3058_v14 }
 0x5c1   :  { %2716 = vmatprep.subr.bf16.mxu0 %v3340_v29 }
 0x5c4   :  { %2717 = vmatpush3.bf16.msra.mxu0 %v3059_v34 }
 0x681   :  { %v2128_v50 = vpop.f32.mrb[16].mxu1 }
 0x682   :  { %v2130_v44 = vpop.f32.mrb[17].mxu1  ;;  %v2129_v0 = vadd.f32 %v2128_v50, %v2007_v42 }
 0x683   :  { %v2131_v11 = vadd.f32 %v2130_v44, %v2011_v61  ;;  %v2132_v36 = vpop.f32.mrb[18].mxu1 }
 0x684   :  { %v2134_v43 = vpop.f32.mrb[19].mxu1  ;;  %v2133_v26 = vadd.f32 %v2132_v36, %v2007_v42  ;;  %v2147_v22 = vmax.f32 %v2129_v0, 0.0 }
 0x685   :  { %v2521_v3 = vmul.f32 -1.442695, %v2131_v11  ;;  %v2135_v41 = vadd.f32 %v2134_v43, %v2011_v61  ;;  %v2234_v11 = vpop.permute.xlu0 %2233 }
 0x686   :  { %v2148_v59 = vmax.f32 %v2133_v26, 0.0 }
 0x687   :  { %3124 = vpow2.f32 %v2521_v3  ;;  %v2522_v46 = vmul.f32 -1.442695, %v2135_v41 }
 0x689   :  { %3126 = vpow2.f32 %v2522_v46  ;;  %v2138_v20 = vpop.f32.mrb[20].mxu1 }
 0x68a   :  { %v2140_v2 = vpop.f32.mrb[21].mxu1  ;;  %v2139_v53 = vadd.f32 %v2138_v20, %v2007_v42 }
 0x68b   :  { %v2141_v58 = vadd.f32 %v2140_v2, %v2011_v61  ;;  %v2142_v37 = vpop.f32.mrb[22].mxu1 }
 0x68c   :  { %v2144_v48 = vpop.f32.mrb[23].mxu1  ;;  %v2143_v45 = vadd.f32 %v2142_v37, %v2007_v42  ;;  %v2149_v17 = vmax.f32 %v2139_v53, 0.0 }
 0x68d   :  { %v2523_v15 = vmul.f32 -1.442695, %v2141_v58  ;;  %v2145_v1 = vadd.f32 %v2144_v48, %v2011_v61 }
 0x68e   :  { %v2150_v30 = vmax.f32 %v2143_v45, 0.0 }
 0x68f   :  { %3128 = vpow2.f32 %v2523_v15  ;;  %v2524_v28 = vmul.f32 -1.442695, %v2145_v1 }
 0x691   :  { %v3125_v5 = vpop.eup %3124  ;;  %3130 = vpow2.f32 %v2524_v28 }
 0x692   :  { %v2163_v49 = vadd.f32 1.0, %v3125_v5 }
 0x693   :  { %v3127_v52 = vpop.eup %3126 }
 0x694   :  { %3132 = vrcp.f32 %v2163_v49  ;;  %v2164_v18 = vadd.f32 1.0, %v3127_v52 }
 0x696   :  { %3134 = vrcp.f32 %v2164_v18 }
 0x699   :  { %v3129_v38 = vpop.eup %3128 }
 0x69a   :  { %v2165_v16 = vadd.f32 1.0, %v3129_v38 }
 0x69b   :  { %v3131_v33 = vpop.eup %3130 }
 0x69c   :  { %3136 = vrcp.f32 %v2165_v16  ;;  %v2166_v23 = vadd.f32 1.0, %v3131_v33 }
 0x69e   :  { %v3133_v10 = vpop.eup %3132  ;;  %3138 = vrcp.f32 %v2166_v23 }
 0x69f   :  { %v2175_v13 = vmul.f32 %v3133_v10, %v4992_v40  ;;  %3140 = vrcp.f32 %v2229_v39 }
 0x6a0   :  { %v3135_v35 = vpop.eup %3134  ;;  %3142 = vrcp.f32 %v2234_v11 }
 0x6a1   :  { %v2176_v4 = vmul.f32 %v3135_v35, %v4994_v56  ;;  %v2179_v7 = vmul.f32 %v2175_v13, %v2147_v22  ;;  %v2529_v13 = vld [vmem:[%s4571_s12] ss:$0 sm:$0xff] }
 0x6a3   :  { %v2180_v51 = vmul.f32 %v2176_v4, %v2148_v59  ;;  %v2260_v8 = vadd.f32 %v2243_v47, %v2179_v7 }
 0x6a5   :  { %v2261_v21 = vadd.f32 %v2248_v24, %v2180_v51  ;;  %v2212_v32 = vadd.f32 %v2180_v51, %v2179_v7 }
 0x6a6   :  { %v3137_v62 = vpop.eup %3136 }
 0x6a7   :  { %v2213_v57 = vrot.slane %v2212_v32, 4  ;;  %v2264_v19 = vmax.f32 %v2260_v8, %v2261_v21  ;;  %v2177_v40 = vmul.f32 %v3137_v62, %v4991_v63 }
 0x6a8   :  { %v3139_v29 = vpop.eup %3138 }
 0x6a9   :  { %v2214_v56 = vadd.f32 %v2213_v57, %v2212_v32  ;;  %v2265_v54 = vrot.slane %v2264_v19, 4  ;;  %v2181_v12 = vmul.f32 %v2177_v40, %v2149_v17  ;;  %v2178_v27 = vmul.f32 %v3139_v29, %v4993_v6  ;;  %v3141_v41 = vpop.eup %3140 }
 0x6aa   :  { %v3143_v24 = vpop.eup %3142 }
 0x6ab   :  { %v2215_v55 = vrot.slane %v2214_v56, 2  ;;  %v2266_v60 = vmax.f32 %v2264_v19, %v2265_v54  ;;  %v2182_v14 = vmul.f32 %v2178_v27, %v2150_v30  ;;  %v2262_v34 = vadd.f32 %v2253_v31, %v2181_v12 }
 0x6ad   :  { %v2216_v9 = vadd.f32 %v2215_v55, %v2214_v56  ;;  %v2267_v61 = vrot.slane %v2266_v60, 2  ;;  %v2219_v50 = vadd.f32 %v2182_v14, %v2181_v12  ;;  %v2263_v44 = vadd.f32 %v2258_v25, %v2182_v14 }
 0x6af   :  { %v2217_v36 = vrot.slane %v2216_v9, 1  ;;  %v2268_v43 = vmax.f32 %v2266_v60, %v2267_v61  ;;  %v2220_v63 = vrot.slane %v2219_v50, 4  ;;  %v2271_v3 = vmax.f32 %v2262_v34, %v2263_v44 }
 0x6b1   :  { %v2218_v46 = vadd.f32 %v2217_v36, %v2216_v9  ;;  %v2269_v20 = vrot.slane %v2268_v43, 1  ;;  %v2221_v2 = vadd.f32 %v2220_v63, %v2219_v50  ;;  %v2272_v58 = vrot.slane %v2271_v3, 4 }
 0x6b3   :  { %v2270_v6 = vmax.f32 %v2268_v43, %v2269_v20  ;;  %v2222_v37 = vrot.slane %v2221_v2, 2  ;;  %v2273_v48 = vmax.f32 %v2271_v3, %v2272_v58  ;;  %v2237_v15 = vmul.f32 %v3141_v41, %v2218_v46 }
 0x6b5   :  { %v2223_v1 = vadd.f32 %v2222_v37, %v2221_v2  ;;  %v2274_v28 = vrot.slane %v2273_v48, 2  ;;  %v2278_v5 = vadd.f32 %v2270_v6, %v2237_v15 }
 0x6b7   :  { %v2224_v49 = vrot.slane %v2223_v1, 1  ;;  %v2275_v52 = vmax.f32 %v2273_v48, %v2274_v28  ;;  %v2280_v0 = vpack.c.bf16 %v2278_v5, %v2278_v5 }
 0x6b9   :  { %v2225_v18 = vadd.f32 %v2224_v49, %v2223_v1  ;;  %v2276_v42 = vrot.slane %v2275_v52, 1  ;;  %v2307_v26 = vunpack.c.l.b16 %v2280_v0 }
 0x6bb   :  { %v2277_v38 = vmax.f32 %v2275_v52, %v2276_v42  ;;  %v2239_v16 = vmul.f32 %v3143_v24, %v2225_v18 }
 0x6bd   :  { %v2279_v33 = vadd.f32 %v2277_v38, %v2239_v16 }
 0x6bf   :  { %v2281_v23 = vpack.c.bf16 %v2279_v33, %v2279_v33 }
 0x6c1   :  { %v2308_v31 = vunpack.c.l.b16 %v2281_v23 }
 0x6c3   :  { %v2310_v10 = vsel %vm2309_vm2, %v2308_v31, %v2307_v26 }
 0x6c4   :  { %v2311_v22 = vpack.c.b16 %v2310_v10, %v2310_v10 }
 0x6c6   :  { %2719 = vmatmul.mubr.bf16.vlgmr.msra.gmra.mrb[28].mxu0 %v2311_v22 }
 0x799   :  { %v2395_v35 = vpop.f32.mrb[28].mxu0 }
 0x79a   :  { %v2396_v59 = vadd.f32 %v2529_v13, %v2395_v35  ;;  %v2720_v4 = vpop.f32.mrb[29].mxu0 }
 0x79b   :  { %v2398_v47 = vpop.f32.mrb[30].mxu0 }
 0x79c   :  { %2401 = vst [vmem:[#allocation13] sm:$0x3] %v2396_v59  ;;  %v2721_v7 = vpop.f32.mrb[31].mxu0 }
 0x79d   :  { %3291 = shalt.err (!%p3288_p10)
}
 0x79e   :  { %s3292_s12 = scalar_lea.hbm %s4572_s13, 32 }
 0x79f   :  { %p3293_p11 = scmp.ne.s32.totalorder %s4572_s13, %s3292_s12  ;;  %p3296_p12 = scmp.lt.u32.totalorder %s3292_s12, %s4572_s13 }
 0x7a1   :  { %p3298_p13 = pnand %p3296_p12, %p3293_p11 }
 0x7a3   :  { %3301 = shalt.err (!%p3298_p13)
}
 0x7a4   :  { %2411 = dma.vmem_to_hbm [thread:$0]  %s2409_s8, 32, %s4572_s13, [#allocation4]  }
 0x7a5   :  { %3310 = dma.done.wait [#allocation4], 32  }
 0x7a6   :  { %3311 = vsyncadd [#allocation4], 4294967264 }
 0x7a7   :  { %2415 = vsyncpa [#allocation3], 1 }
 0x7a8   :  { %2416 = vsyncpa [#allocation6], 1 }
 0x7a9   :  { %2417 = vsyncpa [#allocation9], 1 }
 0x7aa   :  { %2418 = vsyncpa [#allocation12], 1 }
 0x7ab   :  { %2419 = vsyncpa [#allocation4], 1 }

// kernel: tpu_custom_call.1
= control target key start
LH: loop header
LB: loop body
LE: loop exit
PB: predicated region body
PF: predicated region fallthrough
CT: control target
= control target key end

     0   :  { %18 = vsyncpa [#allocation3], 0  ;;  %s4559_s0 = inlined_call_operand.hbm [shape: bf16[2,16,128], index: 0, kind: input, shape index: {}]   ;;  %s4560_s1 = inlined_call_operand.hbm [shape: bf16[2,16,16], index: 1, kind: input, shape index: {}]   ;;  %s4561_s2 = inlined_call_operand.vmem [shape: f32[2,16,1], index: 2, kind: input, shape index: {}]   ;;  %s4562_s3 = inlined_call_operand.hbm [shape: bf16[128,128], index: 3, kind: input, shape index: {}]   ;;  %s4563_s4 = inlined_call_operand.hbm [shape: bf16[256,384], index: 4, kind: input, shape index: {}]   ;;  %s4564_s5 = inlined_call_operand.hbm [shape: bf16[128,128], index: 5, kind: input, shape index: {}]   ;;  %s4565_s6 = inlined_call_operand.vmem [shape: f32[1,128], index: 6, kind: input, shape index: {}]   ;;  %s4566_s7 = inlined_call_operand.vmem [shape: f32[1,128], index: 7, kind: input, shape index: {}]   ;;  %s4567_s8 = inlined_call_operand.vmem [shape: f32[1,128], index: 8, kind: input, shape index: {}]   ;;  %s4568_s9 = inlined_call_operand.hbm [shape: bf16[128,256], index: 9, kind: input, shape index: {}]   ;;  %s4569_s10 = inlined_call_operand.vmem [shape: f32[1,256], index: 10, kind: input, shape index: {}]   ;;  %s4570_s11 = inlined_call_operand.vmem [shape: bf16[128,128], index: 11, kind: input, shape index: {}]   ;;  %s4571_s12 = inlined_call_operand.vmem [shape: f32[1,128], index: 12, kind: input, shape index: {}]   ;;  %s4572_s13 = inlined_call_operand.hbm [shape: f32[1,2,128], index: 13, kind: output, shape index: {}]  }
   0x1   :  { %19 = vsyncpa [#allocation6], 0 }
   0x2   :  { %20 = vsyncpa [#allocation9], 0 }
   0x3   :  { %21 = vsyncpa [#allocation12], 0 }
   0x4   :  { %22 = vsyncpa [#allocation4], 0  ;;  %s3312_s25 = smov [#allocation5]   ;;  %s3313_s27 = smov [#allocation8]  }
   0x5   :  { %s40_s26 = sshll.u32 %s3312_s25, 4  ;;  %s66_s28 = sshll.u32 %s3313_s27, 4  ;;  %s41_s26 = int_to_ptr.vmem [resolvable:$true] %s40_s26  ;;  %s3413_s28 = int_to_ptr.vmem [resolvable:$true] %s66_s28 }
   0x6   :  { %s3148_s14 = scalar_lea.hbm %s4560_s1, 256 }
   0x7   :  { %p3149_p0 = scmp.ne.s32.totalorder %s4560_s1, %s3148_s14  ;;  %p3152_p1 = scmp.lt.u32.totalorder %s3148_s14, %s4560_s1 }
   0x9   :  { %p3154_p2 = pnand %p3152_p1, %p3149_p0 }
   0xb   :  { %3157 = shalt.err (!%p3154_p2)
}
   0xc   :  { %s3158_s19 = scalar_lea.vmem %s41_s26, 256  ;;  %p3163_p4 = scmp.lt.s32.totalorder %s41_s26, %s41_s26 }
   0xd   :  { %p3159_p3 = scmp.ne.s32.totalorder %s41_s26, %s3158_s19  ;;  %p3164_p5 = scmp.lt.s32.totalorder %s3158_s19, %s3158_s19 }
   0xf   :  { %p3165_p6 = por %p3164_p5, %p3163_p4 }
  0x11   :  { %p3166_p7 = pnand %p3165_p6, %p3159_p3 }
  0x13   :  { %3169 = shalt.err (!%p3166_p7)
}
  0x14   :  { %s3314_s20 = smov 64   ;;  %s3315_s21 = smov 4  }
  0x15   :  { %46 = dma.hbm_to_vmem [thread:$0]  %s4560_s1, 256, %s41_s26, [#allocation6], %s3314_s20, %s3314_s20, %s3315_s21  }
  0x16   :  { %s3170_s27 = scalar_lea.hbm %s4563_s4, 6144 }
  0x17   :  { %p3171_p8 = scmp.ne.s32.totalorder %s4563_s4, %s3170_s27  ;;  %p3174_p9 = scmp.lt.u32.totalorder %s3170_s27, %s4563_s4 }
  0x19   :  { %p3176_p10 = pnand %p3174_p9, %p3171_p8 }
  0x1b   :  { %3179 = shalt.err (!%p3176_p10)
}
  0x1c   :  { %s3180_s16 = scalar_lea.vmem %s3413_s28, 6144  ;;  %p3185_p12 = scmp.lt.s32.totalorder %s3413_s28, %s3413_s28 }
  0x1d   :  { %p3181_p11 = scmp.ne.s32.totalorder %s3413_s28, %s3180_s16  ;;  %p3186_p13 = scmp.lt.s32.totalorder %s3180_s16, %s3180_s16 }
  0x1f   :  { %p3187_p0 = por %p3186_p13, %p3185_p12 }
  0x21   :  { %p3188_p1 = pnand %p3187_p0, %p3181_p11 }
  0x23   :  { %3191 = shalt.err (!%p3188_p1)
}
  0x24   :  { %s3316_s1 = smov 192   ;;  %s3317_s26 = smov 12  }
  0x25   :  { %72 = dma.hbm_to_vmem [thread:$0]  %s4563_s4, 6144, %s3413_s28, [#allocation9], %s3316_s1, %s3316_s1, %s3317_s26  }
  0x26   :  { %s3318_s19 = smov [#allocation2]   ;;  %s3319_s23 = smov [#allocation7]  }
  0x27   :  { %s28_s22 = sshll.u32 %s3318_s19, 4  ;;  %s54_s24 = sshll.u32 %s3319_s23, 4  ;;  %s29_s22 = int_to_ptr.vmem [resolvable:$true] %s28_s22  ;;  %s3447_s24 = int_to_ptr.vmem [resolvable:$true] %s54_s24 }
  0x28   :  { %s3192_s29 = scalar_lea.hbm %s4559_s0, 256 }
  0x29   :  { %p3193_p2 = scmp.ne.s32.totalorder %s4559_s0, %s3192_s29  ;;  %p3196_p3 = scmp.lt.u32.totalorder %s3192_s29, %s4559_s0 }
  0x2b   :  { %p3198_p4 = pnand %p3196_p3, %p3193_p2 }
  0x2d   :  { %3201 = shalt.err (!%p3198_p4)
}
  0x2e   :  { %s3202_s4 = scalar_lea.vmem %s29_s22, 256  ;;  %p3207_p6 = scmp.lt.s32.totalorder %s29_s22, %s29_s22 }
  0x2f   :  { %p3203_p5 = scmp.ne.s32.totalorder %s29_s22, %s3202_s4  ;;  %p3208_p7 = scmp.lt.s32.totalorder %s3202_s4, %s3202_s4 }
  0x31   :  { %p3209_p8 = por %p3208_p7, %p3207_p6 }
  0x33   :  { %p3210_p9 = pnand %p3209_p8, %p3203_p5 }
  0x35   :  { %3213 = shalt.err (!%p3210_p9)
}
  0x36   :  { %34 = dma.hbm_to_vmem [thread:$0]  %s4559_s0, 256, %s29_s22, [#allocation3], %s3314_s20, %s3314_s20, %s3315_s21  }
  0x37   :  { %s3214_s18 = scalar_lea.hbm %s4562_s3, 1024 }
  0x38   :  { %p3215_p10 = scmp.ne.s32.totalorder %s4562_s3, %s3214_s18  ;;  %p3218_p11 = scmp.lt.u32.totalorder %s3214_s18, %s4562_s3 }
  0x3a   :  { %p3220_p12 = pnand %p3218_p11, %p3215_p10 }
  0x3c   :  { %3223 = shalt.err (!%p3220_p12)
}
  0x3d   :  { %s3224_s29 = scalar_lea.vmem %s3447_s24, 1024  ;;  %p3229_p0 = scmp.lt.s32.totalorder %s3447_s24, %s3447_s24 }
  0x3e   :  { %p3225_p13 = scmp.ne.s32.totalorder %s3447_s24, %s3224_s29  ;;  %p3230_p1 = scmp.lt.s32.totalorder %s3224_s29, %s3224_s29 }
  0x40   :  { %p3231_p2 = por %p3230_p1, %p3229_p0 }
  0x42   :  { %p3232_p3 = pnand %p3231_p2, %p3225_p13 }
  0x44   :  { %3235 = shalt.err (!%p3232_p3)
}
  0x45   :  { %60 = dma.hbm_to_vmem [thread:$0]  %s4562_s3, 1024, %s3447_s24, [#allocation6], %s3314_s20, %s3314_s20, %s3315_s21  }
  0x46   :  { %s3320_s30 = smov [#allocation10]   ;;  %s3321_s15 = smov [#allocation11]  }
  0x47   :  { %s78_s14 = sshll.u32 %s3320_s30, 4  ;;  %s96_s16 = sshll.u32 %s3321_s15, 4  ;;  %s79_s14 = int_to_ptr.vmem [resolvable:$true] %s78_s14  ;;  %s3484_s16 = int_to_ptr.vmem [resolvable:$true] %s96_s16 }
  0x48   :  { %s3236_s1 = scalar_lea.hbm %s4564_s5, 1024 }
  0x49   :  { %p3237_p4 = scmp.ne.s32.totalorder %s4564_s5, %s3236_s1  ;;  %p3240_p5 = scmp.lt.u32.totalorder %s3236_s1, %s4564_s5 }
  0x4b   :  { %p3242_p6 = pnand %p3240_p5, %p3237_p4 }
  0x4d   :  { %3245 = shalt.err (!%p3242_p6)
}
  0x4e   :  { %s3246_s3 = scalar_lea.vmem %s79_s14, 1024  ;;  %p3251_p8 = scmp.lt.s32.totalorder %s79_s14, %s79_s14 }
  0x4f   :  { %p3247_p7 = scmp.ne.s32.totalorder %s79_s14, %s3246_s3  ;;  %p3252_p9 = scmp.lt.s32.totalorder %s3246_s3, %s3246_s3 }
  0x51   :  { %p3253_p10 = por %p3252_p9, %p3251_p8 }
  0x53   :  { %p3254_p11 = pnand %p3253_p10, %p3247_p7 }
  0x55   :  { %3257 = shalt.err (!%p3254_p11)
}
  0x56   :  { %84 = dma.hbm_to_vmem [thread:$0]  %s4564_s5, 1024, %s79_s14, [#allocation9], %s3314_s20, %s3314_s20, %s3315_s21  }
  0x57   :  { %s3258_s29 = scalar_lea.hbm %s4568_s9, 2048 }
  0x58   :  { %p3259_p12 = scmp.ne.s32.totalorder %s4568_s9, %s3258_s29  ;;  %p3262_p13 = scmp.lt.u32.totalorder %s3258_s29, %s4568_s9 }
  0x5a   :  { %p3264_p0 = pnand %p3262_p13, %p3259_p12 }
  0x5c   :  { %3267 = shalt.err (!%p3264_p0)
}
  0x5d   :  { %s3268_s4 = scalar_lea.vmem %s3484_s16, 2048  ;;  %p3273_p2 = scmp.lt.s32.totalorder %s3484_s16, %s3484_s16 }
  0x5e   :  { %p3269_p1 = scmp.ne.s32.totalorder %s3484_s16, %s3268_s4  ;;  %p3274_p3 = scmp.lt.s32.totalorder %s3268_s4, %s3268_s4 }
  0x60   :  { %p3275_p4 = por %p3274_p3, %p3273_p2 }
  0x62   :  { %p3276_p5 = pnand %p3275_p4, %p3269_p1 }
  0x64   :  { %3279 = shalt.err (!%p3276_p5)
}
  0x65   :  { %s3322_s5 = smov 128   ;;  %s3323_s20 = smov 8  }
  0x66   :  { %102 = dma.hbm_to_vmem [thread:$0]  %s4568_s9, 2048, %s3484_s16, [#allocation12], %s3322_s5, %s3322_s5, %s3323_s20  }
  0x67   :  { %3302 = dma.done.wait [#allocation3], 256  }
  0x68   :  { %3303 = vsyncadd [#allocation3], 4294967040 }
  0x69   :  { %3304 = dma.done.wait [#allocation6], 1280  }
  0x6a   :  { %3305 = vsyncadd [#allocation6], 4294966016 }
  0x6b   :  { %3306 = dma.done.wait [#allocation9], 7168  }
  0x6c   :  { %3307 = vsyncadd [#allocation9], 4294960128 }
  0x6d   :  { %3308 = dma.done.wait [#allocation12], 2048  }
  0x6e   :  { %3309 = vsyncadd [#allocation12], 4294965248  ;;  %v4573_v0 = vmov 0   ;;  %v2946_v1 = vld [vmem:[#allocation7] sm:$0xff]   ;;  %v2947_v2 = vld [vmem:[#allocation7 + $0x8] sm:$0xff]   ;;  %vm2183_vm0 = vcmask 7168  }
  0x6f   :  { %2754 = vset.pattern.permute.xlu1 %v4573_v0  ;;  %2753 = vset.pattern.permute.xlu0 %v4573_v0  ;;  %v2948_v3 = vld [vmem:[#allocation7 + $0x10] sm:$0xff]   ;;  %v139_v6 = vld [vmem:[%s4561_s2 + $0x18] sm:$0xff]  ;;  %v2954_v13 = vld [vmem:[#allocation2] sm:$0xff]   ;;  %v3325_v21 = vmov 1   ;;  %v3326_v28 = vmov 3   ;;  %v3327_v30 = vmov 4  }
  0x70   :  { %2642 = vmatprep.subr.bf16.mxu0 %v2946_v1  ;;  %v138_v4 = vld [vmem:[%s4561_s2 + $0x10] sm:$0xff]  ;;  %v2949_v7 = vld [vmem:[#allocation7 + $0x18] sm:$0xff]   ;;  %v2194_v8 = vsel %vm2183_vm0, %v139_v6, 0.0  ;;  %v2950_v14 = vld [vmem:[#allocation7 + $0x20] sm:$0xff]   ;;  %2658 = vmatprep.mubr.bf16.mxu0 %v2954_v13  ;;  %v3328_v32 = vmov 2   ;;  %v3329_v33 = vmov 5  }
  0x71   :  { %2643 = vmatpush3.bf16.msra.mxu0 %v2946_v1  ;;  %152 = vperm.xlu1 %2754, %v138_v4   ;;  %v2193_v5 = vsel %vm2183_vm0, %v138_v4, 0.0  ;;  %v2539_v10 = vld [vmem:[#allocation5] sm:$0xff]   ;;  %v2546_v16 = vld [vmem:[#allocation5 + $0x8] sm:$0xff]   ;;  %v136_v17 = vld [vmem:[%s4561_s2] sm:$0xff]  ;;  %v3330_v34 = vmov 6   ;;  %v3331_v35 = vmov 7  }
  0x72   :  { %2644 = vmatprep.subr.bf16.mxu0 %v2947_v2  ;;  %v3528_v9 = vadd.f32 %v2194_v8, %v2193_v5  ;;  %v2540_v11 = vunpack.c.l.bf16 %v2539_v10  ;;  %v2541_v12 = vunpack.c.h.bf16 %v2539_v10  ;;  %v137_v18 = vld [vmem:[%s4561_s2 + $0x8] sm:$0xff]  ;;  %142 = vperm.xlu0 %2753, %v136_v17   ;;  %v2184_v19 = vsel %vm2183_vm0, %v136_v17, 0.0  ;;  %v2952_v26 = vld [vmem:[#allocation7 + $0x30] sm:$0xff]   ;;  %v2953_v29 = vld [vmem:[#allocation7 + $0x38] sm:$0xff]   ;;  %s3342_s25 = smov [#allocation13]  }
  0x73   :  { %v2951_v20 = vld [vmem:[#allocation7 + $0x28] sm:$0xff]   ;;  %v2185_v22 = vsel %vm2183_vm0, %v137_v18, 0.0  ;;  %v2544_v23 = vunpack.c.l.bf16 %v2546_v16  ;;  %v2545_v24 = vunpack.c.h.bf16 %v2546_v16  ;;  %v3332_v36 = vmov 10   ;;  %v3569_v41 = vld [vmem:[#allocation8 + $0x4] ss:$12 sps:$4 sm:$0xff]  }
  0x74   :  { %4702 = vst [vmem:[#allocation19_spill] sm:$0xff] %v3528_v9  ;;  %v3530_v15 = vpack.i.bf16 %v2541_v12, %v2540_v11  ;;  %v3541_v25 = vadd.f32 %v2185_v22, %v2184_v19  ;;  %v2955_v31 = vld [vmem:[#allocation2 + $0x8] sm:$0xff]   ;;  %v3333_v37 = vmov 8   ;;  %v3334_v38 = vmov 9   ;;  %1168 = vmatprep.subr.bf16.mxu1 %v3569_v41  ;;  %v3580_v45 = vld [vmem:[#allocation8 + $0x18] ss:$12 sps:$4 sm:$0xff]  }
  0x75   :  { %2645 = vmatpush3.bf16.msra.mxu0 %v2947_v2  ;;  %157 = vperm.xlu1 %2754, %v139_v6   ;;  %v3543_v27 = vpack.i.bf16 %v2545_v24, %v2544_v23  ;;  %v3335_v39 = vmov 13   ;;  %v3336_v40 = vmov 11   ;;  %v3337_v42 = vmov 12   ;;  %v3573_v43 = vld [vmem:[#allocation8] ss:$12 sps:$4 sm:$0xff]   ;;  %4705 = vst [vmem:[#allocation22_spill] sm:$0xff] %v3580_v45 }
  0x76   :  { %2646 = vmatprep.subr.bf16.mxu0 %v2948_v3  ;;  %147 = vperm.xlu0 %2753, %v137_v18   ;;  %4703 = vst [vmem:[#allocation20_spill] sm:$0xff] %v3541_v25  ;;  %v3575_v44 = vld [vmem:[#allocation8 + $0x1c] ss:$12 sps:$4 sm:$0xff]   ;;  %v3582_v46 = vld [vmem:[#allocation8 + $0x34] ss:$12 sps:$4 sm:$0xff]   ;;  %v3338_v49 = vmov 14  }
  0x77   :  { %4704 = vst [vmem:[#allocation21_spill] sm:$0xff] %v3575_v44  ;;  %1169 = vmatpush1.bf16.msra.mxu1 %v3573_v43  ;;  %4706 = vst [vmem:[#allocation23_spill] sm:$0xff] %v3582_v46  ;;  %v3587_v47 = vld [vmem:[#allocation8 + $0x30] ss:$12 sps:$4 sm:$0xff]   ;;  %v3589_v48 = vld [vmem:[#allocation8 + $0x4c] ss:$12 sps:$4 sm:$0xff]  }
  0x78   :  { %1170 = vmatprep.subr.bf16.mxu1 %v3575_v44  ;;  %4707 = vst [vmem:[#allocation24_spill] sm:$0xff] %v3587_v47  ;;  %4708 = vst [vmem:[#allocation25_spill] sm:$0xff] %v3589_v48  ;;  %v3594_v50 = vld [vmem:[#allocation8 + $0x48] ss:$12 sps:$4 sm:$0xff]   ;;  %v3596_v51 = vld [vmem:[#allocation8 + $0x64] ss:$12 sps:$4 sm:$0xff]  }
  0x79   :  { %2647 = vmatpush3.bf16.msra.mxu0 %v2948_v3  ;;  %2760 = vset.pattern.permute.xlu1 %v3325_v21  ;;  %4709 = vst [vmem:[#allocation26_spill] sm:$0xff] %v3594_v50  ;;  %4710 = vst [vmem:[#allocation27_spill] sm:$0xff] %v3596_v51  ;;  %v3339_v52 = vmov 15   ;;  %v3604_v53 = vld [vmem:[#allocation8 + $0x60] ss:$12 sps:$4 sm:$0xff]   ;;  %vm3341_vm1 = vmmov 0  }
  0x7a   :  { %2648 = vmatprep.subr.bf16.mxu0 %v2949_v7  ;;  %2762 = vperm.xlu1 %2760, %v3530_v15   ;;  %4711 = vst [vmem:[#allocation28_spill] sm:$0xff] %v3604_v53  ;;  %v3607_v54 = vld [vmem:[#allocation8 + $0x7c] ss:$12 sps:$4 sm:$0xff]   ;;  %v3611_v55 = vld [vmem:[#allocation8 + $0x78] ss:$12 sps:$4 sm:$0xff]   ;;  %vm2309_vm2 = vcmask 1041409  }
  0x7b   :  { %2756 = vperm.xlu0 %2753, %v3530_v15   ;;  %1171 = vmatpush1.bf16.msra.mxu1 %v3580_v45  ;;  %4712 = vst [vmem:[#allocation29_spill] sm:$0xff] %v3607_v54  ;;  %4713 = vst [vmem:[#allocation30_spill] sm:$0xff] %v3611_v55  ;;  %v3614_v56 = vld [vmem:[#allocation8 + $0x94] ss:$12 sps:$4 sm:$0xff]   ;;  %v3619_v58 = vld [vmem:[#allocation8 + $0x90] ss:$12 sps:$4 sm:$0xff]  }
  0x7c   :  { %1172 = vmatprep.subr.bf16.mxu1 %v3582_v46  ;;  %4714 = vst [vmem:[#allocation31_spill] sm:$0xff] %v3614_v56  ;;  %4716 = vst [vmem:[#allocation33_spill] sm:$0xff] %v3619_v58  ;;  %v3624_v60 = vld [vmem:[#allocation8 + $0xac] ss:$12 sps:$4 sm:$0xff]   ;;  %v3627_v61 = vld [vmem:[#allocation8 + $0xa8] ss:$12 sps:$4 sm:$0xff]  }
  0x7d   :  { %2649 = vmatpush3.bf16.msra.mxu0 %v2949_v7  ;;  %4718 = vst [vmem:[#allocation35_spill] sm:$0xff] %v3624_v60  ;;  %4719 = vst [vmem:[#allocation36_spill] sm:$0xff] %v3627_v61  ;;  %v3632_v63 = vld [vmem:[#allocation8 + $0xc4] ss:$12 sps:$4 sm:$0xff]   ;;  %v3634_v1 = vld [vmem:[#allocation8 + $0xc8] ss:$12 sps:$4 sm:$0xff]  }
  0x7e   :  { %2650 = vmatprep.subr.bf16.mxu0 %v2950_v14  ;;  %2766 = vset.pattern.permute.xlu1 %v3326_v28  ;;  %4721 = vst [vmem:[#allocation38_spill] sm:$0xff] %v3632_v63  ;;  %4722 = vst [vmem:[#allocation39_spill] sm:$0xff] %v3634_v1  ;;  %v3636_v2 = vld [vmem:[#allocation8 + $0xc0] ss:$12 sps:$4 sm:$0xff]   ;;  %v3638_v3 = vld [vmem:[#allocation8 + $0x8] ss:$12 sps:$4 sm:$0xff]  }
  0x7f   :  { %2768 = vperm.xlu1 %2766, %v3530_v15   ;;  %2779 = vperm.xlu0 %2753, %v3543_v27   ;;  %4723 = vst [vmem:[#allocation40_spill] sm:$0xff] %v3636_v2  ;;  %4724 = vst [vmem:[#allocation41_spill] sm:$0xff] %v3638_v3  ;;  %v3644_v4 = vld [vmem:[#allocation8 + $0xdc] ss:$12 sps:$4 sm:$0xff]   ;;  %v3646_v5 = vld [vmem:[#allocation8 + $0xe0] ss:$12 sps:$4 sm:$0xff]  }
  0x80   :  { %1173 = vmatpush1.bf16.msra.mxu1 %v3587_v47  ;;  %4725 = vst [vmem:[#allocation42_spill] sm:$0xff] %v3644_v4  ;;  %4726 = vst [vmem:[#allocation43_spill] sm:$0xff] %v3646_v5  ;;  %v3648_v6 = vld [vmem:[#allocation8 + $0xd8] ss:$12 sps:$4 sm:$0xff]   ;;  %v3650_v7 = vld [vmem:[#allocation8 + $0x20] ss:$12 sps:$4 sm:$0xff]  }
  0x81   :  { %2651 = vmatpush3.bf16.msra.mxu0 %v2950_v14  ;;  %1174 = vmatprep.subr.bf16.mxu1 %v3589_v48  ;;  %4727 = vst [vmem:[#allocation44_spill] sm:$0xff] %v3648_v6  ;;  %4728 = vst [vmem:[#allocation45_spill] sm:$0xff] %v3650_v7  ;;  %v3658_v10 = vld [vmem:[#allocation8 + $0xf4] ss:$12 sps:$4 sm:$0xff]   ;;  %v3660_v11 = vld [vmem:[#allocation8 + $0xf8] ss:$12 sps:$4 sm:$0xff]  }
  0x82   :  { %2652 = vmatprep.subr.bf16.mxu0 %v2951_v20  ;;  %4730 = vst [vmem:[#allocation47_spill] sm:$0xff] %v3658_v10  ;;  %4731 = vst [vmem:[#allocation48_spill] sm:$0xff] %v3660_v11  ;;  %v3662_v12 = vld [vmem:[#allocation8 + $0xf0] ss:$12 sps:$4 sm:$0xff]   ;;  %v3664_v13 = vld [vmem:[#allocation8 + $0x38] ss:$12 sps:$4 sm:$0xff]  }
  0x83   :  { %2772 = vset.pattern.permute.xlu1 %v3327_v30  ;;  %2783 = vset.pattern.permute.xlu0 %v3328_v32  ;;  %4732 = vst [vmem:[#allocation49_spill] sm:$0xff] %v3662_v12  ;;  %4733 = vst [vmem:[#allocation50_spill] sm:$0xff] %v3664_v13  ;;  %v3674_v16 = vld [vmem:[#allocation8 + $0x110] ss:$12 sps:$4 sm:$0xff]   ;;  %v3676_v17 = vld [vmem:[#allocation8 + $0x108] ss:$12 sps:$4 sm:$0xff]  }
  0x84   :  { %2774 = vperm.xlu1 %2772, %v3530_v15   ;;  %2785 = vperm.xlu0 %2783, %v3530_v15   ;;  %4736 = vst [vmem:[#allocation53_spill] sm:$0xff] %v3674_v16  ;;  %4737 = vst [vmem:[#allocation54_spill] sm:$0xff] %v3676_v17  ;;  %v3678_v18 = vld [vmem:[#allocation8 + $0x50] ss:$12 sps:$4 sm:$0xff]   ;;  %v3690_v22 = vld [vmem:[#allocation8 + $0x68] ss:$12 sps:$4 sm:$0xff]  }
  0x85   :  { %2653 = vmatpush3.bf16.msra.mxu0 %v2951_v20  ;;  %1175 = vmatpush1.bf16.msra.mxu1 %v3594_v50  ;;  %4738 = vst [vmem:[#allocation55_spill] sm:$0xff] %v3678_v18  ;;  %v3680_v19 = vld [vmem:[#allocation8 + $0x124] ss:$12 sps:$4 sm:$0xff]   ;;  %v3684_v20 = vld [vmem:[#allocation8 + $0x128] ss:$12 sps:$4 sm:$0xff]   ;;  %4742 = vst [vmem:[#allocation59_spill] sm:$0xff] %v3690_v22 }
  0x86   :  { %2654 = vmatprep.subr.bf16.mxu0 %v2952_v26  ;;  %1176 = vmatprep.subr.bf16.mxu1 %v3596_v51  ;;  %4739 = vst [vmem:[#allocation56_spill] sm:$0xff] %v3680_v19  ;;  %4740 = vst [vmem:[#allocation57_spill] sm:$0xff] %v3684_v20  ;;  %v3694_v23 = vld [vmem:[#allocation8 + $0x13c] ss:$12 sps:$4 sm:$0xff]   ;;  %v3696_v24 = vld [vmem:[#allocation8 + $0x140] ss:$12 sps:$4 sm:$0xff]  }
  0x87   :  { %4743 = vst [vmem:[#allocation60_spill] sm:$0xff] %v3694_v23  ;;  %4744 = vst [vmem:[#allocation61_spill] sm:$0xff] %v3696_v24  ;;  %v3716_v32 = vld [vmem:[#allocation8 + $0x150] ss:$12 sps:$4 sm:$0xff]  }
  0x88   :  { %2789 = vset.pattern.permute.xlu1 %v3325_v21  ;;  %2802 = vperm.xlu0 %2783, %v3543_v27   ;;  %v3688_v21 = vld [vmem:[#allocation8 + $0x120] ss:$12 sps:$4 sm:$0xff]   ;;  %4750 = vst [vmem:[#allocation67_spill] sm:$0xff] %v3716_v32 }
  0x89   :  { %2655 = vmatpush3.bf16.msra.mxu0 %v2952_v26  ;;  %2791 = vperm.xlu1 %2789, %v3543_v27   ;;  %4741 = vst [vmem:[#allocation58_spill] sm:$0xff] %v3688_v21 }
  0x8a   :  { %2656 = vmatprep.subr.bf16.mxu0 %v2953_v29  ;;  %1177 = vmatpush1.bf16.msra.mxu1 %v3604_v53 }
  0x8b   :  { %1178 = vmatprep.subr.bf16.mxu1 %v3607_v54 }
  0x8c   :  { %2818 = vset.pattern.permute.xlu0 %v3331_v35 }
  0x8d   :  { %2657 = vmatpush3.bf16.msra.mxu0 %v2953_v29  ;;  %2795 = vset.pattern.permute.xlu1 %v3329_v33  ;;  %v3706_v29 = vld [vmem:[#allocation8 + $0x80] ss:$12 sps:$4 sm:$0xff]  }
  0x8e   :  { %2797 = vperm.xlu1 %2795, %v3530_v15   ;;  %2820 = vperm.xlu0 %2818, %v3530_v15   ;;  %4747 = vst [vmem:[#allocation64_spill] sm:$0xff] %v3706_v29 }
  0x8f   :  { %1179 = vmatpush1.bf16.msra.mxu1 %v3611_v55  ;;  %2557 = vmatprep.subr.bf16.mxu0 %v3634_v1 }
  0x90   :  { %2659 = vmatmul.mubr.bf16.vlgmr.msra.gmra.mrb[0].mxu0 %v2955_v31  ;;  %1180 = vmatprep.subr.bf16.mxu1 %v3614_v56  ;;  %v3712_v31 = vld [vmem:[#allocation8 + $0x158] ss:$12 sps:$4 sm:$0xff]  }
  0x91   :  { %2558 = vmatpush3.bf16.msra.mxu0 %v3638_v3  ;;  %4749 = vst [vmem:[#allocation66_spill] sm:$0xff] %v3712_v31 }
  0x92   :  { %2806 = vset.pattern.permute.xlu1 %v3330_v34  ;;  %2836 = vset.pattern.permute.xlu0 %v3329_v33  ;;  %v3718_v33 = vld [vmem:[#allocation8 + $0x98] ss:$12 sps:$4 sm:$0xff]  }
  0x93   :  { %2808 = vperm.xlu1 %2806, %v3530_v15   ;;  %2838 = vperm.xlu0 %2836, %v3543_v27   ;;  %4751 = vst [vmem:[#allocation68_spill] sm:$0xff] %v3718_v33 }
  0x94   :  { %1181 = vmatpush1.bf16.msra.mxu1 %v3619_v58  ;;  %2559 = vmatprep.subr.bf16.mxu0 %v3646_v5 }
  0x95   :  { %1182 = vmatprep.subr.bf16.mxu1 %v3624_v60  ;;  %2560 = vmatpush3.bf16.msra.mxu0 %v3650_v7 }
  0x96   :  { %2561 = vmatprep.subr.bf16.mxu0 %v3660_v11 }
  0x97   :  { %2812 = vset.pattern.permute.xlu1 %v3326_v28  ;;  %2854 = vset.pattern.permute.xlu0 %v3332_v36  ;;  %v3704_v28 = vld [vmem:[#allocation8 + $0x138] ss:$12 sps:$4 sm:$0xff]  }
  0x98   :  { %2814 = vperm.xlu1 %2812, %v3543_v27   ;;  %2856 = vperm.xlu0 %2854, %v3530_v15   ;;  %4746 = vst [vmem:[#allocation63_spill] sm:$0xff] %v3704_v28 }
  0x99   :  { %1183 = vmatpush1.bf16.msra.mxu1 %v3627_v61  ;;  %2562 = vmatpush3.bf16.msra.mxu0 %v3664_v13 }
  0x9a   :  { %1184 = vmatprep.subr.bf16.mxu1 %v3632_v63  ;;  %2563 = vmatprep.subr.bf16.mxu0 %v3674_v16 }
  0x9c   :  { %2824 = vset.pattern.permute.xlu1 %v3327_v30  ;;  %2872 = vset.pattern.permute.xlu0 %v3333_v37  ;;  %v3710_v30 = vld [vmem:[#allocation8 + $0x154] ss:$12 sps:$4 sm:$0xff]  }
  0x9d   :  { %2826 = vperm.xlu1 %2824, %v3543_v27   ;;  %2874 = vperm.xlu0 %2872, %v3543_v27   ;;  %4748 = vst [vmem:[#allocation65_spill] sm:$0xff] %v3710_v30 }
  0x9e   :  { %1185 = vmatpush1.bf16.msra.mxu1 %v3636_v2  ;;  %2564 = vmatpush3.bf16.msra.mxu0 %v3678_v18 }
  0x9f   :  { %1186 = vmatprep.subr.bf16.mxu1 %v3644_v4  ;;  %2565 = vmatprep.subr.bf16.mxu0 %v3684_v20 }
  0xa1   :  { %2830 = vset.pattern.permute.xlu1 %v3333_v37  ;;  %2890 = vset.pattern.permute.xlu0 %v3335_v39 }
  0xa2   :  { %2832 = vperm.xlu1 %2830, %v3530_v15   ;;  %2892 = vperm.xlu0 %2890, %v3530_v15  }
  0xa3   :  { %1187 = vmatpush1.bf16.msra.mxu1 %v3648_v6  ;;  %2566 = vmatpush3.bf16.msra.mxu0 %v3690_v22  ;;  %v342_v22 = vlaneseq }
  0xa4   :  { %1188 = vmatprep.subr.bf16.mxu1 %v3658_v10  ;;  %2567 = vmatprep.subr.bf16.mxu0 %v3696_v24 }
  0xa5   :  { %v343_v16 = vshrl.u32 %v342_v22, 7 }
  0xa6   :  { %2842 = vset.pattern.permute.xlu1 %v3334_v38  ;;  %2908 = vset.pattern.permute.xlu0 %v3336_v40 }
  0xa7   :  { %2844 = vperm.xlu1 %2842, %v3530_v15   ;;  %2910 = vperm.xlu0 %2908, %v3543_v27   ;;  %v3775_v11 = vsub.s32 4, %v343_v16  ;;  %v3777_v7 = vsub.s32 0, %v343_v16  ;;  %v3779_v5 = vsub.s32 1, %v343_v16  ;;  %v3781_v3 = vsub.s32 2, %v343_v16 }
  0xa8   :  { %1189 = vmatpush1.bf16.msra.mxu1 %v3662_v12  ;;  %2568 = vmatpush3.bf16.msra.mxu0 %v3706_v29 }
  0xa9   :  { %2569 = vmatprep.subr.bf16.mxu0 %v3712_v31 }
  0xab   :  { %2848 = vset.pattern.permute.xlu1 %v3330_v34  ;;  %2926 = vset.pattern.permute.xlu0 %v3335_v39  ;;  %v3734_v39 = vld [vmem:[#allocation8 + $0xb0] ss:$12 sps:$4 sm:$0xff]  }
  0xac   :  { %2850 = vperm.xlu1 %2848, %v3543_v27   ;;  %2928 = vperm.xlu0 %2926, %v3543_v27   ;;  %4757 = vst [vmem:[#allocation74_spill] sm:$0xff] %v3734_v39 }
  0xad   :  { %2570 = vmatpush3.bf16.msra.mxu0 %v3718_v33 }
  0xb0   :  { %2860 = vset.pattern.permute.xlu1 %v3331_v35  ;;  %2944 = vset.pattern.permute.xlu0 %v4573_v0  ;;  %v3724_v35 = vld [vmem:[#allocation8 + $0x16c] ss:$12 sps:$4 sm:$0xff]  }
  0xb1   :  { %2862 = vperm.xlu1 %2860, %v3543_v27   ;;  %4753 = vst [vmem:[#allocation70_spill] sm:$0xff] %v3724_v35 }
  0xb5   :  { %2866 = vset.pattern.permute.xlu1 %v3336_v40 }
  0xb6   :  { %2868 = vperm.xlu1 %2866, %v3530_v15  }
  0xba   :  { %2878 = vset.pattern.permute.xlu1 %v3337_v42 }
  0xbb   :  { %2880 = vperm.xlu1 %2878, %v3530_v15  }
  0xbf   :  { %2884 = vset.pattern.permute.xlu1 %v3334_v38  ;;  %v3732_v38 = vld [vmem:[#allocation8 + $0x168] ss:$12 sps:$4 sm:$0xff]  }
  0xc0   :  { %2886 = vperm.xlu1 %2884, %v3543_v27   ;;  %4756 = vst [vmem:[#allocation73_spill] sm:$0xff] %v3732_v38 }
  0xc4   :  { %2896 = vset.pattern.permute.xlu1 %v3332_v36  ;;  %v3726_v36 = vld [vmem:[#allocation8 + $0x170] ss:$12 sps:$4 sm:$0xff]  }
  0xc5   :  { %2898 = vperm.xlu1 %2896, %v3543_v27   ;;  %4754 = vst [vmem:[#allocation71_spill] sm:$0xff] %v3726_v36  ;;  %2571 = vmatprep.subr.bf16.mxu0 %v3726_v36 }
  0xc6   :  { %2572 = vmatpush3.bf16.msra.mxu0 %v3734_v39 }
  0xc9   :  { %2902 = vset.pattern.permute.xlu1 %v3338_v49 }
  0xca   :  { %2904 = vperm.xlu1 %2902, %v3530_v15  }
  0xce   :  { %2914 = vset.pattern.permute.xlu1 %v3339_v52 }
  0xcf   :  { %2916 = vperm.xlu1 %2914, %v3530_v15   ;;  %v3672_v15 = vld [vmem:[#allocation8 + $0x10c] ss:$12 sps:$4 sm:$0xff]  }
  0xd0   :  { %4735 = vst [vmem:[#allocation52_spill] sm:$0xff] %v3672_v15  ;;  %1190 = vmatprep.subr.bf16.mxu1 %v3672_v15 }
  0xd1   :  { %1191 = vmatpush1.bf16.msra.mxu1 %v3676_v17 }
  0xd2   :  { %1192 = vmatprep.subr.bf16.mxu1 %v3680_v19 }
  0xd3   :  { %2920 = vset.pattern.permute.xlu1 %v3337_v42 }
  0xd4   :  { %2922 = vperm.xlu1 %2920, %v3543_v27  }
  0xd5   :  { %1193 = vmatpush1.bf16.msra.mxu1 %v3688_v21 }
  0xd6   :  { %1194 = vmatprep.subr.bf16.mxu1 %v3694_v23 }
  0xd8   :  { %2932 = vset.pattern.permute.xlu1 %v3338_v49 }
  0xd9   :  { %2934 = vperm.xlu1 %2932, %v3543_v27   ;;  %1195 = vmatpush1.bf16.msra.mxu1 %v3704_v28 }
  0xda   :  { %1196 = vmatprep.subr.bf16.mxu1 %v3710_v30  ;;  %v3791_v30 = vsub.s32 7, %v343_v16 }
  0xdd   :  { %2938 = vset.pattern.permute.xlu1 %v3339_v52  ;;  %1197 = vmatpush1.bf16.msra.mxu1 %v3716_v32  ;;  %v3789_v32 = vsub.s32 6, %v343_v16 }
  0xde   :  { %2940 = vperm.xlu1 %2938, %v3543_v27   ;;  %1198 = vmatprep.subr.bf16.mxu1 %v3724_v35  ;;  %v3787_v35 = vsub.s32 5, %v343_v16 }
  0xe1   :  { %1199 = vmatpush1.bf16.msra.mxu1 %v3732_v38  ;;  %v3785_v38 = vsub.s32 3, %v343_v16 }
  0xe2   :  { %2945 = vset.pattern.permute.xlu1 %v4573_v0  ;;  %1743 = vmatprep.subr.bf16.mxu1 %v3569_v41 }
  0xf0   :  { %v3617_v57 = vpop.permute.xlu1 %152 }
  0xf1   :  { %4715 = vst [vmem:[#allocation32_spill] sm:$0xff] %v3617_v57  ;;  %v3700_v27 = vpop.permute.xlu0 %142 }
  0xf2   :  { %4745 = vst [vmem:[#allocation62_spill] sm:$0xff] %v3700_v27 }
  0xf4   :  { %v3621_v59 = vpop.permute.xlu1 %157 }
  0xf5   :  { %4717 = vst [vmem:[#allocation34_spill] sm:$0xff] %v3621_v59  ;;  %v3728_v37 = vpop.permute.xlu0 %147 }
  0xf6   :  { %4755 = vst [vmem:[#allocation72_spill] sm:$0xff] %v3728_v37 }
  0xf9   :  { %v3630_v62 = vpop.permute.xlu1 %2762 }
  0xfa   :  { %4720 = vst [vmem:[#allocation37_spill] sm:$0xff] %v3630_v62  ;;  %v3740_v42 = vpop.permute.xlu0 %2756 }
  0xfb   :  { %4758 = vst [vmem:[#allocation75_spill] sm:$0xff] %v3740_v42 }
  0xfe   :  { %v3652_v8 = vpop.permute.xlu1 %2768  ;;  %v3747_v52 = vpop.permute.xlu0 %2779 }
  0xff   :  { %4729 = vst [vmem:[#allocation46_spill] sm:$0xff] %v3652_v8  ;;  %4759 = vst [vmem:[#allocation76_spill] sm:$0xff] %v3747_v52 }
 0x103   :  { %v3670_v14 = vpop.permute.xlu1 %2774  ;;  %v3751_v25 = vpop.permute.xlu0 %2785 }
 0x104   :  { %4734 = vst [vmem:[#allocation51_spill] sm:$0xff] %v3670_v14  ;;  %4760 = vst [vmem:[#allocation77_spill] sm:$0xff] %v3751_v25 }
 0x107   :  { %v3755_v36 = vpop.permute.xlu0 %2802 }
 0x108   :  { %v3698_v26 = vpop.permute.xlu1 %2791 }
 0x10d   :  { %v3720_v34 = vpop.permute.xlu1 %2797  ;;  %v3759_v31 = vpop.permute.xlu0 %2820 }
 0x10e   :  { %4752 = vst [vmem:[#allocation69_spill] sm:$0xff] %v3720_v34 }
 0x112   :  { %v3738_v40 = vpop.permute.xlu1 %2808  ;;  %v3763_v39 = vpop.permute.xlu0 %2838 }
 0x117   :  { %v3745_v49 = vpop.permute.xlu1 %2814  ;;  %v3767_v24 = vpop.permute.xlu0 %2856 }
 0x118   :  { %4762 = vst [vmem:[#allocation79_spill] sm:$0xff] %v3767_v24 }
 0x11c   :  { %v3749_v0 = vpop.permute.xlu1 %2826  ;;  %v3771_v18 = vpop.permute.xlu0 %2874 }
 0x121   :  { %v3753_v9 = vpop.permute.xlu1 %2832  ;;  %v3783_v1 = vpop.permute.xlu0 %2892 }
 0x122   :  { %4761 = vst [vmem:[#allocation78_spill] sm:$0xff] %v3753_v9  ;;  %v4786_v47 = vunpack.i.h.bf16 %v3753_v9 }
 0x126   :  { %v3757_v33 = vpop.permute.xlu1 %2844  ;;  %v3815_v4 = vpop.permute.xlu0 %2910 }
 0x127   :  { %v4787_v45 = vunpack.i.l.bf16 %v3757_v33 }
 0x12b   :  { %v3761_v29 = vpop.permute.xlu1 %2850  ;;  %v3845_v19 = vpop.permute.xlu0 %2928 }
 0x12c   :  { %4767 = vst [vmem:[#allocation84_spill] sm:$0xff] %v3845_v19 }
 0x130   :  { %v3765_v41 = vpop.permute.xlu1 %2862 }
 0x135   :  { %v3769_v20 = vpop.permute.xlu1 %2868 }
 0x136   :  { %4763 = vst [vmem:[#allocation80_spill] sm:$0xff] %v3769_v20 }
 0x13a   :  { %v3773_v13 = vpop.permute.xlu1 %2880 }
 0x13f   :  { %v3809_v6 = vpop.permute.xlu1 %2886 }
 0x144   :  { %v3829_v56 = vpop.permute.xlu1 %2898 }
 0x149   :  { %v3869_v21 = vpop.permute.xlu1 %2904 }
 0x163   :  { %v2660_v15 = vpop.f32.mrb[0].mxu0 }
 0x164   :  { %v291_v28 = vpop.f32.mrb[1].mxu0  ;;  %v308_v63 = vmax.f32 %v2660_v15, 0.0  ;;  %v4770_v15 = vunpack.i.h.bf16 %v3740_v42 }
 0x165   :  { %v306_v17 = vmax.f32 %v291_v28, 0.0  ;;  %v2661_v2 = vpop.f32.mrb[2].mxu0 }
 0x166   :  { %v309_v16 = vmax.f32 %v2661_v2, 0.0  ;;  %v294_v61 = vpop.f32.mrb[3].mxu0  ;;  %v3854_v60 = vmul.f32 %v308_v63, %v3617_v57 }
 0x167   :  { %v307_v58 = vmax.f32 %v294_v61, 0.0  ;;  %v3834_v10 = vmul.f32 %v306_v17, %v3700_v27  ;;  %v4769_v27 = vunpack.i.l.bf16 %v3740_v42 }
 0x168   :  { %v3842_v23 = vmul.f32 %v309_v16, %v3621_v59  ;;  %4768 = vst [vmem:[#allocation85_spill] sm:$0xff] %v3854_v60 }
 0x169   :  { %4764 = vst [vmem:[#allocation81_spill] sm:$0xff] %v3834_v10  ;;  %v3837_v22 = vmul.f32 %v307_v58, %v3728_v37  ;;  %v3900_v58 = vpop.permute.xlu1 %2916 }
 0x16a   :  { %4766 = vst [vmem:[#allocation83_spill] sm:$0xff] %v3842_v23  ;;  %v3866_v16 = vpack.c.bf16 %v3842_v23, %v3854_v60  ;;  %v4771_v60 = vunpack.i.l.bf16 %v3630_v62 }
 0x16b   :  { %4765 = vst [vmem:[#allocation82_spill] sm:$0xff] %v3837_v22  ;;  %v314_v17 = vpack.c.bf16 %v3837_v22, %v3834_v10  ;;  %v4772_v10 = vunpack.i.h.bf16 %v3630_v62 }
 0x16d   :  { %v320_v28 = vunpack.c.l.bf16 %v314_v17  ;;  %1200 = vmatprep.mubr.bf16.mxu1 %v314_v17  ;;  %1253 = vmatprep.mubr.bf16.mxu0 %v314_v17  ;;  %v584_v59 = vrot.slane %v314_v17, 4  ;;  %v585_v17 = vrot.slane %v3866_v16, 4 }
 0x16f   :  { %v345_v12 = vrot.slane %v320_v28, %v3777_v7  ;;  %v377_v37 = vrot.slane %v320_v28, %v3779_v5  ;;  %v409_v2 = vrot.slane %v320_v28, %v3781_v3  ;;  %v441_v63 = vrot.slane %v320_v28, %v3785_v38 }
 0x170   :  { %v473_v61 = vrot.slane %v320_v28, %v3775_v11  ;;  %v505_v54 = vrot.slane %v320_v28, %v3787_v35 }
 0x171   :  { %v350_v57 = vmul.f32 %v4769_v27, %v345_v12  ;;  %v351_v23 = vmul.f32 %v4770_v15, %v345_v12  ;;  %v382_v22 = vmul.f32 %v4771_v60, %v377_v37  ;;  %v383_v55 = vmul.f32 %v4772_v10, %v377_v37 }
 0x172   :  { %v4773_v27 = vunpack.i.l.bf16 %v3751_v25  ;;  %v4774_v12 = vunpack.i.h.bf16 %v3751_v25  ;;  %v3895_v10 = vunpack.c.l.bf16 %v3866_v16  ;;  %v3897_v37 = vunpack.c.l.bf16 %v584_v59 }
 0x173   :  { %v386_v53 = vadd.f32 %v382_v22, %v350_v57  ;;  %v387_v51 = vadd.f32 %v383_v55, %v351_v23  ;;  %v4775_v55 = vunpack.i.l.bf16 %v3652_v8  ;;  %v4776_v22 = vunpack.i.h.bf16 %v3652_v8 }
 0x174   :  { %v414_v42 = vmul.f32 %v4773_v27, %v409_v2  ;;  %v415_v15 = vmul.f32 %v4774_v12, %v409_v2  ;;  %v3907_v12 = vunpack.c.l.bf16 %v585_v17  ;;  %v4777_v60 = vunpack.i.l.bf16 %v3670_v14 }
 0x175   :  { %v446_v23 = vmul.f32 %v4775_v55, %v441_v63  ;;  %v447_v27 = vmul.f32 %v4776_v22, %v441_v63  ;;  %v537_v25 = vrot.slane %v320_v28, %v3789_v32  ;;  %v609_v63 = vrot.slane %v3897_v37, %v3777_v7 }
 0x176   :  { %v418_v62 = vadd.f32 %v414_v42, %v386_v53  ;;  %v419_v57 = vadd.f32 %v415_v15, %v387_v51  ;;  %v478_v59 = vmul.f32 %v4777_v60, %v473_v61  ;;  %v4778_v53 = vunpack.i.h.bf16 %v3670_v14 }
 0x177   :  { %v569_v42 = vrot.slane %v320_v28, %v3791_v30  ;;  %v4779_v15 = vunpack.i.l.bf16 %v3720_v34  ;;  %v641_v17 = vrot.slane %v3897_v37, %v3779_v5  ;;  %v349_v60 = vrot.slane %v3895_v10, %v3777_v7 }
 0x178   :  { %v450_v50 = vadd.f32 %v446_v23, %v418_v62  ;;  %v451_v48 = vadd.f32 %v447_v27, %v419_v57  ;;  %v479_v51 = vmul.f32 %v4778_v53, %v473_v61  ;;  %v4780_v57 = vunpack.i.h.bf16 %v3720_v34 }
 0x179   :  { %v510_v55 = vmul.f32 %v4779_v15, %v505_v54  ;;  %v673_v28 = vrot.slane %v3897_v37, %v3781_v3  ;;  %v4781_v61 = vunpack.i.l.bf16 %v3738_v40  ;;  %v705_v53 = vrot.slane %v3897_v37, %v3785_v38 }
 0x17a   :  { %v482_v22 = vadd.f32 %v478_v59, %v450_v50  ;;  %v483_v62 = vadd.f32 %v479_v51, %v451_v48  ;;  %v511_v23 = vmul.f32 %v4780_v57, %v505_v54  ;;  %v381_v15 = vrot.slane %v3895_v10, %v3779_v5 }
 0x17b   :  { %v542_v27 = vmul.f32 %v4781_v61, %v537_v25  ;;  %v413_v2 = vrot.slane %v3895_v10, %v3781_v3  ;;  %v4782_v59 = vunpack.i.h.bf16 %v3738_v40  ;;  %v4783_v51 = vunpack.i.l.bf16 %v3759_v31 }
 0x17c   :  { %v514_v50 = vadd.f32 %v510_v55, %v482_v22  ;;  %v515_v48 = vadd.f32 %v511_v23, %v483_v62  ;;  %v4784_v34 = vunpack.i.h.bf16 %v3759_v31  ;;  %v4785_v14 = vunpack.i.l.bf16 %v3753_v9 }
 0x17d   :  { %v543_v54 = vmul.f32 %v4782_v59, %v537_v25  ;;  %v574_v57 = vmul.f32 %v4783_v51, %v569_v42  ;;  %v615_v46 = vmul.f32 %v4786_v47, %v609_v63  ;;  %v646_v44 = vmul.f32 %v4787_v45, %v641_v17 }
 0x17e   :  { %v575_v61 = vmul.f32 %v4784_v34, %v569_v42  ;;  %v614_v8 = vmul.f32 %v4785_v14, %v609_v63  ;;  %v546_v55 = vadd.f32 %v542_v27, %v514_v50  ;;  %v4788_v62 = vunpack.i.h.bf16 %v3757_v33 }
 0x17f   :  { %v547_v22 = vadd.f32 %v543_v54, %v515_v48  ;;  %v4789_v23 = vunpack.i.l.bf16 %v3767_v24  ;;  %v4790_v51 = vunpack.i.h.bf16 %v3767_v24  ;;  %v4791_v42 = vunpack.i.l.bf16 %v3769_v20 }
 0x180   :  { %v647_v25 = vmul.f32 %v4788_v62, %v641_v17  ;;  %v4792_v9 = vunpack.i.l.bf16 %v3747_v52  ;;  %v4793_v63 = vunpack.i.h.bf16 %v3747_v52  ;;  %v578_v27 = vadd.f32 %v574_v57, %v546_v55 }
 0x181   :  { %v678_v59 = vmul.f32 %v4789_v23, %v673_v28  ;;  %v679_v34 = vmul.f32 %v4790_v51, %v673_v28  ;;  %v710_v14 = vmul.f32 %v4791_v42, %v705_v53  ;;  %v579_v50 = vadd.f32 %v575_v61, %v547_v22 }
 0x182   :  { %v352_v47 = vmul.f32 %v4792_v9, %v349_v60  ;;  %v353_v45 = vmul.f32 %v4793_v63, %v349_v60  ;;  %v4794_v48 = vunpack.i.h.bf16 %v3769_v20  ;;  %v737_v54 = vrot.slane %v3897_v37, %v3775_v11 }
 0x183   :  { %v769_v28 = vrot.slane %v3897_v37, %v3787_v35  ;;  %v801_v62 = vrot.slane %v3897_v37, %v3789_v32  ;;  %v4795_v23 = vunpack.i.l.bf16 %v3698_v26  ;;  %v4796_v51 = vunpack.i.h.bf16 %v3698_v26 }
 0x184   :  { %v711_v17 = vmul.f32 %v4794_v48, %v705_v53  ;;  %v618_v57 = vadd.f32 %v614_v8, %v578_v27  ;;  %v619_v61 = vadd.f32 %v615_v46, %v579_v50  ;;  %v4797_v55 = vunpack.i.l.bf16 %v3755_v36 }
 0x185   :  { %v384_v9 = vmul.f32 %v4795_v23, %v381_v15  ;;  %v385_v60 = vmul.f32 %v4796_v51, %v381_v15  ;;  %v445_v22 = vrot.slane %v3895_v10, %v3785_v38  ;;  %v4798_v48 = vunpack.i.h.bf16 %v3755_v36 }
 0x186   :  { %v416_v53 = vmul.f32 %v4797_v55, %v413_v2  ;;  %v477_v20 = vrot.slane %v3895_v10, %v3775_v11  ;;  %v650_v23 = vadd.f32 %v646_v44, %v618_v57  ;;  %v651_v24 = vadd.f32 %v647_v25, %v619_v61 }
 0x187   :  { %v388_v42 = vadd.f32 %v384_v9, %v352_v47  ;;  %v389_v63 = vadd.f32 %v385_v60, %v353_v45  ;;  %v417_v52 = vmul.f32 %v4798_v48, %v413_v2  ;;  %v4799_v15 = vunpack.i.l.bf16 %v3773_v13 }
 0x188   :  { %v509_v46 = vrot.slane %v3895_v10, %v3787_v35  ;;  %v4800_v51 = vunpack.i.l.bf16 %v3745_v49  ;;  %v4801_v45 = vunpack.i.h.bf16 %v3745_v49  ;;  %v682_v2 = vadd.f32 %v678_v59, %v650_v23 }
 0x189   :  { %v742_v8 = vmul.f32 %v4799_v15, %v737_v54  ;;  %v420_v27 = vadd.f32 %v416_v53, %v388_v42  ;;  %v421_v50 = vadd.f32 %v417_v52, %v389_v63  ;;  %v683_v60 = vadd.f32 %v679_v34, %v651_v24 }
 0x18a   :  { %v448_v47 = vmul.f32 %v4800_v51, %v445_v22  ;;  %v449_v9 = vmul.f32 %v4801_v45, %v445_v22  ;;  %v4802_v55 = vunpack.i.h.bf16 %v3773_v13  ;;  %v541_v25 = vrot.slane %v3895_v10, %v3789_v32 }
 0x18b   :  { %v4803_v48 = vunpack.i.l.bf16 %v3749_v0  ;;  %v4804_v52 = vunpack.i.h.bf16 %v3749_v0  ;;  %v714_v63 = vadd.f32 %v710_v14, %v682_v2  ;;  %v715_v15 = vadd.f32 %v711_v17, %v683_v60 }
 0x18c   :  { %v743_v44 = vmul.f32 %v4802_v55, %v737_v54  ;;  %v452_v57 = vadd.f32 %v448_v47, %v420_v27  ;;  %v453_v61 = vadd.f32 %v449_v9, %v421_v50  ;;  %v4805_v22 = vunpack.i.l.bf16 %v3783_v1  ;;  %v3999_v54 = vpop.permute.xlu1 %2922 }
 0x18d   :  { %v480_v53 = vmul.f32 %v4803_v48, %v477_v20  ;;  %v481_v42 = vmul.f32 %v4804_v52, %v477_v20  ;;  %v4806_v24 = vunpack.i.l.bf16 %v3763_v39  ;;  %v4807_v27 = vunpack.i.h.bf16 %v3763_v39 }
 0x18e   :  { %v774_v59 = vmul.f32 %v4805_v22, %v769_v28  ;;  %v573_v47 = vrot.slane %v3895_v10, %v3791_v30  ;;  %v746_v45 = vadd.f32 %v742_v8, %v714_v63  ;;  %v747_v20 = vadd.f32 %v743_v44, %v715_v15 }
 0x18f   :  { %v512_v34 = vmul.f32 %v4806_v24, %v509_v46  ;;  %v484_v23 = vadd.f32 %v480_v53, %v452_v57  ;;  %v485_v51 = vadd.f32 %v481_v42, %v453_v61  ;;  %v513_v50 = vmul.f32 %v4807_v27, %v509_v46 }
 0x190   :  { %v4808_v14 = vunpack.i.h.bf16 %v3783_v1  ;;  %v613_v9 = vrot.slane %v3907_v12, %v3777_v7  ;;  %v4809_v55 = vunpack.i.l.bf16 %v3761_v29  ;;  %v4810_v61 = vunpack.i.h.bf16 %v3761_v29  ;;  %v4028_v27 = vpop.permute.xlu1 %2934 }
 0x191   :  { %v516_v2 = vadd.f32 %v512_v34, %v484_v23  ;;  %v517_v60 = vadd.f32 %v513_v50, %v485_v51  ;;  %v4666_v46 = vunpack.i.l.bf16 %v3900_v58  ;;  %v778_v53 = vadd.f32 %v774_v59, %v746_v45  ;;  %4816 = vst [vmem:[#allocation86_spill] sm:$0xff] %v4028_v27 }
 0x192   :  { %v775_v17 = vmul.f32 %v4808_v14, %v769_v28  ;;  %v544_v57 = vmul.f32 %v4809_v55, %v541_v25  ;;  %v545_v48 = vmul.f32 %v4810_v61, %v541_v25  ;;  %v645_v8 = vrot.slane %v3907_v12, %v3779_v5 }
 0x193   :  { %v4811_v52 = vunpack.i.l.bf16 %v3765_v41  ;;  %v4812_v63 = vunpack.i.h.bf16 %v3765_v41  ;;  %v4813_v22 = vunpack.i.l.bf16 %v3869_v21  ;;  %v4814_v25 = vunpack.i.h.bf16 %v3869_v21 }
 0x194   :  { %v779_v10 = vadd.f32 %v775_v17, %v747_v20  ;;  %v548_v44 = vadd.f32 %v544_v57, %v516_v2  ;;  %v549_v28 = vadd.f32 %v545_v48, %v517_v60  ;;  %v4815_v59 = vunpack.i.l.bf16 %v3771_v18 }
 0x195   :  { %v576_v42 = vmul.f32 %v4811_v52, %v573_v47  ;;  %v577_v15 = vmul.f32 %v4812_v63, %v573_v47  ;;  %v806_v24 = vmul.f32 %v4813_v22, %v801_v62  ;;  %v807_v34 = vmul.f32 %v4814_v25, %v801_v62 }
 0x196   :  { %v616_v23 = vmul.f32 %v4815_v59, %v613_v9  ;;  %v677_v51 = vrot.slane %v3907_v12, %v3781_v3  ;;  %v4817_v20 = vunpack.i.h.bf16 %v3771_v18  ;;  %v833_v47 = vrot.slane %v3897_v37, %v3791_v30 }
 0x197   :  { %v580_v50 = vadd.f32 %v576_v42, %v548_v44  ;;  %v581_v45 = vadd.f32 %v577_v15, %v549_v28  ;;  %v4664_v17 = vunpack.i.h.bf16 %v3999_v54  ;;  %v810_v2 = vadd.f32 %v806_v24, %v778_v53 }
 0x198   :  { %v617_v14 = vmul.f32 %v4817_v20, %v613_v9  ;;  %v811_v62 = vadd.f32 %v807_v34, %v779_v10  ;;  %v4818_v60 = vunpack.i.l.bf16 %v3809_v6  ;;  %v4819_v48 = vunpack.i.h.bf16 %v3809_v6 }
 0x199   :  { %v620_v57 = vadd.f32 %v616_v23, %v580_v50  ;;  %v709_v44 = vrot.slane %v3907_v12, %v3785_v38  ;;  %v4665_v9 = vunpack.i.l.bf16 %v3999_v54  ;;  %v741_v37 = vrot.slane %v3907_v12, %v3775_v11 }
 0x19a   :  { %v648_v55 = vmul.f32 %v4818_v60, %v645_v8  ;;  %v621_v61 = vadd.f32 %v617_v14, %v581_v45  ;;  %v649_v52 = vmul.f32 %v4819_v48, %v645_v8  ;;  %v838_v53 = vmul.f32 %v4666_v46, %v833_v47 }
 0x19b   :  { %v4820_v10 = vunpack.i.h.bf16 %v3900_v58  ;;  %v4821_v15 = vunpack.i.l.bf16 %v3829_v56  ;;  %v4822_v8 = vunpack.i.h.bf16 %v3829_v56  ;;  %v4663_v25 = vunpack.i.l.bf16 %v3845_v19 }
 0x19c   :  { %v652_v42 = vadd.f32 %v648_v55, %v620_v57  ;;  %v653_v63 = vadd.f32 %v649_v52, %v621_v61  ;;  %v773_v34 = vrot.slane %v3907_v12, %v3787_v35  ;;  %v842_v59 = vadd.f32 %v838_v53, %v810_v2  ;;  %v4059_v55 = vpop.permute.xlu1 %2940 }
 0x19d   :  { %v839_v28 = vmul.f32 %v4820_v10, %v833_v47  ;;  %v680_v22 = vmul.f32 %v4821_v15, %v677_v51  ;;  %v681_v24 = vmul.f32 %v4822_v8, %v677_v51  ;;  %v4823_v20 = vunpack.i.l.bf16 %v3815_v4  ;;  %4825 = vst [vmem:[#allocation87_spill] sm:$0xff] %v4059_v55 }
 0x19e   :  { %v4824_v47 = vunpack.i.h.bf16 %v3815_v4  ;;  %v744_v51 = vmul.f32 %v4665_v9, %v741_v37  ;;  %v4661_v57 = vunpack.i.h.bf16 %v4028_v27  ;;  %v4662_v61 = vunpack.i.l.bf16 %v4028_v27  ;;  %v4867_v9 = vld [vmem:[#allocation81_spill] sm:$0xff] }
 0x19f   :  { %v843_v23 = vadd.f32 %v839_v28, %v811_v62  ;;  %v684_v50 = vadd.f32 %v680_v22, %v652_v42  ;;  %v685_v45 = vadd.f32 %v681_v24, %v653_v63  ;;  %v712_v14 = vmul.f32 %v4823_v20, %v709_v44  ;;  %v4828_v20 = vld [vmem:[#allocation22_spill] sm:$0xff] }
 0x1a0   :  { %v713_v60 = vmul.f32 %v4824_v47, %v709_v44  ;;  %v745_v2 = vmul.f32 %v4664_v17, %v741_v37  ;;  %v805_v62 = vrot.slane %v3907_v12, %v3789_v32  ;;  %v4659_v44 = vunpack.i.h.bf16 %v4059_v55  ;;  %v4829_v47 = vld [vmem:[#allocation23_spill] sm:$0xff] }
 0x1a1   :  { %v846_v48 = vpack.c.bf16 %v843_v23, %v842_v59  ;;  %v716_v52 = vadd.f32 %v712_v14, %v684_v50  ;;  %v837_v10 = vrot.slane %v3907_v12, %v3791_v30  ;;  %v776_v28 = vmul.f32 %v4663_v25, %v773_v34  ;;  %v4827_v23 = vld [vmem:[#allocation21_spill] sm:$0xff] }
 0x1a2   :  { %v717_v53 = vadd.f32 %v713_v60, %v685_v45  ;;  %v4660_v42 = vunpack.i.l.bf16 %v4059_v55  ;;  %v4826_v37 = vunpack.i.h.bf16 %v3845_v19  ;;  %v808_v12 = vmul.f32 %v4662_v61, %v805_v62  ;;  %v4911_v55 = vld [vmem:[#allocation69_spill] sm:$0xff] }
 0x1a3   :  { %1201 = vmatmul.mubr.bf16.vlgmr.msra.gmra.mrb[0].mxu1 %v846_v48  ;;  %1254 = vmatmul.mubr.bf16.vlgmr.msra.gmra.mrb[4].mxu0 %v846_v48  ;;  %v748_v63 = vadd.f32 %v744_v51, %v716_v52  ;;  %v809_v8 = vmul.f32 %v4661_v57, %v805_v62  ;;  %v4830_v51 = vld [vmem:[#allocation24_spill] sm:$0xff]  ;;  %v4831_v48 = vld [vmem:[#allocation25_spill] sm:$0xff]  ;;  %v4833_v62 = vld [vmem:[#allocation27_spill] sm:$0xff] }
 0x1a4   :  { %v749_v15 = vadd.f32 %v745_v2, %v717_v53  ;;  %v777_v22 = vmul.f32 %v4826_v37, %v773_v34  ;;  %1210 = vmatprep.mubr.bf16.mxu1 %v3866_v16  ;;  %1261 = vmatprep.mubr.bf16.mxu0 %v3866_v16  ;;  %v840_v50 = vmul.f32 %v4660_v42, %v837_v10  ;;  %v4832_v2 = vld [vmem:[#allocation26_spill] sm:$0xff]  ;;  %v4834_v52 = vld [vmem:[#allocation28_spill] sm:$0xff]  ;;  %v4835_v53 = vld [vmem:[#allocation29_spill] sm:$0xff] }
 0x1a5   :  { %1744 = vmatpush1.bf16.msra.mxu1 %v3573_v43  ;;  %v780_v24 = vadd.f32 %v776_v28, %v748_v63  ;;  %v841_v34 = vmul.f32 %v4659_v44, %v837_v10  ;;  %v4836_v10 = vld [vmem:[#allocation30_spill] sm:$0xff]  ;;  %v4837_v28 = vld [vmem:[#allocation31_spill] sm:$0xff]  ;;  %v4838_v63 = vld [vmem:[#allocation33_spill] sm:$0xff] }
 0x1a6   :  { %v781_v59 = vadd.f32 %v777_v22, %v749_v15  ;;  %1745 = vmatprep.subr.bf16.mxu1 %v4827_v23  ;;  %v4839_v15 = vld [vmem:[#allocation35_spill] sm:$0xff]  ;;  %v4840_v37 = vld [vmem:[#allocation36_spill] sm:$0xff]  ;;  %v4841_v22 = vld [vmem:[#allocation38_spill] sm:$0xff] }
 0x1a7   :  { %v812_v45 = vadd.f32 %v808_v12, %v780_v24  ;;  %v4842_v12 = vld [vmem:[#allocation40_spill] sm:$0xff]  ;;  %v4846_v23 = vld [vmem:[#allocation49_spill] sm:$0xff] }
 0x1a8   :  { %v813_v16 = vadd.f32 %v809_v8, %v781_v59  ;;  %v4843_v8 = vld [vmem:[#allocation42_spill] sm:$0xff]  ;;  %v4844_v24 = vld [vmem:[#allocation44_spill] sm:$0xff]  ;;  %v4845_v59 = vld [vmem:[#allocation47_spill] sm:$0xff] }
 0x1a9   :  { %1746 = vmatpush1.bf16.msra.mxu1 %v4828_v20  ;;  %v844_v43 = vadd.f32 %v840_v50, %v812_v45  ;;  %v4847_v50 = vld [vmem:[#allocation52_spill] sm:$0xff] }
 0x1aa   :  { %v845_v14 = vadd.f32 %v841_v34, %v813_v16  ;;  %1747 = vmatprep.subr.bf16.mxu1 %v4829_v47  ;;  %v4848_v34 = vld [vmem:[#allocation54_spill] sm:$0xff]  ;;  %v4849_v45 = vld [vmem:[#allocation56_spill] sm:$0xff]  ;;  %v4854_v47 = vld [vmem:[#allocation67_spill] sm:$0xff] }
 0x1ab   :  { %v4850_v16 = vld [vmem:[#allocation58_spill] sm:$0xff]  ;;  %v4851_v20 = vld [vmem:[#allocation60_spill] sm:$0xff] }
 0x1ac   :  { %v847_v60 = vpack.c.bf16 %v845_v14, %v844_v43  ;;  %v4852_v43 = vld [vmem:[#allocation63_spill] sm:$0xff]  ;;  %v4853_v14 = vld [vmem:[#allocation65_spill] sm:$0xff] }
 0x1ad   :  { %1748 = vmatpush1.bf16.msra.mxu1 %v4830_v51  ;;  %v4856_v51 = vld [vmem:[#allocation73_spill] sm:$0xff] }
 0x1ae   :  { %1211 = vmatmul.mubr.bf16.gmra.mrb[4].mxu1 %v847_v60  ;;  %1262 = vmatmul.mubr.bf16.gmra.mrb[8].mxu0 %v847_v60  ;;  %v4855_v60 = vld [vmem:[#allocation70_spill] sm:$0xff] }
 0x1af   :  { %1749 = vmatprep.subr.bf16.mxu1 %v4831_v48  ;;  %v4118_v48 = vld [vmem:[#allocation10] sm:$0xff]  }
 0x1b0   :  { %4857 = vst [vmem:[#allocation21_spill] sm:$0xff] %v4118_v48  ;;  %2662 = vmatprep.subr.bf16.mxu0 %v4118_v48 }
 0x1b1   :  { %1750 = vmatpush1.bf16.msra.mxu1 %v4832_v2  ;;  %v4120_v2 = vld [vmem:[#allocation10 + $0x8] sm:$0xff]   ;;  %2663 = vmatpush3.bf16.msra.mxu0 %v4118_v48 }
 0x1b2   :  { %1751 = vmatprep.subr.bf16.mxu1 %v4833_v62  ;;  %4858 = vst [vmem:[#allocation22_spill] sm:$0xff] %v4120_v2  ;;  %2664 = vmatprep.subr.bf16.mxu0 %v4120_v2  ;;  %v4125_v62 = vld [vmem:[#allocation10 + $0x10] sm:$0xff]  }
 0x1b3   :  { %4859 = vst [vmem:[#allocation23_spill] sm:$0xff] %v4125_v62 }
 0x1b5   :  { %1752 = vmatpush1.bf16.msra.mxu1 %v4834_v52  ;;  %2665 = vmatpush3.bf16.msra.mxu0 %v4120_v2  ;;  %v4129_v52 = vld [vmem:[#allocation10 + $0x18] sm:$0xff]  }
 0x1b6   :  { %1753 = vmatprep.subr.bf16.mxu1 %v4835_v53  ;;  %2666 = vmatprep.subr.bf16.mxu0 %v4125_v62  ;;  %4860 = vst [vmem:[#allocation24_spill] sm:$0xff] %v4129_v52  ;;  %v4133_v53 = vld [vmem:[#allocation10 + $0x20] sm:$0xff]  }
 0x1b7   :  { %4861 = vst [vmem:[#allocation25_spill] sm:$0xff] %v4133_v53 }
 0x1b9   :  { %1754 = vmatpush1.bf16.msra.mxu1 %v4836_v10  ;;  %2667 = vmatpush3.bf16.msra.mxu0 %v4125_v62  ;;  %v4137_v10 = vld [vmem:[#allocation10 + $0x28] sm:$0xff]  }
 0x1ba   :  { %1755 = vmatprep.subr.bf16.mxu1 %v4837_v28  ;;  %2668 = vmatprep.subr.bf16.mxu0 %v4129_v52  ;;  %4862 = vst [vmem:[#allocation26_spill] sm:$0xff] %v4137_v10  ;;  %v4141_v28 = vld [vmem:[#allocation10 + $0x30] sm:$0xff]  }
 0x1bb   :  { %4863 = vst [vmem:[#allocation27_spill] sm:$0xff] %v4141_v28 }
 0x1bd   :  { %1756 = vmatpush1.bf16.msra.mxu1 %v4838_v63  ;;  %2669 = vmatpush3.bf16.msra.mxu0 %v4129_v52  ;;  %v4145_v63 = vld [vmem:[#allocation10 + $0x38] sm:$0xff]  }
 0x1be   :  { %1757 = vmatprep.subr.bf16.mxu1 %v4839_v15  ;;  %2670 = vmatprep.subr.bf16.mxu0 %v4133_v53  ;;  %4864 = vst [vmem:[#allocation28_spill] sm:$0xff] %v4145_v63  ;;  %v4865_v15 = vld [vmem:[#allocation39_spill] sm:$0xff] }
 0x1c1   :  { %1758 = vmatpush1.bf16.msra.mxu1 %v4840_v37  ;;  %2671 = vmatpush3.bf16.msra.mxu0 %v4133_v53  ;;  %v4154_v37 = vld [vmem:[%s4566_s7] ss:$0 sm:$0xff] }
 0x1c2   :  { %1759 = vmatprep.subr.bf16.mxu1 %v4841_v22  ;;  %2672 = vmatprep.subr.bf16.mxu0 %v4137_v10  ;;  %4866 = vst [vmem:[#allocation29_spill] sm:$0xff] %v4154_v37 }
 0x1c5   :  { %1760 = vmatpush1.bf16.msra.mxu1 %v4842_v12  ;;  %2673 = vmatpush3.bf16.msra.mxu0 %v4137_v10 }
 0x1c6   :  { %1761 = vmatprep.subr.bf16.mxu1 %v4843_v8  ;;  %2674 = vmatprep.subr.bf16.mxu0 %v4141_v28 }
 0x1c9   :  { %1762 = vmatpush1.bf16.msra.mxu1 %v4844_v24  ;;  %2675 = vmatpush3.bf16.msra.mxu0 %v4141_v28 }
 0x1ca   :  { %1763 = vmatprep.subr.bf16.mxu1 %v4845_v59  ;;  %2676 = vmatprep.subr.bf16.mxu0 %v4145_v63 }
 0x1cd   :  { %1764 = vmatpush1.bf16.msra.mxu1 %v4846_v23  ;;  %2677 = vmatpush3.bf16.msra.mxu0 %v4145_v63 }
 0x1ce   :  { %1765 = vmatprep.subr.bf16.mxu1 %v4847_v50  ;;  %2595 = vmatprep.subr.bf16.mxu0 %v4865_v15 }
 0x1d1   :  { %1766 = vmatpush1.bf16.msra.mxu1 %v4848_v34 }
 0x1d2   :  { %1767 = vmatprep.subr.bf16.mxu1 %v4849_v45 }
 0x1d5   :  { %1768 = vmatpush1.bf16.msra.mxu1 %v4850_v16 }
 0x1d6   :  { %1769 = vmatprep.subr.bf16.mxu1 %v4851_v20 }
 0x1d9   :  { %1770 = vmatpush1.bf16.msra.mxu1 %v4852_v43 }
 0x1da   :  { %1771 = vmatprep.subr.bf16.mxu1 %v4853_v14 }
 0x1dd   :  { %1772 = vmatpush1.bf16.msra.mxu1 %v4854_v47 }
 0x1de   :  { %1773 = vmatprep.subr.bf16.mxu1 %v4855_v60 }
 0x1e1   :  { %1774 = vmatpush1.bf16.msra.mxu1 %v4856_v51 }
 0x276   :  { %v4156_v22 = vpop.f32.mrb[0].mxu1  ;;  %v2573_v12 = vpop.f32.mrb[4].mxu0 }
 0x277   :  { %v1204_v8 = vpop.f32.mrb[1].mxu1  ;;  %v2574_v24 = vpop.f32.mrb[5].mxu0 }
 0x278   :  { %v1298_v59 = vadd.f32 %v4154_v37, %v1204_v8  ;;  %v4159_v23 = vadd.f32 %v2574_v24, %v2573_v12  ;;  %v4161_v50 = vpop.f32.mrb[2].mxu1  ;;  %v2576_v34 = vpop.f32.mrb[6].mxu0 }
 0x279   :  { %v1208_v45 = vpop.f32.mrb[3].mxu1  ;;  %v2577_v16 = vpop.f32.mrb[7].mxu0 }
 0x27a   :  { %v2485_v20 = vmul.f32 -1.442695, %v1298_v59  ;;  %v1299_v43 = vadd.f32 %v4154_v37, %v1208_v45  ;;  %v4164_v14 = vadd.f32 %v2577_v16, %v2576_v34 }
 0x27c   :  { %3060 = vpow2.f32 %v2485_v20  ;;  %v2486_v47 = vmul.f32 -1.442695, %v1299_v43 }
 0x27e   :  { %3062 = vpow2.f32 %v2486_v47 }
 0x281   :  { %v1212_v60 = vpop.f32.mrb[4].mxu1  ;;  %v2579_v51 = vpop.f32.mrb[8].mxu0 }
 0x282   :  { %v1214_v15 = vpop.f32.mrb[5].mxu1  ;;  %v2580_v44 = vpop.f32.mrb[9].mxu0 }
 0x283   :  { %v1300_v12 = vadd.f32 %v4154_v37, %v1214_v15  ;;  %v4167_v8 = vadd.f32 %v2580_v44, %v2579_v51  ;;  %v1216_v24 = vpop.f32.mrb[6].mxu1  ;;  %v2582_v42 = vpop.f32.mrb[10].mxu0 }
 0x284   :  { %v1218_v57 = vpop.f32.mrb[7].mxu1  ;;  %v2583_v61 = vpop.f32.mrb[11].mxu0 }
 0x285   :  { %v2487_v59 = vmul.f32 -1.442695, %v1300_v12  ;;  %v1301_v45 = vadd.f32 %v4154_v37, %v1218_v57  ;;  %v4170_v34 = vadd.f32 %v2583_v61, %v2582_v42  ;;  %v4868_v12 = vld [vmem:[#allocation82_spill] sm:$0xff]  ;;  %v4872_v37 = vld [vmem:[#allocation43_spill] sm:$0xff] }
 0x286   :  { %v3061_v16 = vpop.eup %3060 }
 0x287   :  { %v1314_v20 = vadd.f32 1.0, %v3061_v16  ;;  %3064 = vpow2.f32 %v2487_v59  ;;  %v2488_v25 = vmul.f32 -1.442695, %v1301_v45 }
 0x288   :  { %v3063_v43 = vpop.eup %3062 }
 0x289   :  { %3066 = vrcp.f32 %v1314_v20  ;;  %v1315_v47 = vadd.f32 1.0, %v3063_v43  ;;  %v4869_v20 = vld [vmem:[#allocation85_spill] sm:$0xff]  ;;  %v4870_v43 = vld [vmem:[#allocation83_spill] sm:$0xff] }
 0x28b   :  { %3068 = vrcp.f32 %v1315_v47 }
 0x28c   :  { %3070 = vpow2.f32 %v2488_v25 }
 0x291   :  { %v3065_v44 = vpop.eup %3064 }
 0x292   :  { %v1316_v15 = vadd.f32 1.0, %v3065_v44  ;;  %v4871_v44 = vld [vmem:[#allocation41_spill] sm:$0xff] }
 0x293   :  { %v3067_v51 = vpop.eup %3066 }
 0x294   :  { %v1326_v46 = vmul.f32 %v3067_v51, %v4867_v9  ;;  %3072 = vrcp.f32 %v1316_v15  ;;  %v4873_v51 = vld [vmem:[#allocation45_spill] sm:$0xff]  ;;  %v4875_v15 = vld [vmem:[#allocation50_spill] sm:$0xff] }
 0x295   :  { %v3069_v17 = vpop.eup %3068 }
 0x296   :  { %v1327_v63 = vmul.f32 %v3069_v17, %v4868_v12  ;;  %v3071_v57 = vpop.eup %3070  ;;  %v4874_v17 = vld [vmem:[#allocation48_spill] sm:$0xff] }
 0x297   :  { %v1317_v61 = vadd.f32 1.0, %v3071_v57  ;;  %v4878_v57 = vld [vmem:[#allocation57_spill] sm:$0xff] }
 0x298   :  { %v1330_v42 = vpack.c.bf16 %v1327_v63, %v1326_v46  ;;  %v4876_v46 = vld [vmem:[#allocation53_spill] sm:$0xff]  ;;  %v4877_v63 = vld [vmem:[#allocation55_spill] sm:$0xff] }
 0x299   :  { %3074 = vrcp.f32 %v1317_v61  ;;  %v4879_v61 = vld [vmem:[#allocation59_spill] sm:$0xff] }
 0x29a   :  { %2678 = vmatprep.mubr.bf16.mxu0 %v1330_v42  ;;  %v4880_v42 = vld [vmem:[#allocation61_spill] sm:$0xff] }
 0x29e   :  { %v3073_v59 = vpop.eup %3072 }
 0x29f   :  { %v1328_v45 = vmul.f32 %v3073_v59, %v4869_v20  ;;  %v4881_v59 = vld [vmem:[#allocation64_spill] sm:$0xff] }
 0x2a3   :  { %v3075_v16 = vpop.eup %3074 }
 0x2a4   :  { %v1329_v25 = vmul.f32 %v3075_v16, %v4870_v43  ;;  %v4882_v16 = vld [vmem:[#allocation66_spill] sm:$0xff] }
 0x2a6   :  { %v1331_v47 = vpack.c.bf16 %v1329_v25, %v1328_v45  ;;  %v4884_v45 = vld [vmem:[#allocation71_spill] sm:$0xff]  ;;  %v4885_v25 = vld [vmem:[#allocation74_spill] sm:$0xff] }
 0x2a8   :  { %2679 = vmatmul.mubr.bf16.vlgmr.msra.gmra.mrb[12].mxu0 %v1331_v47  ;;  %v4195_v47 = vld [vmem:[%s4565_s6] ss:$0 sm:$0xff] }
 0x2a9   :  { %2596 = vmatpush3.bf16.msra.mxu0 %v4871_v44  ;;  %4886 = vst [vmem:[#allocation30_spill] sm:$0xff] %v4195_v47  ;;  %v1272_v44 = vadd.f32 %v4195_v47, %v1212_v60 }
 0x2aa   :  { %2597 = vmatprep.subr.bf16.mxu0 %v4872_v37  ;;  %v4883_v37 = vld [vmem:[#allocation68_spill] sm:$0xff] }
 0x2ad   :  { %2598 = vmatpush3.bf16.msra.mxu0 %v4873_v51  ;;  %v1270_v51 = vadd.f32 %v4195_v47, %v4156_v22 }
 0x2ae   :  { %2599 = vmatprep.subr.bf16.mxu0 %v4874_v17  ;;  %v1273_v17 = vadd.f32 %v4195_v47, %v1216_v24 }
 0x2b1   :  { %2600 = vmatpush3.bf16.msra.mxu0 %v4875_v15  ;;  %v1271_v15 = vadd.f32 %v4195_v47, %v4161_v50  ;;  %v4206_v50 = vld [vmem:[%s4567_s8] ss:$0 sm:$0xff]  ;;  %s2408_s8 = sshll.u32 %s3342_s25, 4  ;;  %s2409_s8 = int_to_ptr.vmem [resolvable:$true] %s2408_s8 }
 0x2b2   :  { %2601 = vmatprep.subr.bf16.mxu0 %v4876_v46  ;;  %v2483_v46 = vmul.f32 -1.442695, %v1272_v44  ;;  %4887 = vst [vmem:[#allocation31_spill] sm:$0xff] %v4206_v50  ;;  %s3280_s27 = scalar_lea.vmem %s2409_s8, 32  ;;  %p3285_p7 = scmp.lt.s32.totalorder %s2409_s8, %s2409_s8 }
 0x2b3   :  { %p3281_p6 = scmp.ne.s32.totalorder %s2409_s8, %s3280_s27  ;;  %p3286_p8 = scmp.lt.s32.totalorder %s3280_s27, %s3280_s27 }
 0x2b4   :  { %3076 = vpow2.f32 %v2483_v46 }
 0x2b5   :  { %2602 = vmatpush3.bf16.msra.mxu0 %v4877_v63  ;;  %v2481_v63 = vmul.f32 -1.442695, %v1270_v51  ;;  %p3287_p9 = por %p3286_p8, %p3285_p7 }
 0x2b6   :  { %2603 = vmatprep.subr.bf16.mxu0 %v4878_v57  ;;  %v2484_v57 = vmul.f32 -1.442695, %v1273_v17 }
 0x2b7   :  { %3078 = vpow2.f32 %v2481_v63  ;;  %p3288_p10 = pnand %p3287_p9, %p3281_p6 }
 0x2b8   :  { %3080 = vpow2.f32 %v2484_v57 }
 0x2b9   :  { %2604 = vmatpush3.bf16.msra.mxu0 %v4879_v61  ;;  %v2482_v61 = vmul.f32 -1.442695, %v1271_v15 }
 0x2ba   :  { %2605 = vmatprep.subr.bf16.mxu0 %v4880_v42 }
 0x2bb   :  { %3082 = vpow2.f32 %v2482_v61 }
 0x2bd   :  { %2606 = vmatpush3.bf16.msra.mxu0 %v4881_v59 }
 0x2be   :  { %2607 = vmatprep.subr.bf16.mxu0 %v4882_v16  ;;  %v3077_v42 = vpop.eup %3076 }
 0x2c1   :  { %2608 = vmatpush3.bf16.msra.mxu0 %v4883_v37  ;;  %v3079_v59 = vpop.eup %3078  ;;  %v1288_v37 = vadd.f32 1.0, %v3077_v42 }
 0x2c2   :  { %2609 = vmatprep.subr.bf16.mxu0 %v4884_v45  ;;  %v3081_v16 = vpop.eup %3080  ;;  %v1286_v45 = vadd.f32 1.0, %v3079_v59  ;;  %v4888_v59 = vld [vmem:[#allocation32_spill] sm:$0xff] }
 0x2c3   :  { %v1289_v22 = vadd.f32 1.0, %v3081_v16  ;;  %3084 = vrcp.f32 %v1288_v37 }
 0x2c4   :  { %3086 = vrcp.f32 %v1286_v45 }
 0x2c5   :  { %2610 = vmatpush3.bf16.msra.mxu0 %v4885_v25  ;;  %v3083_v60 = vpop.eup %3082  ;;  %3088 = vrcp.f32 %v1289_v22  ;;  %v4890_v22 = vld [vmem:[#allocation34_spill] sm:$0xff] }
 0x2c6   :  { %2682 = vmatprep.subr.bf16.mxu0 %v4118_v48  ;;  %v1287_v25 = vadd.f32 1.0, %v3083_v60  ;;  %v4928_v48 = vld [vmem:[#allocation76_spill] sm:$0xff] }
 0x2c8   :  { %3090 = vrcp.f32 %v1287_v25 }
 0x37b   :  { %v2680_v24 = vpop.f32.mrb[12].mxu0 }
 0x37c   :  { %v1447_v44 = vadd.f32 %v2680_v24, %v4167_v8  ;;  %v1430_v51 = vpop.f32.mrb[13].mxu0  ;;  %v4889_v8 = vld [vmem:[#allocation62_spill] sm:$0xff] }
 0x37d   :  { %v1445_v17 = vadd.f32 %v4159_v23, %v1430_v51  ;;  %v2681_v15 = vpop.f32.mrb[14].mxu0 }
 0x37e   :  { %v1451_v46 = vadd.f32 %v4206_v50, %v1447_v44  ;;  %v1448_v63 = vadd.f32 %v2681_v15, %v4170_v34  ;;  %v1433_v57 = vpop.f32.mrb[15].mxu0  ;;  %v4891_v44 = vld [vmem:[#allocation72_spill] sm:$0xff] }
 0x37f   :  { %v1449_v61 = vadd.f32 %v4206_v50, %v1445_v17  ;;  %v1446_v42 = vadd.f32 %v4164_v14, %v1433_v57  ;;  %v3085_v17 = vpop.eup %3084 }
 0x380   :  { %v1455_v16 = vmul.f32 %v1451_v46, %v4888_v59  ;;  %v1452_v60 = vadd.f32 %v4206_v50, %v1448_v63  ;;  %v3087_v46 = vpop.eup %3086 }
 0x381   :  { %v1453_v37 = vmul.f32 %v1449_v61, %v4889_v8  ;;  %v1450_v45 = vadd.f32 %v4206_v50, %v1446_v42  ;;  %v3089_v61 = vpop.eup %3088 }
 0x382   :  { %v1459_v23 = vmax.f32 %v1455_v16, 0.0  ;;  %v1456_v25 = vmul.f32 %v1452_v60, %v4890_v22  ;;  %v3091_v16 = vpop.eup %3090 }
 0x383   :  { %v1457_v24 = vmax.f32 %v1453_v37, 0.0  ;;  %v1454_v51 = vmul.f32 %v1450_v45, %v4891_v44 }
 0x384   :  { %v1463_v34 = vsub.f32 %v1459_v23, %v4869_v20  ;;  %v1460_v15 = vmax.f32 %v1456_v25, 0.0 }
 0x385   :  { %v1461_v14 = vsub.f32 %v1457_v24, %v4867_v9  ;;  %v1458_v57 = vmax.f32 %v1454_v51, 0.0 }
 0x386   :  { %v1467_v59 = vmul.f32 %v3085_v17, %v1463_v34  ;;  %v1464_v63 = vsub.f32 %v1460_v15, %v4870_v43 }
 0x387   :  { %v1465_v8 = vmul.f32 %v3087_v46, %v1461_v14  ;;  %v1462_v42 = vsub.f32 %v1458_v57, %v4868_v12  ;;  %v4896_v57 = vld [vmem:[#allocation75_spill] sm:$0xff] }
 0x388   :  { %v1468_v60 = vmul.f32 %v3089_v61, %v1464_v63  ;;  %v4225_v45 = vadd.f32 %v1467_v59, %v4869_v20  ;;  %v4897_v46 = vunpack.i.l.bf16 %v4896_v57  ;;  %v4898_v61 = vunpack.i.h.bf16 %v4896_v57 }
 0x389   :  { %v1466_v37 = vmul.f32 %v3091_v16, %v1462_v42  ;;  %v4231_v25 = vadd.f32 %v1465_v8, %v4867_v9  ;;  %v4899_v16 = vld [vmem:[#allocation37_spill] sm:$0xff] }
 0x38a   :  { %4892 = vst [vmem:[#allocation33_spill] sm:$0xff] %v4225_v45  ;;  %v4228_v23 = vadd.f32 %v1468_v60, %v4870_v43  ;;  %v4900_v60 = vunpack.i.l.bf16 %v4899_v16 }
 0x38b   :  { %4894 = vst [vmem:[#allocation36_spill] sm:$0xff] %v4231_v25  ;;  %v4234_v24 = vadd.f32 %v1466_v37, %v4868_v12 }
 0x38c   :  { %4893 = vst [vmem:[#allocation35_spill] sm:$0xff] %v4228_v23  ;;  %v4238_v51 = vpack.c.bf16 %v4228_v23, %v4225_v45 }
 0x38d   :  { %4895 = vst [vmem:[#allocation38_spill] sm:$0xff] %v4234_v24  ;;  %v1473_v34 = vpack.c.bf16 %v4234_v24, %v4231_v25 }
 0x38e   :  { %v1608_v15 = vrot.slane %v4238_v51, 4  ;;  %v4244_v59 = vunpack.c.l.bf16 %v4238_v51 }
 0x38f   :  { %v1475_v20 = vunpack.c.l.bf16 %v1473_v34  ;;  %1775 = vmatprep.mubr.bf16.mxu1 %v1473_v34  ;;  %1828 = vmatprep.mubr.bf16.mxu0 %v1473_v34  ;;  %v1607_v43 = vrot.slane %v1473_v34, 4  ;;  %v4901_v34 = vunpack.i.h.bf16 %v4899_v16 }
 0x390   :  { %v4250_v14 = vunpack.c.l.bf16 %v1608_v15  ;;  %v1484_v15 = vrot.slane %v4244_v59, %v3777_v7 }
 0x391   :  { %v1480_v9 = vrot.slane %v1475_v20, %v3777_v7  ;;  %v1496_v12 = vrot.slane %v1475_v20, %v3779_v5  ;;  %v1512_v8 = vrot.slane %v1475_v20, %v3781_v3  ;;  %v1528_v17 = vrot.slane %v1475_v20, %v3785_v38 }
 0x392   :  { %v1611_v22 = vunpack.c.l.bf16 %v1607_v43  ;;  %v1544_v50 = vrot.slane %v1475_v20, %v3775_v11  ;;  %v1560_v47 = vrot.slane %v1475_v20, %v3787_v35  ;;  %v1576_v43 = vrot.slane %v1475_v20, %v3789_v32 }
 0x393   :  { %v1485_v63 = vmul.f32 %v4897_v46, %v1480_v9  ;;  %v1486_v42 = vmul.f32 %v4898_v61, %v1480_v9  ;;  %v1501_v37 = vmul.f32 %v4900_v60, %v1496_v12  ;;  %v1502_v44 = vmul.f32 %v4901_v34, %v1496_v12  ;;  %v4902_v46 = vld [vmem:[#allocation77_spill] sm:$0xff]  ;;  %v4905_v60 = vld [vmem:[#allocation46_spill] sm:$0xff] }
 0x394   :  { %v4903_v24 = vunpack.i.l.bf16 %v4902_v46  ;;  %v4904_v9 = vunpack.i.h.bf16 %v4902_v46  ;;  %v4906_v25 = vunpack.i.l.bf16 %v4905_v60  ;;  %v1500_v12 = vrot.slane %v4244_v59, %v3779_v5 }
 0x395   :  { %v1505_v23 = vadd.f32 %v1501_v37, %v1485_v63  ;;  %v1506_v45 = vadd.f32 %v1502_v44, %v1486_v42  ;;  %v1516_v34 = vrot.slane %v4244_v59, %v3781_v3  ;;  %v4907_v44 = vunpack.i.h.bf16 %v4905_v60  ;;  %v4908_v37 = vld [vmem:[#allocation51_spill] sm:$0xff] }
 0x396   :  { %v1517_v57 = vmul.f32 %v4903_v24, %v1512_v8  ;;  %v1518_v61 = vmul.f32 %v4904_v9, %v1512_v8  ;;  %v1533_v16 = vmul.f32 %v4906_v25, %v1528_v17  ;;  %v1592_v24 = vrot.slane %v1475_v20, %v3791_v30 }
 0x397   :  { %v1534_v42 = vmul.f32 %v4907_v44, %v1528_v17  ;;  %v4909_v8 = vunpack.i.l.bf16 %v4908_v37  ;;  %v4910_v25 = vunpack.i.h.bf16 %v4908_v37  ;;  %v1616_v10 = vrot.slane %v1611_v22, %v3777_v7 }
 0x398   :  { %v1521_v28 = vadd.f32 %v1517_v57, %v1505_v23  ;;  %v1522_v63 = vadd.f32 %v1518_v61, %v1506_v45  ;;  %v1632_v53 = vrot.slane %v1611_v22, %v3779_v5  ;;  %v4912_v23 = vunpack.i.l.bf16 %v4911_v55 }
 0x399   :  { %v1549_v46 = vmul.f32 %v4909_v8, %v1544_v50  ;;  %v1550_v9 = vmul.f32 %v4910_v25, %v1544_v50  ;;  %v1648_v57 = vrot.slane %v1611_v22, %v3781_v3  ;;  %v4913_v17 = vunpack.i.h.bf16 %v4911_v55  ;;  %v4918_v55 = vld [vmem:[#allocation78_spill] sm:$0xff] }
 0x39a   :  { %v1537_v52 = vadd.f32 %v1533_v16, %v1521_v28  ;;  %v1538_v62 = vadd.f32 %v1534_v42, %v1522_v63  ;;  %v1565_v45 = vmul.f32 %v4912_v23, %v1560_v47  ;;  %v4914_v61 = vunpack.i.l.bf16 %v3738_v40 }
 0x39b   :  { %v1566_v20 = vmul.f32 %v4913_v17, %v1560_v47  ;;  %v4915_v44 = vunpack.i.h.bf16 %v3738_v40  ;;  %v1664_v37 = vrot.slane %v1611_v22, %v3785_v38  ;;  %v4916_v28 = vunpack.i.l.bf16 %v3759_v31 }
 0x39c   :  { %v1581_v60 = vmul.f32 %v4914_v61, %v1576_v43  ;;  %v1553_v8 = vadd.f32 %v1549_v46, %v1537_v52  ;;  %v1554_v25 = vadd.f32 %v1550_v9, %v1538_v62  ;;  %v1680_v63 = vrot.slane %v1611_v22, %v3775_v11  ;;  %v4923_v9 = vld [vmem:[#allocation79_spill] sm:$0xff] }
 0x39d   :  { %v1582_v50 = vmul.f32 %v4915_v44, %v1576_v43  ;;  %v1597_v16 = vmul.f32 %v4916_v28, %v1592_v24  ;;  %v4917_v42 = vunpack.i.h.bf16 %v3759_v31  ;;  %v4919_v47 = vunpack.i.l.bf16 %v4918_v55 }
 0x39e   :  { %v4920_v61 = vunpack.i.h.bf16 %v4918_v55  ;;  %v4921_v40 = vunpack.i.l.bf16 %v3757_v33  ;;  %v1569_v44 = vadd.f32 %v1565_v45, %v1553_v8  ;;  %v1570_v52 = vadd.f32 %v1566_v20, %v1554_v25 }
 0x39f   :  { %v1598_v23 = vmul.f32 %v4917_v42, %v1592_v24  ;;  %v1621_v17 = vmul.f32 %v4919_v47, %v1616_v10  ;;  %v4922_v62 = vunpack.i.h.bf16 %v3757_v33  ;;  %v4924_v28 = vunpack.i.l.bf16 %v4923_v9  ;;  %v4926_v42 = vld [vmem:[#allocation80_spill] sm:$0xff] }
 0x3a0   :  { %v1622_v27 = vmul.f32 %v4920_v61, %v1616_v10  ;;  %v1637_v43 = vmul.f32 %v4921_v40, %v1632_v53  ;;  %v4925_v31 = vunpack.i.h.bf16 %v4923_v9  ;;  %v4927_v19 = vunpack.i.l.bf16 %v4926_v42 }
 0x3a1   :  { %v1638_v46 = vmul.f32 %v4922_v62, %v1632_v53  ;;  %v1653_v2 = vmul.f32 %v4924_v28, %v1648_v57  ;;  %v4929_v55 = vunpack.i.l.bf16 %v4928_v48  ;;  %v4930_v61 = vunpack.i.l.bf16 %v3698_v26 }
 0x3a2   :  { %v1654_v24 = vmul.f32 %v4925_v31, %v1648_v57  ;;  %v1669_v47 = vmul.f32 %v4927_v19, %v1664_v37  ;;  %v1585_v45 = vadd.f32 %v1581_v60, %v1569_v44  ;;  %v1586_v20 = vadd.f32 %v1582_v50, %v1570_v52 }
 0x3a3   :  { %v1487_v10 = vmul.f32 %v4929_v55, %v1484_v15  ;;  %v1503_v40 = vmul.f32 %v4930_v61, %v1500_v12  ;;  %v4931_v33 = vunpack.i.h.bf16 %v4926_v42  ;;  %v4932_v8 = vunpack.i.h.bf16 %v4928_v48 }
 0x3a4   :  { %v4933_v62 = vunpack.i.l.bf16 %v3773_v13  ;;  %v4934_v9 = vunpack.i.h.bf16 %v3773_v13  ;;  %v1696_v28 = vrot.slane %v1611_v22, %v3787_v35  ;;  %v1712_v31 = vrot.slane %v1611_v22, %v3789_v32 }
 0x3a5   :  { %v1670_v53 = vmul.f32 %v4931_v33, %v1664_v37  ;;  %v1488_v25 = vmul.f32 %v4932_v8, %v1484_v15  ;;  %v1601_v55 = vadd.f32 %v1597_v16, %v1585_v45  ;;  %v1602_v61 = vadd.f32 %v1598_v23, %v1586_v20 }
 0x3a6   :  { %v1685_v57 = vmul.f32 %v4933_v62, %v1680_v63  ;;  %v1686_v19 = vmul.f32 %v4934_v9, %v1680_v63  ;;  %v4935_v60 = vunpack.i.h.bf16 %v3698_v26  ;;  %v1507_v44 = vadd.f32 %v1503_v40, %v1487_v10 }
 0x3a7   :  { %v1728_v37 = vrot.slane %v1611_v22, %v3791_v30  ;;  %v4936_v48 = vunpack.i.l.bf16 %v3755_v36  ;;  %v1532_v52 = vrot.slane %v4244_v59, %v3785_v38  ;;  %v1548_v13 = vrot.slane %v4244_v59, %v3775_v11 }
 0x3a8   :  { %v1504_v50 = vmul.f32 %v4935_v60, %v1500_v12  ;;  %v1625_v63 = vadd.f32 %v1621_v17, %v1601_v55  ;;  %v1626_v42 = vadd.f32 %v1622_v27, %v1602_v61  ;;  %v4937_v16 = vunpack.i.h.bf16 %v3755_v36 }
 0x3a9   :  { %v1519_v15 = vmul.f32 %v4936_v48, %v1516_v34  ;;  %v4938_v26 = vunpack.i.l.bf16 %v3783_v1  ;;  %v4939_v22 = vunpack.i.l.bf16 %v3745_v49  ;;  %v1564_v45 = vrot.slane %v4244_v59, %v3787_v35 }
 0x3aa   :  { %v1508_v33 = vadd.f32 %v1504_v50, %v1488_v25  ;;  %v1520_v23 = vmul.f32 %v4937_v16, %v1516_v34  ;;  %v1641_v20 = vadd.f32 %v1637_v43, %v1625_v63  ;;  %v1642_v8 = vadd.f32 %v1638_v46, %v1626_v42 }
 0x3ab   :  { %v1701_v12 = vmul.f32 %v4938_v26, %v1696_v28  ;;  %v1523_v10 = vadd.f32 %v1519_v15, %v1507_v44  ;;  %v1535_v40 = vmul.f32 %v4939_v22, %v1532_v52  ;;  %v4940_v17 = vunpack.i.h.bf16 %v3745_v49 }
 0x3ac   :  { %v1524_v62 = vadd.f32 %v1520_v23, %v1508_v33  ;;  %v4941_v25 = vunpack.i.h.bf16 %v3783_v1  ;;  %v4942_v9 = vunpack.i.l.bf16 %v3749_v0  ;;  %v1580_v61 = vrot.slane %v4244_v59, %v3789_v32 }
 0x3ad   :  { %v1536_v27 = vmul.f32 %v4940_v17, %v1532_v52  ;;  %v1539_v34 = vadd.f32 %v1535_v40, %v1523_v10  ;;  %v1657_v60 = vadd.f32 %v1653_v2, %v1641_v20  ;;  %v1658_v50 = vadd.f32 %v1654_v24, %v1642_v8 }
 0x3ae   :  { %v1702_v36 = vmul.f32 %v4941_v25, %v1696_v28  ;;  %v1551_v55 = vmul.f32 %v4942_v9, %v1548_v13  ;;  %v4943_v43 = vunpack.i.h.bf16 %v3749_v0  ;;  %v4944_v48 = vunpack.i.l.bf16 %v3869_v21 }
 0x3af   :  { %v1540_v44 = vadd.f32 %v1536_v27, %v1524_v62  ;;  %v4945_v1 = vunpack.i.l.bf16 %v3763_v39  ;;  %v1596_v52 = vrot.slane %v4244_v59, %v3791_v30  ;;  %v1673_v63 = vadd.f32 %v1669_v47, %v1657_v60 }
 0x3b0   :  { %v1552_v46 = vmul.f32 %v4943_v43, %v1548_v13  ;;  %v1717_v49 = vmul.f32 %v4944_v48, %v1712_v31  ;;  %v1555_v15 = vadd.f32 %v1551_v55, %v1539_v34  ;;  %v1674_v42 = vadd.f32 %v1670_v53, %v1658_v50 }
 0x3b1   :  { %v1567_v28 = vmul.f32 %v4945_v1, %v1564_v45  ;;  %v4946_v2 = vunpack.i.h.bf16 %v3763_v39  ;;  %v4947_v16 = vunpack.i.h.bf16 %v3869_v21  ;;  %v4948_v23 = vunpack.i.l.bf16 %v3761_v29 }
 0x3b2   :  { %v1556_v33 = vadd.f32 %v1552_v46, %v1540_v44  ;;  %v1620_v10 = vrot.slane %v4250_v14, %v3777_v7  ;;  %v1689_v22 = vadd.f32 %v1685_v57, %v1673_v63  ;;  %v1690_v40 = vadd.f32 %v1686_v19, %v1674_v42 }
 0x3b3   :  { %v1568_v24 = vmul.f32 %v4946_v2, %v1564_v45  ;;  %v1718_v0 = vmul.f32 %v4947_v16, %v1712_v31  ;;  %v1571_v13 = vadd.f32 %v1567_v28, %v1555_v15  ;;  %v1583_v26 = vmul.f32 %v4948_v23, %v1580_v61 }
 0x3b4   :  { %v4949_v59 = vunpack.i.h.bf16 %v3761_v29  ;;  %v4950_v53 = vunpack.i.l.bf16 %v3900_v58  ;;  %v4951_v21 = vunpack.i.l.bf16 %v3765_v41  ;;  %v1636_v8 = vrot.slane %v4250_v14, %v3779_v5 }
 0x3b5   :  { %v1572_v20 = vadd.f32 %v1568_v24, %v1556_v33  ;;  %v1587_v45 = vadd.f32 %v1583_v26, %v1571_v13  ;;  %v1705_v62 = vadd.f32 %v1701_v12, %v1689_v22  ;;  %v1706_v17 = vadd.f32 %v1702_v36, %v1690_v40 }
 0x3b6   :  { %v1584_v47 = vmul.f32 %v4949_v59, %v1580_v61  ;;  %v1733_v39 = vmul.f32 %v4950_v53, %v1728_v37  ;;  %v1599_v31 = vmul.f32 %v4951_v21, %v1596_v52  ;;  %v4952_v57 = vunpack.i.h.bf16 %v3765_v41 }
 0x3b7   :  { %v4953_v25 = vunpack.i.h.bf16 %v3900_v58  ;;  %v4954_v9 = vunpack.i.l.bf16 %v3771_v18  ;;  %v1652_v61 = vrot.slane %v4250_v14, %v3781_v3  ;;  %v1721_v60 = vadd.f32 %v1717_v49, %v1705_v62 }
 0x3b8   :  { %v1588_v27 = vadd.f32 %v1584_v47, %v1572_v20  ;;  %v1600_v19 = vmul.f32 %v4952_v57, %v1596_v52  ;;  %v1603_v34 = vadd.f32 %v1599_v31, %v1587_v45  ;;  %v1722_v50 = vadd.f32 %v1718_v0, %v1706_v17  ;;  %v4964_v20 = vld [vmem:[#allocation21_spill] sm:$0xff] }
 0x3b9   :  { %v1734_v29 = vmul.f32 %v4953_v25, %v1728_v37  ;;  %v1623_v55 = vmul.f32 %v4954_v9, %v1620_v10  ;;  %v4955_v12 = vunpack.i.h.bf16 %v3771_v18  ;;  %v4956_v41 = vunpack.i.l.bf16 %v3809_v6  ;;  %v4972_v25 = vld [vmem:[#allocation87_spill] sm:$0xff] }
 0x3ba   :  { %v1604_v44 = vadd.f32 %v1600_v19, %v1588_v27  ;;  %v1668_v58 = vrot.slane %v4250_v14, %v3785_v38  ;;  %v1737_v37 = vadd.f32 %v1733_v39, %v1721_v60  ;;  %v4957_v1 = vunpack.i.h.bf16 %v3809_v6  ;;  %v4967_v39 = vld [vmem:[#allocation22_spill] sm:$0xff] }
 0x3bb   :  { %v1624_v36 = vmul.f32 %v4955_v12, %v1620_v10  ;;  %v1627_v43 = vadd.f32 %v1623_v55, %v1603_v34  ;;  %v1639_v46 = vmul.f32 %v4956_v41, %v1636_v8  ;;  %v1738_v48 = vadd.f32 %v1734_v29, %v1722_v50  ;;  %v4976_v50 = vld [vmem:[#allocation24_spill] sm:$0xff]  ;;  %v4980_v41 = vld [vmem:[#allocation27_spill] sm:$0xff] }
 0x3bc   :  { %v1640_v28 = vmul.f32 %v4957_v1, %v1636_v8  ;;  %v4958_v49 = vunpack.i.l.bf16 %v3829_v56  ;;  %v1684_v18 = vrot.slane %v4250_v14, %v3775_v11  ;;  %v4959_v33 = vunpack.i.h.bf16 %v3829_v56  ;;  %v4969_v8 = vld [vmem:[#allocation86_spill] sm:$0xff]  ;;  %v3036_v1 = vld [vmem:[#allocation11 + $0x24] ss:$8 sps:$4 sm:$0xff]  }
 0x3bd   :  { %v1628_v15 = vadd.f32 %v1624_v36, %v1604_v44  ;;  %v1643_v3 = vadd.f32 %v1639_v46, %v1627_v43  ;;  %v1741_v63 = vpack.c.bf16 %v1738_v48, %v1737_v37  ;;  %v4960_v38 = vunpack.i.l.bf16 %v3815_v4  ;;  %v4978_v36 = vld [vmem:[#allocation25_spill] sm:$0xff]  ;;  %v4979_v43 = vld [vmem:[#allocation26_spill] sm:$0xff]  ;;  %v4981_v46 = vld [vmem:[#allocation28_spill] sm:$0xff] }
 0x3be   :  { %v1655_v52 = vmul.f32 %v4958_v49, %v1652_v61  ;;  %v1656_v2 = vmul.f32 %v4959_v33, %v1652_v61  ;;  %v1700_v6 = vrot.slane %v4250_v14, %v3787_v35  ;;  %v4961_v13 = vunpack.i.h.bf16 %v3815_v4  ;;  %v4965_v4 = vld [vmem:[#allocation84_spill] sm:$0xff]  ;;  %v3033_v48 = vld [vmem:[#allocation11 + $0x14] ss:$8 sps:$4 sm:$0xff]  }
 0x3bf   :  { %v1644_v42 = vadd.f32 %v1640_v28, %v1628_v15  ;;  %v1671_v16 = vmul.f32 %v4960_v38, %v1668_v58  ;;  %1776 = vmatmul.mubr.bf16.vlgmr.msra.gmra.mrb[8].mxu1 %v1741_v63  ;;  %1829 = vmatmul.mubr.bf16.vlgmr.msra.gmra.mrb[16].mxu0 %v1741_v63  ;;  %v4962_v56 = vunpack.i.l.bf16 %v3999_v54  ;;  %v1716_v10 = vrot.slane %v4250_v14, %v3789_v32  ;;  %v3030_v37 = vld [vmem:[#allocation11 + $0x4] ss:$8 sps:$4 sm:$0xff]   ;;  %v3031_v15 = vld [vmem:[#allocation11 + $0x10] ss:$8 sps:$4 sm:$0xff]   ;;  %v3034_v28 = vld [vmem:[#allocation11 + $0x20] ss:$8 sps:$4 sm:$0xff]  }
 0x3c0   :  { %v1659_v24 = vadd.f32 %v1655_v52, %v1643_v3  ;;  %v1672_v23 = vmul.f32 %v4961_v13, %v1668_v58  ;;  %1785 = vmatprep.mubr.bf16.mxu1 %v4238_v51  ;;  %1836 = vmatprep.mubr.bf16.mxu0 %v4238_v51  ;;  %v4963_v35 = vunpack.i.h.bf16 %v3999_v54  ;;  %v4966_v47 = vunpack.i.l.bf16 %v4965_v4  ;;  %v3028_v58 = vld [vmem:[#allocation11] ss:$8 sps:$4 sm:$0xff]   ;;  %v4982_v63 = vld [vmem:[#allocation29_spill] sm:$0xff] }
 0x3c1   :  { %v1660_v0 = vadd.f32 %v1656_v2, %v1644_v42  ;;  %v1687_v26 = vmul.f32 %v4962_v56, %v1684_v18  ;;  %2683 = vmatpush3.bf16.msra.mxu0 %v4964_v20  ;;  %v1732_v51 = vrot.slane %v4250_v14, %v3791_v30  ;;  %v4968_v21 = vunpack.i.h.bf16 %v4965_v4  ;;  %v4974_v14 = vld [vmem:[#allocation23_spill] sm:$0xff]  ;;  %2094 = vmatprep.subr.bf16.mxu1 %v3030_v37  ;;  %v3043_v37 = vld [vmem:[#allocation11 + $0x50] ss:$8 sps:$4 sm:$0xff]  }
 0x3c2   :  { %v1675_v11 = vadd.f32 %v1671_v16, %v1659_v24  ;;  %v1688_v40 = vmul.f32 %v4963_v35, %v1684_v18  ;;  %v1703_v53 = vmul.f32 %v4966_v47, %v1700_v6  ;;  %2684 = vmatprep.subr.bf16.mxu0 %v4967_v39  ;;  %v4970_v62 = vunpack.i.l.bf16 %v4969_v8  ;;  %2095 = vmatpush1.bf16.msra.mxu1 %v3028_v58  ;;  %v3045_v58 = vld [vmem:[#allocation11 + $0x54] ss:$8 sps:$4 sm:$0xff]  }
 0x3c3   :  { %v1676_v22 = vadd.f32 %v1672_v23, %v1660_v0  ;;  %v1704_v31 = vmul.f32 %v4968_v21, %v1700_v6  ;;  %v4971_v27 = vunpack.i.h.bf16 %v4969_v8  ;;  %v4973_v29 = vunpack.i.l.bf16 %v4972_v25  ;;  %2096 = vmatprep.subr.bf16.mxu1 %v3033_v48  ;;  %v3048_v48 = vld [vmem:[#allocation11 + $0x64] ss:$8 sps:$4 sm:$0xff]  }
 0x3c4   :  { %v1691_v59 = vadd.f32 %v1687_v26, %v1675_v11  ;;  %v1719_v54 = vmul.f32 %v4970_v62, %v1716_v10  ;;  %v4975_v9 = vunpack.i.h.bf16 %v4972_v25  ;;  %v4977_v12 = vmov 0  }
 0x3c5   :  { %v1692_v45 = vadd.f32 %v1688_v40, %v1676_v22  ;;  %v1720_v57 = vmul.f32 %v4971_v27, %v1716_v10  ;;  %2685 = vmatpush3.bf16.msra.mxu0 %v4967_v39  ;;  %v1735_v30 = vmul.f32 %v4973_v29, %v1732_v51  ;;  %v4984_v27 = vld [vmem:[#allocation38_spill] sm:$0xff] }
 0x3c6   :  { %v1707_v32 = vadd.f32 %v1703_v53, %v1691_v59  ;;  %2686 = vmatprep.subr.bf16.mxu0 %v4974_v14  ;;  %v1736_v55 = vmul.f32 %v4975_v9, %v1732_v51  ;;  %2097 = vmatpush1.bf16.msra.mxu1 %v3031_v15  ;;  %v4987_v15 = vld [vmem:[#allocation19_spill] sm:$0xff] }
 0x3c7   :  { %v1708_v17 = vadd.f32 %v1704_v31, %v1692_v45  ;;  %2098 = vmatprep.subr.bf16.mxu1 %v3036_v1  ;;  %v2196_v1 = vrot.slane %v4987_v15, 4 }
 0x3c8   :  { %v1723_v19 = vadd.f32 %v1719_v54, %v1707_v32  ;;  %v4983_v54 = vld [vmem:[#allocation36_spill] sm:$0xff] }
 0x3c9   :  { %v1724_v34 = vadd.f32 %v1720_v57, %v1708_v17  ;;  %2687 = vmatpush3.bf16.msra.mxu0 %v4974_v14 }
 0x3ca   :  { %v1739_v61 = vadd.f32 %v1735_v30, %v1723_v19  ;;  %2688 = vmatprep.subr.bf16.mxu0 %v4976_v50  ;;  %2099 = vmatpush1.bf16.msra.mxu1 %v3034_v28  ;;  %v4988_v28 = vld [vmem:[#allocation20_spill] sm:$0xff] }
 0x3cb   :  { %v1740_v60 = vadd.f32 %v1736_v55, %v1724_v34  ;;  %v4985_v55 = vld [vmem:[#allocation33_spill] sm:$0xff] }
 0x3cd   :  { %v1742_v44 = vpack.c.bf16 %v1740_v60, %v1739_v61  ;;  %2689 = vmatpush3.bf16.msra.mxu0 %v4976_v50  ;;  %v4986_v60 = vld [vmem:[#allocation35_spill] sm:$0xff] }
 0x3ce   :  { %2690 = vmatprep.subr.bf16.mxu0 %v4978_v36 }
 0x3cf   :  { %1786 = vmatmul.mubr.bf16.gmra.mrb[12].mxu1 %v1742_v44  ;;  %1837 = vmatmul.mubr.bf16.gmra.mrb[20].mxu0 %v1742_v44 }
 0x3d0   :  { %2126 = vmatprep.mubr.bf16.mxu1 %v4977_v12 }
 0x3d1   :  { %2691 = vmatpush3.bf16.msra.mxu0 %v4978_v36  ;;  %v3037_v36 = vld [vmem:[#allocation11 + $0x30] ss:$8 sps:$4 sm:$0xff]  }
 0x3d2   :  { %2692 = vmatprep.subr.bf16.mxu0 %v4979_v43 }
 0x3d5   :  { %2693 = vmatpush3.bf16.msra.mxu0 %v4979_v43  ;;  %v3039_v43 = vld [vmem:[#allocation11 + $0x34] ss:$8 sps:$4 sm:$0xff]  }
 0x3d6   :  { %2694 = vmatprep.subr.bf16.mxu0 %v4980_v41  ;;  %2100 = vmatprep.subr.bf16.mxu1 %v3039_v43 }
 0x3d7   :  { %2101 = vmatpush1.bf16.msra.mxu1 %v3037_v36 }
 0x3d9   :  { %2695 = vmatpush3.bf16.msra.mxu0 %v4980_v41  ;;  %v3040_v41 = vld [vmem:[#allocation11 + $0x40] ss:$8 sps:$4 sm:$0xff]  }
 0x3da   :  { %2696 = vmatprep.subr.bf16.mxu0 %v4981_v46 }
 0x3dd   :  { %2697 = vmatpush3.bf16.msra.mxu0 %v4981_v46  ;;  %v3042_v46 = vld [vmem:[#allocation11 + $0x44] ss:$8 sps:$4 sm:$0xff]  }
 0x3de   :  { %2102 = vmatprep.subr.bf16.mxu1 %v3042_v46 }
 0x3df   :  { %2103 = vmatpush1.bf16.msra.mxu1 %v3040_v41 }
 0x3e0   :  { %2104 = vmatprep.subr.bf16.mxu1 %v3045_v58 }
 0x3e3   :  { %2105 = vmatpush1.bf16.msra.mxu1 %v3043_v37 }
 0x3e4   :  { %2106 = vmatprep.subr.bf16.mxu1 %v3048_v48 }
 0x492   :  { %v4442_v3 = vpop.f32.mrb[8].mxu1  ;;  %v2611_v49 = vpop.f32.mrb[16].mxu0 }
 0x493   :  { %v1779_v52 = vpop.f32.mrb[9].mxu1  ;;  %v2612_v18 = vpop.f32.mrb[17].mxu0 }
 0x494   :  { %v1873_v42 = vadd.f32 %v4982_v63, %v1779_v52  ;;  %v4445_v33 = vadd.f32 %v2612_v18, %v2611_v49  ;;  %v4447_v2 = vpop.f32.mrb[10].mxu1  ;;  %v2614_v24 = vpop.f32.mrb[18].mxu0  ;;  %v2187_v49 = vrot.slane %v4988_v28, 4  ;;  %v3046_v52 = vld [vmem:[#allocation11 + $0x60] ss:$8 sps:$4 sm:$0xff]  }
 0x495   :  { %v1783_v38 = vpop.f32.mrb[11].mxu1  ;;  %v2615_v16 = vpop.f32.mrb[19].mxu0  ;;  %v3144_v18 = vld [vmem:[%s4561_s2] sm:$0xff]  ;;  %2107 = vmatpush1.bf16.msra.mxu1 %v3046_v52 }
 0x496   :  { %v2501_v6 = vmul.f32 -1.442695, %v1873_v42  ;;  %v1874_v0 = vadd.f32 %v4982_v63, %v1783_v38  ;;  %v4450_v13 = vadd.f32 %v2615_v16, %v2614_v24  ;;  %v3145_v42 = vld [vmem:[%s4561_s2 + $0x8] sm:$0xff]  ;;  %v3051_v38 = vld [vmem:[#allocation11 + $0x74] ss:$8 sps:$4 sm:$0xff]   ;;  %v2197_v16 = vadd.f32 %v2196_v1, %v4987_v15 }
 0x497   :  { %v2526_v24 = vadd.f32 -1.0, %v3145_v42  ;;  %2108 = vmatprep.subr.bf16.mxu1 %v3051_v38  ;;  %v4990_v15 = vld [vmem:[#allocation31_spill] sm:$0xff] }
 0x498   :  { %3092 = vpow2.f32 %v2501_v6  ;;  %v2502_v23 = vmul.f32 -1.442695, %v1874_v0  ;;  %v2188_v6 = vadd.f32 %v2187_v49, %v4988_v28  ;;  %v3146_v0 = vld [vmem:[%s4561_s2 + $0x10] sm:$0xff] }
 0x49a   :  { %3094 = vpow2.f32 %v2502_v23  ;;  %v2527_v23 = vadd.f32 -1.0, %v3146_v0 }
 0x4a2   :  { %v4452_v11 = vpop.f32.mrb[12].mxu1  ;;  %v2617_v56 = vpop.f32.mrb[20].mxu0 }
 0x4a3   :  { %v1789_v26 = vpop.f32.mrb[13].mxu1  ;;  %v2618_v10 = vpop.f32.mrb[21].mxu0 }
 0x4a4   :  { %v3093_v22 = vpop.eup %3092  ;;  %v1875_v35 = vadd.f32 %v4982_v63, %v1789_v26  ;;  %v4455_v40 = vadd.f32 %v2618_v10, %v2617_v56  ;;  %v4457_v20 = vpop.f32.mrb[14].mxu1  ;;  %v3147_v56 = vld [vmem:[%s4561_s2 + $0x18] sm:$0xff] }
 0x4a5   :  { %v2620_v59 = vpop.f32.mrb[22].mxu0  ;;  %v1889_v4 = vadd.f32 1.0, %v3093_v22  ;;  %v1793_v47 = vpop.f32.mrb[15].mxu1  ;;  %v2528_v26 = vadd.f32 -1.0, %v3147_v56  ;;  %v3049_v10 = vld [vmem:[#allocation11 + $0x70] ss:$8 sps:$4 sm:$0xff]  }
 0x4a6   :  { %v2621_v53 = vpop.f32.mrb[23].mxu0  ;;  %v3095_v51 = vpop.eup %3094  ;;  %v1876_v39 = vadd.f32 %v4982_v63, %v1793_v47  ;;  %v2503_v21 = vmul.f32 -1.442695, %v1875_v35  ;;  %v2525_v63 = vadd.f32 -1.0, %v3144_v18  ;;  %v2209_v22 = vmul.f32 1e+09, %v2526_v24  ;;  %2109 = vmatpush1.bf16.msra.mxu1 %v3049_v10 }
 0x4a7   :  { %3096 = vrcp.f32 %v1889_v4  ;;  %v1890_v45 = vadd.f32 1.0, %v3095_v51  ;;  %v4460_v31 = vadd.f32 %v2621_v53, %v2620_v59  ;;  %v2189_v59 = vrot.slane %v2188_v6, 2  ;;  %v4994_v56 = vld [vmem:[#allocation72_spill] sm:$0xff] }
 0x4a8   :  { %v2504_v32 = vmul.f32 -1.442695, %v1876_v39  ;;  %v2208_v35 = vmul.f32 1e+09, %v2525_v63  ;;  %v2198_v4 = vrot.slane %v2197_v16, 2  ;;  %2247 = vperm.xlu1 %2945, %v2209_v22   ;;  %v4991_v63 = vld [vmem:[#allocation32_spill] sm:$0xff] }
 0x4a9   :  { %3098 = vrcp.f32 %v1890_v45  ;;  %v2210_v47 = vmul.f32 1e+09, %v2527_v23  ;;  %v2211_v53 = vmul.f32 1e+09, %v2528_v26  ;;  %v2190_v51 = vadd.f32 %v2189_v59, %v2188_v6  ;;  %v4993_v6 = vld [vmem:[#allocation34_spill] sm:$0xff] }
 0x4aa   :  { %3100 = vpow2.f32 %v2503_v21  ;;  %2242 = vperm.xlu0 %2944, %v2208_v35   ;;  %v2199_v39 = vadd.f32 %v2198_v4, %v2197_v16 }
 0x4ab   :  { %3102 = vpow2.f32 %v2504_v32  ;;  %v2191_v45 = vrot.slane %v2190_v51, 1 }
 0x4ac   :  { %v2200_v21 = vrot.slane %v2199_v39, 1  ;;  %2252 = vperm.xlu1 %2945, %v2210_v47  }
 0x4ad   :  { %v2192_v32 = vadd.f32 %v2191_v45, %v2190_v51 }
 0x4ae   :  { %2257 = vperm.xlu0 %2944, %v2211_v53  }
 0x4b1   :  { %v3097_v8 = vpop.eup %3096 }
 0x4b2   :  { %v1901_v17 = vmul.f32 %v3097_v8, %v4983_v54  ;;  %v2201_v8 = vadd.f32 %v2200_v21, %v2199_v39 }
 0x4b3   :  { %v3099_v62 = vpop.eup %3098 }
 0x4b4   :  { %v1902_v57 = vmul.f32 %v3099_v62, %v4984_v27  ;;  %v3101_v19 = vpop.eup %3100  ;;  %v2202_v62 = vmax.f32 %v2192_v32, 1.0 }
 0x4b5   :  { %v1891_v25 = vadd.f32 1.0, %v3101_v19  ;;  %v3103_v30 = vpop.eup %3102 }
 0x4b6   :  { %v1905_v29 = vpack.c.bf16 %v1902_v57, %v1901_v17  ;;  %v1892_v14 = vadd.f32 1.0, %v3103_v30  ;;  %v2203_v17 = vmax.f32 %v2201_v8, 1.0  ;;  %2228 = vperm.xlu1 %2945, %v2202_v62   ;;  %v4989_v57 = vld [vmem:[#allocation30_spill] sm:$0xff] }
 0x4b7   :  { %3104 = vrcp.f32 %v1891_v25  ;;  %v1847_v19 = vadd.f32 %v4989_v57, %v4452_v11  ;;  %v1845_v25 = vadd.f32 %v4989_v57, %v4442_v3  ;;  %v1846_v30 = vadd.f32 %v4989_v57, %v4447_v2 }
 0x4b8   :  { %2698 = vmatprep.mubr.bf16.mxu0 %v1905_v29  ;;  %3106 = vrcp.f32 %v1892_v14  ;;  %2233 = vperm.xlu0 %2944, %v2203_v17   ;;  %v1848_v29 = vadd.f32 %v4989_v57, %v4457_v20 }
 0x4b9   :  { %v2499_v14 = vmul.f32 -1.442695, %v1847_v19 }
 0x4bb   :  { %3108 = vpow2.f32 %v2499_v14  ;;  %v3058_v14 = vld [vmem:[%s4570_s11 + $0x30] sm:$0xff]  }
 0x4c1   :  { %v3105_v34 = vpop.eup %3104 }
 0x4c2   :  { %v3107_v9 = vpop.eup %3106  ;;  %v1903_v61 = vmul.f32 %v3105_v34, %v4985_v55  ;;  %v2497_v34 = vmul.f32 -1.442695, %v1845_v25 }
 0x4c3   :  { %v1904_v50 = vmul.f32 %v3107_v9, %v4986_v60  ;;  %v2500_v9 = vmul.f32 -1.442695, %v1848_v29  ;;  %v3340_v29 = vmov 0.0  }
 0x4c4   :  { %3110 = vpow2.f32 %v2497_v34  ;;  %2702 = vmatprep.subr.bf16.mxu0 %v3340_v29  ;;  %v3059_v34 = vld [vmem:[%s4570_s11 + $0x38] sm:$0xff]  }
 0x4c5   :  { %v1906_v44 = vpack.c.bf16 %v1904_v50, %v1903_v61  ;;  %v2498_v61 = vmul.f32 -1.442695, %v1846_v30  ;;  %3112 = vpow2.f32 %v2500_v9  ;;  %v3109_v50 = vpop.eup %3108  ;;  %v3052_v30 = vld [vmem:[%s4570_s11] sm:$0xff]  }
 0x4c6   :  { %v1863_v43 = vadd.f32 1.0, %v3109_v50  ;;  %v2002_v9 = vld [vmem:[%s4569_s10] sm:$0x3] }
 0x4c7   :  { %2699 = vmatmul.mubr.bf16.vlgmr.msra.gmra.mrb[24].mxu0 %v1906_v44  ;;  %3114 = vpow2.f32 %v2498_v61  ;;  %v2011_v61 = vrot.slane %v2002_v9, %v3779_v5 }
 0x4c8   :  { %3116 = vrcp.f32 %v1863_v43  ;;  %2718 = vmatprep.mubr.msk.bf16.mxu0 %vm3341_vm1, %v3340_v29  ;;  %2703 = vmatpush3.bf16.msra.mxu0 %v3052_v30 }
 0x4c9   :  { %2704 = vmatprep.subr.bf16.mxu0 %v3340_v29 }
 0x4ce   :  { %v3111_v44 = vpop.eup %3110 }
 0x4cf   :  { %v3113_v11 = vpop.eup %3112  ;;  %v1861_v3 = vadd.f32 1.0, %v3111_v44 }
 0x4d0   :  { %v1864_v41 = vadd.f32 1.0, %v3113_v11 }
 0x4d1   :  { %v3115_v36 = vpop.eup %3114  ;;  %3118 = vrcp.f32 %v1861_v3 }
 0x4d2   :  { %v1862_v46 = vadd.f32 1.0, %v3115_v36  ;;  %3120 = vrcp.f32 %v1864_v41  ;;  %v3117_v22 = vpop.eup %3116 }
 0x4d4   :  { %3122 = vrcp.f32 %v1862_v46 }
 0x4db   :  { %v3119_v59 = vpop.eup %3118 }
 0x4dc   :  { %v3121_v53 = vpop.eup %3120 }
 0x4de   :  { %v3123_v45 = vpop.eup %3122 }
 0x59a   :  { %v2700_v20 = vpop.f32.mrb[24].mxu0 }
 0x59b   :  { %v1958_v2 = vadd.f32 %v2700_v20, %v4455_v40  ;;  %v1941_v58 = vpop.f32.mrb[25].mxu0  ;;  %v4992_v40 = vld [vmem:[#allocation62_spill] sm:$0xff] }
 0x59c   :  { %v1956_v37 = vadd.f32 %v4445_v33, %v1941_v58  ;;  %v2701_v48 = vpop.f32.mrb[26].mxu0 }
 0x59d   :  { %v1962_v1 = vadd.f32 %v4990_v15, %v1958_v2  ;;  %v1959_v28 = vadd.f32 %v2701_v48, %v4460_v31  ;;  %v1944_v49 = vpop.f32.mrb[27].mxu0 }
 0x59e   :  { %v1960_v52 = vadd.f32 %v4990_v15, %v1956_v37  ;;  %v1957_v18 = vadd.f32 %v4450_v13, %v1944_v49 }
 0x59f   :  { %v1966_v42 = vmul.f32 %v1962_v1, %v4991_v63  ;;  %v1963_v24 = vadd.f32 %v4990_v15, %v1959_v28 }
 0x5a0   :  { %v1964_v38 = vmul.f32 %v1960_v52, %v4992_v40  ;;  %v1961_v16 = vadd.f32 %v4990_v15, %v1957_v18 }
 0x5a1   :  { %v1970_v33 = vmax.f32 %v1966_v42, 0.0  ;;  %v1967_v0 = vmul.f32 %v1963_v24, %v4993_v6  ;;  %v2007_v42 = vrot.slane %v2002_v9, %v3777_v7  ;;  %v2248_v24 = vpop.permute.xlu1 %2247 }
 0x5a2   :  { %v1968_v23 = vmax.f32 %v1964_v38, 0.0  ;;  %v1965_v26 = vmul.f32 %v1961_v16, %v4994_v56 }
 0x5a3   :  { %v1974_v31 = vsub.f32 %v1970_v33, %v4985_v55  ;;  %v1971_v10 = vmax.f32 %v1967_v0, 0.0 }
 0x5a4   :  { %v1972_v13 = vsub.f32 %v1968_v23, %v4983_v54  ;;  %v1969_v35 = vmax.f32 %v1965_v26, 0.0 }
 0x5a5   :  { %v1975_v4 = vsub.f32 %v1971_v10, %v4986_v60  ;;  %v1978_v47 = vmul.f32 %v3117_v22, %v1974_v31  ;;  %v2253_v31 = vpop.permute.xlu1 %2252 }
 0x5a6   :  { %v1976_v51 = vmul.f32 %v3119_v59, %v1972_v13  ;;  %v1973_v39 = vsub.f32 %v1969_v35, %v4984_v27 }
 0x5a7   :  { %v1979_v21 = vmul.f32 %v3121_v53, %v1975_v4  ;;  %v1982_v8 = vadd.f32 %v1978_v47, %v4985_v55  ;;  %v3056_v55 = vld [vmem:[%s4570_s11 + $0x20] sm:$0xff]   ;;  %v2243_v47 = vpop.permute.xlu0 %2242 }
 0x5a8   :  { %v1977_v32 = vmul.f32 %v3123_v45, %v1973_v39  ;;  %v1980_v17 = vadd.f32 %v1976_v51, %v4983_v54  ;;  %v3053_v54 = vld [vmem:[%s4570_s11 + $0x8] sm:$0xff]  }
 0x5a9   :  { %v1983_v62 = vadd.f32 %v1979_v21, %v4986_v60  ;;  %2705 = vmatpush3.bf16.msra.mxu0 %v3053_v54  ;;  %v3057_v60 = vld [vmem:[%s4570_s11 + $0x28] sm:$0xff]   ;;  %v2229_v39 = vpop.permute.xlu1 %2228 }
 0x5aa   :  { %v1981_v57 = vadd.f32 %v1977_v32, %v4984_v27  ;;  %2706 = vmatprep.subr.bf16.mxu0 %v3340_v29  ;;  %v3055_v27 = vld [vmem:[%s4570_s11 + $0x18] sm:$0xff]  }
 0x5ab   :  { %v1985_v19 = vpack.c.bf16 %v1983_v62, %v1982_v8 }
 0x5ac   :  { %v1984_v25 = vpack.c.bf16 %v1981_v57, %v1980_v17 }
 0x5ae   :  { %2127 = vmatmul.mubr.bf16.vlgmr.msra.gmra.mrb[16].mxu1 %v1984_v25  ;;  %v2258_v25 = vpop.permute.xlu0 %2257 }
 0x5af   :  { %2136 = vmatprep.mubr.bf16.mxu1 %v4977_v12  ;;  %v3054_v12 = vld [vmem:[%s4570_s11 + $0x10] sm:$0xff]  }
 0x5b0   :  { %2707 = vmatpush3.bf16.msra.mxu0 %v3054_v12 }
 0x5b1   :  { %2708 = vmatprep.subr.bf16.mxu0 %v3340_v29 }
 0x5b4   :  { %2709 = vmatpush3.bf16.msra.mxu0 %v3055_v27 }
 0x5b5   :  { %2710 = vmatprep.subr.bf16.mxu0 %v3340_v29 }
 0x5b6   :  { %2137 = vmatmul.mubr.bf16.gmra.mrb[20].mxu1 %v1985_v19 }
 0x5b8   :  { %2711 = vmatpush3.bf16.msra.mxu0 %v3056_v55 }
 0x5b9   :  { %2712 = vmatprep.subr.bf16.mxu0 %v3340_v29 }
 0x5bc   :  { %2713 = vmatpush3.bf16.msra.mxu0 %v3057_v60 }
 0x5bd   :  { %2714 = vmatprep.subr.bf16.mxu0 %v3340_v29 }
 0x5c0   :  { %2715 = vmatpush3.bf16.msra.mxu0 %v3058_v14 }
 0x5c1   :  { %2716 = vmatprep.subr.bf16.mxu0 %v3340_v29 }
 0x5c4   :  { %2717 = vmatpush3.bf16.msra.mxu0 %v3059_v34 }
 0x681   :  { %v2128_v50 = vpop.f32.mrb[16].mxu1 }
 0x682   :  { %v2130_v44 = vpop.f32.mrb[17].mxu1  ;;  %v2129_v0 = vadd.f32 %v2128_v50, %v2007_v42 }
 0x683   :  { %v2131_v11 = vadd.f32 %v2130_v44, %v2011_v61  ;;  %v2132_v36 = vpop.f32.mrb[18].mxu1 }
 0x684   :  { %v2134_v43 = vpop.f32.mrb[19].mxu1  ;;  %v2133_v26 = vadd.f32 %v2132_v36, %v2007_v42  ;;  %v2147_v22 = vmax.f32 %v2129_v0, 0.0 }
 0x685   :  { %v2521_v3 = vmul.f32 -1.442695, %v2131_v11  ;;  %v2135_v41 = vadd.f32 %v2134_v43, %v2011_v61  ;;  %v2234_v11 = vpop.permute.xlu0 %2233 }
 0x686   :  { %v2148_v59 = vmax.f32 %v2133_v26, 0.0 }
 0x687   :  { %3124 = vpow2.f32 %v2521_v3  ;;  %v2522_v46 = vmul.f32 -1.442695, %v2135_v41 }
 0x689   :  { %3126 = vpow2.f32 %v2522_v46  ;;  %v2138_v20 = vpop.f32.mrb[20].mxu1 }
 0x68a   :  { %v2140_v2 = vpop.f32.mrb[21].mxu1  ;;  %v2139_v53 = vadd.f32 %v2138_v20, %v2007_v42 }
 0x68b   :  { %v2141_v58 = vadd.f32 %v2140_v2, %v2011_v61  ;;  %v2142_v37 = vpop.f32.mrb[22].mxu1 }
 0x68c   :  { %v2144_v48 = vpop.f32.mrb[23].mxu1  ;;  %v2143_v45 = vadd.f32 %v2142_v37, %v2007_v42  ;;  %v2149_v17 = vmax.f32 %v2139_v53, 0.0 }
 0x68d   :  { %v2523_v15 = vmul.f32 -1.442695, %v2141_v58  ;;  %v2145_v1 = vadd.f32 %v2144_v48, %v2011_v61 }
 0x68e   :  { %v2150_v30 = vmax.f32 %v2143_v45, 0.0 }
 0x68f   :  { %3128 = vpow2.f32 %v2523_v15  ;;  %v2524_v28 = vmul.f32 -1.442695, %v2145_v1 }
 0x691   :  { %v3125_v5 = vpop.eup %3124  ;;  %3130 = vpow2.f32 %v2524_v28 }
 0x692   :  { %v2163_v49 = vadd.f32 1.0, %v3125_v5 }
 0x693   :  { %v3127_v52 = vpop.eup %3126 }
 0x694   :  { %3132 = vrcp.f32 %v2163_v49  ;;  %v2164_v18 = vadd.f32 1.0, %v3127_v52 }
 0x696   :  { %3134 = vrcp.f32 %v2164_v18 }
 0x699   :  { %v3129_v38 = vpop.eup %3128 }
 0x69a   :  { %v2165_v16 = vadd.f32 1.0, %v3129_v38 }
 0x69b   :  { %v3131_v33 = vpop.eup %3130 }
 0x69c   :  { %3136 = vrcp.f32 %v2165_v16  ;;  %v2166_v23 = vadd.f32 1.0, %v3131_v33 }
 0x69e   :  { %v3133_v10 = vpop.eup %3132  ;;  %3138 = vrcp.f32 %v2166_v23 }
 0x69f   :  { %v2175_v13 = vmul.f32 %v3133_v10, %v4992_v40  ;;  %3140 = vrcp.f32 %v2229_v39 }
 0x6a0   :  { %v3135_v35 = vpop.eup %3134  ;;  %3142 = vrcp.f32 %v2234_v11 }
 0x6a1   :  { %v2176_v4 = vmul.f32 %v3135_v35, %v4994_v56  ;;  %v2179_v7 = vmul.f32 %v2175_v13, %v2147_v22  ;;  %v2529_v13 = vld [vmem:[%s4571_s12] ss:$0 sm:$0xff] }
 0x6a3   :  { %v2180_v51 = vmul.f32 %v2176_v4, %v2148_v59  ;;  %v2260_v8 = vadd.f32 %v2243_v47, %v2179_v7 }
 0x6a5   :  { %v2261_v21 = vadd.f32 %v2248_v24, %v2180_v51  ;;  %v2212_v32 = vadd.f32 %v2180_v51, %v2179_v7 }
 0x6a6   :  { %v3137_v62 = vpop.eup %3136 }
 0x6a7   :  { %v2213_v57 = vrot.slane %v2212_v32, 4  ;;  %v2264_v19 = vmax.f32 %v2260_v8, %v2261_v21  ;;  %v2177_v40 = vmul.f32 %v3137_v62, %v4991_v63 }
 0x6a8   :  { %v3139_v29 = vpop.eup %3138 }
 0x6a9   :  { %v2214_v56 = vadd.f32 %v2213_v57, %v2212_v32  ;;  %v2265_v54 = vrot.slane %v2264_v19, 4  ;;  %v2181_v12 = vmul.f32 %v2177_v40, %v2149_v17  ;;  %v2178_v27 = vmul.f32 %v3139_v29, %v4993_v6  ;;  %v3141_v41 = vpop.eup %3140 }
 0x6aa   :  { %v3143_v24 = vpop.eup %3142 }
 0x6ab   :  { %v2215_v55 = vrot.slane %v2214_v56, 2  ;;  %v2266_v60 = vmax.f32 %v2264_v19, %v2265_v54  ;;  %v2182_v14 = vmul.f32 %v2178_v27, %v2150_v30  ;;  %v2262_v34 = vadd.f32 %v2253_v31, %v2181_v12 }
 0x6ad   :  { %v2216_v9 = vadd.f32 %v2215_v55, %v2214_v56  ;;  %v2267_v61 = vrot.slane %v2266_v60, 2  ;;  %v2219_v50 = vadd.f32 %v2182_v14, %v2181_v12  ;;  %v2263_v44 = vadd.f32 %v2258_v25, %v2182_v14 }
 0x6af   :  { %v2217_v36 = vrot.slane %v2216_v9, 1  ;;  %v2268_v43 = vmax.f32 %v2266_v60, %v2267_v61  ;;  %v2220_v63 = vrot.slane %v2219_v50, 4  ;;  %v2271_v3 = vmax.f32 %v2262_v34, %v2263_v44 }
 0x6b1   :  { %v2218_v46 = vadd.f32 %v2217_v36, %v2216_v9  ;;  %v2269_v20 = vrot.slane %v2268_v43, 1  ;;  %v2221_v2 = vadd.f32 %v2220_v63, %v2219_v50  ;;  %v2272_v58 = vrot.slane %v2271_v3, 4 }
 0x6b3   :  { %v2270_v6 = vmax.f32 %v2268_v43, %v2269_v20  ;;  %v2222_v37 = vrot.slane %v2221_v2, 2  ;;  %v2273_v48 = vmax.f32 %v2271_v3, %v2272_v58  ;;  %v2237_v15 = vmul.f32 %v3141_v41, %v2218_v46 }
 0x6b5   :  { %v2223_v1 = vadd.f32 %v2222_v37, %v2221_v2  ;;  %v2274_v28 = vrot.slane %v2273_v48, 2  ;;  %v2278_v5 = vadd.f32 %v2270_v6, %v2237_v15 }
 0x6b7   :  { %v2224_v49 = vrot.slane %v2223_v1, 1  ;;  %v2275_v52 = vmax.f32 %v2273_v48, %v2274_v28  ;;  %v2280_v0 = vpack.c.bf16 %v2278_v5, %v2278_v5 }
 0x6b9   :  { %v2225_v18 = vadd.f32 %v2224_v49, %v2223_v1  ;;  %v2276_v42 = vrot.slane %v2275_v52, 1  ;;  %v2307_v26 = vunpack.c.l.b16 %v2280_v0 }
 0x6bb   :  { %v2277_v38 = vmax.f32 %v2275_v52, %v2276_v42  ;;  %v2239_v16 = vmul.f32 %v3143_v24, %v2225_v18 }
 0x6bd   :  { %v2279_v33 = vadd.f32 %v2277_v38, %v2239_v16 }
 0x6bf   :  { %v2281_v23 = vpack.c.bf16 %v2279_v33, %v2279_v33 }
 0x6c1   :  { %v2308_v31 = vunpack.c.l.b16 %v2281_v23 }
 0x6c3   :  { %v2310_v10 = vsel %vm2309_vm2, %v2308_v31, %v2307_v26 }
 0x6c4   :  { %v2311_v22 = vpack.c.b16 %v2310_v10, %v2310_v10 }
 0x6c6   :  { %2719 = vmatmul.mubr.bf16.vlgmr.msra.gmra.mrb[28].mxu0 %v2311_v22 }
 0x799   :  { %v2395_v35 = vpop.f32.mrb[28].mxu0 }
 0x79a   :  { %v2396_v59 = vadd.f32 %v2529_v13, %v2395_v35  ;;  %v2720_v4 = vpop.f32.mrb[29].mxu0 }
 0x79b   :  { %v2398_v47 = vpop.f32.mrb[30].mxu0 }
 0x79c   :  { %2401 = vst [vmem:[#allocation13] sm:$0x3] %v2396_v59  ;;  %v2721_v7 = vpop.f32.mrb[31].mxu0 }
 0x79d   :  { %3291 = shalt.err (!%p3288_p10)
}
 0x79e   :  { %s3292_s12 = scalar_lea.hbm %s4572_s13, 32 }
 0x79f   :  { %p3293_p11 = scmp.ne.s32.totalorder %s4572_s13, %s3292_s12  ;;  %p3296_p12 = scmp.lt.u32.totalorder %s3292_s12, %s4572_s13 }
 0x7a1   :  { %p3298_p13 = pnand %p3296_p12, %p3293_p11 }
 0x7a3   :  { %3301 = shalt.err (!%p3298_p13)
}
 0x7a4   :  { %2411 = dma.vmem_to_hbm [thread:$0]  %s2409_s8, 32, %s4572_s13, [#allocation4]  }
 0x7a5   :  { %3310 = dma.done.wait [#allocation4], 32  }
 0x7a6   :  { %3311 = vsyncadd [#allocation4], 4294967264 }
 0x7a7   :  { %2415 = vsyncpa [#allocation3], 1 }
 0x7a8   :  { %2416 = vsyncpa [#allocation6], 1 }
 0x7a9   :  { %2417 = vsyncpa [#allocation9], 1 }
 0x7aa   :  { %2418 = vsyncpa [#allocation12], 1 }
 0x7ab   :  { %2419 = vsyncpa [#allocation4], 1 }

</bundles_post_ra>
